<compile_context>
chip_gen: v7x
topology: tpu7x:2x2x1
jax: 0.10.0
libtpu: 0.0.40
codegen_flags: <defaults>
</compile_context>

<pallas_src>
import jax
import jax.numpy as jnp
from jax import lax
from jax.experimental import pallas as pl
from jax.experimental.pallas import tpu as pltpu

LRN_SIZE, LRN_ALPHA, LRN_BETA, LRN_K = 5, 1e-4, 0.75, 2.0
_VMEM_LIMIT = 32 * 1024 * 1024            # explicit; safe on v5e / v6e / v7x


def _conv_out(n, k):
    return n - k + 1


def _pool_out(n, k=3, s=2):
    return (n - k) // s + 1


def _pick_block(n, cap):
    b = max(1, min(n, cap))
    while n % b:
        b -= 1
    return b


# --------------------------------------------------------------------------- #
# Fused conv block: (im2col'd) conv matmul + bias + ReLU + maxpool(3,2) + LRN  #
# --------------------------------------------------------------------------- #
def _make_conv_block_kernel(Nb, Ho, Wo, K, Cout):
    Ph, Pw = _pool_out(Ho), _pool_out(Wo)
    half = LRN_SIZE // 2
    M = Nb * Ho * Wo

    def kernel(x_ref, w_ref, b_ref, o_ref):
        # ---- conv as ONE fat MXU matmul: (M, K) x (K, Cout), bf16 -> f32 acc ----
        x2d = x_ref[...].reshape(M, K)
        acc = jnp.dot(x2d, w_ref[...], preferred_element_type=jnp.float32)
        r = jnp.maximum(acc + b_ref[...], 0.0).reshape(Nb, Ho, Wo, Cout)

        # ---- 3x3 / stride-2 max pool: compute only the Ph / Pw needed anchors ----
        hs = jnp.concatenate(
            [jnp.maximum(jnp.maximum(r[:, 2 * i:2 * i + 1],
                                     r[:, 2 * i + 1:2 * i + 2]),
                         r[:, 2 * i + 2:2 * i + 3]) for i in range(Ph)],
            axis=1)                                       # (Nb, Ph, Wo, Cout)
        p = jnp.concatenate(
            [jnp.maximum(jnp.maximum(hs[:, :, 2 * j:2 * j + 1],
                                     hs[:, :, 2 * j + 1:2 * j + 2]),
                         hs[:, :, 2 * j + 2:2 * j + 3]) for j in range(Pw)],
            axis=2)                                       # (Nb, Ph, Pw, Cout) f32

        # ---- cross-channel LRN: zero-padded window sum via lane shifts (VPU/XLU,
        #      no MXU), then power -beta via rsqrt ----
        sq = p * p
        s = sq
        for d in range(1, half + 1):
            z = jnp.zeros(sq.shape[:-1] + (d,), sq.dtype)
            s = s + jnp.concatenate([sq[..., d:], z], axis=-1)        # c + d
            s = s + jnp.concatenate([z, sq[..., :Cout - d]], axis=-1)  # c - d
        t = LRN_K + (LRN_ALPHA / LRN_SIZE) * s
        if LRN_BETA == 0.75:
            u = lax.rsqrt(lax.rsqrt(t))                   # t ** -0.25
            inv = u * u * u                               # t ** -0.75
        else:
            inv = jnp.exp(-LRN_BETA * jnp.log(t))
        # single full-block store
        o_ref[...] = (p * inv).astype(o_ref.dtype)

    return kernel, (Ph, Pw)


def conv_block(patches, w2d, b, *, out_dtype=jnp.bfloat16, batch_block=16):
    """patches: (N, Ho, Wo, K) bf16 im2col tensor; w2d: (K, Cout) bf16; b: (1, Cout) f32."""
    N, Ho, Wo, K = patches.shape
    Cout = w2d.shape[1]
    # keep the grid length >= 2 when possible so "parallel" shards across v7x's 2 TCs
    Nb = _pick_block(N, min(batch_block, max(1, N // 2)))
    kernel, (Ph, Pw) = _make_conv_block_kernel(Nb, Ho, Wo, K, Cout)
    return pl.pallas_call(
        kernel,
        out_shape=jax.ShapeDtypeStruct((N, Ph, Pw, Cout), out_dtype),
        grid=(N // Nb,),
        in_specs=[
            pl.BlockSpec((Nb, Ho, Wo, K), lambda n: (n, 0, 0, 0)),
            pl.BlockSpec((K, Cout), lambda n: (0, 0)),
            pl.BlockSpec((1, Cout), lambda n: (0, 0)),
        ],
        out_specs=pl.BlockSpec((Nb, Ph, Pw, Cout), lambda n: (n, 0, 0, 0)),
        compiler_params=pltpu.CompilerParams(
            dimension_semantics=("parallel",),
            vmem_limit_bytes=_VMEM_LIMIT),
    )(patches, w2d, b)


# --------------------------------------------------------------------------- #
# Fused MLP: fc1 + ReLU + fc2 in one un-tiled step (weights fit VMEM easily)   #
# --------------------------------------------------------------------------- #
def _mlp_kernel(x_ref, w1_ref, b1_ref, w2_ref, b2_ref, o_ref):
    h = jnp.dot(x_ref[...], w1_ref[...], preferred_element_type=jnp.float32)
    h = jnp.maximum(h + b1_ref[...], 0.0).astype(jnp.bfloat16)
    o_ref[...] = (jnp.dot(h, w2_ref[...], preferred_element_type=jnp.float32)
                  + b2_ref[...])


def mlp(x, w1, b1, w2, b2):
    """x:(N,K) bf16; w1:(K,Hd) bf16; b1:(1,Hd) f32; w2:(Hd,Od) bf16; b2:(1,Od) f32."""
    N = x.shape[0]
    Od = w2.shape[1]
    return pl.pallas_call(
        _mlp_kernel,
        out_shape=jax.ShapeDtypeStruct((N, Od), jnp.float32),
        compiler_params=pltpu.CompilerParams(vmem_limit_bytes=_VMEM_LIMIT),
    )(x, w1, b1, w2, b2)


# --------------------------------------------------------------------------- #
# Wrapper-side layout plumbing + parameters                                    #
# --------------------------------------------------------------------------- #
def _im2col(x, KH, KW):
    """(N,H,W,C) -> (N,Ho,Wo,KH*KW*C), K index = ((kh*KW + kw)*C + c). XLA-side."""
    N, H, W, C = x.shape
    Ho, Wo = _conv_out(H, KH), _conv_out(W, KW)
    cols = [x[:, kh:kh + Ho, kw:kw + Wo, :]
            for kh in range(KH) for kw in range(KW)]
    return jnp.concatenate(cols, axis=-1)


def _conv_w2d(w_oihw):
    """PyTorch (Cout,Cin,KH,KW) -> (KH*KW*Cin, Cout) bf16, matching _im2col order."""
    cout = w_oihw.shape[0]
    return jnp.transpose(w_oihw, (2, 3, 1, 0)).reshape(-1, cout).astype(jnp.bfloat16)


def init_params(key, input_hw):
    """Deterministic synthetic parameters with PyTorch-convention shapes."""
    H, W = input_hw
    ks = jax.random.split(key, 8)
    p = {}
    p["conv1_w"] = jax.random.normal(ks[0], (64, 1, 7, 7), jnp.float32) * 0.05
    p["conv1_b"] = jax.random.normal(ks[1], (64,), jnp.float32) * 0.01
    p["conv2_w"] = jax.random.normal(ks[2], (128, 64, 5, 5), jnp.float32) * 0.02
    p["conv2_b"] = jax.random.normal(ks[3], (128,), jnp.float32) * 0.01
    h1, w1 = _pool_out(_conv_out(H, 7)), _pool_out(_conv_out(W, 7))
    h2, w2 = _pool_out(_conv_out(h1, 5)), _pool_out(_conv_out(w1, 5))
    feat = 128 * h2 * w2                                   # LazyLinear in_features
    p["fc1_w"] = jax.random.normal(ks[4], (1000, feat), jnp.float32) / jnp.sqrt(1.0 * feat)
    p["fc1_b"] = jax.random.normal(ks[5], (1000,), jnp.float32) * 0.01
    p["fc2_w"] = jax.random.normal(ks[6], (50, 1000), jnp.float32) / jnp.sqrt(1000.0)
    p["fc2_b"] = jax.random.normal(ks[7], (50,), jnp.float32) * 0.01
    return p


@jax.jit
def cnn_simple_forward(x_nchw, params):
    # NCHW (PyTorch) -> NHWC for the kernels
    x = jnp.transpose(x_nchw, (0, 2, 3, 1)).astype(jnp.float32)

    # conv block 1 (7x7, Cin=1 -> 64): im2col -> one (M,49)x(49,64) matmul + fused tail
    p1 = _im2col(x, 7, 7).astype(jnp.bfloat16)                      # (N,26,26,49)
    x = conv_block(p1, _conv_w2d(params["conv1_w"]),
                   params["conv1_b"].reshape(1, -1))                # (N,12,12,64) bf16

    # conv block 2 (5x5, 64 -> 128): im2col -> one (M,1600)x(1600,128) matmul + tail
    p2 = _im2col(x, 5, 5).astype(jnp.bfloat16)                      # (N,8,8,1600)
    x = conv_block(p2, _conv_w2d(params["conv2_w"]),
                   params["conv2_b"].reshape(1, -1))                # (N,3,3,128) bf16

    # Flatten in PyTorch NCHW order, then fc1 + ReLU + fc2 fused in one kernel
    x = jnp.transpose(x, (0, 3, 1, 2)).reshape(x.shape[0], -1)      # (N, 1152) bf16
    return mlp(x,
               params["fc1_w"].T.astype(jnp.bfloat16),
               params["fc1_b"].reshape(1, -1),
               params["fc2_w"].T.astype(jnp.bfloat16),
               params["fc2_b"].reshape(1, -1))


if __name__ == "__main__":
    key = jax.random.PRNGKey(0)
    pkey, xkey = jax.random.split(key)
    H = W = 32
    params = init_params(pkey, (H, W))
    x = jax.random.normal(xkey, (2, 1, H, W), jnp.float32)          # NCHW, 1 channel
    out = jax.block_until_ready(cnn_simple_forward(x, params))
    assert out.shape == (2, 50), out.shape
    assert bool(jnp.all(jnp.isfinite(out)))
    print("KERNEL_OK")
</pallas_src>

<mosaic_0001>
module attributes {stable_mosaic.version = 11 : i64} {
  func.func @kernel(%arg0: i32, %arg1: memref<1x26x26x49xbf16, #tpu.memory_space<vmem>>, %arg2: memref<49x64xbf16, #tpu.memory_space<vmem>>, %arg3: memref<1x64xf32, #tpu.memory_space<vmem>>, %arg4: memref<1x12x12x64xbf16, #tpu.memory_space<vmem>>) attributes {dimension_semantics = [#tpu.dimension_semantics<parallel>], iteration_bounds = array<i64: 2>, scalar_prefetch = 0 : i64, scratch_operands = 0 : i64, tpu.core_type = #tpu.core_type<tc>, window_params = [{transform_indices = @transform_0, window_bounds = array<i64: 1, 26, 26, 49>}, {pipeline_mode = #tpu.pipeline_mode<synchronous>, transform_indices = @transform_1, window_bounds = array<i64: 49, 64>}, {pipeline_mode = #tpu.pipeline_mode<synchronous>, transform_indices = @transform_2, window_bounds = array<i64: 1, 64>}, {transform_indices = @transform_3, window_bounds = array<i64: 1, 12, 12, 64>}]} {
    %c0 = arith.constant 0 : index
    %c0_0 = arith.constant 0 : index
    %c0_1 = arith.constant 0 : index
    %c0_2 = arith.constant 0 : index
    %0 = vector.load %arg1[%c0, %c0_0, %c0_1, %c0_2] : memref<1x26x26x49xbf16, #tpu.memory_space<vmem>>, vector<1x26x26x49xbf16>
    %1 = vector.shape_cast %0 : vector<1x26x26x49xbf16> to vector<676x49xbf16>
    %c0_3 = arith.constant 0 : index
    %c0_4 = arith.constant 0 : index
    %2 = vector.load %arg2[%c0_3, %c0_4] : memref<49x64xbf16, #tpu.memory_space<vmem>>, vector<49x64xbf16>
    %cst = arith.constant dense<0.000000e+00> : vector<676x64xf32>
    %3 = tpu.matmul %1, %2, %cst {dimension_numbers = #tpu.dot_dimension_numbers<[1], [0], [0], [1], [0, 0, 1, 1], [], []>} : vector<676x49xbf16>, vector<49x64xbf16>, vector<676x64xf32> -> vector<676x64xf32>
    %c0_5 = arith.constant 0 : index
    %c0_6 = arith.constant 0 : index
    %4 = vector.load %arg3[%c0_5, %c0_6] : memref<1x64xf32, #tpu.memory_space<vmem>>, vector<1x64xf32>
    %5 = vector.broadcast %4 : vector<1x64xf32> to vector<676x64xf32>
    %6 = arith.addf %3, %5 : vector<676x64xf32>
    %cst_7 = arith.constant 0.000000e+00 : f32
    %7 = vector.broadcast %cst_7 : f32 to vector<676x64xf32>
    %8 = arith.maximumf %6, %7 : vector<676x64xf32>
    %9 = vector.shape_cast %8 : vector<676x64xf32> to vector<1x26x26x64xf32>
    %10 = vector.extract_strided_slice %9 {offsets = [0, 0, 0, 0], sizes = [1, 1, 26, 64], strides = [1, 1, 1, 1]} : vector<1x26x26x64xf32> to vector<1x1x26x64xf32>
    %11 = vector.extract_strided_slice %9 {offsets = [0, 1, 0, 0], sizes = [1, 1, 26, 64], strides = [1, 1, 1, 1]} : vector<1x26x26x64xf32> to vector<1x1x26x64xf32>
    %12 = arith.maximumf %10, %11 : vector<1x1x26x64xf32>
    %13 = vector.extract_strided_slice %9 {offsets = [0, 2, 0, 0], sizes = [1, 1, 26, 64], strides = [1, 1, 1, 1]} : vector<1x26x26x64xf32> to vector<1x1x26x64xf32>
    %14 = arith.maximumf %12, %13 : vector<1x1x26x64xf32>
    %15 = vector.extract_strided_slice %9 {offsets = [0, 2, 0, 0], sizes = [1, 1, 26, 64], strides = [1, 1, 1, 1]} : vector<1x26x26x64xf32> to vector<1x1x26x64xf32>
    %16 = vector.extract_strided_slice %9 {offsets = [0, 3, 0, 0], sizes = [1, 1, 26, 64], strides = [1, 1, 1, 1]} : vector<1x26x26x64xf32> to vector<1x1x26x64xf32>
    %17 = arith.maximumf %15, %16 : vector<1x1x26x64xf32>
    %18 = vector.extract_strided_slice %9 {offsets = [0, 4, 0, 0], sizes = [1, 1, 26, 64], strides = [1, 1, 1, 1]} : vector<1x26x26x64xf32> to vector<1x1x26x64xf32>
    %19 = arith.maximumf %17, %18 : vector<1x1x26x64xf32>
    %20 = vector.extract_strided_slice %9 {offsets = [0, 4, 0, 0], sizes = [1, 1, 26, 64], strides = [1, 1, 1, 1]} : vector<1x26x26x64xf32> to vector<1x1x26x64xf32>
    %21 = vector.extract_strided_slice %9 {offsets = [0, 5, 0, 0], sizes = [1, 1, 26, 64], strides = [1, 1, 1, 1]} : vector<1x26x26x64xf32> to vector<1x1x26x64xf32>
    %22 = arith.maximumf %20, %21 : vector<1x1x26x64xf32>
    %23 = vector.extract_strided_slice %9 {offsets = [0, 6, 0, 0], sizes = [1, 1, 26, 64], strides = [1, 1, 1, 1]} : vector<1x26x26x64xf32> to vector<1x1x26x64xf32>
    %24 = arith.maximumf %22, %23 : vector<1x1x26x64xf32>
    %25 = vector.extract_strided_slice %9 {offsets = [0, 6, 0, 0], sizes = [1, 1, 26, 64], strides = [1, 1, 1, 1]} : vector<1x26x26x64xf32> to vector<1x1x26x64xf32>
    %26 = vector.extract_strided_slice %9 {offsets = [0, 7, 0, 0], sizes = [1, 1, 26, 64], strides = [1, 1, 1, 1]} : vector<1x26x26x64xf32> to vector<1x1x26x64xf32>
    %27 = arith.maximumf %25, %26 : vector<1x1x26x64xf32>
    %28 = vector.extract_strided_slice %9 {offsets = [0, 8, 0, 0], sizes = [1, 1, 26, 64], strides = [1, 1, 1, 1]} : vector<1x26x26x64xf32> to vector<1x1x26x64xf32>
    %29 = arith.maximumf %27, %28 : vector<1x1x26x64xf32>
    %30 = vector.extract_strided_slice %9 {offsets = [0, 8, 0, 0], sizes = [1, 1, 26, 64], strides = [1, 1, 1, 1]} : vector<1x26x26x64xf32> to vector<1x1x26x64xf32>
    %31 = vector.extract_strided_slice %9 {offsets = [0, 9, 0, 0], sizes = [1, 1, 26, 64], strides = [1, 1, 1, 1]} : vector<1x26x26x64xf32> to vector<1x1x26x64xf32>
    %32 = arith.maximumf %30, %31 : vector<1x1x26x64xf32>
    %33 = vector.extract_strided_slice %9 {offsets = [0, 10, 0, 0], sizes = [1, 1, 26, 64], strides = [1, 1, 1, 1]} : vector<1x26x26x64xf32> to vector<1x1x26x64xf32>
    %34 = arith.maximumf %32, %33 : vector<1x1x26x64xf32>
    %35 = vector.extract_strided_slice %9 {offsets = [0, 10, 0, 0], sizes = [1, 1, 26, 64], strides = [1, 1, 1, 1]} : vector<1x26x26x64xf32> to vector<1x1x26x64xf32>
    %36 = vector.extract_strided_slice %9 {offsets = [0, 11, 0, 0], sizes = [1, 1, 26, 64], strides = [1, 1, 1, 1]} : vector<1x26x26x64xf32> to vector<1x1x26x64xf32>
    %37 = arith.maximumf %35, %36 : vector<1x1x26x64xf32>
    %38 = vector.extract_strided_slice %9 {offsets = [0, 12, 0, 0], sizes = [1, 1, 26, 64], strides = [1, 1, 1, 1]} : vector<1x26x26x64xf32> to vector<1x1x26x64xf32>
    %39 = arith.maximumf %37, %38 : vector<1x1x26x64xf32>
    %40 = vector.extract_strided_slice %9 {offsets = [0, 12, 0, 0], sizes = [1, 1, 26, 64], strides = [1, 1, 1, 1]} : vector<1x26x26x64xf32> to vector<1x1x26x64xf32>
    %41 = vector.extract_strided_slice %9 {offsets = [0, 13, 0, 0], sizes = [1, 1, 26, 64], strides = [1, 1, 1, 1]} : vector<1x26x26x64xf32> to vector<1x1x26x64xf32>
    %42 = arith.maximumf %40, %41 : vector<1x1x26x64xf32>
    %43 = vector.extract_strided_slice %9 {offsets = [0, 14, 0, 0], sizes = [1, 1, 26, 64], strides = [1, 1, 1, 1]} : vector<1x26x26x64xf32> to vector<1x1x26x64xf32>
    %44 = arith.maximumf %42, %43 : vector<1x1x26x64xf32>
    %45 = vector.extract_strided_slice %9 {offsets = [0, 14, 0, 0], sizes = [1, 1, 26, 64], strides = [1, 1, 1, 1]} : vector<1x26x26x64xf32> to vector<1x1x26x64xf32>
    %46 = vector.extract_strided_slice %9 {offsets = [0, 15, 0, 0], sizes = [1, 1, 26, 64], strides = [1, 1, 1, 1]} : vector<1x26x26x64xf32> to vector<1x1x26x64xf32>
    %47 = arith.maximumf %45, %46 : vector<1x1x26x64xf32>
    %48 = vector.extract_strided_slice %9 {offsets = [0, 16, 0, 0], sizes = [1, 1, 26, 64], strides = [1, 1, 1, 1]} : vector<1x26x26x64xf32> to vector<1x1x26x64xf32>
    %49 = arith.maximumf %47, %48 : vector<1x1x26x64xf32>
    %50 = vector.extract_strided_slice %9 {offsets = [0, 16, 0, 0], sizes = [1, 1, 26, 64], strides = [1, 1, 1, 1]} : vector<1x26x26x64xf32> to vector<1x1x26x64xf32>
    %51 = vector.extract_strided_slice %9 {offsets = [0, 17, 0, 0], sizes = [1, 1, 26, 64], strides = [1, 1, 1, 1]} : vector<1x26x26x64xf32> to vector<1x1x26x64xf32>
    %52 = arith.maximumf %50, %51 : vector<1x1x26x64xf32>
    %53 = vector.extract_strided_slice %9 {offsets = [0, 18, 0, 0], sizes = [1, 1, 26, 64], strides = [1, 1, 1, 1]} : vector<1x26x26x64xf32> to vector<1x1x26x64xf32>
    %54 = arith.maximumf %52, %53 : vector<1x1x26x64xf32>
    %55 = vector.extract_strided_slice %9 {offsets = [0, 18, 0, 0], sizes = [1, 1, 26, 64], strides = [1, 1, 1, 1]} : vector<1x26x26x64xf32> to vector<1x1x26x64xf32>
    %56 = vector.extract_strided_slice %9 {offsets = [0, 19, 0, 0], sizes = [1, 1, 26, 64], strides = [1, 1, 1, 1]} : vector<1x26x26x64xf32> to vector<1x1x26x64xf32>
    %57 = arith.maximumf %55, %56 : vector<1x1x26x64xf32>
    %58 = vector.extract_strided_slice %9 {offsets = [0, 20, 0, 0], sizes = [1, 1, 26, 64], strides = [1, 1, 1, 1]} : vector<1x26x26x64xf32> to vector<1x1x26x64xf32>
    %59 = arith.maximumf %57, %58 : vector<1x1x26x64xf32>
    %60 = vector.extract_strided_slice %9 {offsets = [0, 20, 0, 0], sizes = [1, 1, 26, 64], strides = [1, 1, 1, 1]} : vector<1x26x26x64xf32> to vector<1x1x26x64xf32>
    %61 = vector.extract_strided_slice %9 {offsets = [0, 21, 0, 0], sizes = [1, 1, 26, 64], strides = [1, 1, 1, 1]} : vector<1x26x26x64xf32> to vector<1x1x26x64xf32>
    %62 = arith.maximumf %60, %61 : vector<1x1x26x64xf32>
    %63 = vector.extract_strided_slice %9 {offsets = [0, 22, 0, 0], sizes = [1, 1, 26, 64], strides = [1, 1, 1, 1]} : vector<1x26x26x64xf32> to vector<1x1x26x64xf32>
    %64 = arith.maximumf %62, %63 : vector<1x1x26x64xf32>
    %65 = vector.extract_strided_slice %9 {offsets = [0, 22, 0, 0], sizes = [1, 1, 26, 64], strides = [1, 1, 1, 1]} : vector<1x26x26x64xf32> to vector<1x1x26x64xf32>
    %66 = vector.extract_strided_slice %9 {offsets = [0, 23, 0, 0], sizes = [1, 1, 26, 64], strides = [1, 1, 1, 1]} : vector<1x26x26x64xf32> to vector<1x1x26x64xf32>
    %67 = arith.maximumf %65, %66 : vector<1x1x26x64xf32>
    %68 = vector.extract_strided_slice %9 {offsets = [0, 24, 0, 0], sizes = [1, 1, 26, 64], strides = [1, 1, 1, 1]} : vector<1x26x26x64xf32> to vector<1x1x26x64xf32>
    %69 = arith.maximumf %67, %68 : vector<1x1x26x64xf32>
    %70 = tpu.concatenate %14, %19, %24, %29, %34, %39, %44, %49, %54, %59, %64, %69 in 1 : vector<1x1x26x64xf32>, vector<1x1x26x64xf32>, vector<1x1x26x64xf32>, vector<1x1x26x64xf32>, vector<1x1x26x64xf32>, vector<1x1x26x64xf32>, vector<1x1x26x64xf32>, vector<1x1x26x64xf32>, vector<1x1x26x64xf32>, vector<1x1x26x64xf32>, vector<1x1x26x64xf32>, vector<1x1x26x64xf32> -> vector<1x12x26x64xf32>
    %71 = vector.extract_strided_slice %70 {offsets = [0, 0, 0, 0], sizes = [1, 12, 1, 64], strides = [1, 1, 1, 1]} : vector<1x12x26x64xf32> to vector<1x12x1x64xf32>
    %72 = vector.extract_strided_slice %70 {offsets = [0, 0, 1, 0], sizes = [1, 12, 1, 64], strides = [1, 1, 1, 1]} : vector<1x12x26x64xf32> to vector<1x12x1x64xf32>
    %73 = arith.maximumf %71, %72 : vector<1x12x1x64xf32>
    %74 = vector.extract_strided_slice %70 {offsets = [0, 0, 2, 0], sizes = [1, 12, 1, 64], strides = [1, 1, 1, 1]} : vector<1x12x26x64xf32> to vector<1x12x1x64xf32>
    %75 = arith.maximumf %73, %74 : vector<1x12x1x64xf32>
    %76 = vector.extract_strided_slice %70 {offsets = [0, 0, 2, 0], sizes = [1, 12, 1, 64], strides = [1, 1, 1, 1]} : vector<1x12x26x64xf32> to vector<1x12x1x64xf32>
    %77 = vector.extract_strided_slice %70 {offsets = [0, 0, 3, 0], sizes = [1, 12, 1, 64], strides = [1, 1, 1, 1]} : vector<1x12x26x64xf32> to vector<1x12x1x64xf32>
    %78 = arith.maximumf %76, %77 : vector<1x12x1x64xf32>
    %79 = vector.extract_strided_slice %70 {offsets = [0, 0, 4, 0], sizes = [1, 12, 1, 64], strides = [1, 1, 1, 1]} : vector<1x12x26x64xf32> to vector<1x12x1x64xf32>
    %80 = arith.maximumf %78, %79 : vector<1x12x1x64xf32>
    %81 = vector.extract_strided_slice %70 {offsets = [0, 0, 4, 0], sizes = [1, 12, 1, 64], strides = [1, 1, 1, 1]} : vector<1x12x26x64xf32> to vector<1x12x1x64xf32>
    %82 = vector.extract_strided_slice %70 {offsets = [0, 0, 5, 0], sizes = [1, 12, 1, 64], strides = [1, 1, 1, 1]} : vector<1x12x26x64xf32> to vector<1x12x1x64xf32>
    %83 = arith.maximumf %81, %82 : vector<1x12x1x64xf32>
    %84 = vector.extract_strided_slice %70 {offsets = [0, 0, 6, 0], sizes = [1, 12, 1, 64], strides = [1, 1, 1, 1]} : vector<1x12x26x64xf32> to vector<1x12x1x64xf32>
    %85 = arith.maximumf %83, %84 : vector<1x12x1x64xf32>
    %86 = vector.extract_strided_slice %70 {offsets = [0, 0, 6, 0], sizes = [1, 12, 1, 64], strides = [1, 1, 1, 1]} : vector<1x12x26x64xf32> to vector<1x12x1x64xf32>
    %87 = vector.extract_strided_slice %70 {offsets = [0, 0, 7, 0], sizes = [1, 12, 1, 64], strides = [1, 1, 1, 1]} : vector<1x12x26x64xf32> to vector<1x12x1x64xf32>
    %88 = arith.maximumf %86, %87 : vector<1x12x1x64xf32>
    %89 = vector.extract_strided_slice %70 {offsets = [0, 0, 8, 0], sizes = [1, 12, 1, 64], strides = [1, 1, 1, 1]} : vector<1x12x26x64xf32> to vector<1x12x1x64xf32>
    %90 = arith.maximumf %88, %89 : vector<1x12x1x64xf32>
    %91 = vector.extract_strided_slice %70 {offsets = [0, 0, 8, 0], sizes = [1, 12, 1, 64], strides = [1, 1, 1, 1]} : vector<1x12x26x64xf32> to vector<1x12x1x64xf32>
    %92 = vector.extract_strided_slice %70 {offsets = [0, 0, 9, 0], sizes = [1, 12, 1, 64], strides = [1, 1, 1, 1]} : vector<1x12x26x64xf32> to vector<1x12x1x64xf32>
    %93 = arith.maximumf %91, %92 : vector<1x12x1x64xf32>
    %94 = vector.extract_strided_slice %70 {offsets = [0, 0, 10, 0], sizes = [1, 12, 1, 64], strides = [1, 1, 1, 1]} : vector<1x12x26x64xf32> to vector<1x12x1x64xf32>
    %95 = arith.maximumf %93, %94 : vector<1x12x1x64xf32>
    %96 = vector.extract_strided_slice %70 {offsets = [0, 0, 10, 0], sizes = [1, 12, 1, 64], strides = [1, 1, 1, 1]} : vector<1x12x26x64xf32> to vector<1x12x1x64xf32>
    %97 = vector.extract_strided_slice %70 {offsets = [0, 0, 11, 0], sizes = [1, 12, 1, 64], strides = [1, 1, 1, 1]} : vector<1x12x26x64xf32> to vector<1x12x1x64xf32>
    %98 = arith.maximumf %96, %97 : vector<1x12x1x64xf32>
    %99 = vector.extract_strided_slice %70 {offsets = [0, 0, 12, 0], sizes = [1, 12, 1, 64], strides = [1, 1, 1, 1]} : vector<1x12x26x64xf32> to vector<1x12x1x64xf32>
    %100 = arith.maximumf %98, %99 : vector<1x12x1x64xf32>
    %101 = vector.extract_strided_slice %70 {offsets = [0, 0, 12, 0], sizes = [1, 12, 1, 64], strides = [1, 1, 1, 1]} : vector<1x12x26x64xf32> to vector<1x12x1x64xf32>
    %102 = vector.extract_strided_slice %70 {offsets = [0, 0, 13, 0], sizes = [1, 12, 1, 64], strides = [1, 1, 1, 1]} : vector<1x12x26x64xf32> to vector<1x12x1x64xf32>
    %103 = arith.maximumf %101, %102 : vector<1x12x1x64xf32>
    %104 = vector.extract_strided_slice %70 {offsets = [0, 0, 14, 0], sizes = [1, 12, 1, 64], strides = [1, 1, 1, 1]} : vector<1x12x26x64xf32> to vector<1x12x1x64xf32>
    %105 = arith.maximumf %103, %104 : vector<1x12x1x64xf32>
    %106 = vector.extract_strided_slice %70 {offsets = [0, 0, 14, 0], sizes = [1, 12, 1, 64], strides = [1, 1, 1, 1]} : vector<1x12x26x64xf32> to vector<1x12x1x64xf32>
    %107 = vector.extract_strided_slice %70 {offsets = [0, 0, 15, 0], sizes = [1, 12, 1, 64], strides = [1, 1, 1, 1]} : vector<1x12x26x64xf32> to vector<1x12x1x64xf32>
    %108 = arith.maximumf %106, %107 : vector<1x12x1x64xf32>
    %109 = vector.extract_strided_slice %70 {offsets = [0, 0, 16, 0], sizes = [1, 12, 1, 64], strides = [1, 1, 1, 1]} : vector<1x12x26x64xf32> to vector<1x12x1x64xf32>
    %110 = arith.maximumf %108, %109 : vector<1x12x1x64xf32>
    %111 = vector.extract_strided_slice %70 {offsets = [0, 0, 16, 0], sizes = [1, 12, 1, 64], strides = [1, 1, 1, 1]} : vector<1x12x26x64xf32> to vector<1x12x1x64xf32>
    %112 = vector.extract_strided_slice %70 {offsets = [0, 0, 17, 0], sizes = [1, 12, 1, 64], strides = [1, 1, 1, 1]} : vector<1x12x26x64xf32> to vector<1x12x1x64xf32>
    %113 = arith.maximumf %111, %112 : vector<1x12x1x64xf32>
    %114 = vector.extract_strided_slice %70 {offsets = [0, 0, 18, 0], sizes = [1, 12, 1, 64], strides = [1, 1, 1, 1]} : vector<1x12x26x64xf32> to vector<1x12x1x64xf32>
    %115 = arith.maximumf %113, %114 : vector<1x12x1x64xf32>
    %116 = vector.extract_strided_slice %70 {offsets = [0, 0, 18, 0], sizes = [1, 12, 1, 64], strides = [1, 1, 1, 1]} : vector<1x12x26x64xf32> to vector<1x12x1x64xf32>
    %117 = vector.extract_strided_slice %70 {offsets = [0, 0, 19, 0], sizes = [1, 12, 1, 64], strides = [1, 1, 1, 1]} : vector<1x12x26x64xf32> to vector<1x12x1x64xf32>
    %118 = arith.maximumf %116, %117 : vector<1x12x1x64xf32>
    %119 = vector.extract_strided_slice %70 {offsets = [0, 0, 20, 0], sizes = [1, 12, 1, 64], strides = [1, 1, 1, 1]} : vector<1x12x26x64xf32> to vector<1x12x1x64xf32>
    %120 = arith.maximumf %118, %119 : vector<1x12x1x64xf32>
    %121 = vector.extract_strided_slice %70 {offsets = [0, 0, 20, 0], sizes = [1, 12, 1, 64], strides = [1, 1, 1, 1]} : vector<1x12x26x64xf32> to vector<1x12x1x64xf32>
    %122 = vector.extract_strided_slice %70 {offsets = [0, 0, 21, 0], sizes = [1, 12, 1, 64], strides = [1, 1, 1, 1]} : vector<1x12x26x64xf32> to vector<1x12x1x64xf32>
    %123 = arith.maximumf %121, %122 : vector<1x12x1x64xf32>
    %124 = vector.extract_strided_slice %70 {offsets = [0, 0, 22, 0], sizes = [1, 12, 1, 64], strides = [1, 1, 1, 1]} : vector<1x12x26x64xf32> to vector<1x12x1x64xf32>
    %125 = arith.maximumf %123, %124 : vector<1x12x1x64xf32>
    %126 = vector.extract_strided_slice %70 {offsets = [0, 0, 22, 0], sizes = [1, 12, 1, 64], strides = [1, 1, 1, 1]} : vector<1x12x26x64xf32> to vector<1x12x1x64xf32>
    %127 = vector.extract_strided_slice %70 {offsets = [0, 0, 23, 0], sizes = [1, 12, 1, 64], strides = [1, 1, 1, 1]} : vector<1x12x26x64xf32> to vector<1x12x1x64xf32>
    %128 = arith.maximumf %126, %127 : vector<1x12x1x64xf32>
    %129 = vector.extract_strided_slice %70 {offsets = [0, 0, 24, 0], sizes = [1, 12, 1, 64], strides = [1, 1, 1, 1]} : vector<1x12x26x64xf32> to vector<1x12x1x64xf32>
    %130 = arith.maximumf %128, %129 : vector<1x12x1x64xf32>
    %131 = tpu.concatenate %75, %80, %85, %90, %95, %100, %105, %110, %115, %120, %125, %130 in 2 : vector<1x12x1x64xf32>, vector<1x12x1x64xf32>, vector<1x12x1x64xf32>, vector<1x12x1x64xf32>, vector<1x12x1x64xf32>, vector<1x12x1x64xf32>, vector<1x12x1x64xf32>, vector<1x12x1x64xf32>, vector<1x12x1x64xf32>, vector<1x12x1x64xf32>, vector<1x12x1x64xf32>, vector<1x12x1x64xf32> -> vector<1x12x12x64xf32>
    %132 = arith.mulf %131, %131 : vector<1x12x12x64xf32>
    %cst_8 = arith.constant 0.000000e+00 : f32
    %133 = vector.broadcast %cst_8 : f32 to vector<1x12x12x1xf32>
    %134 = vector.extract_strided_slice %132 {offsets = [0, 0, 0, 1], sizes = [1, 12, 12, 63], strides = [1, 1, 1, 1]} : vector<1x12x12x64xf32> to vector<1x12x12x63xf32>
    %135 = tpu.concatenate %134, %133 in 3 : vector<1x12x12x63xf32>, vector<1x12x12x1xf32> -> vector<1x12x12x64xf32>
    %136 = arith.addf %132, %135 : vector<1x12x12x64xf32>
    %137 = vector.extract_strided_slice %132 {offsets = [0, 0, 0, 0], sizes = [1, 12, 12, 63], strides = [1, 1, 1, 1]} : vector<1x12x12x64xf32> to vector<1x12x12x63xf32>
    %138 = tpu.concatenate %133, %137 in 3 : vector<1x12x12x1xf32>, vector<1x12x12x63xf32> -> vector<1x12x12x64xf32>
    %139 = arith.addf %136, %138 : vector<1x12x12x64xf32>
    %cst_9 = arith.constant 0.000000e+00 : f32
    %140 = vector.broadcast %cst_9 : f32 to vector<1x12x12x2xf32>
    %141 = vector.extract_strided_slice %132 {offsets = [0, 0, 0, 2], sizes = [1, 12, 12, 62], strides = [1, 1, 1, 1]} : vector<1x12x12x64xf32> to vector<1x12x12x62xf32>
    %142 = tpu.concatenate %141, %140 in 3 : vector<1x12x12x62xf32>, vector<1x12x12x2xf32> -> vector<1x12x12x64xf32>
    %143 = arith.addf %139, %142 : vector<1x12x12x64xf32>
    %144 = vector.extract_strided_slice %132 {offsets = [0, 0, 0, 0], sizes = [1, 12, 12, 62], strides = [1, 1, 1, 1]} : vector<1x12x12x64xf32> to vector<1x12x12x62xf32>
    %145 = tpu.concatenate %140, %144 in 3 : vector<1x12x12x2xf32>, vector<1x12x12x62xf32> -> vector<1x12x12x64xf32>
    %146 = arith.addf %143, %145 : vector<1x12x12x64xf32>
    %cst_10 = arith.constant 2.000000e-05 : f32
    %147 = vector.broadcast %cst_10 : f32 to vector<1x12x12x64xf32>
    %148 = arith.mulf %147, %146 : vector<1x12x12x64xf32>
    %cst_11 = arith.constant 2.000000e+00 : f32
    %149 = vector.broadcast %cst_11 : f32 to vector<1x12x12x64xf32>
    %150 = arith.addf %149, %148 : vector<1x12x12x64xf32>
    %151 = math.rsqrt %150 : vector<1x12x12x64xf32>
    %152 = math.rsqrt %151 : vector<1x12x12x64xf32>
    %153 = arith.mulf %152, %152 : vector<1x12x12x64xf32>
    %154 = arith.mulf %153, %152 : vector<1x12x12x64xf32>
    %155 = arith.mulf %131, %154 : vector<1x12x12x64xf32>
    %156 = arith.truncf %155 : vector<1x12x12x64xf32> to vector<1x12x12x64xbf16>
    %c0_12 = arith.constant 0 : index
    %c0_13 = arith.constant 0 : index
    %c0_14 = arith.constant 0 : index
    %c0_15 = arith.constant 0 : index
    %157 = vector.load %arg4[%c0_12, %c0_13, %c0_14, %c0_15] : memref<1x12x12x64xbf16, #tpu.memory_space<vmem>>, vector<1x12x12x64xbf16>
    tpu.vector_store %arg4[%c0_12, %c0_13, %c0_14, %c0_15], %156 {strides = array<i32>} : memref<1x12x12x64xbf16, #tpu.memory_space<vmem>>, vector<1x12x12x64xbf16>,
    return
  }
  func.func @transform_0(%arg0: i32) -> (i32, i32, i32, i32) {
    %c0_i32 = arith.constant 0 : i32
    %c0_i32_0 = arith.constant 0 : i32
    %c0_i32_1 = arith.constant 0 : i32
    %c0_i32_2 = arith.constant 0 : i32
    return %arg0, %c0_i32, %c0_i32_0, %c0_i32_1 : i32, i32, i32, i32
  }
  func.func @transform_1(%arg0: i32) -> (i32, i32) {
    %c0_i32 = arith.constant 0 : i32
    %c0_i32_0 = arith.constant 0 : i32
    %c0_i32_1 = arith.constant 0 : i32
    return %c0_i32, %c0_i32_0 : i32, i32
  }
  func.func @transform_2(%arg0: i32) -> (i32, i32) {
    %c0_i32 = arith.constant 0 : i32
    %c0_i32_0 = arith.constant 0 : i32
    %c0_i32_1 = arith.constant 0 : i32
    return %c0_i32, %c0_i32_0 : i32, i32
  }
  func.func @transform_3(%arg0: i32) -> (i32, i32, i32, i32) {
    %c0_i32 = arith.constant 0 : i32
    %c0_i32_0 = arith.constant 0 : i32
    %c0_i32_1 = arith.constant 0 : i32
    %c0_i32_2 = arith.constant 0 : i32
    return %arg0, %c0_i32, %c0_i32_0, %c0_i32_1 : i32, i32, i32, i32
  }
}

module attributes {stable_mosaic.version = 11 : i64} {
  func.func @kernel(%arg0: i32, %arg1: memref<1x8x8x1600xbf16, #tpu.memory_space<vmem>>, %arg2: memref<1600x128xbf16, #tpu.memory_space<vmem>>, %arg3: memref<1x128xf32, #tpu.memory_space<vmem>>, %arg4: memref<1x3x3x128xbf16, #tpu.memory_space<vmem>>) attributes {dimension_semantics = [#tpu.dimension_semantics<parallel>], iteration_bounds = array<i64: 2>, scalar_prefetch = 0 : i64, scratch_operands = 0 : i64, tpu.core_type = #tpu.core_type<tc>, window_params = [{transform_indices = @transform_0, window_bounds = array<i64: 1, 8, 8, 1600>}, {pipeline_mode = #tpu.pipeline_mode<synchronous>, transform_indices = @transform_1, window_bounds = array<i64: 1600, 128>}, {pipeline_mode = #tpu.pipeline_mode<synchronous>, transform_indices = @transform_2, window_bounds = array<i64: 1, 128>}, {transform_indices = @transform_3, window_bounds = array<i64: 1, 3, 3, 128>}]} {
    %c0 = arith.constant 0 : index
    %c0_0 = arith.constant 0 : index
    %c0_1 = arith.constant 0 : index
    %c0_2 = arith.constant 0 : index
    %0 = vector.load %arg1[%c0, %c0_0, %c0_1, %c0_2] : memref<1x8x8x1600xbf16, #tpu.memory_space<vmem>>, vector<1x8x8x1600xbf16>
    %1 = vector.shape_cast %0 : vector<1x8x8x1600xbf16> to vector<64x1600xbf16>
    %c0_3 = arith.constant 0 : index
    %c0_4 = arith.constant 0 : index
    %2 = vector.load %arg2[%c0_3, %c0_4] : memref<1600x128xbf16, #tpu.memory_space<vmem>>, vector<1600x128xbf16>
    %cst = arith.constant dense<0.000000e+00> : vector<64x128xf32>
    %3 = tpu.matmul %1, %2, %cst {dimension_numbers = #tpu.dot_dimension_numbers<[1], [0], [0], [1], [0, 0, 1, 1], [], []>} : vector<64x1600xbf16>, vector<1600x128xbf16>, vector<64x128xf32> -> vector<64x128xf32>
    %c0_5 = arith.constant 0 : index
    %c0_6 = arith.constant 0 : index
    %4 = vector.load %arg3[%c0_5, %c0_6] : memref<1x128xf32, #tpu.memory_space<vmem>>, vector<1x128xf32>
    %5 = vector.broadcast %4 : vector<1x128xf32> to vector<64x128xf32>
    %6 = arith.addf %3, %5 : vector<64x128xf32>
    %cst_7 = arith.constant 0.000000e+00 : f32
    %7 = vector.broadcast %cst_7 : f32 to vector<64x128xf32>
    %8 = arith.maximumf %6, %7 : vector<64x128xf32>
    %9 = vector.shape_cast %8 : vector<64x128xf32> to vector<1x8x8x128xf32>
    %10 = vector.extract_strided_slice %9 {offsets = [0, 0, 0, 0], sizes = [1, 1, 8, 128], strides = [1, 1, 1, 1]} : vector<1x8x8x128xf32> to vector<1x1x8x128xf32>
    %11 = vector.extract_strided_slice %9 {offsets = [0, 1, 0, 0], sizes = [1, 1, 8, 128], strides = [1, 1, 1, 1]} : vector<1x8x8x128xf32> to vector<1x1x8x128xf32>
    %12 = arith.maximumf %10, %11 : vector<1x1x8x128xf32>
    %13 = vector.extract_strided_slice %9 {offsets = [0, 2, 0, 0], sizes = [1, 1, 8, 128], strides = [1, 1, 1, 1]} : vector<1x8x8x128xf32> to vector<1x1x8x128xf32>
    %14 = arith.maximumf %12, %13 : vector<1x1x8x128xf32>
    %15 = vector.extract_strided_slice %9 {offsets = [0, 2, 0, 0], sizes = [1, 1, 8, 128], strides = [1, 1, 1, 1]} : vector<1x8x8x128xf32> to vector<1x1x8x128xf32>
    %16 = vector.extract_strided_slice %9 {offsets = [0, 3, 0, 0], sizes = [1, 1, 8, 128], strides = [1, 1, 1, 1]} : vector<1x8x8x128xf32> to vector<1x1x8x128xf32>
    %17 = arith.maximumf %15, %16 : vector<1x1x8x128xf32>
    %18 = vector.extract_strided_slice %9 {offsets = [0, 4, 0, 0], sizes = [1, 1, 8, 128], strides = [1, 1, 1, 1]} : vector<1x8x8x128xf32> to vector<1x1x8x128xf32>
    %19 = arith.maximumf %17, %18 : vector<1x1x8x128xf32>
    %20 = vector.extract_strided_slice %9 {offsets = [0, 4, 0, 0], sizes = [1, 1, 8, 128], strides = [1, 1, 1, 1]} : vector<1x8x8x128xf32> to vector<1x1x8x128xf32>
    %21 = vector.extract_strided_slice %9 {offsets = [0, 5, 0, 0], sizes = [1, 1, 8, 128], strides = [1, 1, 1, 1]} : vector<1x8x8x128xf32> to vector<1x1x8x128xf32>
    %22 = arith.maximumf %20, %21 : vector<1x1x8x128xf32>
    %23 = vector.extract_strided_slice %9 {offsets = [0, 6, 0, 0], sizes = [1, 1, 8, 128], strides = [1, 1, 1, 1]} : vector<1x8x8x128xf32> to vector<1x1x8x128xf32>
    %24 = arith.maximumf %22, %23 : vector<1x1x8x128xf32>
    %25 = tpu.concatenate %14, %19, %24 in 1 : vector<1x1x8x128xf32>, vector<1x1x8x128xf32>, vector<1x1x8x128xf32> -> vector<1x3x8x128xf32>
    %26 = vector.extract_strided_slice %25 {offsets = [0, 0, 0, 0], sizes = [1, 3, 1, 128], strides = [1, 1, 1, 1]} : vector<1x3x8x128xf32> to vector<1x3x1x128xf32>
    %27 = vector.extract_strided_slice %25 {offsets = [0, 0, 1, 0], sizes = [1, 3, 1, 128], strides = [1, 1, 1, 1]} : vector<1x3x8x128xf32> to vector<1x3x1x128xf32>
    %28 = arith.maximumf %26, %27 : vector<1x3x1x128xf32>
    %29 = vector.extract_strided_slice %25 {offsets = [0, 0, 2, 0], sizes = [1, 3, 1, 128], strides = [1, 1, 1, 1]} : vector<1x3x8x128xf32> to vector<1x3x1x128xf32>
    %30 = arith.maximumf %28, %29 : vector<1x3x1x128xf32>
    %31 = vector.extract_strided_slice %25 {offsets = [0, 0, 2, 0], sizes = [1, 3, 1, 128], strides = [1, 1, 1, 1]} : vector<1x3x8x128xf32> to vector<1x3x1x128xf32>
    %32 = vector.extract_strided_slice %25 {offsets = [0, 0, 3, 0], sizes = [1, 3, 1, 128], strides = [1, 1, 1, 1]} : vector<1x3x8x128xf32> to vector<1x3x1x128xf32>
    %33 = arith.maximumf %31, %32 : vector<1x3x1x128xf32>
    %34 = vector.extract_strided_slice %25 {offsets = [0, 0, 4, 0], sizes = [1, 3, 1, 128], strides = [1, 1, 1, 1]} : vector<1x3x8x128xf32> to vector<1x3x1x128xf32>
    %35 = arith.maximumf %33, %34 : vector<1x3x1x128xf32>
    %36 = vector.extract_strided_slice %25 {offsets = [0, 0, 4, 0], sizes = [1, 3, 1, 128], strides = [1, 1, 1, 1]} : vector<1x3x8x128xf32> to vector<1x3x1x128xf32>
    %37 = vector.extract_strided_slice %25 {offsets = [0, 0, 5, 0], sizes = [1, 3, 1, 128], strides = [1, 1, 1, 1]} : vector<1x3x8x128xf32> to vector<1x3x1x128xf32>
    %38 = arith.maximumf %36, %37 : vector<1x3x1x128xf32>
    %39 = vector.extract_strided_slice %25 {offsets = [0, 0, 6, 0], sizes = [1, 3, 1, 128], strides = [1, 1, 1, 1]} : vector<1x3x8x128xf32> to vector<1x3x1x128xf32>
    %40 = arith.maximumf %38, %39 : vector<1x3x1x128xf32>
    %41 = tpu.concatenate %30, %35, %40 in 2 : vector<1x3x1x128xf32>, vector<1x3x1x128xf32>, vector<1x3x1x128xf32> -> vector<1x3x3x128xf32>
    %42 = arith.mulf %41, %41 : vector<1x3x3x128xf32>
    %cst_8 = arith.constant 0.000000e+00 : f32
    %43 = vector.broadcast %cst_8 : f32 to vector<1x3x3x1xf32>
    %44 = vector.extract_strided_slice %42 {offsets = [0, 0, 0, 1], sizes = [1, 3, 3, 127], strides = [1, 1, 1, 1]} : vector<1x3x3x128xf32> to vector<1x3x3x127xf32>
    %45 = tpu.concatenate %44, %43 in 3 : vector<1x3x3x127xf32>, vector<1x3x3x1xf32> -> vector<1x3x3x128xf32>
    %46 = arith.addf %42, %45 : vector<1x3x3x128xf32>
    %47 = vector.extract_strided_slice %42 {offsets = [0, 0, 0, 0], sizes = [1, 3, 3, 127], strides = [1, 1, 1, 1]} : vector<1x3x3x128xf32> to vector<1x3x3x127xf32>
    %48 = tpu.concatenate %43, %47 in 3 : vector<1x3x3x1xf32>, vector<1x3x3x127xf32> -> vector<1x3x3x128xf32>
    %49 = arith.addf %46, %48 : vector<1x3x3x128xf32>
    %cst_9 = arith.constant 0.000000e+00 : f32
    %50 = vector.broadcast %cst_9 : f32 to vector<1x3x3x2xf32>
    %51 = vector.extract_strided_slice %42 {offsets = [0, 0, 0, 2], sizes = [1, 3, 3, 126], strides = [1, 1, 1, 1]} : vector<1x3x3x128xf32> to vector<1x3x3x126xf32>
    %52 = tpu.concatenate %51, %50 in 3 : vector<1x3x3x126xf32>, vector<1x3x3x2xf32> -> vector<1x3x3x128xf32>
    %53 = arith.addf %49, %52 : vector<1x3x3x128xf32>
    %54 = vector.extract_strided_slice %42 {offsets = [0, 0, 0, 0], sizes = [1, 3, 3, 126], strides = [1, 1, 1, 1]} : vector<1x3x3x128xf32> to vector<1x3x3x126xf32>
    %55 = tpu.concatenate %50, %54 in 3 : vector<1x3x3x2xf32>, vector<1x3x3x126xf32> -> vector<1x3x3x128xf32>
    %56 = arith.addf %53, %55 : vector<1x3x3x128xf32>
    %cst_10 = arith.constant 2.000000e-05 : f32
    %57 = vector.broadcast %cst_10 : f32 to vector<1x3x3x128xf32>
    %58 = arith.mulf %57, %56 : vector<1x3x3x128xf32>
    %cst_11 = arith.constant 2.000000e+00 : f32
    %59 = vector.broadcast %cst_11 : f32 to vector<1x3x3x128xf32>
    %60 = arith.addf %59, %58 : vector<1x3x3x128xf32>
    %61 = math.rsqrt %60 : vector<1x3x3x128xf32>
    %62 = math.rsqrt %61 : vector<1x3x3x128xf32>
    %63 = arith.mulf %62, %62 : vector<1x3x3x128xf32>
    %64 = arith.mulf %63, %62 : vector<1x3x3x128xf32>
    %65 = arith.mulf %41, %64 : vector<1x3x3x128xf32>
    %66 = arith.truncf %65 : vector<1x3x3x128xf32> to vector<1x3x3x128xbf16>
    %c0_12 = arith.constant 0 : index
    %c0_13 = arith.constant 0 : index
    %c0_14 = arith.constant 0 : index
    %c0_15 = arith.constant 0 : index
    %67 = vector.load %arg4[%c0_12, %c0_13, %c0_14, %c0_15] : memref<1x3x3x128xbf16, #tpu.memory_space<vmem>>, vector<1x3x3x128xbf16>
    tpu.vector_store %arg4[%c0_12, %c0_13, %c0_14, %c0_15], %66 {strides = array<i32>} : memref<1x3x3x128xbf16, #tpu.memory_space<vmem>>, vector<1x3x3x128xbf16>,
    return
  }
  func.func @transform_0(%arg0: i32) -> (i32, i32, i32, i32) {
    %c0_i32 = arith.constant 0 : i32
    %c0_i32_0 = arith.constant 0 : i32
    %c0_i32_1 = arith.constant 0 : i32
    %c0_i32_2 = arith.constant 0 : i32
    return %arg0, %c0_i32, %c0_i32_0, %c0_i32_1 : i32, i32, i32, i32
  }
  func.func @transform_1(%arg0: i32) -> (i32, i32) {
    %c0_i32 = arith.constant 0 : i32
    %c0_i32_0 = arith.constant 0 : i32
    %c0_i32_1 = arith.constant 0 : i32
    return %c0_i32, %c0_i32_0 : i32, i32
  }
  func.func @transform_2(%arg0: i32) -> (i32, i32) {
    %c0_i32 = arith.constant 0 : i32
    %c0_i32_0 = arith.constant 0 : i32
    %c0_i32_1 = arith.constant 0 : i32
    return %c0_i32, %c0_i32_0 : i32, i32
  }
  func.func @transform_3(%arg0: i32) -> (i32, i32, i32, i32) {
    %c0_i32 = arith.constant 0 : i32
    %c0_i32_0 = arith.constant 0 : i32
    %c0_i32_1 = arith.constant 0 : i32
    %c0_i32_2 = arith.constant 0 : i32
    return %arg0, %c0_i32, %c0_i32_0, %c0_i32_1 : i32, i32, i32, i32
  }
}

module attributes {stable_mosaic.version = 11 : i64} {
  func.func @_mlp_kernel(%arg0: memref<2x1152xbf16, #tpu.memory_space<vmem>>, %arg1: memref<1152x1000xbf16, #tpu.memory_space<vmem>>, %arg2: memref<1x1000xf32, #tpu.memory_space<vmem>>, %arg3: memref<1000x50xbf16, #tpu.memory_space<vmem>>, %arg4: memref<1x50xf32, #tpu.memory_space<vmem>>, %arg5: memref<2x50xf32, #tpu.memory_space<vmem>>) attributes {dimension_semantics = [], scalar_prefetch = 0 : i64, scratch_operands = 0 : i64, tpu.core_type = #tpu.core_type<tc>} {
    %c0 = arith.constant 0 : index
    %c0_0 = arith.constant 0 : index
    %0 = vector.load %arg0[%c0, %c0_0] : memref<2x1152xbf16, #tpu.memory_space<vmem>>, vector<2x1152xbf16>
    %c0_1 = arith.constant 0 : index
    %c0_2 = arith.constant 0 : index
    %1 = vector.load %arg1[%c0_1, %c0_2] : memref<1152x1000xbf16, #tpu.memory_space<vmem>>, vector<1152x1000xbf16>
    %cst = arith.constant dense<0.000000e+00> : vector<2x1000xf32>
    %2 = tpu.matmul %0, %1, %cst {dimension_numbers = #tpu.dot_dimension_numbers<[1], [0], [0], [1], [0, 0, 1, 1], [], []>} : vector<2x1152xbf16>, vector<1152x1000xbf16>, vector<2x1000xf32> -> vector<2x1000xf32>
    %c0_3 = arith.constant 0 : index
    %c0_4 = arith.constant 0 : index
    %3 = vector.load %arg2[%c0_3, %c0_4] : memref<1x1000xf32, #tpu.memory_space<vmem>>, vector<1x1000xf32>
    %4 = vector.broadcast %3 : vector<1x1000xf32> to vector<2x1000xf32>
    %5 = arith.addf %2, %4 : vector<2x1000xf32>
    %cst_5 = arith.constant 0.000000e+00 : f32
    %6 = vector.broadcast %cst_5 : f32 to vector<2x1000xf32>
    %7 = arith.maximumf %5, %6 : vector<2x1000xf32>
    %8 = arith.truncf %7 : vector<2x1000xf32> to vector<2x1000xbf16>
    %c0_6 = arith.constant 0 : index
    %c0_7 = arith.constant 0 : index
    %9 = vector.load %arg3[%c0_6, %c0_7] : memref<1000x50xbf16, #tpu.memory_space<vmem>>, vector<1000x50xbf16>
    %cst_8 = arith.constant dense<0.000000e+00> : vector<2x50xf32>
    %10 = tpu.matmul %8, %9, %cst_8 {dimension_numbers = #tpu.dot_dimension_numbers<[1], [0], [0], [1], [0, 0, 1, 1], [], []>} : vector<2x1000xbf16>, vector<1000x50xbf16>, vector<2x50xf32> -> vector<2x50xf32>
    %c0_9 = arith.constant 0 : index
    %c0_10 = arith.constant 0 : index
    %11 = vector.load %arg4[%c0_9, %c0_10] : memref<1x50xf32, #tpu.memory_space<vmem>>, vector<1x50xf32>
    %12 = vector.broadcast %11 : vector<1x50xf32> to vector<2x50xf32>
    %13 = arith.addf %10, %12 : vector<2x50xf32>
    %c0_11 = arith.constant 0 : index
    %c0_12 = arith.constant 0 : index
    %14 = vector.load %arg5[%c0_11, %c0_12] : memref<2x50xf32, #tpu.memory_space<vmem>>, vector<2x50xf32>
    tpu.vector_store %arg5[%c0_11, %c0_12], %13 {strides = array<i32>} : memref<2x50xf32, #tpu.memory_space<vmem>>, vector<2x50xf32>,
    return
  }
}

</mosaic_0001>

<bundles_post_ra>
// kernel: cnn_simple_forward.4
= control target key start
LH: loop header
LB: loop body
LE: loop exit
PB: predicated region body
PF: predicated region fallthrough
CT: control target
= control target key end

     0   :  { %s2646_s12 = smov 0   ;;  %s3066_s0 = inlined_call_operand.vmem [shape: bf16[2,8,8,1600], index: 0, kind: input, shape index: {}]   ;;  %s3067_s1 = inlined_call_operand.vmem [shape: bf16[1600,128], index: 1, kind: input, shape index: {}]   ;;  %s3068_s2 = inlined_call_operand.vmem [shape: f32[1,128], index: 2, kind: input, shape index: {}]   ;;  %s3069_s3 = inlined_call_operand.vmem [shape: bf16[2,3,3,128], index: 3, kind: output, shape index: {}]  }
   0x1 LB: > { %s1974_s13 = sadd.s32 4294967295, %s2620_s12   ;;  %p1978_p0 = scmp.ge.s32.totalorder %s2620_s12, 1  ;;  %s2620_s12 = sphi %s2646_s12, %s13_s12  }
   0x2   : > { %p137_p1 = scmp.lt.s32.totalorder %s2620_s12, 3 }
   0x4   : > { %p138_p2 = pnand %p1978_p0, %p137_p1 }
   0x5   : > { %v2426_v0 = vld [vmem:[%s3067_s1 + $0x40] sm:$0xff] (!%p138_p2)   ;;  %v2430_v4 = vld [vmem:[%s3067_s1 + $0x48] sm:$0xff] (!%p138_p2)   ;;  %v2434_v8 = vld [vmem:[%s3067_s1 + $0x50] sm:$0xff] (!%p138_p2)   ;;  %p161_p3 = scmp.lt.s32.totalorder (!%p138_p2), %s1974_s13, 1  ;;  %vm1295_vm0 = vcmask (!%p138_p2), 523264   ;;  %vm1805_vm1 = vcmask (!%p138_p2), 1040384  }
   0x6   : > { %141 = sbr.rel (%p138_p2) target bundleno = 544 (0x220), region = 32  ;;  %v2427_v1 = vld [vmem:[%s3067_s1 + $0xc0] sm:$0xff] (!%p138_p2)   ;;  %2140 = vmatprep.subr.bf16.mxu0 (!%p138_p2), %v2426_v0  ;;  %v2431_v5 = vld [vmem:[%s3067_s1 + $0xc8] sm:$0xff] (!%p138_p2)   ;;  %v2435_v9 = vld [vmem:[%s3067_s1 + $0xd0] sm:$0xff] (!%p138_p2)   ;;  %vm1809_vm2 = vcmask (!%p138_p2), 1041408   ;;  %s2623_s25 = smov (!%p138_p2), 127  }
   0x7   : > { %v2428_v2 = vld [vmem:[%s3067_s1] sm:$0xff] (!%p138_p2)   ;;  %2180 = vmatprep.subr.bf16.mxu1 (!%p138_p2), %v2427_v1  ;;  %v2432_v6 = vld [vmem:[%s3067_s1 + $0x8] sm:$0xff] (!%p138_p2)   ;;  %v2436_v10 = vld [vmem:[%s3067_s1 + $0x10] sm:$0xff] (!%p138_p2)   ;;  %s2624_s26 = smov (!%p138_p2), 1   ;;  %s2625_s28 = smov (!%p138_p2), 2   ;;  %vm1828_vm3 = vcmask (!%p138_p2), 1039360  }
   0x8   : > { %v2429_v3 = vld [vmem:[%s3067_s1 + $0x80] sm:$0xff] (!%p138_p2)   ;;  %2141 = vmatpush3.bf16.msra.mxu0 (!%p138_p2), %v2428_v2  ;;  %v2433_v7 = vld [vmem:[%s3067_s1 + $0x88] sm:$0xff] (!%p138_p2)   ;;  %v2437_v11 = vld [vmem:[%s3067_s1 + $0x90] sm:$0xff] (!%p138_p2)   ;;  %vm1844_vm4 = vcmask (!%p138_p2), 7168   ;;  %vm1860_vm5 = vcmask (!%p138_p2), 1031168   ;;  %vm1876_vm6 = vcmask (!%p138_p2), 15360  }
   0x9   : > { %2181 = vmatpush3.bf16.msra.mxu1 (!%p138_p2), %v2429_v3  ;;  %2142 = vmatprep.subr.bf16.mxu0 (!%p138_p2), %v2430_v4  ;;  %v2438_v12 = vld [vmem:[%s3067_s1 + $0x58] sm:$0xff] (!%p138_p2)   ;;  %v2442_v16 = vld [vmem:[%s3067_s1 + $0x60] sm:$0xff] (!%p138_p2)   ;;  %v2446_v20 = vld [vmem:[%s3067_s1 + $0x68] sm:$0xff] (!%p138_p2)   ;;  %vm1908_vm7 = vsmask.f32 (!%p138_p2), 1280 }
   0xa   : > { %2182 = vmatprep.subr.bf16.mxu1 (!%p138_p2), %v2431_v5  ;;  %v2439_v13 = vld [vmem:[%s3067_s1 + $0xd8] sm:$0xff] (!%p138_p2)   ;;  %v2443_v17 = vld [vmem:[%s3067_s1 + $0xe0] sm:$0xff] (!%p138_p2)   ;;  %v2447_v21 = vld [vmem:[%s3067_s1 + $0xe8] sm:$0xff] (!%p138_p2)  }
   0xb   : > { %v2440_v14 = vld [vmem:[%s3067_s1 + $0x18] sm:$0xff] (!%p138_p2)   ;;  %v2444_v18 = vld [vmem:[%s3067_s1 + $0x20] sm:$0xff] (!%p138_p2)   ;;  %v2448_v22 = vld [vmem:[%s3067_s1 + $0x28] sm:$0xff] (!%p138_p2)  }
   0xc   : > { %2143 = vmatpush3.bf16.msra.mxu0 (!%p138_p2), %v2432_v6  ;;  %v2441_v15 = vld [vmem:[%s3067_s1 + $0x98] sm:$0xff] (!%p138_p2)   ;;  %v2445_v19 = vld [vmem:[%s3067_s1 + $0xa0] sm:$0xff] (!%p138_p2)   ;;  %v2449_v23 = vld [vmem:[%s3067_s1 + $0xa8] sm:$0xff] (!%p138_p2)  }
   0xd   : > { %2183 = vmatpush3.bf16.msra.mxu1 %v2433_v7  ;;  %2144 = vmatprep.subr.bf16.mxu0 %v2434_v8  ;;  %s3073_s13 = smov (!%p161_p3, %s1974_s13), 1  ;;  %v2450_v24 = vld [vmem:[%s3067_s1 + $0x70] sm:$0xff]   ;;  %v2454_v28 = vld [vmem:[%s3067_s1 + $0x78] sm:$0xff]   ;;  %v2464_v36 = vld [vmem:[%s3067_s1 + $0x140] sm:$0xff]  }
   0xe   : > { %2184 = vmatprep.subr.bf16.mxu1 %v2435_v9  ;;  %v2451_v25 = vld [vmem:[%s3067_s1 + $0xf0] sm:$0xff]   ;;  %s2412_s16 = smul.u32 416, %s3073_s13  ;;  %v2455_v29 = vld [vmem:[%s3067_s1 + $0xf8] sm:$0xff]   ;;  %v2465_v37 = vld [vmem:[%s3067_s1 + $0x1c0] sm:$0xff]  }
   0xf   : > { %v2452_v26 = vld [vmem:[%s3067_s1 + $0x30] sm:$0xff]   ;;  %v2456_v30 = vld [vmem:[%s3067_s1 + $0x38] sm:$0xff]   ;;  %v2466_v38 = vld [vmem:[%s3067_s1 + $0x100] sm:$0xff]   ;;  %s2413_s29 = smul.u32 6, %s3073_s13 }
  0x10   : > { %2145 = vmatpush3.bf16.msra.mxu0 %v2436_v10  ;;  %v2453_v27 = vld [vmem:[%s3067_s1 + $0xb0] sm:$0xff]   ;;  %s2754_s27 = scalar_lea.vmem %s3066_s0, %s2412_s16  ;;  %v2457_v31 = vld [vmem:[%s3067_s1 + $0xb8] sm:$0xff]   ;;  %v2467_v39 = vld [vmem:[%s3067_s1 + $0x180] sm:$0xff]  }
  0x11   : > { %2185 = vmatpush3.bf16.msra.mxu1 %v2437_v11  ;;  %2146 = vmatprep.subr.bf16.mxu0 %v2438_v12  ;;  %v2458_v32 = vld [vmem:[%s2754_s27] ss:$52 sps:$4 sm:$0xff]   ;;  %v2460_v33 = vld [vmem:[%s2754_s27 + $0x4] ss:$52 sps:$4 sm:$0xff]   ;;  %v2461_v34 = vld [vmem:[%s2754_s27 + $0x8] ss:$52 sps:$4 sm:$0xff]   ;;  %s170_s5 = scalar_lea.vmem %s3069_s3, %s2413_s29 }
  0x12   : > { %2186 = vmatprep.subr.bf16.mxu1 %v2439_v13  ;;  %v2463_v35 = vld [vmem:[%s2754_s27 + $0xc] ss:$52 sps:$4 sm:$0xff]   ;;  %1340 = vmatprep.mubr.bf16.mxu0 %v2460_v33  ;;  %v2474_v45 = vld [vmem:[%s2754_s27 + $0x74] ss:$52 sps:$4 sm:$0xff]   ;;  %v2477_v47 = vld [vmem:[%s2754_s27 + $0x70] ss:$52 sps:$4 sm:$0xff]  }
  0x13   : > { %1404 = vmatprep.mubr.bf16.mxu1 %v2463_v35  ;;  %v2468_v40 = vld [vmem:[%s3067_s1 + $0x148] sm:$0xff]   ;;  %v2478_v48 = vld [vmem:[%s3067_s1 + $0x150] sm:$0xff]   ;;  %v2482_v52 = vld [vmem:[%s3067_s1 + $0x158] sm:$0xff]  }
  0x14   : > { %2147 = vmatpush3.bf16.msra.mxu0 %v2440_v14  ;;  %v2469_v41 = vld [vmem:[%s3067_s1 + $0x1c8] sm:$0xff]   ;;  %v2479_v49 = vld [vmem:[%s3067_s1 + $0x1d0] sm:$0xff]   ;;  %v2483_v53 = vld [vmem:[%s3067_s1 + $0x1d8] sm:$0xff]  }
  0x15   : > { %2187 = vmatpush3.bf16.msra.mxu1 %v2441_v15  ;;  %2148 = vmatprep.subr.bf16.mxu0 %v2442_v16  ;;  %v2470_v42 = vld [vmem:[%s3067_s1 + $0x108] sm:$0xff]   ;;  %v2480_v50 = vld [vmem:[%s3067_s1 + $0x110] sm:$0xff]   ;;  %v2484_v54 = vld [vmem:[%s3067_s1 + $0x118] sm:$0xff]  }
  0x16   : > { %2188 = vmatprep.subr.bf16.mxu1 %v2443_v17  ;;  %v2471_v43 = vld [vmem:[%s3067_s1 + $0x188] sm:$0xff]   ;;  %v2481_v51 = vld [vmem:[%s3067_s1 + $0x190] sm:$0xff]   ;;  %v2485_v55 = vld [vmem:[%s3067_s1 + $0x198] sm:$0xff]  }
  0x17   : > { %v2472_v44 = vld [vmem:[%s2754_s27 + $0x6c] ss:$52 sps:$4 sm:$0xff]   ;;  %v2476_v46 = vld [vmem:[%s2754_s27 + $0x68] ss:$52 sps:$4 sm:$0xff]   ;;  %v2490_v58 = vld [vmem:[%s2754_s27 + $0xd0] ss:$52 sps:$4 sm:$0xff]  }
  0x18   : > { %2149 = vmatpush3.bf16.msra.mxu0 %v2444_v18  ;;  %v2486_v56 = vld [vmem:[%s2754_s27 + $0xd4] ss:$52 sps:$4 sm:$0xff]   ;;  %v2488_v57 = vld [vmem:[%s2754_s27 + $0xdc] ss:$52 sps:$4 sm:$0xff]   ;;  %v2491_v59 = vld [vmem:[%s2754_s27 + $0xd8] ss:$52 sps:$4 sm:$0xff]  }
  0x19   : > { %2189 = vmatpush3.bf16.msra.mxu1 %v2445_v19  ;;  %2150 = vmatprep.subr.bf16.mxu0 %v2446_v20  ;;  %v2492_v60 = vld [vmem:[%s3067_s1 + $0x160] sm:$0xff]   ;;  %v2496_v0 = vld [vmem:[%s3067_s1 + $0x168] sm:$0xff]   ;;  %v2500_v4 = vld [vmem:[%s2754_s27 + $0x13c] ss:$52 sps:$4 sm:$0xff]  }
  0x1a   : > { %2190 = vmatprep.subr.bf16.mxu1 %v2447_v21  ;;  %v2493_v61 = vld [vmem:[%s3067_s1 + $0x1e0] sm:$0xff]   ;;  %v2497_v1 = vld [vmem:[%s3067_s1 + $0x1e8] sm:$0xff]   ;;  %v2506_v8 = vld [vmem:[%s3067_s1 + $0x170] sm:$0xff]  }
  0x1b   : > { %v2494_v62 = vld [vmem:[%s3067_s1 + $0x120] sm:$0xff]   ;;  %v2498_v2 = vld [vmem:[%s3067_s1 + $0x128] sm:$0xff]   ;;  %v2507_v9 = vld [vmem:[%s3067_s1 + $0x1f0] sm:$0xff]  }
  0x1c   : > { %2151 = vmatpush3.bf16.msra.mxu0 %v2448_v22  ;;  %v2495_v63 = vld [vmem:[%s3067_s1 + $0x1a0] sm:$0xff]   ;;  %v2499_v3 = vld [vmem:[%s3067_s1 + $0x1a8] sm:$0xff]   ;;  %v2508_v10 = vld [vmem:[%s3067_s1 + $0x130] sm:$0xff]  }
  0x1d   : > { %2191 = vmatpush3.bf16.msra.mxu1 %v2449_v23  ;;  %2152 = vmatprep.subr.bf16.mxu0 %v2450_v24  ;;  %v2502_v5 = vld [vmem:[%s2754_s27 + $0x144] ss:$52 sps:$4 sm:$0xff]   ;;  %v2505_v7 = vld [vmem:[%s2754_s27 + $0x140] ss:$52 sps:$4 sm:$0xff]   ;;  %v2519_v19 = vld [vmem:[%s2754_s27 + $0x1c] ss:$52 sps:$4 sm:$0xff]  }
  0x1e   : > { %2192 = vmatprep.subr.bf16.mxu1 %v2451_v25  ;;  %v2504_v6 = vld [vmem:[%s2754_s27 + $0x138] ss:$52 sps:$4 sm:$0xff]   ;;  %v2509_v11 = vld [vmem:[%s3067_s1 + $0x1b0] sm:$0xff]   ;;  %v2520_v20 = vld [vmem:[%s3067_s1 + $0x240] sm:$0xff]  }
  0x1f   : > { %v2510_v12 = vld [vmem:[%s3067_s1 + $0x178] sm:$0xff]   ;;  %v2514_v16 = vld [vmem:[%s2754_s27 + $0x10] ss:$52 sps:$4 sm:$0xff]   ;;  %v2516_v17 = vld [vmem:[%s2754_s27 + $0x14] ss:$52 sps:$4 sm:$0xff]  }
  0x20   : > { %2153 = vmatpush3.bf16.msra.mxu0 %v2452_v26  ;;  %v2511_v13 = vld [vmem:[%s3067_s1 + $0x1f8] sm:$0xff]   ;;  %v2521_v21 = vld [vmem:[%s3067_s1 + $0x2c0] sm:$0xff]   ;;  %v2524_v24 = vld [vmem:[%s3067_s1 + $0x248] sm:$0xff]  }
  0x21   : > { %2193 = vmatpush3.bf16.msra.mxu1 %v2453_v27  ;;  %2154 = vmatprep.subr.bf16.mxu0 %v2454_v28  ;;  %v2512_v14 = vld [vmem:[%s3067_s1 + $0x138] sm:$0xff]   ;;  %v2522_v22 = vld [vmem:[%s3067_s1 + $0x200] sm:$0xff]   ;;  %v2525_v25 = vld [vmem:[%s3067_s1 + $0x2c8] sm:$0xff]  }
  0x22   : > { %2194 = vmatprep.subr.bf16.mxu1 %v2455_v29  ;;  %v2513_v15 = vld [vmem:[%s3067_s1 + $0x1b8] sm:$0xff]   ;;  %v2523_v23 = vld [vmem:[%s3067_s1 + $0x280] sm:$0xff]   ;;  %v2526_v26 = vld [vmem:[%s3067_s1 + $0x208] sm:$0xff]  }
  0x23   : > { %v2517_v18 = vld [vmem:[%s2754_s27 + $0x18] ss:$52 sps:$4 sm:$0xff]   ;;  %v2528_v28 = vld [vmem:[%s2754_s27 + $0x7c] ss:$52 sps:$4 sm:$0xff]   ;;  %vm3051_vm8 = vmand %vm1809_vm2, %vm1908_vm7 }
  0x24   : > { %2155 = vmatpush3.bf16.msra.mxu0 %v2456_v30  ;;  %v2527_v27 = vld [vmem:[%s3067_s1 + $0x288] sm:$0xff]   ;;  %v2530_v29 = vld [vmem:[%s2754_s27 + $0x84] ss:$52 sps:$4 sm:$0xff]   ;;  %v2535_v33 = vld [vmem:[%s3067_s1 + $0x2d0] sm:$0xff]  }
  0x25   : > { %2195 = vmatpush3.bf16.msra.mxu1 %v2457_v31  ;;  %2220 = vmatprep.subr.bf16.mxu0 %v2464_v36  ;;  %v2532_v30 = vld [vmem:[%s2754_s27 + $0x78] ss:$52 sps:$4 sm:$0xff]   ;;  %v2533_v31 = vld [vmem:[%s2754_s27 + $0x80] ss:$52 sps:$4 sm:$0xff]  }
  0x26   : > { %2260 = vmatprep.subr.bf16.mxu1 %v2465_v37  ;;  %v2537_v35 = vld [vmem:[%s3067_s1 + $0x290] sm:$0xff]   ;;  %v2538_v36 = vld [vmem:[%s3067_s1 + $0x258] sm:$0xff]  }
  0x27   : > { %1341 = vmatmul.mubr.bf16.vlgmr.msra.gmra.mrb[0].mxu0 %v2458_v32  ;;  %v2534_v32 = vld [vmem:[%s3067_s1 + $0x250] sm:$0xff]   ;;  %v2539_v37 = vld [vmem:[%s3067_s1 + $0x2d8] sm:$0xff]  }
  0x28   : > { %1405 = vmatmul.mubr.bf16.vlgmr.msra.gmra.mrb[0].mxu1 %v2461_v34  ;;  %2221 = vmatpush3.bf16.msra.mxu0 %v2466_v38  ;;  %v2536_v34 = vld [vmem:[%s3067_s1 + $0x210] sm:$0xff]   ;;  %v2540_v38 = vld [vmem:[%s3067_s1 + $0x218] sm:$0xff]  }
  0x29   : > { %2261 = vmatpush3.bf16.msra.mxu1 %v2467_v39  ;;  %2222 = vmatprep.subr.bf16.mxu0 %v2468_v40  ;;  %v2541_v39 = vld [vmem:[%s3067_s1 + $0x298] sm:$0xff]  }
  0x2a   : > { %2262 = vmatprep.subr.bf16.mxu1 %v2469_v41  ;;  %1348 = vmatprep.mubr.bf16.mxu0 %v2472_v44  ;;  %v2542_v40 = vld [vmem:[%s2754_s27 + $0xe4] ss:$52 sps:$4 sm:$0xff]   ;;  %v2544_v41 = vld [vmem:[%s2754_s27 + $0xec] ss:$52 sps:$4 sm:$0xff]  }
  0x2b   : > { %1412 = vmatprep.mubr.bf16.mxu1 %v2474_v45  ;;  %v2548_v44 = vld [vmem:[%s3067_s1 + $0x260] sm:$0xff]  }
  0x2c   : > { %2223 = vmatpush3.bf16.msra.mxu0 %v2470_v42  ;;  %v2546_v42 = vld [vmem:[%s2754_s27 + $0xe0] ss:$52 sps:$4 sm:$0xff]  }
  0x2d   : > { %2263 = vmatpush3.bf16.msra.mxu1 %v2471_v43  ;;  %2224 = vmatprep.subr.bf16.mxu0 %v2478_v48  ;;  %v2547_v43 = vld [vmem:[%s2754_s27 + $0xe8] ss:$52 sps:$4 sm:$0xff]   ;;  %v2549_v45 = vld [vmem:[%s3067_s1 + $0x2e0] sm:$0xff]  }
  0x2e   : > { %2264 = vmatprep.subr.bf16.mxu1 %v2479_v49  ;;  %v2552_v48 = vld [vmem:[%s3067_s1 + $0x268] sm:$0xff]  }
  0x2f   : > { %1349 = vmatmul.mubr.bf16.gmra.mrb[4].mxu0 %v2476_v46  ;;  %v2550_v46 = vld [vmem:[%s3067_s1 + $0x220] sm:$0xff]   ;;  %v2553_v49 = vld [vmem:[%s3067_s1 + $0x2e8] sm:$0xff]  }
  0x30   : > { %1413 = vmatmul.mubr.bf16.gmra.mrb[4].mxu1 %v2477_v47  ;;  %2225 = vmatpush3.bf16.msra.mxu0 %v2480_v50  ;;  %v2551_v47 = vld [vmem:[%s3067_s1 + $0x2a0] sm:$0xff]   ;;  %v2554_v50 = vld [vmem:[%s3067_s1 + $0x228] sm:$0xff]  }
  0x31   : > { %2265 = vmatpush3.bf16.msra.mxu1 %v2481_v51  ;;  %2226 = vmatprep.subr.bf16.mxu0 %v2482_v52  ;;  %v2555_v51 = vld [vmem:[%s3067_s1 + $0x2a8] sm:$0xff]  }
  0x32   : > { %2266 = vmatprep.subr.bf16.mxu1 %v2483_v53  ;;  %1356 = vmatprep.mubr.bf16.mxu0 %v2486_v56  ;;  %v2556_v52 = vld [vmem:[%s2754_s27 + $0x14c] ss:$52 sps:$4 sm:$0xff]   ;;  %v2558_v53 = vld [vmem:[%s2754_s27 + $0x154] ss:$52 sps:$4 sm:$0xff]  }
  0x33   : > { %1420 = vmatprep.mubr.bf16.mxu1 %v2488_v57  ;;  %v2562_v56 = vld [vmem:[%s3067_s1 + $0x270] sm:$0xff]  }
  0x34   : > { %2227 = vmatpush3.bf16.msra.mxu0 %v2484_v54  ;;  %v2560_v54 = vld [vmem:[%s2754_s27 + $0x148] ss:$52 sps:$4 sm:$0xff]   ;;  %v2563_v57 = vld [vmem:[%s3067_s1 + $0x2f0] sm:$0xff]  }
  0x35   : > { %2267 = vmatpush3.bf16.msra.mxu1 %v2485_v55  ;;  %2228 = vmatprep.subr.bf16.mxu0 %v2492_v60  ;;  %v2561_v55 = vld [vmem:[%s2754_s27 + $0x150] ss:$52 sps:$4 sm:$0xff]   ;;  %v2566_v60 = vld [vmem:[%s3067_s1 + $0x278] sm:$0xff]  }
  0x36   : > { %2268 = vmatprep.subr.bf16.mxu1 %v2493_v61  ;;  %v2567_v61 = vld [vmem:[%s3067_s1 + $0x2f8] sm:$0xff]  }
  0x37   : > { %1357 = vmatmul.mubr.bf16.gmra.mrb[8].mxu0 %v2490_v58  ;;  %v2564_v58 = vld [vmem:[%s3067_s1 + $0x230] sm:$0xff]  }
  0x38   : > { %1421 = vmatmul.mubr.bf16.gmra.mrb[8].mxu1 %v2491_v59  ;;  %2229 = vmatpush3.bf16.msra.mxu0 %v2494_v62  ;;  %v2565_v59 = vld [vmem:[%s3067_s1 + $0x2b0] sm:$0xff]   ;;  %v2568_v62 = vld [vmem:[%s3067_s1 + $0x238] sm:$0xff]  }
  0x39   : > { %2269 = vmatpush3.bf16.msra.mxu1 %v2495_v63  ;;  %2230 = vmatprep.subr.bf16.mxu0 %v2496_v0  ;;  %v2569_v63 = vld [vmem:[%s3067_s1 + $0x2b8] sm:$0xff]   ;;  %v2570_v0 = vld [vmem:[%s2754_s27 + $0x20] ss:$52 sps:$4 sm:$0xff]  }
  0x3a   : > { %2270 = vmatprep.subr.bf16.mxu1 %v2497_v1  ;;  %1364 = vmatprep.mubr.bf16.mxu0 %v2500_v4  ;;  %v2572_v1 = vld [vmem:[%s2754_s27 + $0x24] ss:$52 sps:$4 sm:$0xff]  }
  0x3b   : > { %1428 = vmatprep.mubr.bf16.mxu1 %v2502_v5  ;;  %v2576_v4 = vld [vmem:[%s3067_s1 + $0x300] sm:$0xff]  }
  0x3c   : > { %2231 = vmatpush3.bf16.msra.mxu0 %v2498_v2  ;;  %v2573_v2 = vld [vmem:[%s2754_s27 + $0x28] ss:$52 sps:$4 sm:$0xff]   ;;  %v2577_v5 = vld [vmem:[%s2754_s27 + $0x8c] ss:$52 sps:$4 sm:$0xff]  }
  0x3d   : > { %2271 = vmatpush3.bf16.msra.mxu1 %v2499_v3  ;;  %2232 = vmatprep.subr.bf16.mxu0 %v2506_v8  ;;  %v2575_v3 = vld [vmem:[%s2754_s27 + $0x2c] ss:$52 sps:$4 sm:$0xff]   ;;  %v2581_v8 = vld [vmem:[%s2754_s27 + $0x88] ss:$52 sps:$4 sm:$0xff]  }
  0x3e   : > { %2272 = vmatprep.subr.bf16.mxu1 %v2507_v9  ;;  %v2582_v9 = vld [vmem:[%s2754_s27 + $0x90] ss:$52 sps:$4 sm:$0xff]  }
  0x3f   : > { %1365 = vmatmul.mubr.bf16.gmra.mrb[12].mxu0 %v2504_v6  ;;  %v2579_v6 = vld [vmem:[%s2754_s27 + $0x94] ss:$52 sps:$4 sm:$0xff]  }
  0x40   : > { %1429 = vmatmul.mubr.bf16.gmra.mrb[12].mxu1 %v2505_v7  ;;  %2233 = vmatpush3.bf16.msra.mxu0 %v2508_v10  ;;  %v2583_v7 = vld [vmem:[%s3067_s1 + $0x308] sm:$0xff]  }
  0x41   : > { %2273 = vmatpush3.bf16.msra.mxu1 %v2509_v11  ;;  %2234 = vmatprep.subr.bf16.mxu0 %v2510_v12  ;;  %v2584_v10 = vld [vmem:[%s2754_s27 + $0xf4] ss:$52 sps:$4 sm:$0xff]   ;;  %v2586_v11 = vld [vmem:[%s2754_s27 + $0xfc] ss:$52 sps:$4 sm:$0xff]  }
  0x42   : > { %2274 = vmatprep.subr.bf16.mxu1 %v2511_v13  ;;  %1468 = vmatprep.mubr.bf16.mxu0 %v2516_v17  ;;  %v2590_v12 = vld [vmem:[%s3067_s1 + $0x310] sm:$0xff]   ;;  %v2597_v13 = vld [vmem:[%s3067_s1 + $0x318] sm:$0xff]  }
  0x43   : > { %1532 = vmatprep.mubr.bf16.mxu1 %v2519_v19  ;;  %v2593_v17 = vld [vmem:[%s2754_s27 + $0x164] ss:$52 sps:$4 sm:$0xff]   ;;  %v2596_v19 = vld [vmem:[%s2754_s27 + $0x160] ss:$52 sps:$4 sm:$0xff]  }
  0x44   : > { %2235 = vmatpush3.bf16.msra.mxu0 %v2512_v14  ;;  %v2588_v14 = vld [vmem:[%s2754_s27 + $0xf0] ss:$52 sps:$4 sm:$0xff]  }
  0x45   : > { %2275 = vmatpush3.bf16.msra.mxu1 %v2513_v15  ;;  %2300 = vmatprep.subr.bf16.mxu0 %v2520_v20  ;;  %v2589_v15 = vld [vmem:[%s2754_s27 + $0xf8] ss:$52 sps:$4 sm:$0xff]   ;;  %v2598_v20 = vld [vmem:[%s2754_s27 + $0x30] ss:$52 sps:$4 sm:$0xff]  }
  0x46   : > { %2340 = vmatprep.subr.bf16.mxu1 %v2521_v21  ;;  %v2599_v21 = vld [vmem:[%s2754_s27 + $0x100] ss:$52 sps:$4 sm:$0xff]  }
  0x47   : > { %1469 = vmatmul.mubr.bf16.vlgmr.msra.gmra.mrb[16].mxu0 %v2514_v16  ;;  %v2591_v16 = vld [vmem:[%s2754_s27 + $0x15c] ss:$52 sps:$4 sm:$0xff]  }
  0x48   : > { %1533 = vmatmul.mubr.bf16.vlgmr.msra.gmra.mrb[16].mxu1 %v2517_v18  ;;  %2301 = vmatpush3.bf16.msra.mxu0 %v2522_v22  ;;  %v2595_v18 = vld [vmem:[%s2754_s27 + $0x158] ss:$52 sps:$4 sm:$0xff]  }
  0x49   : > { %2341 = vmatpush3.bf16.msra.mxu1 %v2523_v23  ;;  %2302 = vmatprep.subr.bf16.mxu0 %v2524_v24  ;;  %v2600_v22 = vld [vmem:[%s2754_s27 + $0x98] ss:$52 sps:$4 sm:$0xff]   ;;  %v2601_v23 = vld [vmem:[%s2754_s27 + $0x168] ss:$52 sps:$4 sm:$0xff]   ;;  %s2622_s27 = smov 126  }
  0x4a   : > { %2342 = vmatprep.subr.bf16.mxu1 %v2525_v25  ;;  %1476 = vmatprep.mubr.bf16.mxu0 %v2528_v28  ;;  %v1981_v25 = vld [vmem:[%s3068_s2] ss:$0 sm:$0xff] }
  0x4b   : > { %1540 = vmatprep.mubr.bf16.mxu1 %v2530_v29 }
  0x4c   : > { %2303 = vmatpush3.bf16.msra.mxu0 %v2526_v26 }
  0x4d   : > { %2343 = vmatpush3.bf16.msra.mxu1 %v2527_v27  ;;  %2304 = vmatprep.subr.bf16.mxu0 %v2534_v32 }
  0x4e   : > { %2344 = vmatprep.subr.bf16.mxu1 %v2535_v33 }
  0x4f   : > { %1477 = vmatmul.mubr.bf16.gmra.mrb[20].mxu0 %v2532_v30 }
  0x50   : > { %1541 = vmatmul.mubr.bf16.gmra.mrb[20].mxu1 %v2533_v31  ;;  %2305 = vmatpush3.bf16.msra.mxu0 %v2536_v34 }
  0x51   : > { %2345 = vmatpush3.bf16.msra.mxu1 %v2537_v35  ;;  %2306 = vmatprep.subr.bf16.mxu0 %v2538_v36 }
  0x52   : > { %2346 = vmatprep.subr.bf16.mxu1 %v2539_v37  ;;  %1484 = vmatprep.mubr.bf16.mxu0 %v2542_v40 }
  0x53   : > { %1548 = vmatprep.mubr.bf16.mxu1 %v2544_v41 }
  0x54   : > { %2307 = vmatpush3.bf16.msra.mxu0 %v2540_v38 }
  0x55   : > { %2347 = vmatpush3.bf16.msra.mxu1 %v2541_v39  ;;  %2308 = vmatprep.subr.bf16.mxu0 %v2548_v44 }
  0x56   : > { %2348 = vmatprep.subr.bf16.mxu1 %v2549_v45 }
  0x57   : > { %1485 = vmatmul.mubr.bf16.gmra.mrb[24].mxu0 %v2546_v42 }
  0x58   : > { %1549 = vmatmul.mubr.bf16.gmra.mrb[24].mxu1 %v2547_v43  ;;  %2309 = vmatpush3.bf16.msra.mxu0 %v2550_v46 }
  0x59   : > { %2349 = vmatpush3.bf16.msra.mxu1 %v2551_v47  ;;  %2310 = vmatprep.subr.bf16.mxu0 %v2552_v48 }
  0x5a   : > { %2350 = vmatprep.subr.bf16.mxu1 %v2553_v49  ;;  %1492 = vmatprep.mubr.bf16.mxu0 %v2556_v52 }
  0x5b   : > { %1556 = vmatprep.mubr.bf16.mxu1 %v2558_v53 }
  0x5c   : > { %2311 = vmatpush3.bf16.msra.mxu0 %v2554_v50 }
  0x5d   : > { %2351 = vmatpush3.bf16.msra.mxu1 %v2555_v51  ;;  %2312 = vmatprep.subr.bf16.mxu0 %v2562_v56 }
  0x5e   : > { %2352 = vmatprep.subr.bf16.mxu1 %v2563_v57 }
  0x5f   : > { %1493 = vmatmul.mubr.bf16.gmra.mrb[28].mxu0 %v2560_v54 }
  0x60   : > { %1557 = vmatmul.mubr.bf16.gmra.mrb[28].mxu1 %v2561_v55  ;;  %2313 = vmatpush3.bf16.msra.mxu0 %v2564_v58 }
  0x61   : > { %2353 = vmatpush3.bf16.msra.mxu1 %v2565_v59  ;;  %2314 = vmatprep.subr.bf16.mxu0 %v2566_v60 }
  0x62   : > { %2354 = vmatprep.subr.bf16.mxu1 %v2567_v61  ;;  %1596 = vmatprep.mubr.bf16.mxu0 %v2572_v1 }
  0x63   : > { %1660 = vmatprep.mubr.bf16.mxu1 %v2575_v3 }
  0x64   : > { %2315 = vmatpush3.bf16.msra.mxu0 %v2568_v62 }
  0x65   : > { %2355 = vmatpush3.bf16.msra.mxu1 %v2569_v63  ;;  %2388 = vmatprep.subr.bf16.mxu0 %v2576_v4 }
  0x66   : > { %2404 = vmatprep.subr.bf16.mxu1 %v2576_v4 }
  0x67   : > { %1597 = vmatmul.mubr.bf16.vlgmr.msra.gmra.mrb[32].mxu0 %v2570_v0 }
  0x68   : > { %1661 = vmatmul.mubr.bf16.vlgmr.msra.gmra.mrb[32].mxu1 %v2573_v2  ;;  %2389 = vmatpush3.bf16.msra.mxu0 %v2576_v4 }
  0x69   : > { %2408 = vmatpush3.bf16.msra.mxu1 %v2576_v4  ;;  %1604 = vmatprep.mubr.bf16.mxu0 %v2577_v5 }
  0x6a   : > { %1668 = vmatprep.mubr.bf16.mxu1 %v2579_v6  ;;  %2390 = vmatprep.subr.bf16.mxu0 %v2583_v7 }
  0x6b   : > { %2405 = vmatprep.subr.bf16.mxu1 %v2583_v7 }
  0x6c   : > { %2391 = vmatpush3.bf16.msra.mxu0 %v2583_v7 }
  0x6d   : > { %2409 = vmatpush3.bf16.msra.mxu1 %v2583_v7  ;;  %2392 = vmatprep.subr.bf16.mxu0 %v2590_v12 }
  0x6e   : > { %2406 = vmatprep.subr.bf16.mxu1 %v2590_v12 }
  0x6f   : > { %1605 = vmatmul.mubr.bf16.gmra.mrb[36].mxu0 %v2581_v8 }
  0x70   : > { %1669 = vmatmul.mubr.bf16.gmra.mrb[36].mxu1 %v2582_v9  ;;  %1612 = vmatprep.mubr.bf16.mxu0 %v2584_v10 }
  0x71   : > { %1676 = vmatprep.mubr.bf16.mxu1 %v2586_v11  ;;  %2393 = vmatpush3.bf16.msra.mxu0 %v2590_v12 }
  0x72   : > { %2410 = vmatpush3.bf16.msra.mxu1 %v2590_v12  ;;  %2394 = vmatprep.subr.bf16.mxu0 %v2597_v13 }
  0x73   : > { %2407 = vmatprep.subr.bf16.mxu1 %v2597_v13 }
  0x75   : > { %2395 = vmatpush3.bf16.msra.mxu0 %v2597_v13 }
  0x76   : > { %2411 = vmatpush3.bf16.msra.mxu1 %v2597_v13 }
  0x77   : > { %1613 = vmatmul.mubr.bf16.gmra.mrb[40].mxu0 %v2588_v14 }
  0x78   : > { %1677 = vmatmul.mubr.bf16.gmra.mrb[40].mxu1 %v2589_v15  ;;  %1620 = vmatprep.mubr.bf16.mxu0 %v2591_v16 }
  0x79   : > { %1684 = vmatprep.mubr.bf16.mxu1 %v2593_v17 }
  0x7f   : > { %1621 = vmatmul.mubr.bf16.gmra.mrb[44].mxu0 %v2595_v18 }
  0x80   : > { %1685 = vmatmul.mubr.bf16.gmra.mrb[44].mxu1 %v2596_v19  ;;  %2396 = vmatprep.mubr.msk.bf16.mxu0 %vm1295_vm0, %v2598_v20 }
  0x81   : > { %2400 = vmatprep.mubr.msk.bf16.mxu1 %vm1295_vm0, %v2599_v21 }
  0x87   : > { %2397 = vmatmul.mubr.msk.bf16.vlgmr.msra.gmra.mrb[48].mxu0 %vm1295_vm0, %v2600_v22 }
  0x88   : > { %2401 = vmatmul.mubr.msk.bf16.vlgmr.msra.gmra.mrb[48].mxu1 %vm1295_vm0, %v2601_v23 }
  0xfa   : > { %v2156_v24 = vpop.f32.mrb[0].mxu0 }
  0xfb   : > { %v2157_v26 = vpop.f32.mrb[1].mxu0  ;;  %v2196_v27 = vpop.f32.mrb[0].mxu1 }
  0xfc   : > { %v2158_v28 = vadd.f32 %v2157_v26, %v2156_v24  ;;  %v2159_v29 = vpop.f32.mrb[2].mxu0  ;;  %v2197_v30 = vpop.f32.mrb[1].mxu1 }
  0xfd   : > { %v2198_v31 = vadd.f32 %v2197_v30, %v2196_v27  ;;  %v2160_v32 = vpop.f32.mrb[3].mxu0  ;;  %v2199_v33 = vpop.f32.mrb[2].mxu1 }
  0xfe   : > { %v1343_v34 = vadd.f32 %v2158_v28, %v1981_v25  ;;  %v2161_v35 = vadd.f32 %v2160_v32, %v2159_v29  ;;  %v2200_v36 = vpop.f32.mrb[3].mxu1 }
  0xff   : > { %v2201_v37 = vadd.f32 %v2200_v36, %v2199_v33 }
 0x100   : > { %v1407_v38 = vadd.f32 %v2198_v31, %v1343_v34  ;;  %v1346_v39 = vadd.f32 %v2161_v35, %v1981_v25 }
 0x102   : > { %v1410_v40 = vadd.f32 %v2201_v37, %v1346_v39  ;;  %v2162_v41 = vpop.f32.mrb[4].mxu0 }
 0x103   : > { %v2163_v42 = vpop.f32.mrb[5].mxu0  ;;  %v2202_v43 = vpop.f32.mrb[4].mxu1 }
 0x104   : > { %v2164_v44 = vadd.f32 %v2163_v42, %v2162_v41  ;;  %v2165_v45 = vpop.f32.mrb[6].mxu0  ;;  %v2203_v46 = vpop.f32.mrb[5].mxu1 }
 0x105   : > { %v2204_v47 = vadd.f32 %v2203_v46, %v2202_v43  ;;  %v2166_v48 = vpop.f32.mrb[7].mxu0  ;;  %v2205_v49 = vpop.f32.mrb[6].mxu1 }
 0x106   : > { %v1351_v50 = vadd.f32 %v2164_v44, %v1981_v25  ;;  %v2167_v51 = vadd.f32 %v2166_v48, %v2165_v45  ;;  %v2206_v52 = vpop.f32.mrb[7].mxu1 }
 0x107   : > { %v2207_v53 = vadd.f32 %v2206_v52, %v2205_v49 }
 0x108   : > { %v1415_v54 = vadd.f32 %v2204_v47, %v1351_v50  ;;  %v1354_v55 = vadd.f32 %v2167_v51, %v1981_v25 }
 0x10a   : > { %v1418_v56 = vadd.f32 %v2207_v53, %v1354_v55  ;;  %v2168_v57 = vpop.f32.mrb[8].mxu0 }
 0x10b   : > { %v2169_v58 = vpop.f32.mrb[9].mxu0  ;;  %v2208_v59 = vpop.f32.mrb[8].mxu1 }
 0x10c   : > { %v2170_v60 = vadd.f32 %v2169_v58, %v2168_v57  ;;  %v2171_v61 = vpop.f32.mrb[10].mxu0  ;;  %v2209_v62 = vpop.f32.mrb[9].mxu1 }
 0x10d   : > { %v2210_v63 = vadd.f32 %v2209_v62, %v2208_v59  ;;  %v2172_v0 = vpop.f32.mrb[11].mxu0  ;;  %v2211_v1 = vpop.f32.mrb[10].mxu1 }
 0x10e   : > { %v1359_v2 = vadd.f32 %v2170_v60, %v1981_v25  ;;  %v2173_v3 = vadd.f32 %v2172_v0, %v2171_v61  ;;  %v2212_v4 = vpop.f32.mrb[11].mxu1 }
 0x10f   : > { %v2213_v5 = vadd.f32 %v2212_v4, %v2211_v1 }
 0x110   : > { %v1423_v6 = vadd.f32 %v2210_v63, %v1359_v2  ;;  %v1362_v7 = vadd.f32 %v2173_v3, %v1981_v25 }
 0x112   : > { %v1426_v8 = vadd.f32 %v2213_v5, %v1362_v7  ;;  %v2174_v9 = vpop.f32.mrb[12].mxu0 }
 0x113   : > { %v2214_v10 = vpop.f32.mrb[12].mxu1  ;;  %v2175_v11 = vpop.f32.mrb[13].mxu0 }
 0x114   : > { %v2215_v12 = vpop.f32.mrb[13].mxu1  ;;  %v2176_v13 = vadd.f32 %v2175_v11, %v2174_v9  ;;  %v2177_v14 = vpop.f32.mrb[14].mxu0 }
 0x115   : > { %v2216_v15 = vadd.f32 %v2215_v12, %v2214_v10  ;;  %v2217_v16 = vpop.f32.mrb[14].mxu1  ;;  %v2178_v17 = vpop.f32.mrb[15].mxu0 }
 0x116   : > { %v2218_v18 = vpop.f32.mrb[15].mxu1  ;;  %v1367_v19 = vadd.f32 %v2176_v13, %v1981_v25 }
 0x118   : > { %v1431_v20 = vadd.f32 %v2216_v15, %v1367_v19 }
 0x11a   : > { %v2236_v21 = vpop.f32.mrb[16].mxu0 }
 0x11b   : > { %v2237_v22 = vpop.f32.mrb[17].mxu0  ;;  %v2276_v24 = vpop.f32.mrb[16].mxu1 }
 0x11c   : > { %v2238_v23 = vadd.f32 %v2237_v22, %v2236_v21  ;;  %v2239_v26 = vpop.f32.mrb[18].mxu0  ;;  %v2277_v27 = vpop.f32.mrb[17].mxu1 }
 0x11d   : > { %v2240_v28 = vpop.f32.mrb[19].mxu0  ;;  %v2278_v30 = vadd.f32 %v2277_v27, %v2276_v24  ;;  %v2279_v32 = vpop.f32.mrb[18].mxu1 }
 0x11e   : > { %v1471_v29 = vadd.f32 %v2238_v23, %v1407_v38  ;;  %v2241_v31 = vadd.f32 %v2240_v28, %v2239_v26  ;;  %v2280_v33 = vpop.f32.mrb[19].mxu1 }
 0x11f   : > { %v2281_v36 = vadd.f32 %v2280_v33, %v2279_v32 }
 0x120   : > { %v1535_v34 = vadd.f32 %v2278_v30, %v1471_v29  ;;  %v1474_v35 = vadd.f32 %v2241_v31, %v1410_v40 }
 0x122   : > { %v1538_v37 = vadd.f32 %v2281_v36, %v1474_v35  ;;  %v2242_v39 = vpop.f32.mrb[20].mxu0 }
 0x123   : > { %v2243_v41 = vpop.f32.mrb[21].mxu0  ;;  %v2282_v25 = vpop.f32.mrb[20].mxu1 }
 0x124   : > { %v2244_v42 = vadd.f32 %v2243_v41, %v2242_v39  ;;  %v2245_v43 = vpop.f32.mrb[22].mxu0  ;;  %v2283_v44 = vpop.f32.mrb[21].mxu1 }
 0x125   : > { %v2284_v45 = vadd.f32 %v2283_v44, %v2282_v25  ;;  %v2246_v46 = vpop.f32.mrb[23].mxu0  ;;  %v2285_v47 = vpop.f32.mrb[22].mxu1 }
 0x126   : > { %v1479_v48 = vadd.f32 %v2244_v42, %v1415_v54  ;;  %v2247_v49 = vadd.f32 %v2246_v46, %v2245_v43  ;;  %v2286_v38 = vpop.f32.mrb[23].mxu1 }
 0x127   : > { %v2287_v50 = vadd.f32 %v2286_v38, %v2285_v47 }
 0x128   : > { %v1543_v51 = vadd.f32 %v2284_v45, %v1479_v48  ;;  %v1482_v52 = vadd.f32 %v2247_v49, %v1418_v56 }
 0x12a   : > { %v1546_v53 = vadd.f32 %v2287_v50, %v1482_v52  ;;  %v2248_v55 = vpop.f32.mrb[24].mxu0 }
 0x12b   : > { %v2288_v40 = vpop.f32.mrb[24].mxu1  ;;  %v2249_v57 = vpop.f32.mrb[25].mxu0 }
 0x12c   : > { %v2289_v58 = vpop.f32.mrb[25].mxu1  ;;  %v2250_v59 = vadd.f32 %v2249_v57, %v2248_v55  ;;  %v2251_v60 = vpop.f32.mrb[26].mxu0 }
 0x12d   : > { %v2290_v61 = vadd.f32 %v2289_v58, %v2288_v40  ;;  %v2291_v62 = vpop.f32.mrb[26].mxu1  ;;  %v2252_v63 = vpop.f32.mrb[27].mxu0 }
 0x12e   : > { %v2292_v0 = vpop.f32.mrb[27].mxu1  ;;  %v1487_v1 = vadd.f32 %v2250_v59, %v1423_v6  ;;  %v2253_v2 = vadd.f32 %v2252_v63, %v2251_v60 }
 0x12f   : > { %v2293_v3 = vadd.f32 %v2292_v0, %v2291_v62 }
 0x130   : > { %v1551_v54 = vadd.f32 %v2290_v61, %v1487_v1  ;;  %v1490_v4 = vadd.f32 %v2253_v2, %v1426_v8 }
 0x132   : > { %v1554_v5 = vadd.f32 %v2293_v3, %v1490_v4  ;;  %v2254_v7 = vpop.f32.mrb[28].mxu0 }
 0x133   : > { %v2255_v9 = vpop.f32.mrb[29].mxu0  ;;  %v2294_v56 = vpop.f32.mrb[28].mxu1 }
 0x134   : > { %v2256_v10 = vadd.f32 %v2255_v9, %v2254_v7  ;;  %v2257_v11 = vpop.f32.mrb[30].mxu0  ;;  %v2295_v12 = vpop.f32.mrb[29].mxu1 }
 0x135   : > { %v2296_v13 = vadd.f32 %v2295_v12, %v2294_v56  ;;  %v2258_v14 = vpop.f32.mrb[31].mxu0  ;;  %v2297_v15 = vpop.f32.mrb[30].mxu1 }
 0x136   : > { %v1495_v16 = vadd.f32 %v2256_v10, %v1431_v20  ;;  %v2298_v17 = vpop.f32.mrb[31].mxu1 }
 0x138   : > { %v1559_v18 = vadd.f32 %v2296_v13, %v1495_v16 }
 0x13a   : > { %v2316_v19 = vpop.f32.mrb[32].mxu0 }
 0x13b   : > { %v2317_v21 = vpop.f32.mrb[33].mxu0  ;;  %v2356_v6 = vpop.f32.mrb[32].mxu1 }
 0x13c   : > { %v2318_v22 = vadd.f32 %v2317_v21, %v2316_v19  ;;  %v2319_v23 = vpop.f32.mrb[34].mxu0  ;;  %v2357_v24 = vpop.f32.mrb[33].mxu1 }
 0x13d   : > { %v2358_v8 = vadd.f32 %v2357_v24, %v2356_v6  ;;  %v2320_v26 = vpop.f32.mrb[35].mxu0  ;;  %v2359_v27 = vpop.f32.mrb[34].mxu1 }
 0x13e   : > { %v1599_v28 = vadd.f32 %v2318_v22, %v1535_v34  ;;  %v2321_v29 = vadd.f32 %v2320_v26, %v2319_v23  ;;  %v2360_v30 = vpop.f32.mrb[35].mxu1 }
 0x13f   : > { %v2361_v31 = vadd.f32 %v2360_v30, %v2359_v27 }
 0x140   : > { %v1602_v32 = vadd.f32 %v2321_v29, %v1538_v37  ;;  %v1663_v33 = vadd.f32 %v2358_v8, %v1599_v28 }
 0x142   : > { %v2322_v35 = vpop.f32.mrb[36].mxu0  ;;  %v1666_v36 = vadd.f32 %v2361_v31, %v1602_v32 }
 0x143   : > { %v2323_v20 = vpop.f32.mrb[37].mxu0  ;;  %v2362_v39 = vpop.f32.mrb[36].mxu1 }
 0x144   : > { %v2324_v41 = vadd.f32 %v2323_v20, %v2322_v35  ;;  %v2325_v25 = vpop.f32.mrb[38].mxu0  ;;  %v2363_v42 = vpop.f32.mrb[37].mxu1 }
 0x145   : > { %v2364_v43 = vadd.f32 %v2363_v42, %v2362_v39  ;;  %v2326_v44 = vpop.f32.mrb[39].mxu0  ;;  %v2365_v45 = vpop.f32.mrb[38].mxu1 }
 0x146   : > { %v1607_v46 = vadd.f32 %v2324_v41, %v1543_v51  ;;  %v2327_v47 = vadd.f32 %v2326_v44, %v2325_v25  ;;  %v2366_v48 = vpop.f32.mrb[39].mxu1 }
 0x147   : > { %v2367_v49 = vadd.f32 %v2366_v48, %v2365_v45 }
 0x148   : > { %v1610_v34 = vadd.f32 %v2327_v47, %v1546_v53  ;;  %v1671_v38 = vadd.f32 %v2364_v43, %v1607_v46 }
 0x14a   : > { %v2328_v50 = vpop.f32.mrb[40].mxu0  ;;  %v1674_v52 = vadd.f32 %v2367_v49, %v1610_v34 }
 0x14b   : > { %v2329_v37 = vpop.f32.mrb[41].mxu0  ;;  %v2368_v55 = vpop.f32.mrb[40].mxu1 }
 0x14c   : > { %v2330_v40 = vadd.f32 %v2329_v37, %v2328_v50  ;;  %v2331_v57 = vpop.f32.mrb[42].mxu0  ;;  %v2369_v58 = vpop.f32.mrb[41].mxu1 }
 0x14d   : > { %v2370_v59 = vadd.f32 %v2369_v58, %v2368_v55  ;;  %v2332_v60 = vpop.f32.mrb[43].mxu0  ;;  %v2371_v61 = vpop.f32.mrb[42].mxu1 }
 0x14e   : > { %v1615_v62 = vadd.f32 %v2330_v40, %v1551_v54  ;;  %v2333_v63 = vadd.f32 %v2332_v60, %v2331_v57  ;;  %v2372_v0 = vpop.f32.mrb[43].mxu1 }
 0x14f   : > { %v2373_v1 = vadd.f32 %v2372_v0, %v2371_v61 }
 0x150   : > { %v1618_v51 = vadd.f32 %v2333_v63, %v1554_v5  ;;  %v1679_v2 = vadd.f32 %v2370_v59, %v1615_v62 }
 0x152   : > { %v2334_v3 = vpop.f32.mrb[44].mxu0  ;;  %v1682_v4 = vadd.f32 %v2373_v1, %v1618_v51 }
 0x153   : > { %v2335_v53 = vpop.f32.mrb[45].mxu0  ;;  %v2374_v7 = vpop.f32.mrb[44].mxu1 }
 0x154   : > { %v2336_v9 = vadd.f32 %v2335_v53, %v2334_v3  ;;  %v2337_v56 = vpop.f32.mrb[46].mxu0  ;;  %v2375_v10 = vpop.f32.mrb[45].mxu1 }
 0x155   : > { %v2376_v11 = vadd.f32 %v2375_v10, %v2374_v7  ;;  %v2338_v12 = vpop.f32.mrb[47].mxu0  ;;  %v2377_v13 = vpop.f32.mrb[46].mxu1 }
 0x156   : > { %v1623_v14 = vadd.f32 %v2336_v9, %v1559_v18  ;;  %v2378_v15 = vpop.f32.mrb[47].mxu1 }
 0x158   : > { %v1687_v16 = vadd.f32 %v2376_v11, %v1623_v14 }
 0x15a   : > { %v2398_v17 = vpop.f32.mrb[48].mxu0 }
 0x15b   : > { %v1735_v54 = vadd.f32 %v2398_v17, %v1671_v38  ;;  %v2402_v19 = vpop.f32.mrb[48].mxu1  ;;  %v1726_v21 = vpop.f32.mrb[49].mxu0 }
 0x15c   : > { %v1751_v6 = vadd.f32 %v2402_v19, %v1687_v16  ;;  %v1727_v5 = vadd.f32 %v1726_v21, %v1663_v33  ;;  %v1742_v22 = vpop.f32.mrb[49].mxu1  ;;  %v2399_v23 = vpop.f32.mrb[50].mxu0 }
 0x15d   : > { %v1743_v24 = vadd.f32 %v1742_v22, %v1679_v2  ;;  %v1738_v8 = vadd.f32 %v2399_v23, %v1674_v52  ;;  %v2403_v26 = vpop.f32.mrb[50].mxu1  ;;  %v1729_v27 = vpop.f32.mrb[51].mxu0  ;;  %v1758_v30 = vmax.f32 %v1735_v54, 0.0 }
 0x15e   : > { %v1730_v28 = vadd.f32 %v1729_v27, %v1666_v36  ;;  %v1745_v29 = vpop.f32.mrb[51].mxu1  ;;  %v1756_v18 = vmax.f32 %v1727_v5, 0.0  ;;  %v1762_v42 = vmax.f32 %v1751_v6, 0.0 }
 0x15f   : > { %v1759_v31 = vmax.f32 %v1738_v8, 0.0  ;;  %v1746_v32 = vadd.f32 %v1745_v29, %v1682_v4  ;;  %v1760_v20 = vmax.f32 %v1743_v24, 0.0 }
 0x160   : > { %v1757_v35 = vmax.f32 %v1730_v28, 0.0 }
 0x161   : > { %v1765_v39 = vmax.f32 %v1758_v30, %v1759_v31  ;;  %v1761_v41 = vmax.f32 %v1746_v32, 0.0 }
 0x162   : > { %v1763_v25 = vmax.f32 %v1756_v18, %v1757_v35 }
 0x163   : > { %v1766_v43 = vmax.f32 %v1765_v39, %v1760_v20  ;;  %v1767_v33 = vmax.f32 %v1760_v20, %v1761_v41 }
 0x164   : > { %v1764_v44 = vmax.f32 %v1763_v25, %v1758_v30 }
 0x165   : > { %v1773_v45 = vrot.slane %v1766_v43, 1  ;;  %v1768_v46 = vmax.f32 %v1767_v33, %v1762_v42  ;;  %v1782_v49 = vrot.slane %v1766_v43, 2 }
 0x166   : > { %v1772_v47 = vrot.slane %v1764_v44, 1  ;;  %v1781_v38 = vrot.slane %v1764_v44, 2 }
 0x167   : > { %v1779_v48 = vmax.f32 %v1766_v43, %v1773_v45  ;;  %v1774_v36 = vrot.slane %v1768_v46, 1  ;;  %v1783_v37 = vrot.slane %v1768_v46, 2 }
 0x168   : > { %v1778_v34 = vmax.f32 %v1764_v44, %v1772_v47 }
 0x169   : > { %v1788_v50 = vmax.f32 %v1779_v48, %v1782_v49  ;;  %v1780_v52 = vmax.f32 %v1768_v46, %v1774_v36 }
 0x16a   : > { %v1787_v55 = vmax.f32 %v1778_v34, %v1781_v38 }
 0x16b   : > { %v1794_v40 = vrot.slane %v1788_v50, 1  ;;  %v1800_v57 = vrot.slane %v1788_v50, 2  ;;  %v1789_v58 = vmax.f32 %v1780_v52, %v1783_v37 }
 0x16c   : > { %v1793_v59 = vrot.slane %v1787_v55, 1  ;;  %v1799_v51 = vrot.slane %v1787_v55, 2 }
 0x16d   : > { %v1795_v60 = vrot.slane %v1789_v58, 1  ;;  %v1801_v61 = vrot.slane %v1789_v58, 2  ;;  %v1807_v62 = vsel %vm1805_vm1, %v1788_v50, %v1794_v40 }
 0x16e   : > { %v3023_v63 = vsel %vm1809_vm2, %v1807_v62, %v1800_v57  ;;  %v1806_v3 = vsel %vm1805_vm1, %v1787_v55, %v1793_v59 }
 0x16f   : > { %v1814_v0 = vmul.f32 %v3023_v63, %v3023_v63  ;;  %v1808_v1 = vsel %vm1805_vm1, %v1789_v58, %v1795_v60  ;;  %v3035_v53 = vsel %vm1809_vm2, %v1806_v3, %v1799_v51 }
 0x170   : > { %v3029_v2 = vsel %vm1809_vm2, %v1808_v1, %v1801_v61  ;;  %v1813_v7 = vmul.f32 %v3035_v53, %v3035_v53  ;;  %v1910_v61 = vld [vmem:[%s170_s5] sm:$0x3] }
 0x171   : > { %1853 = vrot.lane.b32.xlu1 %v1814_v0, %s2622_s27  ;;  %1821 = vrot.lane.b32.xlu0 %v1814_v0, %s2623_s25  ;;  %v1815_v4 = vmul.f32 %v3029_v2, %v3029_v2 }
 0x175   : > { %1823 = vrot.lane.b32.xlu1 %v1815_v4, %s2623_s25  ;;  %1837 = vrot.lane.b32.xlu0 %v1814_v0, %s2624_s26 }
 0x179   : > { %1835 = vrot.lane.b32.xlu1 %v1813_v7, %s2624_s26  ;;  %1819 = vrot.lane.b32.xlu0 %v1813_v7, %s2623_s25 }
 0x17d   : > { %1839 = vrot.lane.b32.xlu1 %v1815_v4, %s2624_s26  ;;  %1851 = vrot.lane.b32.xlu0 %v1813_v7, %s2622_s27 }
 0x181   : > { %1867 = vrot.lane.b32.xlu1 %v1813_v7, %s2625_s28  ;;  %1855 = vrot.lane.b32.xlu0 %v1815_v4, %s2622_s27 }
 0x185   : > { %1871 = vrot.lane.b32.xlu1 %v1815_v4, %s2625_s28  ;;  %1869 = vrot.lane.b32.xlu0 %v1814_v0, %s2625_s28 }
 0x1e3   : > { %v1854_v9 = vpop.permute.xlu1 %1853  ;;  %v1822_v56 = vpop.permute.xlu0 %1821 }
 0x1e4   : > { %v1830_v16 = vsel %vm1828_vm3, %v1822_v56, 0.0  ;;  %v1862_v35 = vsel %vm1860_vm5, %v1854_v9, 0.0  ;;  %v1913_v56 = vld [vmem:[%s170_s5 + $0x2] sm:$0x3] }
 0x1e5   : > { %v1833_v23 = vadd.f32 %v1830_v16, %v1814_v0 }
 0x1e7   : > { %v1824_v10 = vpop.permute.xlu1 %1823  ;;  %v1838_v11 = vpop.permute.xlu0 %1837 }
 0x1e8   : > { %v1831_v6 = vsel %vm1828_vm3, %v1824_v10, 0.0  ;;  %v1846_v5 = vsel %vm1844_vm4, 0.0, %v1838_v11 }
 0x1e9   : > { %v1834_v8 = vadd.f32 %v1831_v6, %v1815_v4  ;;  %v1849_v26 = vadd.f32 %v1846_v5, %v1833_v23 }
 0x1eb   : > { %v1836_v12 = vpop.permute.xlu1 %1835  ;;  %v1820_v13 = vpop.permute.xlu0 %1819  ;;  %v1865_v25 = vadd.f32 %v1862_v35, %v1849_v26 }
 0x1ec   : > { %v1829_v14 = vsel %vm1828_vm3, %v1820_v13, 0.0  ;;  %v1845_v17 = vsel %vm1844_vm4, 0.0, %v1836_v12 }
 0x1ed   : > { %v1832_v15 = vadd.f32 %v1829_v14, %v1813_v7  ;;  %v1916_v7 = vld [vmem:[%s170_s5 + $0x4] sm:$0x3] }
 0x1ef   : > { %v1840_v54 = vpop.permute.xlu1 %1839  ;;  %v1848_v19 = vadd.f32 %v1845_v17, %v1832_v15  ;;  %v1852_v21 = vpop.permute.xlu0 %1851 }
 0x1f0   : > { %v1861_v22 = vsel %vm1860_vm5, %v1852_v21, 0.0  ;;  %v1847_v24 = vsel %vm1844_vm4, 0.0, %v1840_v54 }
 0x1f1   : > { %v1864_v27 = vadd.f32 %v1861_v22, %v1848_v19  ;;  %v1850_v32 = vadd.f32 %v1847_v24, %v1834_v8 }
 0x1f3   : > { %v1868_v28 = vpop.permute.xlu1 %1867  ;;  %v1856_v29 = vpop.permute.xlu0 %1855 }
 0x1f4   : > { %v1877_v30 = vsel %vm1876_vm6, 0.0, %v1868_v28  ;;  %v1863_v31 = vsel %vm1860_vm5, %v1856_v29, 0.0 }
 0x1f5   : > { %v1880_v18 = vadd.f32 %v1877_v30, %v1864_v27  ;;  %v1866_v39 = vadd.f32 %v1863_v31, %v1850_v32 }
 0x1f7   : > { %v1883_v20 = vmul.f32 2e-05, %v1880_v18  ;;  %v1872_v41 = vpop.permute.xlu1 %1871  ;;  %v1870_v42 = vpop.permute.xlu0 %1869 }
 0x1f8   : > { %v1879_v43 = vsel %vm1876_vm6, 0.0, %v1872_v41  ;;  %v1878_v33 = vsel %vm1876_vm6, 0.0, %v1870_v42 }
 0x1f9   : > { %v1886_v44 = vadd.f32 2.0, %v1883_v20  ;;  %v1882_v45 = vadd.f32 %v1879_v43, %v1866_v39  ;;  %v1881_v46 = vadd.f32 %v1878_v33, %v1865_v25 }
 0x1fb   : > { %2602 = vrsqrt.f32 %v1886_v44  ;;  %v1885_v47 = vmul.f32 2e-05, %v1882_v45  ;;  %v1884_v48 = vmul.f32 2e-05, %v1881_v46 }
 0x1fd   : > { %v1888_v49 = vadd.f32 2.0, %v1885_v47  ;;  %v1887_v36 = vadd.f32 2.0, %v1884_v48 }
 0x1ff   : > { %2604 = vrsqrt.f32 %v1888_v49 }
 0x200   : > { %2606 = vrsqrt.f32 %v1887_v36 }
 0x205   : > { %v2603_v34 = vpop.eup %2602 }
 0x206   : > { %2608 = vrsqrt.f32 %v2603_v34 }
 0x209   : > { %v2605_v38 = vpop.eup %2604 }
 0x20a   : > { %v2607_v50 = vpop.eup %2606  ;;  %2610 = vrsqrt.f32 %v2605_v38 }
 0x20b   : > { %2612 = vrsqrt.f32 %v2607_v50 }
 0x210   : > { %v2609_v52 = vpop.eup %2608 }
 0x211   : > { %v1895_v37 = vmul.f32 %v2609_v52, %v2609_v52 }
 0x213   : > { %v1898_v55 = vmul.f32 %v2609_v52, %v1895_v37 }
 0x214   : > { %v2611_v40 = vpop.eup %2610 }
 0x215   : > { %v2613_v57 = vpop.eup %2612  ;;  %v1901_v58 = vmul.f32 %v1898_v55, %v3035_v53  ;;  %v1897_v59 = vmul.f32 %v2611_v40, %v2611_v40 }
 0x216   : > { %v1896_v62 = vmul.f32 %v2613_v57, %v2613_v57 }
 0x217   : > { %v1904_v0 = vpack.c.bf16 %v1901_v58, %v1901_v58  ;;  %v1900_v1 = vmul.f32 %v2611_v40, %v1897_v59 }
 0x218   : > { %v1899_v51 = vmul.f32 %v2613_v57, %v1896_v62 }
 0x219   : > { %v1911_v3 = vsel %vm3051_vm8, %v1904_v0, %v1910_v61  ;;  %v1903_v4 = vmul.f32 %v1900_v1, %v3029_v2 }
 0x21a   : > { %1912 = vst [vmem:[%s170_s5] sm:$0x3] %v1911_v3  ;;  %v1902_v53 = vmul.f32 %v1899_v51, %v3023_v63 }
 0x21b   : > { %v1906_v9 = vpack.c.bf16 %v1903_v4, %v1903_v4 }
 0x21c   : > { %v1905_v10 = vpack.c.bf16 %v1902_v53, %v1902_v53 }
 0x21d   : > { %v1917_v11 = vsel %vm3051_vm8, %v1906_v9, %v1916_v7 }
 0x21e   : > { %1918 = vst [vmem:[%s170_s5 + $0x4] sm:$0x3] %v1917_v11  ;;  %v1914_v12 = vsel %vm3051_vm8, %v1905_v10, %v1913_v56 }
 0x21f   : > { %1915 = vst [vmem:[%s170_s5 + $0x2] sm:$0x3] %v1914_v12 }
 0x220 PF: > { %s13_s12 = sadd.s32 1, %s2620_s12  }
 0x221   : > { %p10_p4 = scmp.ge.s32.totalorder %s13_s12, 4  }
 0x223   :  { %12 = sbr.rel (!%p10_p4) target bundleno = 1 (0x1), region = 62 }

// kernel: cnn_simple_forward.3
= control target key start
LH: loop header
LB: loop body
LE: loop exit
PB: predicated region body
PF: predicated region fallthrough
CT: control target
= control target key end

     0   :  { %s10792_s12 = smov 0   ;;  %s15496_s0 = inlined_call_operand.vmem [shape: bf16[2,26,26,49], index: 0, kind: input, shape index: {}]   ;;  %s15497_s1 = inlined_call_operand.vmem [shape: bf16[49,64], index: 1, kind: input, shape index: {}]   ;;  %s15498_s2 = inlined_call_operand.vmem [shape: f32[1,64], index: 2, kind: input, shape index: {}]   ;;  %s15499_s3 = inlined_call_operand.vmem [shape: bf16[2,12,12,64], index: 3, kind: output, shape index: {}]  }
   0x1 LB: > { %s10005_s13 = sadd.s32 4294967295, %s10761_s12   ;;  %p10009_p0 = scmp.ge.s32.totalorder %s10761_s12, 1  ;;  %s10761_s12 = sphi %s10792_s12, %s13_s12  }
   0x2   : > { %p137_p1 = scmp.lt.s32.totalorder %s10761_s12, 3 }
   0x4   : > { %p138_p2 = pnand %p10009_p0, %p137_p1 }
   0x6   : > { %141 = sbr.rel (%p138_p2) target bundleno = 902 (0x386), region = 32 }
   0xd   : > { %v10651_v0 = vld [vmem:[%s15497_s1] sm:$0xff]   ;;  %v15500_v1 = vmov 0.0   ;;  %v391_v2 = vlaneseq  ;;  %v10652_v3 = vld [vmem:[%s15497_s1 + $0x8] sm:$0xff]   ;;  %vm4854_vm0 = vcmask 1040384   ;;  %p161_p3 = scmp.lt.s32.totalorder %s10005_s13, 1  ;;  %vm10764_vm1 = vmmov 0  }
   0xe   : > { %10444 = vmatprep.subr.bf16.mxu0 %v15500_v1  ;;  %10624 = vmatprep.subr.bf16.mxu1 %v15500_v1  ;;  %v10765_v4 = vmov 1966171168   ;;  %v10653_v7 = vld [vmem:[%s15497_s1 + $0x10] sm:$0xff]   ;;  %v10654_v8 = vld [vmem:[%s15497_s1 + $0x18] ss:$0 sps:$4 sm:$0x11]  }
   0xf   : > { %10445 = vmatpush3.bf16.msra.mxu0 %v10651_v0  ;;  %10628 = vmatpush3.bf16.msra.mxu1 %v10651_v0  ;;  %v389_v5 = vunpack.c.l.s4 %v10765_v4  ;;  %v10812_v6 = vshrl.u32 %v391_v2, 7  ;;  %s16246_s13 = smov (!%p161_p3, %s10005_s13), 1  ;;  %v10766_v9 = vmov 0   ;;  %vm4724_vm2 = vcmask 400384   ;;  %s10768_s28 = smov 127  }
  0x10   : > { %10446 = vmatprep.subr.bf16.mxu0 %v15500_v1  ;;  %10625 = vmatprep.subr.bf16.mxu1 %v15500_v1  ;;  %v4856_v10 = vsel %vm4854_vm0, 65535, %v10766_v9  ;;  %s10632_s22 = smul.u32 416, %s16246_s13  ;;  %vm9014_vm3 = vcmask 1041408   ;;  %vm9027_vm4 = vcmask 1042432   ;;  %vm9040_vm5 = vcmask 1043456   ;;  %s10769_s29 = smov 1  }
  0x11   : > { %10452 = vmatprep.mubr.msk.bf16.mxu0 %vm10764_vm1, %v15500_v1  ;;  %10540 = vmatprep.mubr.msk.bf16.mxu1 %vm10764_vm1, %v15500_v1  ;;  %v390_v11 = vunpack.c.0.s8 %v389_v5  ;;  %v4858_v13 = vand.u32 %v10654_v8, %v4856_v10  ;;  %vm9053_vm6 = vcmask 1044480   ;;  %vm9066_vm7 = vcmask 1045504   ;;  %s10770_s30 = smov 126   ;;  %s10771_s6 = smov 2  }
  0x12   : > { %s10834_s25 = scalar_lea.vmem %s15496_s0, %s10632_s22  ;;  %vm9079_vm8 = vcmask 1046528   ;;  %vm9248_vm9 = vcmask 515072   ;;  %vm9369_vm10 = vcmask 7168   ;;  %vm9490_vm11 = vcmask 506880   ;;  %s10633_s11 = smul.u32 96, %s16246_s13 }
  0x13   : > { %10447 = vmatpush3.bf16.msra.mxu0 %v10652_v3  ;;  %10629 = vmatpush3.bf16.msra.mxu1 %v10652_v3  ;;  %v10829_v12 = vsub.s32 %v390_v11, %v10812_v6  ;;  %v10012_v14 = vld.sshfl [vmem:[%s10834_s25] sm:$0x33 pattern:$0x75316420]  ;;  %vm9611_vm12 = vcmask 15360   ;;  %vm9924_vm13 = vcmask 519168  }
  0x14   : > { %10448 = vmatprep.subr.bf16.mxu0 %v15500_v1  ;;  %10626 = vmatprep.subr.bf16.mxu1 %v15500_v1  ;;  %v10013_v15 = vld.sshfl [vmem:[%s10834_s25 + $0x4] sm:$0x33 pattern:$0x75316420]  ;;  %v387_v16 = vcombine.high %v10012_v14, %v10012_v14  ;;  %s15266_s15 = scalar_lea.vmem %s15499_s3, %s10633_s11  ;;  %vm9926_vm14 = vcmask 517120  }
  0x15   : > { %15640 = vst [vmem:[#allocation2_spill] sm:$0xff] %v10829_v12  ;;  %v394_v17 = vrot.slane %v10012_v14, %v10829_v12  ;;  %v411_v18 = vcombine.high %v10013_v15, %v10013_v15  ;;  %v418_v19 = vrot.slane %v10013_v15, %v10829_v12  ;;  %v10065_v20 = vld.sshfl [vmem:[%s10834_s25 + $0xd4] sm:$0x33 pattern:$0x75316420] }
  0x16   : > { %v401_v21 = vrot.slane %v387_v16, %v10829_v12  ;;  %v10066_v22 = vld.sshfl [vmem:[%s10834_s25 + $0xd8] sm:$0x33 pattern:$0x75316420]  ;;  %v1529_v23 = vcombine.high %v10065_v20, %v10065_v20 }
  0x17   : > { %10449 = vmatpush3.bf16.msra.mxu0 %v10653_v7  ;;  %10630 = vmatpush3.bf16.msra.mxu1 %v10653_v7  ;;  %v425_v24 = vrot.slane %v411_v18, %v10829_v12  ;;  %v10067_v25 = vld.sshfl [vmem:[%s10834_s25 + $0xdc] sm:$0x1 pattern:$0x75316420]  ;;  %v1553_v26 = vcombine.high %v10066_v22, %v10066_v22  ;;  %v1560_v27 = vrot.slane %v10066_v22, %v10829_v12 }
  0x18   : > { %10450 = vmatprep.subr.bf16.mxu0 %v15500_v1  ;;  %10627 = vmatprep.subr.bf16.mxu1 %v15500_v1  ;;  %v2630_v28 = vcombine.low %v394_v17, %v401_v21  ;;  %v10117_v29 = vcombine.high %v394_v17, %v401_v21  ;;  %v10068_v30 = vld.sshfl [vmem:[%s10834_s25 + $0xe0] sm:$0x33 pattern:$0x75316420]  ;;  %v10850_v31 = vrot.slane %v1529_v23, %v10829_v12 }
  0x19   : > { %v1583_v32 = vrot.slane %v10067_v25, %v10829_v12  ;;  %v2632_v33 = vcombine.low %v418_v19, %v425_v24  ;;  %v10118_v34 = vcombine.high %v418_v19, %v425_v24  ;;  %v1567_v35 = vrot.slane %v1553_v26, %v10829_v12  ;;  %v10014_v41 = vld.sshfl [vmem:[%s10834_s25 + $0x8] sm:$0x33 pattern:$0x75316420] }
  0x1a   : > { %v1568_v36 = vcombine.high %v1560_v27, %v1560_v27  ;;  %v2640_v37 = vrot.slane %v2630_v28, %v10829_v12  ;;  %v2647_v38 = vrot.slane %v10117_v29, %v10829_v12  ;;  %v1545_v39 = vcombine.high %v10850_v31, %v10850_v31  ;;  %v10015_v50 = vld.sshfl [vmem:[%s10834_s25 + $0xc] sm:$0x1 pattern:$0x75316420] }
  0x1b   : > { %10451 = vmatpush3.bf16.msra.mxu0 %v4858_v13  ;;  %10631 = vmatpush3.bf16.msra.mxu1 %v4858_v13  ;;  %v1591_v40 = vcombine.high %v10068_v30, %v10068_v30  ;;  %v2654_v42 = vrot.slane %v2632_v33, %v10829_v12  ;;  %v2661_v43 = vrot.slane %v10118_v34, %v10829_v12  ;;  %v10016_v53 = vld.sshfl [vmem:[%s10834_s25 + $0x10] sm:$0x33 pattern:$0x75316420] }
  0x1c   : > { %v1569_v44 = vcombine.high %v1567_v35, %v1567_v35  ;;  %v1598_v45 = vrot.slane %v10068_v30, %v10829_v12  ;;  %v2662_v46 = vcombine.low %v2640_v37, %v2647_v38  ;;  %v3708_v48 = vcombine.low %v1545_v39, %v1560_v27  ;;  %v10069_v60 = vld.sshfl [vmem:[%s10834_s25 + $0xe4] sm:$0x33 pattern:$0x75316420] }
  0x1d   : > { %v1605_v47 = vrot.slane %v1591_v40, %v10829_v12  ;;  %v3709_v49 = vcombine.low %v1567_v35, %v1568_v36  ;;  %v2663_v51 = vcombine.low %v2654_v42, %v2661_v43  ;;  %v435_v54 = vcombine.high %v10014_v41, %v10014_v41  ;;  %v10070_v10 = vld.sshfl [vmem:[%s10834_s25 + $0xe8] sm:$0x33 pattern:$0x75316420] }
  0x1e   : > { %v3710_v52 = vcombine.low %v1569_v44, %v1583_v32  ;;  %v442_v55 = vrot.slane %v10014_v41, %v10829_v12  ;;  %v2670_v56 = vrot.slane %v2662_v46, %v10829_v12  ;;  %v3718_v58 = vrot.slane %v3708_v48, %v10829_v12  ;;  %v10017_v29 = vld.sshfl [vmem:[%s10834_s25 + $0x14] sm:$0x33 pattern:$0x75316420] }
  0x1f   : > { %v3711_v57 = vcombine.low %v1598_v45, %v1605_v47  ;;  %v3725_v59 = vrot.slane %v3709_v49, %v10829_v12  ;;  %v2677_v61 = vrot.slane %v2663_v51, %v10829_v12  ;;  %v449_v63 = vrot.slane %v435_v54, %v10829_v12  ;;  %v10018_v35 = vld.sshfl [vmem:[%s10834_s25 + $0x18] sm:$0x33 pattern:$0x75316420] }
  0x20   : > { %v3732_v62 = vrot.slane %v3710_v52, %v10829_v12  ;;  %v465_v0 = vrot.slane %v10015_v50, %v10829_v12  ;;  %v473_v4 = vcombine.high %v10016_v53, %v10016_v53  ;;  %v480_v5 = vrot.slane %v10016_v53, %v10829_v12  ;;  %v10071_v52 = vld.sshfl [vmem:[%s10834_s25 + $0xec] sm:$0x1 pattern:$0x75316420] }
  0x21   : > { %v3739_v2 = vrot.slane %v3711_v57, %v10829_v12  ;;  %v3740_v3 = vcombine.low %v3718_v58, %v3725_v59  ;;  %v2678_v7 = vcombine.low %v2670_v56, %v2677_v61  ;;  %v2679_v8 = vcombine.low %v442_v55, %v449_v63  ;;  %v10072_v57 = vld.sshfl [vmem:[%s10834_s25 + $0xf0] sm:$0x33 pattern:$0x75316420] }
  0x22   : > { %v10119_v9 = vcombine.high %v442_v55, %v449_v63  ;;  %v1615_v11 = vcombine.high %v10069_v60, %v10069_v60  ;;  %v487_v15 = vrot.slane %v473_v4, %v10829_v12  ;;  %v488_v16 = vcombine.high %v480_v5, %v480_v5 }
  0x23   : > { %v3741_v13 = vcombine.low %v3732_v62, %v3739_v2  ;;  %v3748_v14 = vrot.slane %v3740_v3, %v10829_v12  ;;  %10453 = vmatmul.mubr.msk.bf16.vlgmr.msra.gmra.mrb[0].mxu0 %vm4724_vm2, %v2678_v7  ;;  %v2681_v17 = vcombine.low %v465_v0, %v480_v5  ;;  %v2689_v18 = vrot.slane %v2679_v8, %v10829_v12  ;;  %v10073_v62 = vld.sshfl [vmem:[%s10834_s25 + $0xf4] sm:$0x33 pattern:$0x75316420] }
  0x24   : > { %v2696_v19 = vrot.slane %v10119_v9, %v10829_v12  ;;  %v1622_v20 = vrot.slane %v10069_v60, %v10829_v12  ;;  %10456 = vmatprep.mubr.msk.bf16.mxu0 %vm10764_vm1, %v15500_v1  ;;  %v2682_v22 = vcombine.low %v487_v15, %v488_v16  ;;  %v1629_v23 = vrot.slane %v1615_v11, %v10829_v12 }
  0x25   : > { %v3755_v21 = vrot.slane %v3741_v13, %v10829_v12  ;;  %v1639_v24 = vcombine.high %v10070_v10, %v10070_v10  ;;  %v2703_v25 = vrot.slane %v2681_v17, %v10829_v12  ;;  %v1646_v27 = vrot.slane %v10070_v10, %v10829_v12 }
  0x26   : > { %v2711_v26 = vcombine.low %v2689_v18, %v2696_v19  ;;  %v10138_v28 = vcombine.high %v1598_v45, %v1605_v47  ;;  %v2710_v32 = vrot.slane %v2682_v22, %v10829_v12  ;;  %v3758_v34 = vcombine.low %v1622_v20, %v1629_v23  ;;  %v10020_v19 = vld.sshfl [vmem:[%s10834_s25 + $0x20] sm:$0x33 pattern:$0x75316420] }
  0x27   : > { %v3756_v30 = vcombine.low %v3748_v14, %v3755_v21  ;;  %v1653_v33 = vrot.slane %v1639_v24, %v10829_v12  ;;  %v10139_v37 = vcombine.high %v1622_v20, %v1629_v23  ;;  %v489_v39 = vcombine.high %v487_v15, %v487_v15  ;;  %v10019_v14 = vld.sshfl [vmem:[%s10834_s25 + $0x1c] sm:$0x1 pattern:$0x75316420] }
  0x28   : > { %v2719_v36 = vrot.slane %v2711_v26, %v10829_v12  ;;  %v3767_v38 = vrot.slane %v10138_v28, %v10829_v12  ;;  %v2712_v40 = vcombine.low %v2703_v25, %v2710_v32  ;;  %v3774_v42 = vrot.slane %v3758_v34, %v10829_v12  ;;  %v10021_v23 = vld.sshfl [vmem:[%s10834_s25 + $0x24] sm:$0x33 pattern:$0x75316420] }
  0x29   : > { %10541 = vmatmul.mubr.msk.bf16.vlgmr.msra.gmra.mrb[0].mxu1 %vm4724_vm2, %v3756_v30  ;;  %v3760_v41 = vcombine.low %v1646_v27, %v1653_v33  ;;  %v497_v43 = vcombine.high %v10017_v29, %v10017_v29  ;;  %v3781_v44 = vrot.slane %v10139_v37, %v10829_v12  ;;  %v504_v45 = vrot.slane %v10017_v29, %v10829_v12 }
  0x2a   : > { %10544 = vmatprep.mubr.msk.bf16.mxu1 %vm10764_vm1, %v15500_v1  ;;  %v521_v46 = vcombine.high %v10018_v35, %v10018_v35  ;;  %v528_v47 = vrot.slane %v10018_v35, %v10829_v12  ;;  %v2726_v48 = vrot.slane %v2712_v40, %v10829_v12  ;;  %v3789_v50 = vcombine.low %v3767_v38, %v3774_v42 }
  0x2b   : > { %v3788_v49 = vrot.slane %v3760_v41, %v10829_v12  ;;  %v511_v51 = vrot.slane %v497_v43, %v10829_v12  ;;  %v512_v53 = vcombine.high %v504_v45, %v504_v45  ;;  %v2728_v56 = vcombine.low %v489_v39, %v504_v45  ;;  %v10074_v45 = vld.sshfl [vmem:[%s10834_s25 + $0xf8] sm:$0x33 pattern:$0x75316420] }
  0x2c   : > { %v535_v54 = vrot.slane %v521_v46, %v10829_v12  ;;  %v536_v55 = vcombine.high %v528_v47, %v528_v47  ;;  %v2727_v58 = vcombine.low %v2719_v36, %v2726_v48  ;;  %v3797_v60 = vrot.slane %v3789_v50, %v10829_v12 }
  0x2d   : > { %v3790_v59 = vcombine.low %v3781_v44, %v3788_v49  ;;  %v513_v61 = vcombine.high %v511_v51, %v511_v51  ;;  %v2729_v63 = vcombine.low %v511_v51, %v512_v53  ;;  %v2738_v2 = vrot.slane %v2728_v56, %v10829_v12  ;;  %v10075_v51 = vld.sshfl [vmem:[%s10834_s25 + $0xfc] sm:$0x1 pattern:$0x75316420] }
  0x2e   : > { %v2731_v0 = vcombine.low %v535_v54, %v536_v55  ;;  %v1669_v3 = vrot.slane %v10071_v52, %v10829_v12  ;;  %10457 = vmatmul.mubr.msk.bf16.gmra.mrb[4].mxu0 %vm4724_vm2, %v2727_v58  ;;  %v1677_v7 = vcombine.high %v10072_v57, %v10072_v57  ;;  %v1684_v8 = vrot.slane %v10072_v57, %v10829_v12 }
  0x2f   : > { %v3804_v4 = vrot.slane %v3790_v59, %v10829_v12  ;;  %v2730_v5 = vcombine.low %v513_v61, %v528_v47  ;;  %10460 = vmatprep.mubr.msk.bf16.mxu0 %vm10764_vm1, %v15500_v1  ;;  %v2745_v9 = vrot.slane %v2729_v63, %v10829_v12  ;;  %v1708_v11 = vrot.slane %v10073_v62, %v10829_v12 }
  0x30   : > { %v2759_v10 = vrot.slane %v2731_v0, %v10829_v12  ;;  %v10140_v13 = vcombine.high %v1646_v27, %v1653_v33  ;;  %v1691_v17 = vrot.slane %v1677_v7, %v10829_v12  ;;  %v1692_v18 = vcombine.high %v1684_v8, %v1684_v8  ;;  %v10023_v7 = vld.sshfl [vmem:[%s10834_s25 + $0x2c] sm:$0x1 pattern:$0x75316420] }
  0x31   : > { %v3805_v15 = vcombine.low %v3797_v60, %v3804_v4  ;;  %v2752_v16 = vrot.slane %v2730_v5, %v10829_v12  ;;  %v2760_v20 = vcombine.low %v2738_v2, %v2745_v9  ;;  %v3807_v21 = vcombine.low %v1669_v3, %v1684_v8  ;;  %v10022_v60 = vld.sshfl [vmem:[%s10834_s25 + $0x28] sm:$0x33 pattern:$0x75316420] }
  0x32   : > { %v3816_v22 = vrot.slane %v10140_v13, %v10829_v12  ;;  %v537_v24 = vcombine.high %v535_v54, %v535_v54  ;;  %v1693_v26 = vcombine.high %v1691_v17, %v1691_v17  ;;  %v3808_v28 = vcombine.low %v1691_v17, %v1692_v18 }
  0x33   : > { %10545 = vmatmul.mubr.msk.bf16.gmra.mrb[4].mxu1 %vm4724_vm2, %v3805_v15  ;;  %v2761_v25 = vcombine.low %v2752_v16, %v2759_v10  ;;  %v551_v27 = vrot.slane %v10019_v14, %v10829_v12  ;;  %v2768_v29 = vrot.slane %v2760_v20, %v10829_v12  ;;  %v3823_v30 = vrot.slane %v3807_v21, %v10829_v12 }
  0x34   : > { %10548 = vmatprep.mubr.msk.bf16.mxu1 %vm10764_vm1, %v15500_v1  ;;  %v559_v32 = vcombine.high %v10020_v19, %v10020_v19  ;;  %v566_v33 = vrot.slane %v10020_v19, %v10829_v12  ;;  %v3809_v35 = vcombine.low %v1693_v26, %v1708_v11  ;;  %v3830_v36 = vrot.slane %v3808_v28, %v10829_v12 }
  0x35   : > { %v2775_v34 = vrot.slane %v2761_v25, %v10829_v12  ;;  %v583_v37 = vcombine.high %v10021_v23, %v10021_v23  ;;  %v3838_v38 = vcombine.low %v3816_v22, %v3823_v30  ;;  %v10937_v40 = vrot.slane %v10021_v23, %v10829_v12  ;;  %v10076_v22 = vld.sshfl [vmem:[%s10834_s25 + $0x100] sm:$0x33 pattern:$0x75316420] }
  0x36   : > { %v573_v39 = vrot.slane %v559_v32, %v10829_v12  ;;  %v2777_v41 = vcombine.low %v537_v24, %v551_v27  ;;  %v3837_v43 = vrot.slane %v3809_v35, %v10829_v12  ;;  %v1701_v46 = vcombine.high %v10073_v62, %v10073_v62  ;;  %v10077_v35 = vld.sshfl [vmem:[%s10834_s25 + $0x104] sm:$0x33 pattern:$0x75316420] }
  0x37   : > { %v2776_v42 = vcombine.low %v2768_v29, %v2775_v34  ;;  %v597_v44 = vrot.slane %v583_v37, %v10829_v12  ;;  %v3846_v47 = vrot.slane %v3838_v38, %v10829_v12  ;;  %v1716_v55 = vcombine.high %v1708_v11, %v1708_v11  ;;  %v10024_v11 = vld.sshfl [vmem:[%s10834_s25 + $0x30] sm:$0x33 pattern:$0x75316420] }
  0x38   : > { %v2778_v48 = vcombine.low %v566_v33, %v573_v39  ;;  %v10120_v49 = vcombine.high %v566_v33, %v573_v39  ;;  %v2787_v50 = vrot.slane %v2777_v41, %v10829_v12  ;;  %v3839_v52 = vcombine.low %v3830_v36, %v3837_v43 }
  0x39   : > { %10461 = vmatmul.mubr.msk.bf16.gmra.mrb[8].mxu0 %vm4724_vm2, %v2776_v42  ;;  %v2780_v53 = vcombine.low %v10937_v40, %v597_v44  ;;  %v1715_v54 = vrot.slane %v1701_v46, %v10829_v12  ;;  %v1725_v58 = vcombine.high %v10074_v45, %v10074_v45  ;;  %v1732_v59 = vrot.slane %v10074_v45, %v10829_v12 }
  0x3a   : > { %10464 = vmatprep.mubr.msk.bf16.mxu0 %vm10764_vm1, %v15500_v1  ;;  %v2794_v56 = vrot.slane %v2778_v48, %v10829_v12  ;;  %v2801_v57 = vrot.slane %v10120_v49, %v10829_v12  ;;  %v3853_v61 = vrot.slane %v3839_v52, %v10829_v12  ;;  %v1755_v0 = vrot.slane %v10075_v51, %v10829_v12 }
  0x3b   : > { %v2808_v62 = vrot.slane %v2780_v53, %v10829_v12  ;;  %v1717_v63 = vcombine.high %v1715_v54, %v1715_v54  ;;  %v1739_v3 = vrot.slane %v1725_v58, %v10829_v12  ;;  %v1740_v4 = vcombine.high %v1732_v59, %v1732_v59  ;;  %v10025_v53 = vld.sshfl [vmem:[%s10834_s25 + $0x34] sm:$0x33 pattern:$0x75316420] }
  0x3c   : > { %v2809_v2 = vcombine.low %v2787_v50, %v2794_v56  ;;  %v3855_v5 = vcombine.low %v1715_v54, %v1716_v55  ;;  %v3854_v8 = vcombine.low %v3846_v47, %v3853_v61  ;;  %v607_v13 = vcombine.high %v10022_v60, %v10022_v60  ;;  %v10992_v56 = vld.sshfl [vmem:[%s10834_s25 + $0x38] sm:$0x33 pattern:$0x75316420] }
  0x3d   : > { %v2810_v9 = vcombine.low %v2801_v57, %v2808_v62  ;;  %v3856_v10 = vcombine.low %v1717_v63, %v1732_v59  ;;  %v1741_v15 = vcombine.high %v1739_v3, %v1739_v3  ;;  %v3857_v16 = vcombine.low %v1739_v3, %v1740_v4  ;;  %v10078_v4 = vld.sshfl [vmem:[%s10834_s25 + $0x108] sm:$0x33 pattern:$0x75316420] }
  0x3e   : > { %v2817_v14 = vrot.slane %v2809_v2, %v10829_v12  ;;  %v3865_v17 = vrot.slane %v3855_v5, %v10829_v12  ;;  %10549 = vmatmul.mubr.msk.bf16.gmra.mrb[8].mxu1 %vm4724_vm2, %v3854_v8  ;;  %v614_v20 = vrot.slane %v10022_v60, %v10829_v12  ;;  %v621_v21 = vrot.slane %v607_v13, %v10829_v12 }
  0x3f   : > { %v2824_v18 = vrot.slane %v2810_v9, %v10829_v12  ;;  %v3872_v19 = vrot.slane %v3856_v10, %v10829_v12  ;;  %10552 = vmatprep.mubr.msk.bf16.mxu1 %vm10764_vm1, %v15500_v1  ;;  %v3858_v23 = vcombine.low %v1741_v15, %v1755_v0  ;;  %v3879_v24 = vrot.slane %v3857_v16, %v10829_v12  ;;  %v10079_v15 = vld.sshfl [vmem:[%s10834_s25 + $0x10c] sm:$0x1 pattern:$0x75316420] }
  0x40   : > { %v637_v25 = vrot.slane %v10023_v7, %v10829_v12  ;;  %v652_v26 = vrot.slane %v10024_v11, %v10829_v12  ;;  %v10121_v29 = vcombine.high %v10937_v40, %v597_v44  ;;  %v2827_v30 = vcombine.low %v614_v20, %v621_v21 }
  0x41   : > { %v2825_v28 = vcombine.low %v2817_v14, %v2824_v18  ;;  %v3887_v27 = vcombine.low %v3865_v17, %v3872_v19  ;;  %v3886_v32 = vrot.slane %v3858_v23, %v10829_v12  ;;  %v10122_v33 = vcombine.high %v614_v20, %v621_v21  ;;  %v10080_v19 = vld.sshfl [vmem:[%s10834_s25 + $0x110] sm:$0x33 pattern:$0x75316420] }
  0x42   : > { %v2829_v34 = vcombine.low %v637_v25, %v652_v26  ;;  %v1763_v36 = vcombine.high %v10076_v22, %v10076_v22  ;;  %v2836_v38 = vrot.slane %v10121_v29, %v10829_v12  ;;  %v2843_v39 = vrot.slane %v2827_v30, %v10829_v12 }
  0x43   : > { %10465 = vmatmul.mubr.msk.bf16.gmra.mrb[12].mxu0 %vm4724_vm2, %v2825_v28  ;;  %v3895_v37 = vrot.slane %v3887_v27, %v10829_v12  ;;  %v1770_v41 = vrot.slane %v10076_v22, %v10829_v12  ;;  %v3888_v42 = vcombine.low %v3879_v24, %v3886_v32  ;;  %v2850_v40 = vrot.slane %v10122_v33, %v10829_v12 }
  0x44   : > { %10468 = vmatprep.mubr.msk.bf16.mxu0 %vm10764_vm1, %v15500_v1  ;;  %v2857_v43 = vrot.slane %v2829_v34, %v10829_v12  ;;  %v1777_v44 = vrot.slane %v1763_v36, %v10829_v12  ;;  %v2858_v45 = vcombine.low %v2836_v38, %v2843_v39  ;;  %v1787_v46 = vcombine.high %v10077_v35, %v10077_v35  ;;  %v10027_v38 = vld.sshfl [vmem:[%s10834_s25 + $0x3c] sm:$0x1 pattern:$0x75316420] }
  0x45   : > { %v1794_v47 = vrot.slane %v10077_v35, %v10829_v12  ;;  %v645_v48 = vcombine.high %v10024_v11, %v10024_v11  ;;  %v3902_v49 = vrot.slane %v3888_v42, %v10829_v12  ;;  %v660_v58 = vcombine.high %v652_v26, %v652_v26 }
  0x46   : > { %v2859_v50 = vcombine.low %v2850_v40, %v2857_v43  ;;  %v3904_v51 = vcombine.low %v1770_v41, %v1777_v44  ;;  %v10141_v52 = vcombine.high %v1770_v41, %v1777_v44  ;;  %v2866_v54 = vrot.slane %v2858_v45, %v10829_v12  ;;  %v10028_v43 = vld.sshfl [vmem:[%s10834_s25 + $0x40] sm:$0x33 pattern:$0x75316420] }
  0x47   : > { %v1801_v55 = vrot.slane %v1787_v46, %v10829_v12  ;;  %v659_v57 = vrot.slane %v645_v48, %v10829_v12  ;;  %v3903_v59 = vcombine.low %v3895_v37, %v3902_v49  ;;  %v669_v3 = vcombine.high %v10025_v53, %v10025_v53 }
  0x48   : > { %v2873_v60 = vrot.slane %v2859_v50, %v10829_v12  ;;  %v3914_v61 = vrot.slane %v3904_v51, %v10829_v12  ;;  %v3921_v62 = vrot.slane %v10141_v52, %v10829_v12  ;;  %v676_v8 = vrot.slane %v10025_v53, %v10829_v12  ;;  %v10081_v52 = vld.sshfl [vmem:[%s10834_s25 + $0x114] sm:$0x33 pattern:$0x75316420] }
  0x49   : > { %v3906_v63 = vcombine.low %v1794_v47, %v1801_v55  ;;  %v10142_v0 = vcombine.high %v1794_v47, %v1801_v55  ;;  %v661_v2 = vcombine.high %v659_v57, %v659_v57  ;;  %10553 = vmatmul.mubr.msk.bf16.gmra.mrb[12].mxu1 %vm4724_vm2, %v3903_v59  ;;  %v11003_v9 = vrot.slane %v10992_v56, %v10829_v12 }
  0x4a   : > { %v2874_v5 = vcombine.low %v2866_v54, %v2873_v60  ;;  %v3936_v7 = vcombine.low %v3914_v61, %v3921_v62  ;;  %10556 = vmatprep.mubr.msk.bf16.mxu1 %vm10764_vm1, %v15500_v1  ;;  %v683_v13 = vrot.slane %v669_v3, %v10829_v12  ;;  %v2875_v14 = vcombine.low %v659_v57, %v660_v58 }
  0x4b   : > { %v3928_v10 = vrot.slane %v3906_v63, %v10829_v12  ;;  %v3935_v11 = vrot.slane %v10142_v0, %v10829_v12  ;;  %v684_v17 = vcombine.high %v676_v8, %v676_v8  ;;  %v2876_v18 = vcombine.low %v661_v2, %v676_v8  ;;  %v10082_v63 = vld.sshfl [vmem:[%s10834_s25 + $0x118] sm:$0x33 pattern:$0x75316420] }
  0x4c   : > { %10469 = vmatmul.mubr.msk.bf16.gmra.mrb[16].mxu0 %vm4724_vm2, %v2874_v5  ;;  %v3944_v16 = vrot.slane %v3936_v7, %v10829_v12  ;;  %v1811_v20 = vcombine.high %v10078_v4, %v10078_v4  ;;  %v685_v22 = vcombine.high %v683_v13, %v683_v13  ;;  %v2885_v23 = vrot.slane %v2875_v14, %v10829_v12 }
  0x4d   : > { %v3937_v21 = vcombine.low %v3928_v10, %v3935_v11  ;;  %10472 = vmatprep.mubr.msk.bf16.mxu0 %vm10764_vm1, %v15500_v1  ;;  %v1818_v24 = vrot.slane %v10078_v4, %v10829_v12  ;;  %v2877_v25 = vcombine.low %v683_v13, %v684_v17  ;;  %v2892_v26 = vrot.slane %v2876_v18, %v10829_v12  ;;  %v10029_v17 = vld.sshfl [vmem:[%s10834_s25 + $0x44] sm:$0x33 pattern:$0x75316420] }
  0x4e   : > { %v1825_v28 = vrot.slane %v1811_v20, %v10829_v12  ;;  %v1841_v27 = vrot.slane %v10079_v15, %v10829_v12  ;;  %v2878_v30 = vcombine.low %v685_v22, %v11003_v9  ;;  %v1849_v32 = vcombine.high %v10080_v19, %v10080_v19 }
  0x4f   : > { %v3951_v29 = vrot.slane %v3937_v21, %v10829_v12  ;;  %v1856_v33 = vrot.slane %v10080_v19, %v10829_v12  ;;  %v2899_v34 = vrot.slane %v2877_v25, %v10829_v12  ;;  %v2907_v35 = vcombine.low %v2885_v23, %v2892_v26 }
  0x50   : > { %v3953_v36 = vcombine.low %v1818_v24, %v1825_v28  ;;  %v10143_v37 = vcombine.high %v1818_v24, %v1825_v28  ;;  %v2906_v41 = vrot.slane %v2878_v30, %v10829_v12  ;;  %v1863_v42 = vrot.slane %v1849_v32, %v10829_v12 }
  0x51   : > { %v3952_v39 = vcombine.low %v3944_v16, %v3951_v29  ;;  %v1864_v40 = vcombine.high %v1856_v33, %v1856_v33  ;;  %v2915_v44 = vrot.slane %v2907_v35, %v10829_v12  ;;  %v3955_v45 = vcombine.low %v1841_v27, %v1856_v33  ;;  %v10030_v29 = vld.sshfl [vmem:[%s10834_s25 + $0x48] sm:$0x33 pattern:$0x75316420] }
  0x52   : > { %v3963_v46 = vrot.slane %v3953_v36, %v10829_v12  ;;  %v3970_v47 = vrot.slane %v10143_v37, %v10829_v12  ;;  %v2908_v48 = vcombine.low %v2899_v34, %v2906_v41  ;;  %v693_v50 = vcombine.high %v10992_v56, %v10992_v56 }
  0x53   : > { %10557 = vmatmul.mubr.msk.bf16.gmra.mrb[16].mxu1 %vm4724_vm2, %v3952_v39  ;;  %v3956_v49 = vcombine.low %v1863_v42, %v1864_v40  ;;  %v708_v51 = vcombine.high %v11003_v9, %v11003_v9  ;;  %v3977_v53 = vrot.slane %v3955_v45, %v10829_v12  ;;  %v723_v55 = vrot.slane %v10027_v38, %v10829_v12 }
  0x54   : > { %10560 = vmatprep.mubr.msk.bf16.mxu1 %vm10764_vm1, %v15500_v1  ;;  %v3985_v54 = vcombine.low %v3963_v46, %v3970_v47  ;;  %v731_v57 = vcombine.high %v10028_v43, %v10028_v43  ;;  %v2922_v58 = vrot.slane %v2908_v48, %v10829_v12  ;;  %v707_v60 = vrot.slane %v693_v50, %v10829_v12 }
  0x55   : > { %v3984_v59 = vrot.slane %v3956_v49, %v10829_v12  ;;  %v738_v56 = vrot.slane %v10028_v43, %v10829_v12  ;;  %v1865_v0 = vcombine.high %v1863_v42, %v1863_v42  ;;  %v1873_v2 = vcombine.high %v10081_v52, %v10081_v52  ;;  %v10084_v49 = vld.sshfl [vmem:[%s10834_s25 + $0x120] sm:$0x33 pattern:$0x75316420] }
  0x56   : > { %v3993_v61 = vrot.slane %v3985_v54, %v10829_v12  ;;  %v745_v62 = vrot.slane %v731_v57, %v10829_v12  ;;  %v2923_v3 = vcombine.low %v2915_v44, %v2922_v58  ;;  %v709_v5 = vcombine.high %v707_v60, %v707_v60  ;;  %v10083_v44 = vld.sshfl [vmem:[%s10834_s25 + $0x11c] sm:$0x1 pattern:$0x75316420] }
  0x57   : > { %v3986_v4 = vcombine.low %v3977_v53, %v3984_v59  ;;  %v2924_v7 = vcombine.low %v707_v60, %v708_v51  ;;  %v1880_v10 = vrot.slane %v10081_v52, %v10829_v12  ;;  %v1887_v11 = vrot.slane %v1873_v2, %v10829_v12  ;;  %v10085_v53 = vld.sshfl [vmem:[%s10834_s25 + $0x124] sm:$0x33 pattern:$0x75316420] }
  0x58   : > { %v2926_v8 = vcombine.low %v738_v56, %v745_v62  ;;  %v10123_v9 = vcombine.high %v738_v56, %v745_v62  ;;  %10473 = vmatmul.mubr.msk.bf16.gmra.mrb[20].mxu0 %vm4724_vm2, %v2923_v3  ;;  %v2925_v14 = vcombine.low %v709_v5, %v723_v55  ;;  %v1897_v16 = vcombine.high %v10082_v63, %v10082_v63 }
  0x59   : > { %v4000_v13 = vrot.slane %v3986_v4, %v10829_v12  ;;  %v2934_v15 = vrot.slane %v2924_v7, %v10829_v12  ;;  %10476 = vmatprep.mubr.msk.bf16.mxu0 %vm10764_vm1, %v15500_v1  ;;  %v1888_v20 = vcombine.high %v1880_v10, %v1880_v10  ;;  %v1889_v21 = vcombine.high %v1887_v11, %v1887_v11 }
  0x5a   : > { %v2948_v18 = vrot.slane %v2926_v8, %v10829_v12  ;;  %v2955_v19 = vrot.slane %v10123_v9, %v10829_v12  ;;  %v2941_v23 = vrot.slane %v2925_v14, %v10829_v12  ;;  %v1904_v24 = vrot.slane %v10082_v63, %v10829_v12  ;;  %v10031_v63 = vld.sshfl [vmem:[%s10834_s25 + $0x4c] sm:$0x1 pattern:$0x75316420] }
  0x5b   : > { %v4001_v22 = vcombine.low %v3993_v61, %v4000_v13  ;;  %v1911_v25 = vrot.slane %v1897_v16, %v10829_v12  ;;  %v4002_v28 = vcombine.low %v1865_v0, %v1880_v10  ;;  %v4003_v27 = vcombine.low %v1887_v11, %v1888_v20  ;;  %v10032_v10 = vld.sshfl [vmem:[%s10834_s25 + $0x50] sm:$0x33 pattern:$0x75316420] }
  0x5c   : > { %v2957_v26 = vcombine.low %v2948_v18, %v2955_v19  ;;  %v755_v30 = vcombine.high %v10029_v17, %v10029_v17  ;;  %v2956_v32 = vcombine.low %v2934_v15, %v2941_v23  ;;  %v1912_v33 = vcombine.high %v1904_v24, %v1904_v24  ;;  %v10033_v15 = vld.sshfl [vmem:[%s10834_s25 + $0x54] sm:$0x33 pattern:$0x75316420] }
  0x5d   : > { %10561 = vmatmul.mubr.msk.bf16.gmra.mrb[20].mxu1 %vm4724_vm2, %v4001_v22  ;;  %v4004_v34 = vcombine.low %v1889_v21, %v1904_v24  ;;  %v762_v35 = vrot.slane %v10029_v17, %v10829_v12  ;;  %v4012_v37 = vrot.slane %v4002_v28, %v10829_v12  ;;  %v4019_v38 = vrot.slane %v4003_v27, %v10829_v12 }
  0x5e   : > { %v2971_v36 = vrot.slane %v2957_v26, %v10829_v12  ;;  %10564 = vmatprep.mubr.msk.bf16.mxu1 %vm10764_vm1, %v15500_v1  ;;  %v769_v39 = vrot.slane %v755_v30, %v10829_v12  ;;  %v2964_v41 = vrot.slane %v2956_v32, %v10829_v12  ;;  %v4005_v42 = vcombine.low %v1911_v25, %v1912_v33 }
  0x5f   : > { %v4026_v40 = vrot.slane %v4004_v34, %v10829_v12  ;;  %v779_v43 = vcombine.high %v10030_v29, %v10030_v29  ;;  %v4034_v45 = vcombine.low %v4012_v37, %v4019_v38  ;;  %v786_v46 = vrot.slane %v10030_v29, %v10829_v12  ;;  %v10086_v34 = vld.sshfl [vmem:[%s10834_s25 + $0x128] sm:$0x33 pattern:$0x75316420] }
  0x60   : > { %v2973_v47 = vcombine.low %v762_v35, %v769_v39  ;;  %v10124_v48 = vcombine.high %v762_v35, %v769_v39  ;;  %v2972_v50 = vcombine.low %v2964_v41, %v2971_v36  ;;  %v4033_v51 = vrot.slane %v4005_v42, %v10829_v12  ;;  %v10087_v39 = vld.sshfl [vmem:[%s10834_s25 + $0x12c] sm:$0x1 pattern:$0x75316420] }
  0x61   : > { %v793_v52 = vrot.slane %v779_v43, %v10829_v12  ;;  %v1913_v54 = vcombine.high %v1911_v25, %v1911_v25  ;;  %v4042_v55 = vrot.slane %v4034_v45, %v10829_v12  ;;  %v1927_v59 = vrot.slane %v10083_v44, %v10829_v12  ;;  %v11116_v44 = vld.sshfl [vmem:[%s10834_s25 + $0x130] sm:$0x33 pattern:$0x75316420] }
  0x62   : > { %v2983_v57 = vrot.slane %v2973_v47, %v10829_v12  ;;  %v2990_v58 = vrot.slane %v10124_v48, %v10829_v12  ;;  %10477 = vmatmul.mubr.msk.bf16.gmra.mrb[24].mxu0 %vm4724_vm2, %v2972_v50  ;;  %v4035_v60 = vcombine.low %v4026_v40, %v4033_v51  ;;  %v1935_v62 = vcombine.high %v10084_v49, %v10084_v49 }
  0x63   : > { %v2975_v56 = vcombine.low %v786_v46, %v793_v52  ;;  %v10125_v61 = vcombine.high %v786_v46, %v793_v52  ;;  %10480 = vmatprep.mubr.msk.bf16.mxu0 %vm10764_vm1, %v15500_v1  ;;  %v1942_v2 = vrot.slane %v10084_v49, %v10829_v12  ;;  %v1959_v3 = vcombine.high %v10085_v53, %v10085_v53 }
  0x64   : > { %v3005_v0 = vcombine.low %v2983_v57, %v2990_v58  ;;  %v11089_v4 = vrot.slane %v10085_v53, %v10829_v12  ;;  %v4049_v5 = vrot.slane %v4035_v60, %v10829_v12  ;;  %v1949_v9 = vrot.slane %v1935_v62, %v10829_v12  ;;  %v10034_v58 = vld.sshfl [vmem:[%s10834_s25 + $0x58] sm:$0x33 pattern:$0x75316420] }
  0x65   : > { %v2997_v7 = vrot.slane %v2975_v56, %v10829_v12  ;;  %v3004_v8 = vrot.slane %v10125_v61, %v10829_v12  ;;  %v1973_v13 = vrot.slane %v1959_v3, %v10829_v12  ;;  %v4051_v14 = vcombine.low %v1913_v54, %v1927_v59  ;;  %v10035_v62 = vld.sshfl [vmem:[%s10834_s25 + $0x5c] sm:$0x1 pattern:$0x75316420] }
  0x66   : > { %v3013_v11 = vrot.slane %v3005_v0, %v10829_v12  ;;  %v809_v16 = vrot.slane %v10031_v63, %v10829_v12  ;;  %v4050_v17 = vcombine.low %v4042_v55, %v4049_v5  ;;  %v4052_v19 = vcombine.low %v1942_v2, %v1949_v9  ;;  %v10036_v5 = vld.sshfl [vmem:[%s10834_s25 + $0x60] sm:$0x33 pattern:$0x75316420] }
  0x67   : > { %v3006_v18 = vcombine.low %v2997_v7, %v3004_v8  ;;  %v10144_v20 = vcombine.high %v1942_v2, %v1949_v9  ;;  %v4054_v21 = vcombine.low %v11089_v4, %v1973_v13  ;;  %v4061_v22 = vrot.slane %v4051_v14, %v10829_v12 }
  0x68   : > { %v817_v23 = vcombine.high %v10032_v10, %v10032_v10  ;;  %v824_v24 = vrot.slane %v10032_v10, %v10829_v12  ;;  %10565 = vmatmul.mubr.msk.bf16.gmra.mrb[24].mxu1 %vm4724_vm2, %v4050_v17  ;;  %v4068_v26 = vrot.slane %v4052_v19, %v10829_v12  ;;  %v841_v27 = vcombine.high %v10033_v15, %v10033_v15 }
  0x69   : > { %v3020_v25 = vrot.slane %v3006_v18, %v10829_v12  ;;  %v4075_v28 = vrot.slane %v10144_v20, %v10829_v12  ;;  %10568 = vmatprep.mubr.msk.bf16.mxu1 %vm10764_vm1, %v15500_v1  ;;  %v4082_v29 = vrot.slane %v4054_v21, %v10829_v12  ;;  %v848_v33 = vrot.slane %v10033_v15, %v10829_v12 }
  0x6a   : > { %v831_v30 = vrot.slane %v817_v23, %v10829_v12  ;;  %v832_v32 = vcombine.high %v824_v24, %v824_v24  ;;  %v4083_v36 = vcombine.low %v4061_v22, %v4068_v26  ;;  %v855_v37 = vrot.slane %v841_v27, %v10829_v12 }
  0x6b   : > { %v3021_v35 = vcombine.low %v3013_v11, %v3020_v25  ;;  %v3022_v38 = vcombine.low %v809_v16, %v824_v24  ;;  %v4084_v41 = vcombine.low %v4075_v28, %v4082_v29  ;;  %v856_v40 = vcombine.high %v848_v33, %v848_v33  ;;  %v10089_v28 = vld.sshfl [vmem:[%s10834_s25 + $0x134] sm:$0x33 pattern:$0x75316420] }
  0x6c   : > { %v833_v42 = vcombine.high %v831_v30, %v831_v30  ;;  %v3023_v43 = vcombine.low %v831_v30, %v832_v32  ;;  %v4091_v45 = vrot.slane %v4083_v36, %v10829_v12  ;;  %v1983_v47 = vcombine.high %v10086_v34, %v10086_v34  ;;  %v11154_v32 = vld.sshfl [vmem:[%s10834_s25 + $0x138] sm:$0x33 pattern:$0x75316420] }
  0x6d   : > { %10481 = vmatmul.mubr.msk.bf16.gmra.mrb[28].mxu0 %vm4724_vm2, %v3021_v35  ;;  %v3032_v46 = vrot.slane %v3022_v38, %v10829_v12  ;;  %v1990_v48 = vrot.slane %v10086_v34, %v10829_v12  ;;  %v4098_v49 = vrot.slane %v4084_v41, %v10829_v12  ;;  %v3025_v51 = vcombine.low %v855_v37, %v856_v40  ;;  %v10037_v40 = vld.sshfl [vmem:[%s10834_s25 + $0x64] sm:$0x33 pattern:$0x75316420] }
  0x6e   : > { %10484 = vmatprep.mubr.msk.bf16.mxu0 %vm10764_vm1, %v15500_v1  ;;  %v3024_v50 = vcombine.low %v833_v42, %v848_v33  ;;  %v3039_v52 = vrot.slane %v3023_v43, %v10829_v12  ;;  %v1997_v53 = vrot.slane %v1983_v47, %v10829_v12  ;;  %v2013_v54 = vrot.slane %v10087_v39, %v10829_v12 }
  0x6f   : > { %v2028_v55 = vrot.slane %v11116_v44, %v10829_v12  ;;  %v10145_v57 = vcombine.high %v11089_v4, %v1973_v13  ;;  %v4099_v59 = vcombine.low %v4091_v45, %v4098_v49  ;;  %v3053_v56 = vrot.slane %v3025_v51, %v10829_v12  ;;  %v10038_v51 = vld.sshfl [vmem:[%s10834_s25 + $0x68] sm:$0x33 pattern:$0x75316420] }
  0x70   : > { %v3046_v60 = vrot.slane %v3024_v50, %v10829_v12  ;;  %v3054_v61 = vcombine.low %v3032_v46, %v3039_v52  ;;  %v4101_v63 = vcombine.low %v1990_v48, %v1997_v53  ;;  %v10146_v0 = vcombine.high %v1990_v48, %v1997_v53 }
  0x71   : > { %v4103_v2 = vcombine.low %v2013_v54, %v2028_v55  ;;  %v4110_v3 = vrot.slane %v10145_v57, %v10829_v12  ;;  %10569 = vmatmul.mubr.msk.bf16.gmra.mrb[28].mxu1 %vm4724_vm2, %v4099_v59  ;;  %v857_v4 = vcombine.high %v855_v37, %v855_v37  ;;  %v865_v9 = vcombine.high %v10034_v58, %v10034_v58 }
  0x72   : > { %v3055_v7 = vcombine.low %v3046_v60, %v3053_v56  ;;  %v3062_v8 = vrot.slane %v3054_v61, %v10829_v12  ;;  %10572 = vmatprep.mubr.msk.bf16.mxu1 %vm10764_vm1, %v15500_v1  ;;  %v4117_v10 = vrot.slane %v4101_v63, %v10829_v12  ;;  %v4124_v11 = vrot.slane %v10146_v0, %v10829_v12 }
  0x73   : > { %v4131_v13 = vrot.slane %v4103_v2, %v10829_v12  ;;  %v872_v14 = vrot.slane %v10034_v58, %v10829_v12  ;;  %v879_v16 = vrot.slane %v865_v9, %v10829_v12  ;;  %v895_v17 = vrot.slane %v10035_v62, %v10829_v12 }
  0x74   : > { %v3069_v15 = vrot.slane %v3055_v7, %v10829_v12  ;;  %v903_v18 = vcombine.high %v10036_v5, %v10036_v5  ;;  %v4132_v19 = vcombine.low %v4110_v3, %v4117_v10  ;;  %v910_v22 = vrot.slane %v10036_v5, %v10829_v12  ;;  %v10091_v7 = vld.sshfl [vmem:[%s10834_s25 + $0x13c] sm:$0x1 pattern:$0x75316420] }
  0x75   : > { %v4133_v20 = vcombine.low %v4124_v11, %v4131_v13  ;;  %v880_v21 = vcombine.high %v872_v14, %v872_v14  ;;  %v881_v24 = vcombine.high %v879_v16, %v879_v16  ;;  %v3071_v26 = vcombine.low %v857_v4, %v872_v14  ;;  %v10092_v11 = vld.sshfl [vmem:[%s10834_s25 + $0x140] sm:$0x33 pattern:$0x75316420] }
  0x76   : > { %v3070_v23 = vcombine.low %v3062_v8, %v3069_v15  ;;  %v917_v25 = vrot.slane %v903_v18, %v10829_v12  ;;  %v4140_v27 = vrot.slane %v4132_v19, %v10829_v12  ;;  %v2021_v33 = vcombine.high %v11116_v44, %v11116_v44 }
  0x77   : > { %v4147_v29 = vrot.slane %v4133_v20, %v10829_v12  ;;  %v3072_v30 = vcombine.low %v879_v16, %v880_v21  ;;  %v3073_v34 = vcombine.low %v881_v24, %v895_v17  ;;  %v3081_v36 = vrot.slane %v3071_v26, %v10829_v12  ;;  %v10039_v17 = vld.sshfl [vmem:[%s10834_s25 + $0x6c] sm:$0x1 pattern:$0x75316420] }
  0x78   : > { %10485 = vmatmul.mubr.msk.bf16.gmra.mrb[32].mxu0 %vm4724_vm2, %v3070_v23  ;;  %v3074_v35 = vcombine.low %v910_v22, %v917_v25  ;;  %v2036_v37 = vcombine.high %v2028_v55, %v2028_v55  ;;  %v2035_v41 = vrot.slane %v2021_v33, %v10829_v12  ;;  %v2045_v42 = vcombine.high %v10089_v28, %v10089_v28 }
  0x79   : > { %v4148_v38 = vcombine.low %v4140_v27, %v4147_v29  ;;  %10488 = vmatprep.mubr.msk.bf16.mxu0 %vm10764_vm1, %v15500_v1  ;;  %v3088_v39 = vrot.slane %v3072_v30, %v10829_v12  ;;  %v3095_v43 = vrot.slane %v3073_v34, %v10829_v12  ;;  %v2052_v45 = vrot.slane %v10089_v28, %v10829_v12 }
  0x7a   : > { %v3102_v44 = vrot.slane %v3074_v35, %v10829_v12  ;;  %v2076_v46 = vrot.slane %v11154_v32, %v10829_v12  ;;  %v2037_v48 = vcombine.high %v2035_v41, %v2035_v41  ;;  %v2059_v49 = vrot.slane %v2045_v42, %v10829_v12 }
  0x7b   : > { %10573 = vmatmul.mubr.msk.bf16.gmra.mrb[32].mxu1 %vm4724_vm2, %v4148_v38  ;;  %v3103_v47 = vcombine.low %v3081_v36, %v3088_v39  ;;  %v4149_v50 = vcombine.low %v2035_v41, %v2036_v37  ;;  %v2060_v53 = vcombine.high %v2052_v45, %v2052_v45  ;;  %v927_v54 = vcombine.high %v10037_v40, %v10037_v40  ;;  %v10041_v41 = vld.sshfl [vmem:[%s10834_s25 + $0x74] sm:$0x33 pattern:$0x75316420] }
  0x7c   : > { %v3104_v52 = vcombine.low %v3095_v43, %v3102_v44  ;;  %10576 = vmatprep.mubr.msk.bf16.mxu1 %vm10764_vm1, %v15500_v1  ;;  %v934_v55 = vrot.slane %v10037_v40, %v10829_v12  ;;  %v2061_v58 = vcombine.high %v2059_v49, %v2059_v49  ;;  %v4150_v59 = vcombine.low %v2037_v48, %v2052_v45 }
  0x7d   : > { %v3111_v57 = vrot.slane %v3103_v47, %v10829_v12  ;;  %v4159_v60 = vrot.slane %v4149_v50, %v10829_v12  ;;  %v4151_v61 = vcombine.low %v2059_v49, %v2060_v53  ;;  %v941_v62 = vrot.slane %v927_v54, %v10829_v12  ;;  %v10093_v53 = vld.sshfl [vmem:[%s10834_s25 + $0x144] sm:$0x33 pattern:$0x75316420] }
  0x7e   : > { %v3118_v56 = vrot.slane %v3104_v52, %v10829_v12  ;;  %v951_v63 = vcombine.high %v10038_v51, %v10038_v51  ;;  %v4152_v0 = vcombine.low %v2061_v58, %v2076_v46  ;;  %v4166_v2 = vrot.slane %v4150_v59, %v10829_v12 }
  0x7f   : > { %v11182_v3 = vrot.slane %v10038_v51, %v10829_v12  ;;  %v10126_v5 = vcombine.high %v910_v22, %v917_v25  ;;  %v4173_v4 = vrot.slane %v4151_v61, %v10829_v12  ;;  %v3121_v10 = vcombine.low %v934_v55, %v941_v62  ;;  %v10040_v22 = vld.sshfl [vmem:[%s10834_s25 + $0x70] sm:$0x33 pattern:$0x75316420] }
  0x80   : > { %v3119_v8 = vcombine.low %v3111_v57, %v3118_v56  ;;  %v11187_v9 = vrot.slane %v951_v63, %v10829_v12  ;;  %v4180_v13 = vrot.slane %v4152_v0, %v10829_v12  ;;  %v4181_v14 = vcombine.low %v4159_v60, %v4166_v2 }
  0x81   : > { %v10127_v15 = vcombine.high %v934_v55, %v941_v62  ;;  %v3130_v16 = vrot.slane %v10126_v5, %v10829_v12  ;;  %v3137_v19 = vrot.slane %v3121_v10, %v10829_v12  ;;  %v2069_v20 = vcombine.high %v11154_v32, %v11154_v32  ;;  %v10094_v62 = vld.sshfl [vmem:[%s10834_s25 + $0x148] sm:$0x33 pattern:$0x75316420] }
  0x82   : > { %10489 = vmatmul.mubr.msk.bf16.gmra.mrb[36].mxu0 %vm4724_vm2, %v3119_v8  ;;  %v3123_v18 = vcombine.low %v11182_v3, %v11187_v9  ;;  %v2084_v21 = vcombine.high %v2076_v46, %v2076_v46  ;;  %v4182_v23 = vcombine.low %v4173_v4, %v4180_v13  ;;  %v4189_v24 = vrot.slane %v4181_v14, %v10829_v12 }
  0x83   : > { %10492 = vmatprep.mubr.msk.bf16.mxu0 %vm10764_vm1, %v15500_v1  ;;  %v3144_v25 = vrot.slane %v10127_v15, %v10829_v12  ;;  %v2099_v26 = vrot.slane %v10091_v7, %v10829_v12  ;;  %v3152_v27 = vcombine.low %v3130_v16, %v3137_v19  ;;  %v2083_v29 = vrot.slane %v2069_v20, %v10829_v12 }
  0x84   : > { %v3151_v28 = vrot.slane %v3123_v18, %v10829_v12  ;;  %v2107_v30 = vcombine.high %v10092_v11, %v10092_v11  ;;  %v4196_v32 = vrot.slane %v4182_v23, %v10829_v12  ;;  %v2114_v33 = vrot.slane %v10092_v11, %v10829_v12 }
  0x85   : > { %v981_v34 = vrot.slane %v10039_v17, %v10829_v12  ;;  %v989_v35 = vcombine.high %v10040_v22, %v10040_v22  ;;  %v3160_v37 = vrot.slane %v3152_v27, %v10829_v12  ;;  %v2085_v38 = vcombine.high %v2083_v29, %v2083_v29 }
  0x86   : > { %v3153_v36 = vcombine.low %v3144_v25, %v3151_v28  ;;  %v2121_v39 = vrot.slane %v2107_v30, %v10829_v12  ;;  %v4197_v42 = vcombine.low %v4189_v24, %v4196_v32  ;;  %v4198_v40 = vcombine.low %v2083_v29, %v2084_v21  ;;  %v10043_v25 = vld.sshfl [vmem:[%s10834_s25 + $0x7c] sm:$0x1 pattern:$0x75316420] }
  0x87   : > { %v996_v43 = vrot.slane %v10040_v22, %v10829_v12  ;;  %v1003_v44 = vrot.slane %v989_v35, %v10829_v12  ;;  %v4199_v46 = vcombine.low %v2085_v38, %v2099_v26  ;;  %v1020_v52 = vrot.slane %v10041_v41, %v10829_v12  ;;  %v10042_v22 = vld.sshfl [vmem:[%s10834_s25 + $0x78] sm:$0x33 pattern:$0x75316420] }
  0x88   : > { %v3167_v45 = vrot.slane %v3153_v36, %v10829_v12  ;;  %v4200_v47 = vcombine.low %v2114_v33, %v2121_v39  ;;  %v10147_v48 = vcombine.high %v2114_v33, %v2121_v39  ;;  %10577 = vmatmul.mubr.msk.bf16.gmra.mrb[36].mxu1 %vm4724_vm2, %v4197_v42  ;;  %v4208_v49 = vrot.slane %v4198_v40, %v10829_v12  ;;  %v10095_v33 = vld.sshfl [vmem:[%s10834_s25 + $0x14c] sm:$0x1 pattern:$0x75316420] }
  0x89   : > { %v1004_v50 = vcombine.high %v996_v43, %v996_v43  ;;  %v1005_v51 = vcombine.high %v1003_v44, %v1003_v44  ;;  %10580 = vmatprep.mubr.msk.bf16.mxu1 %vm10764_vm1, %v15500_v1  ;;  %v4215_v55 = vrot.slane %v4199_v46, %v10829_v12  ;;  %v10128_v59 = vcombine.high %v11182_v3, %v11187_v9  ;;  %v10096_v38 = vld.sshfl [vmem:[%s10834_s25 + $0x150] sm:$0x33 pattern:$0x75316420] }
  0x8a   : > { %v3168_v54 = vcombine.low %v3160_v37, %v3167_v45  ;;  %v4222_v57 = vrot.slane %v4200_v47, %v10829_v12  ;;  %v4229_v58 = vrot.slane %v10147_v48, %v10829_v12  ;;  %v3170_v60 = vcombine.low %v981_v34, %v996_v43  ;;  %v10097_v47 = vld.sshfl [vmem:[%s10834_s25 + $0x154] sm:$0x33 pattern:$0x75316420] }
  0x8b   : > { %v3171_v56 = vcombine.low %v1003_v44, %v1004_v50  ;;  %v3172_v61 = vcombine.low %v1005_v51, %v1020_v52  ;;  %v4230_v63 = vcombine.low %v4208_v49, %v4215_v55  ;;  %v2131_v2 = vcombine.high %v10093_v53, %v10093_v53 }
  0x8c   : > { %10493 = vmatmul.mubr.msk.bf16.gmra.mrb[40].mxu0 %vm4724_vm2, %v3168_v54  ;;  %v4231_v0 = vcombine.low %v4222_v57, %v4229_v58  ;;  %v2138_v5 = vrot.slane %v10093_v53, %v10829_v12  ;;  %v3179_v7 = vrot.slane %v10128_v59, %v10829_v12  ;;  %v3186_v8 = vrot.slane %v3170_v60, %v10829_v12 }
  0x8d   : > { %10496 = vmatprep.mubr.msk.bf16.mxu0 %vm10764_vm1, %v15500_v1  ;;  %v3193_v3 = vrot.slane %v3171_v56, %v10829_v12  ;;  %v3200_v4 = vrot.slane %v3172_v61, %v10829_v12  ;;  %v4238_v9 = vrot.slane %v4230_v63, %v10829_v12  ;;  %v2145_v11 = vrot.slane %v2131_v2, %v10829_v12 }
  0x8e   : > { %v4245_v10 = vrot.slane %v4231_v0, %v10829_v12  ;;  %v2155_v13 = vcombine.high %v10094_v62, %v10094_v62  ;;  %v3201_v14 = vcombine.low %v3179_v7, %v3186_v8  ;;  %v2162_v16 = vrot.slane %v10094_v62, %v10829_v12  ;;  %v10044_v0 = vld.sshfl [vmem:[%s10834_s25 + $0x80] sm:$0x33 pattern:$0x75316420] }
  0x8f   : > { %v3202_v15 = vcombine.low %v3193_v3, %v3200_v4  ;;  %v1013_v17 = vcombine.high %v10041_v41, %v10041_v41  ;;  %v4247_v20 = vcombine.low %v2138_v5, %v2145_v11  ;;  %v10148_v21 = vcombine.high %v2138_v5, %v2145_v11  ;;  %v10045_v3 = vld.sshfl [vmem:[%s10834_s25 + $0x84] sm:$0x33 pattern:$0x75316420] }
  0x90   : > { %v4246_v18 = vcombine.low %v4238_v9, %v4245_v10  ;;  %v2169_v19 = vrot.slane %v2155_v13, %v10829_v12  ;;  %v3209_v23 = vrot.slane %v3201_v14, %v10829_v12  ;;  %v1028_v28 = vcombine.high %v1020_v52, %v1020_v52 }
  0x91   : > { %v3216_v24 = vrot.slane %v3202_v15, %v10829_v12  ;;  %v1027_v26 = vrot.slane %v1013_v17, %v10829_v12  ;;  %v4257_v30 = vrot.slane %v4247_v20, %v10829_v12  ;;  %v4264_v32 = vrot.slane %v10148_v21, %v10829_v12  ;;  %v10098_v21 = vld.sshfl [vmem:[%s10834_s25 + $0x158] sm:$0x33 pattern:$0x75316420] }
  0x92   : > { %10581 = vmatmul.mubr.msk.bf16.gmra.mrb[40].mxu1 %vm4724_vm2, %v4246_v18  ;;  %v4249_v27 = vcombine.low %v2162_v16, %v2169_v19  ;;  %v10149_v29 = vcombine.high %v2162_v16, %v2169_v19  ;;  %v1037_v36 = vcombine.high %v10042_v22, %v10042_v22  ;;  %v1044_v37 = vrot.slane %v10042_v22, %v10829_v12 }
  0x93   : > { %v3217_v34 = vcombine.low %v3209_v23, %v3216_v24  ;;  %10584 = vmatprep.mubr.msk.bf16.mxu1 %vm10764_vm1, %v15500_v1  ;;  %v1029_v35 = vcombine.high %v1027_v26, %v1027_v26  ;;  %v4279_v42 = vcombine.low %v4257_v30, %v4264_v32  ;;  %v1067_v40 = vrot.slane %v10043_v25, %v10829_v12 }
  0x94   : > { %v4271_v39 = vrot.slane %v4249_v27, %v10829_v12  ;;  %v4278_v41 = vrot.slane %v10149_v29, %v10829_v12  ;;  %v1051_v43 = vrot.slane %v1037_v36, %v10829_v12  ;;  %v1052_v44 = vcombine.high %v1044_v37, %v1044_v37 }
  0x95   : > { %10497 = vmatmul.mubr.msk.bf16.gmra.mrb[44].mxu0 %vm4724_vm2, %v3217_v34  ;;  %v3218_v45 = vcombine.low %v1027_v26, %v1028_v28  ;;  %v3219_v46 = vcombine.low %v1029_v35, %v1044_v37  ;;  %v4287_v49 = vrot.slane %v4279_v42, %v10829_v12  ;;  %v2185_v50 = vrot.slane %v10095_v33, %v10829_v12  ;;  %v10099_v34 = vld.sshfl [vmem:[%s10834_s25 + $0x15c] sm:$0x1 pattern:$0x75316420] }
  0x96   : > { %v4280_v48 = vcombine.low %v4271_v39, %v4278_v41  ;;  %10500 = vmatprep.mubr.msk.bf16.mxu0 %vm10764_vm1, %v15500_v1  ;;  %v2193_v51 = vcombine.high %v10096_v38, %v10096_v38  ;;  %v1053_v52 = vcombine.high %v1051_v43, %v1051_v43  ;;  %v3220_v53 = vcombine.low %v1051_v43, %v1052_v44  ;;  %v10100_v41 = vld.sshfl [vmem:[%s10834_s25 + $0x160] sm:$0x33 pattern:$0x75316420] }
  0x97   : > { %v3228_v54 = vrot.slane %v3218_v45, %v10829_v12  ;;  %v3235_v55 = vrot.slane %v3219_v46, %v10829_v12  ;;  %v2200_v58 = vrot.slane %v10096_v38, %v10829_v12  ;;  %v2217_v60 = vcombine.high %v10097_v47, %v10097_v47 }
  0x98   : > { %v4294_v57 = vrot.slane %v4280_v48, %v10829_v12  ;;  %v2207_v59 = vrot.slane %v2193_v51, %v10829_v12  ;;  %v3221_v56 = vcombine.low %v1053_v52, %v1067_v40  ;;  %v3242_v61 = vrot.slane %v3220_v53, %v10829_v12  ;;  %v10046_v53 = vld.sshfl [vmem:[%s10834_s25 + $0x88] sm:$0x33 pattern:$0x75316420] }
  0x99   : > { %v3250_v62 = vcombine.low %v3228_v54, %v3235_v55  ;;  %v2224_v63 = vrot.slane %v10097_v47, %v10829_v12  ;;  %v2208_v5 = vcombine.high %v2200_v58, %v2200_v58  ;;  %v2231_v8 = vrot.slane %v2217_v60, %v10829_v12 }
  0x9a   : > { %v4295_v2 = vcombine.low %v4287_v49, %v4294_v57  ;;  %v2209_v7 = vcombine.high %v2207_v59, %v2207_v59  ;;  %v3249_v4 = vrot.slane %v3221_v56, %v10829_v12  ;;  %v4296_v11 = vcombine.low %v2185_v50, %v2200_v58 }
  0x9b   : > { %v3258_v9 = vrot.slane %v3250_v62, %v10829_v12  ;;  %v2232_v10 = vcombine.high %v2224_v63, %v2224_v63  ;;  %v4297_v13 = vcombine.low %v2207_v59, %v2208_v5  ;;  %v1075_v15 = vcombine.high %v10044_v0, %v10044_v0  ;;  %v10047_v59 = vld.sshfl [vmem:[%s10834_s25 + $0x8c] sm:$0x1 pattern:$0x75316420] }
  0x9c   : > { %10585 = vmatmul.mubr.msk.bf16.gmra.mrb[44].mxu1 %vm4724_vm2, %v4295_v2  ;;  %v4298_v14 = vcombine.low %v2209_v7, %v2224_v63  ;;  %v1082_v16 = vrot.slane %v10044_v0, %v10829_v12  ;;  %v3251_v17 = vcombine.low %v3242_v61, %v3249_v4  ;;  %v4306_v19 = vrot.slane %v4296_v11, %v10829_v12  ;;  %v10048_v63 = vld.sshfl [vmem:[%s10834_s25 + $0x90] sm:$0x33 pattern:$0x75316420] }
  0x9d   : > { %10588 = vmatprep.mubr.msk.bf16.mxu1 %vm10764_vm1, %v15500_v1  ;;  %v4299_v18 = vcombine.low %v2231_v8, %v2232_v10  ;;  %v1099_v20 = vcombine.high %v10045_v3, %v10045_v3  ;;  %v4313_v22 = vrot.slane %v4297_v13, %v10829_v12  ;;  %v1089_v24 = vrot.slane %v1075_v15, %v10829_v12 }
  0x9e   : > { %v4320_v23 = vrot.slane %v4298_v14, %v10829_v12  ;;  %v1106_v25 = vrot.slane %v10045_v3, %v10829_v12  ;;  %v3265_v26 = vrot.slane %v3251_v17, %v10829_v12  ;;  %v2233_v29 = vcombine.high %v2231_v8, %v2231_v8  ;;  %v10101_v8 = vld.sshfl [vmem:[%s10834_s25 + $0x164] sm:$0x33 pattern:$0x75316420] }
  0x9f   : > { %v4327_v28 = vrot.slane %v4299_v18, %v10829_v12  ;;  %v1113_v27 = vrot.slane %v1099_v20, %v10829_v12  ;;  %v4328_v30 = vcombine.low %v4306_v19, %v4313_v22  ;;  %v3267_v32 = vcombine.low %v1082_v16, %v1089_v24  ;;  %v10102_v19 = vld.sshfl [vmem:[%s10834_s25 + $0x168] sm:$0x33 pattern:$0x75316420] }
  0xa0   : > { %v10129_v33 = vcombine.high %v1082_v16, %v1089_v24  ;;  %v2241_v35 = vcombine.high %v10098_v21, %v10098_v21  ;;  %v3266_v36 = vcombine.low %v3258_v9, %v3265_v26  ;;  %v2248_v44 = vrot.slane %v10098_v21, %v10829_v12 }
  0xa1   : > { %v4329_v37 = vcombine.low %v4320_v23, %v4327_v28  ;;  %v3269_v38 = vcombine.low %v1106_v25, %v1113_v27  ;;  %v10130_v39 = vcombine.high %v1106_v25, %v1113_v27  ;;  %v4336_v42 = vrot.slane %v4328_v30, %v10829_v12 }
  0xa2   : > { %v3277_v40 = vrot.slane %v3267_v32, %v10829_v12  ;;  %v3284_v43 = vrot.slane %v10129_v33, %v10829_v12  ;;  %10501 = vmatmul.mubr.msk.bf16.gmra.mrb[48].mxu0 %vm4724_vm2, %v3266_v36  ;;  %v2255_v48 = vrot.slane %v2241_v35, %v10829_v12  ;;  %v2256_v50 = vcombine.high %v2248_v44, %v2248_v44 }
  0xa3   : > { %v4343_v45 = vrot.slane %v4329_v37, %v10829_v12  ;;  %v3291_v46 = vrot.slane %v3269_v38, %v10829_v12  ;;  %v3298_v47 = vrot.slane %v10130_v39, %v10829_v12  ;;  %10504 = vmatprep.mubr.msk.bf16.mxu0 %vm10764_vm1, %v15500_v1  ;;  %v2271_v51 = vrot.slane %v10099_v34, %v10829_v12 }
  0xa4   : > { %v3299_v49 = vcombine.low %v3277_v40, %v3284_v43  ;;  %v2279_v52 = vcombine.high %v10100_v41, %v10100_v41  ;;  %v2257_v57 = vcombine.high %v2255_v48, %v2255_v48  ;;  %v2286_v58 = vrot.slane %v10100_v41, %v10829_v12  ;;  %v10049_v40 = vld.sshfl [vmem:[%s10834_s25 + $0x94] sm:$0x33 pattern:$0x75316420] }
  0xa5   : > { %v4344_v54 = vcombine.low %v4336_v42, %v4343_v45  ;;  %v3300_v55 = vcombine.low %v3291_v46, %v3298_v47  ;;  %v4345_v61 = vcombine.low %v2233_v29, %v2248_v44  ;;  %v4346_v62 = vcombine.low %v2255_v48, %v2256_v50  ;;  %v10050_v46 = vld.sshfl [vmem:[%s10834_s25 + $0x98] sm:$0x33 pattern:$0x75316420] }
  0xa6   : > { %v3307_v60 = vrot.slane %v3299_v49, %v10829_v12  ;;  %v2293_v56 = vrot.slane %v2279_v52, %v10829_v12  ;;  %v4347_v2 = vcombine.low %v2257_v57, %v2271_v51  ;;  %v1123_v5 = vcombine.high %v10046_v53, %v10046_v53 }
  0xa7   : > { %10589 = vmatmul.mubr.msk.bf16.gmra.mrb[48].mxu1 %vm4724_vm2, %v4344_v54  ;;  %v3314_v0 = vrot.slane %v3300_v55, %v10829_v12  ;;  %v1130_v7 = vrot.slane %v10046_v53, %v10829_v12  ;;  %v4355_v4 = vrot.slane %v4345_v61, %v10829_v12  ;;  %v4362_v9 = vrot.slane %v4346_v62, %v10829_v12 }
  0xa8   : > { %10592 = vmatprep.mubr.msk.bf16.mxu1 %vm10764_vm1, %v15500_v1  ;;  %v4348_v3 = vcombine.low %v2286_v58, %v2293_v56  ;;  %v1153_v10 = vrot.slane %v10047_v59, %v10829_v12  ;;  %v4369_v13 = vrot.slane %v4347_v2, %v10829_v12  ;;  %v1137_v14 = vrot.slane %v1123_v5, %v10829_v12  ;;  %v10104_v2 = vld.sshfl [vmem:[%s10834_s25 + $0x170] sm:$0x33 pattern:$0x75316420] }
  0xa9   : > { %v3315_v11 = vcombine.low %v3307_v60, %v3314_v0  ;;  %v1161_v15 = vcombine.high %v10048_v63, %v10048_v63  ;;  %v4377_v17 = vcombine.low %v4355_v4, %v4362_v9  ;;  %v1168_v18 = vrot.slane %v10048_v63, %v10829_v12  ;;  %v10105_v4 = vld.sshfl [vmem:[%s10834_s25 + $0x174] sm:$0x33 pattern:$0x75316420] }
  0xaa   : > { %v4376_v16 = vrot.slane %v4348_v3, %v10829_v12  ;;  %v2303_v20 = vcombine.high %v10101_v8, %v10101_v8  ;;  %v3316_v22 = vcombine.low %v1130_v7, %v1137_v14  ;;  %v10131_v23 = vcombine.high %v1130_v7, %v1137_v14 }
  0xab   : > { %10505 = vmatmul.mubr.msk.bf16.gmra.mrb[52].mxu0 %vm4724_vm2, %v3315_v11  ;;  %v1175_v21 = vrot.slane %v1161_v15, %v10829_v12  ;;  %v2310_v24 = vrot.slane %v10101_v8, %v10829_v12  ;;  %v4385_v26 = vrot.slane %v4377_v17, %v10829_v12  ;;  %v1176_v28 = vcombine.high %v1168_v18, %v1168_v18 }
  0xac   : > { %v4378_v25 = vcombine.low %v4369_v13, %v4376_v16  ;;  %10508 = vmatprep.mubr.msk.bf16.mxu0 %vm10764_vm1, %v15500_v1  ;;  %v3318_v27 = vcombine.low %v1153_v10, %v1168_v18  ;;  %v3326_v29 = vrot.slane %v3316_v22, %v10829_v12  ;;  %v3333_v30 = vrot.slane %v10131_v23, %v10829_v12  ;;  %v10051_v22 = vld.sshfl [vmem:[%s10834_s25 + $0x9c] sm:$0x1 pattern:$0x75316420] }
  0xad   : > { %v2317_v32 = vrot.slane %v2303_v20, %v10829_v12  ;;  %v2327_v33 = vcombine.high %v10102_v19, %v10102_v19  ;;  %v3319_v35 = vcombine.low %v1175_v21, %v1176_v28  ;;  %v11335_v37 = vrot.slane %v10102_v19, %v10829_v12  ;;  %v10052_v28 = vld.sshfl [vmem:[%s10834_s25 + $0xa0] sm:$0x33 pattern:$0x75316420] }
  0xae   : > { %v4392_v34 = vrot.slane %v4378_v25, %v10829_v12  ;;  %v3340_v36 = vrot.slane %v3318_v27, %v10829_v12  ;;  %v3348_v38 = vcombine.low %v3326_v29, %v3333_v30  ;;  %v10150_v41 = vcombine.high %v2286_v58, %v2293_v56  ;;  %v10103_v56 = vld.sshfl [vmem:[%s10834_s25 + $0x16c] sm:$0x1 pattern:$0x75316420] }
  0xaf   : > { %v2341_v39 = vrot.slane %v2327_v33, %v10829_v12  ;;  %v4395_v42 = vcombine.low %v2310_v24, %v2317_v32  ;;  %v3347_v44 = vrot.slane %v3319_v35, %v10829_v12  ;;  %v10151_v45 = vcombine.high %v2310_v24, %v2317_v32  ;;  %v10053_v33 = vld.sshfl [vmem:[%s10834_s25 + $0xa4] sm:$0x33 pattern:$0x75316420] }
  0xb0   : > { %v4393_v43 = vcombine.low %v4385_v26, %v4392_v34  ;;  %v1177_v47 = vcombine.high %v1175_v21, %v1175_v21  ;;  %v3356_v48 = vrot.slane %v3348_v38, %v10829_v12  ;;  %v4404_v50 = vrot.slane %v10150_v41, %v10829_v12 }
  0xb1   : > { %v4397_v49 = vcombine.low %v11335_v37, %v2341_v39  ;;  %v4411_v51 = vrot.slane %v4395_v42, %v10829_v12  ;;  %v3349_v52 = vcombine.low %v3340_v36, %v3347_v44  ;;  %v4418_v53 = vrot.slane %v10151_v45, %v10829_v12 }
  0xb2   : > { %10593 = vmatmul.mubr.msk.bf16.gmra.mrb[52].mxu1 %vm4724_vm2, %v4393_v43  ;;  %v1185_v54 = vcombine.high %v10049_v40, %v10049_v40  ;;  %v1192_v55 = vrot.slane %v10049_v40, %v10829_v12  ;;  %v1209_v59 = vcombine.high %v10050_v46, %v10050_v46  ;;  %v1216_v60 = vrot.slane %v10050_v46, %v10829_v12 }
  0xb3   : > { %10596 = vmatprep.mubr.msk.bf16.mxu1 %vm10764_vm1, %v15500_v1  ;;  %v4425_v57 = vrot.slane %v4397_v49, %v10829_v12  ;;  %v4426_v58 = vcombine.low %v4404_v50, %v4411_v51  ;;  %v3363_v61 = vrot.slane %v3349_v52, %v10829_v12  ;;  %v2357_v16 = vrot.slane %v10103_v56, %v10829_v12 }
  0xb4   : > { %v1199_v62 = vrot.slane %v1185_v54, %v10829_v12  ;;  %v1200_v63 = vcombine.high %v1192_v55, %v1192_v55  ;;  %v3365_v0 = vcombine.low %v1177_v47, %v1192_v55  ;;  %v1223_v8 = vrot.slane %v1209_v59, %v10829_v12  ;;  %v10106_v54 = vld.sshfl [vmem:[%s10834_s25 + $0x178] sm:$0x33 pattern:$0x75316420] }
  0xb5   : > { %v4427_v5 = vcombine.low %v4418_v53, %v4425_v57  ;;  %v4434_v7 = vrot.slane %v4426_v58, %v10829_v12  ;;  %v1224_v3 = vcombine.high %v1216_v60, %v1216_v60  ;;  %v3364_v9 = vcombine.low %v3356_v48, %v3363_v61 }
  0xb6   : > { %v1201_v10 = vcombine.high %v1199_v62, %v1199_v62  ;;  %v3366_v11 = vcombine.low %v1199_v62, %v1200_v63  ;;  %v3375_v13 = vrot.slane %v3365_v0, %v10829_v12  ;;  %v2365_v17 = vcombine.high %v10104_v2, %v10104_v2  ;;  %v10107_v63 = vld.sshfl [vmem:[%s10834_s25 + $0x17c] sm:$0x1 pattern:$0x75316420] }
  0xb7   : > { %v4441_v14 = vrot.slane %v4427_v5, %v10829_v12  ;;  %v3368_v15 = vcombine.low %v1223_v8, %v1224_v3  ;;  %10509 = vmatmul.mubr.msk.bf16.gmra.mrb[56].mxu0 %vm4724_vm2, %v3364_v9  ;;  %v2372_v20 = vrot.slane %v10104_v2, %v10829_v12  ;;  %v11366_v21 = vrot.slane %v10105_v4, %v10829_v12 }
  0xb8   : > { %v3367_v18 = vcombine.low %v1201_v10, %v1216_v60  ;;  %v3382_v19 = vrot.slane %v3366_v11, %v10829_v12  ;;  %10512 = vmatprep.mubr.msk.bf16.mxu0 %vm10764_vm1, %v15500_v1  ;;  %v2379_v25 = vrot.slane %v2365_v17, %v10829_v12  ;;  %v10152_v26 = vcombine.high %v11335_v37, %v2341_v39  ;;  %v10054_v10 = vld.sshfl [vmem:[%s10834_s25 + $0xa8] sm:$0x33 pattern:$0x75316420] }
  0xb9   : > { %v4442_v23 = vcombine.low %v4434_v7, %v4441_v14  ;;  %v3396_v24 = vrot.slane %v3368_v15, %v10829_v12  ;;  %v2380_v30 = vcombine.high %v2372_v20, %v2372_v20  ;;  %v4444_v32 = vcombine.low %v2357_v16, %v2372_v20  ;;  %v10055_v20 = vld.sshfl [vmem:[%s10834_s25 + $0xac] sm:$0x1 pattern:$0x75316420] }
  0xba   : > { %v3389_v27 = vrot.slane %v3367_v18, %v10829_v12  ;;  %v3397_v29 = vcombine.low %v3375_v13, %v3382_v19  ;;  %v2381_v34 = vcombine.high %v2379_v25, %v2379_v25  ;;  %v4453_v35 = vrot.slane %v10152_v26, %v10829_v12 }
  0xbb   : > { %10597 = vmatmul.mubr.msk.bf16.gmra.mrb[56].mxu1 %vm4724_vm2, %v4442_v23  ;;  %v1225_v36 = vcombine.high %v1223_v8, %v1223_v8  ;;  %v1239_v38 = vrot.slane %v10051_v22, %v10829_v12  ;;  %v4445_v37 = vcombine.low %v2379_v25, %v2380_v30  ;;  %v4460_v39 = vrot.slane %v4444_v32, %v10829_v12 }
  0xbc   : > { %v3398_v41 = vcombine.low %v3389_v27, %v3396_v24  ;;  %v3405_v42 = vrot.slane %v3397_v29, %v10829_v12  ;;  %10600 = vmatprep.mubr.msk.bf16.mxu1 %vm10764_vm1, %v15500_v1  ;;  %v4446_v40 = vcombine.low %v2381_v34, %v11366_v21  ;;  %v1247_v43 = vcombine.high %v10052_v28, %v10052_v28  ;;  %v10056_v24 = vld.sshfl [vmem:[%s10834_s25 + $0xb0] sm:$0x33 pattern:$0x75316420] }
  0xbd   : > { %v1254_v44 = vrot.slane %v10052_v28, %v10829_v12  ;;  %v1271_v45 = vcombine.high %v10053_v33, %v10053_v33  ;;  %v4467_v47 = vrot.slane %v4445_v37, %v10829_v12  ;;  %v4475_v48 = vcombine.low %v4453_v35, %v4460_v39  ;;  %v10108_v35 = vld.sshfl [vmem:[%s10834_s25 + $0x180] sm:$0x33 pattern:$0x75316420] }
  0xbe   : > { %v3412_v46 = vrot.slane %v3398_v41, %v10829_v12  ;;  %v11389_v49 = vrot.slane %v10053_v33, %v10829_v12  ;;  %v4474_v50 = vrot.slane %v4446_v40, %v10829_v12  ;;  %v1261_v51 = vrot.slane %v1247_v43, %v10829_v12 }
  0xbf   : > { %v1285_v52 = vrot.slane %v1271_v45, %v10829_v12  ;;  %v3414_v53 = vcombine.low %v1225_v36, %v1239_v38  ;;  %v4483_v57 = vrot.slane %v4475_v48, %v10829_v12  ;;  %v2389_v58 = vcombine.high %v10105_v4, %v10105_v4 }
  0xc0   : > { %v3413_v55 = vcombine.low %v3405_v42, %v3412_v46  ;;  %v2404_v59 = vcombine.high %v11366_v21, %v11366_v21  ;;  %v4476_v60 = vcombine.low %v4467_v47, %v4474_v50  ;;  %v3415_v56 = vcombine.low %v1254_v44, %v1261_v51 }
  0xc1   : > { %v10132_v61 = vcombine.high %v1254_v44, %v1261_v51  ;;  %v3417_v62 = vcombine.low %v11389_v49, %v1285_v52  ;;  %v3424_v0 = vrot.slane %v3414_v53, %v10829_v12  ;;  %v2403_v2 = vrot.slane %v2389_v58, %v10829_v12  ;;  %v10109_v44 = vld.sshfl [vmem:[%s10834_s25 + $0x184] sm:$0x33 pattern:$0x75316420] }
  0xc2   : > { %10513 = vmatmul.mubr.msk.bf16.gmra.mrb[60].mxu0 %vm4724_vm2, %v3413_v55  ;;  %v2413_v5 = vcombine.high %v10106_v54, %v10106_v54  ;;  %v2420_v7 = vrot.slane %v10106_v54, %v10829_v12  ;;  %v4490_v8 = vrot.slane %v4476_v60, %v10829_v12  ;;  %v3431_v3 = vrot.slane %v3415_v56, %v10829_v12  ;;  %v10057_v58 = vld.sshfl [vmem:[%s10834_s25 + $0xb4] sm:$0x33 pattern:$0x75316420] }
  0xc3   : > { %10516 = vmatprep.mubr.msk.bf16.mxu0 %vm10764_vm1, %v15500_v1  ;;  %v3438_v4 = vrot.slane %v10132_v61, %v10829_v12  ;;  %v3445_v9 = vrot.slane %v3417_v62, %v10829_v12  ;;  %v2405_v11 = vcombine.high %v2403_v2, %v2403_v2  ;;  %v2443_v15 = vrot.slane %v10107_v63, %v10829_v12 }
  0xc4   : > { %v2427_v13 = vrot.slane %v2413_v5, %v10829_v12  ;;  %v2428_v14 = vcombine.high %v2420_v7, %v2420_v7  ;;  %v4491_v16 = vcombine.low %v4483_v57, %v4490_v8  ;;  %v3446_v17 = vcombine.low %v3424_v0, %v3431_v3  ;;  %v11447_v8 = vld.sshfl [vmem:[%s10834_s25 + $0xb8] sm:$0x33 pattern:$0x75316420] }
  0xc5   : > { %v3447_v18 = vcombine.low %v3438_v4, %v3445_v9  ;;  %v4492_v19 = vcombine.low %v2403_v2, %v2404_v59  ;;  %v4493_v22 = vcombine.low %v2405_v11, %v2420_v7  ;;  %v1295_v25 = vcombine.high %v10054_v10, %v10054_v10 }
  0xc6   : > { %v2429_v21 = vcombine.high %v2427_v13, %v2427_v13  ;;  %v4494_v23 = vcombine.low %v2427_v13, %v2428_v14  ;;  %10601 = vmatmul.mubr.msk.bf16.gmra.mrb[60].mxu1 %vm4724_vm2, %v4491_v16  ;;  %v3454_v26 = vrot.slane %v3446_v17, %v10829_v12  ;;  %v1302_v29 = vrot.slane %v10054_v10, %v10829_v12 }
  0xc7   : > { %v3461_v28 = vrot.slane %v3447_v18, %v10829_v12  ;;  %v4502_v27 = vrot.slane %v4492_v19, %v10829_v12  ;;  %10604 = vmatprep.mubr.msk.bf16.mxu1 %vm10764_vm1, %v15500_v1  ;;  %v4509_v32 = vrot.slane %v4493_v22, %v10829_v12  ;;  %v1309_v34 = vrot.slane %v1295_v25, %v10829_v12  ;;  %v10110_v18 = vld.sshfl [vmem:[%s10834_s25 + $0x188] sm:$0x33 pattern:$0x75316420] }
  0xc8   : > { %v4495_v30 = vcombine.low %v2429_v21, %v2443_v15  ;;  %v4516_v33 = vrot.slane %v4494_v23, %v10829_v12  ;;  %v1325_v38 = vrot.slane %v10055_v20, %v10829_v12  ;;  %v1340_v41 = vrot.slane %v10056_v24, %v10829_v12 }
  0xc9   : > { %v3462_v36 = vcombine.low %v3454_v26, %v3461_v28  ;;  %v10133_v42 = vcombine.high %v11389_v49, %v1285_v52  ;;  %v4524_v39 = vcombine.low %v4502_v27, %v4509_v32  ;;  %v3464_v40 = vcombine.low %v1302_v29, %v1309_v34  ;;  %v10111_v28 = vld.sshfl [vmem:[%s10834_s25 + $0x18c] sm:$0x1 pattern:$0x75316420] }
  0xca   : > { %v4523_v37 = vrot.slane %v4495_v30, %v10829_v12  ;;  %v10134_v43 = vcombine.high %v1302_v29, %v1309_v34  ;;  %v3466_v45 = vcombine.low %v1325_v38, %v1340_v41  ;;  %v2451_v47 = vcombine.high %v10108_v35, %v10108_v35  ;;  %v10112_v30 = vld.sshfl [vmem:[%s10834_s25 + $0x190] sm:$0x33 pattern:$0x75316420] }
  0xcb   : > { %10517 = vmatmul.mubr.msk.bf16.gmra.mrb[64].mxu0 %vm4724_vm2, %v3462_v36  ;;  %v3473_v46 = vrot.slane %v10133_v42, %v10829_v12  ;;  %v2458_v48 = vrot.slane %v10108_v35, %v10829_v12  ;;  %v4532_v51 = vrot.slane %v4524_v39, %v10829_v12  ;;  %v3480_v49 = vrot.slane %v3464_v40, %v10829_v12 }
  0xcc   : > { %v4525_v50 = vcombine.low %v4516_v33, %v4523_v37  ;;  %10520 = vmatprep.mubr.msk.bf16.mxu0 %vm10764_vm1, %v15500_v1  ;;  %v3487_v52 = vrot.slane %v10134_v43, %v10829_v12  ;;  %v3494_v53 = vrot.slane %v3466_v45, %v10829_v12  ;;  %v2465_v54 = vrot.slane %v2451_v47, %v10829_v12 }
  0xcd   : > { %v2475_v55 = vcombine.high %v10109_v44, %v10109_v44  ;;  %v2482_v57 = vrot.slane %v10109_v44, %v10829_v12  ;;  %v3495_v60 = vcombine.low %v3473_v46, %v3480_v49  ;;  %v1333_v56 = vcombine.high %v10056_v24, %v10056_v24 }
  0xce   : > { %v4539_v59 = vrot.slane %v4525_v50, %v10829_v12  ;;  %v1348_v61 = vcombine.high %v1340_v41, %v1340_v41  ;;  %v3496_v62 = vcombine.low %v3487_v52, %v3494_v53  ;;  %v4541_v0 = vcombine.low %v2458_v48, %v2465_v54 }
  0xcf   : > { %v2489_v63 = vrot.slane %v2475_v55, %v10829_v12  ;;  %v10153_v2 = vcombine.high %v2458_v48, %v2465_v54  ;;  %v3503_v7 = vrot.slane %v3495_v60, %v10829_v12  ;;  %v1347_v3 = vrot.slane %v1333_v56, %v10829_v12  ;;  %v10060_v55 = vld.sshfl [vmem:[%s10834_s25 + $0xc0] sm:$0x33 pattern:$0x75316420] }
  0xd0   : > { %v4540_v5 = vcombine.low %v4532_v51, %v4539_v59  ;;  %v1357_v4 = vcombine.high %v10057_v58, %v10057_v58  ;;  %v3510_v9 = vrot.slane %v3496_v62, %v10829_v12  ;;  %v4551_v13 = vrot.slane %v4541_v0, %v10829_v12  ;;  %v10059_v51 = vld.sshfl [vmem:[%s10834_s25 + $0xbc] sm:$0x1 pattern:$0x75316420] }
  0xd1   : > { %v4543_v10 = vcombine.low %v2482_v57, %v2489_v63  ;;  %v10154_v11 = vcombine.high %v2482_v57, %v2489_v63  ;;  %v4558_v14 = vrot.slane %v10153_v2, %v10829_v12  ;;  %v1349_v15 = vcombine.high %v1347_v3, %v1347_v3  ;;  %v10061_v56 = vld.sshfl [vmem:[%s10834_s25 + $0xc4] sm:$0x33 pattern:$0x75316420] }
  0xd2   : > { %10605 = vmatmul.mubr.msk.bf16.gmra.mrb[64].mxu1 %vm4724_vm2, %v4540_v5  ;;  %v1364_v16 = vrot.slane %v10057_v58, %v10829_v12  ;;  %v1371_v17 = vrot.slane %v1357_v4, %v10829_v12  ;;  %v3511_v19 = vcombine.low %v3503_v7, %v3510_v9  ;;  %v1388_v22 = vrot.slane %v11447_v8, %v10829_v12  ;;  %v10062_v4 = vld.sshfl [vmem:[%s10834_s25 + $0xc8] sm:$0x33 pattern:$0x75316420] }
  0xd3   : > { %10608 = vmatprep.mubr.msk.bf16.mxu1 %vm10764_vm1, %v15500_v1  ;;  %v4565_v20 = vrot.slane %v4543_v10, %v10829_v12  ;;  %v4572_v21 = vrot.slane %v10154_v11, %v10829_v12  ;;  %v4573_v23 = vcombine.low %v4551_v13, %v4558_v14  ;;  %v3512_v26 = vcombine.low %v1347_v3, %v1348_v61 }
  0xd4   : > { %v1372_v24 = vcombine.high %v1364_v16, %v1364_v16  ;;  %v1373_v25 = vcombine.high %v1371_v17, %v1371_v17  ;;  %10521 = vmatmul.mubr.msk.bf16.gmra.mrb[68].mxu0 %vm4724_vm2, %v3511_v19  ;;  %v3513_v29 = vcombine.low %v1349_v15, %v1364_v16  ;;  %v2499_v32 = vcombine.high %v10110_v18, %v10110_v18 }
  0xd5   : > { %v4574_v27 = vcombine.low %v4565_v20, %v4572_v21  ;;  %v2506_v33 = vrot.slane %v10110_v18, %v10829_v12  ;;  %v4581_v34 = vrot.slane %v4573_v23, %v10829_v12  ;;  %10524 = vmatprep.mubr.msk.bf16.mxu0 %vm10764_vm1, %v15500_v1  ;;  %v3522_v38 = vrot.slane %v3512_v26, %v10829_v12 }
  0xd6   : > { %v3514_v35 = vcombine.low %v1371_v17, %v1372_v24  ;;  %v3515_v36 = vcombine.low %v1373_v25, %v1388_v22  ;;  %v3529_v42 = vrot.slane %v3513_v29, %v10829_v12  ;;  %v2513_v37 = vrot.slane %v2499_v32, %v10829_v12  ;;  %v10063_v29 = vld.sshfl [vmem:[%s10834_s25 + $0xcc] sm:$0x1 pattern:$0x75316420] }
  0xd7   : > { %v4588_v41 = vrot.slane %v4574_v27, %v10829_v12  ;;  %v2529_v39 = vrot.slane %v10111_v28, %v10829_v12  ;;  %v2537_v44 = vcombine.high %v10112_v30, %v10112_v30  ;;  %v2544_v45 = vrot.slane %v10112_v30, %v10829_v12 }
  0xd8   : > { %v3536_v40 = vrot.slane %v3514_v35, %v10829_v12  ;;  %v3543_v43 = vrot.slane %v3515_v36, %v10829_v12  ;;  %v3544_v47 = vcombine.low %v3522_v38, %v3529_v42  ;;  %v4590_v48 = vcombine.low %v2506_v33, %v2513_v37  ;;  %v10064_v35 = vld.sshfl [vmem:[%s10834_s25 + $0xd0] sm:$0x33 pattern:$0x75316420] }
  0xd9   : > { %v4589_v46 = vcombine.low %v4581_v34, %v4588_v41  ;;  %v10155_v50 = vcombine.high %v2506_v33, %v2513_v37  ;;  %v11480_v52 = vrot.slane %v2537_v44, %v10829_v12  ;;  %v2552_v53 = vcombine.high %v2544_v45, %v2544_v45 }
  0xda   : > { %v3545_v49 = vcombine.low %v3536_v40, %v3543_v43  ;;  %v4592_v54 = vcombine.low %v2529_v39, %v2544_v45  ;;  %v3552_v57 = vrot.slane %v3544_v47, %v10829_v12  ;;  %v4600_v58 = vrot.slane %v4590_v48, %v10829_v12 }
  0xdb   : > { %15641 = vst [vmem:[#allocation3_spill] sm:$0xff] %v11480_v52  ;;  %10609 = vmatmul.mubr.msk.bf16.gmra.mrb[68].mxu1 %vm4724_vm2, %v4589_v46  ;;  %v4607_v59 = vrot.slane %v10155_v50, %v10829_v12  ;;  %v1381_v60 = vcombine.high %v11447_v8, %v11447_v8  ;;  %v4593_v62 = vcombine.low %v11480_v52, %v2552_v53 }
  0xdc   : > { %v3559_v61 = vrot.slane %v3545_v49, %v10829_v12  ;;  %10612 = vmatprep.mubr.msk.bf16.mxu1 %vm10764_vm1, %v15500_v1  ;;  %v4614_v63 = vrot.slane %v4592_v54, %v10829_v12  ;;  %v1396_v0 = vcombine.high %v1388_v22, %v1388_v22  ;;  %v1411_v7 = vrot.slane %v10059_v51, %v10829_v12  ;;  %v10751_v49 = vld.sshfl [vmem:[%s10834_s25 + $0xd4] sm:$0x33 pattern:$0x75316420] }
  0xdd   : > { %v4622_v2 = vcombine.low %v4600_v58, %v4607_v59  ;;  %v1395_v5 = vrot.slane %v1381_v60, %v10829_v12  ;;  %v1419_v3 = vcombine.high %v10060_v55, %v10060_v55  ;;  %v4621_v8 = vrot.slane %v4593_v62, %v10829_v12 }
  0xde   : > { %v3560_v9 = vcombine.low %v3552_v57, %v3559_v61  ;;  %v1426_v10 = vrot.slane %v10060_v55, %v10829_v12  ;;  %v1443_v11 = vcombine.high %v10061_v56, %v10061_v56  ;;  %v1450_v18 = vrot.slane %v10061_v56, %v10829_v12 }
  0xdf   : > { %v4630_v13 = vrot.slane %v4622_v2, %v10829_v12  ;;  %v1397_v14 = vcombine.high %v1395_v5, %v1395_v5  ;;  %v1433_v15 = vrot.slane %v1419_v3, %v10829_v12  ;;  %v3561_v16 = vcombine.low %v1395_v5, %v1396_v0 }
  0xe0   : > { %10525 = vmatmul.mubr.msk.bf16.gmra.mrb[72].mxu0 %vm4724_vm2, %v3560_v9  ;;  %v4623_v17 = vcombine.low %v4614_v63, %v4621_v8  ;;  %v1457_v19 = vrot.slane %v1443_v11, %v10829_v12  ;;  %v1467_v20 = vcombine.high %v10062_v4, %v10062_v4  ;;  %v1474_v26 = vrot.slane %v10062_v4, %v10829_v12 }
  0xe1   : > { %10528 = vmatprep.mubr.msk.bf16.mxu0 %vm10764_vm1, %v15500_v1  ;;  %v3562_v21 = vcombine.low %v1397_v14, %v1411_v7  ;;  %v3563_v22 = vcombine.low %v1426_v10, %v1433_v15  ;;  %v10135_v23 = vcombine.high %v1426_v10, %v1433_v15  ;;  %v3571_v24 = vrot.slane %v3561_v16, %v10829_v12 }
  0xe2   : > { %v4637_v25 = vrot.slane %v4623_v17, %v10829_v12  ;;  %v1481_v28 = vrot.slane %v1467_v20, %v10829_v12  ;;  %v3610_v27 = vcombine.low %v1450_v18, %v1457_v19  ;;  %v10136_v34 = vcombine.high %v1450_v18, %v1457_v19  ;;  %v11548_v17 = vld [vmem:[%s15498_s2] ss:$0 sm:$0xff] }
  0xe3   : > { %v3578_v30 = vrot.slane %v3562_v21, %v10829_v12  ;;  %v3585_v32 = vrot.slane %v3563_v22, %v10829_v12  ;;  %v3592_v33 = vrot.slane %v10135_v23, %v10829_v12  ;;  %v1497_v43 = vrot.slane %v10063_v29, %v10829_v12 }
  0xe4   : > { %v4638_v36 = vcombine.low %v4630_v13, %v4637_v25  ;;  %v3612_v38 = vcombine.low %v1474_v26, %v1481_v28  ;;  %v10137_v41 = vcombine.high %v1474_v26, %v1481_v28  ;;  %v3620_v42 = vrot.slane %v3610_v27, %v10829_v12 }
  0xe5   : > { %v3593_v37 = vcombine.low %v3571_v24, %v3578_v30  ;;  %v3594_v39 = vcombine.low %v3585_v32, %v3592_v33  ;;  %v3627_v40 = vrot.slane %v10136_v34, %v10829_v12  ;;  %v1505_v46 = vcombine.high %v10064_v35, %v10064_v35 }
  0xe6   : > { %10613 = vmatmul.mubr.msk.bf16.gmra.mrb[72].mxu1 %vm4724_vm2, %v4638_v36  ;;  %v3634_v44 = vrot.slane %v3612_v38, %v10829_v12  ;;  %v3641_v45 = vrot.slane %v10137_v41, %v10829_v12  ;;  %v1512_v47 = vrot.slane %v10064_v35, %v10829_v12  ;;  %v1536_v53 = vrot.slane %v10751_v49, %v10829_v12 }
  0xe7   : > { %v3601_v48 = vrot.slane %v3593_v37, %v10829_v12  ;;  %v3608_v50 = vrot.slane %v3594_v39, %v10829_v12  ;;  %v3642_v51 = vcombine.low %v3620_v42, %v3627_v40  ;;  %10616 = vmatprep.mubr.msk.bf16.mxu1 %vm10764_vm1, %v15500_v1  ;;  %v1519_v55 = vrot.slane %v1505_v46, %v10829_v12 }
  0xe8   : > { %v3643_v54 = vcombine.low %v3634_v44, %v3641_v45  ;;  %v1520_v57 = vcombine.high %v1512_v47, %v1512_v47  ;;  %v3659_v58 = vcombine.low %v1497_v43, %v1512_v47  ;;  %v1544_v60 = vcombine.high %v1536_v53, %v1536_v53 }
  0xe9   : > { %v3609_v59 = vcombine.low %v3601_v48, %v3608_v50  ;;  %v1521_v56 = vcombine.high %v1519_v55, %v1519_v55  ;;  %v3650_v62 = vrot.slane %v3642_v51, %v10829_v12  ;;  %v10767_v18 = vmov 1983009808  }
  0xea   : > { %v3660_v61 = vcombine.low %v1519_v55, %v1520_v57  ;;  %v3657_v63 = vrot.slane %v3643_v54, %v10829_v12  ;;  %v3662_v0 = vcombine.low %v10850_v31, %v1544_v60  ;;  %v3669_v2 = vrot.slane %v3659_v58, %v10829_v12 }
  0xeb   : > { %10529 = vmatmul.mubr.msk.bf16.gmra.mrb[76].mxu0 %vm4724_vm2, %v3609_v59  ;;  %v3661_v5 = vcombine.low %v1521_v56, %v1536_v53  ;;  %v5399_v19 = vunpack.c.l.s4 %v10767_v18  ;;  %v11567_v58 = vsub.s32 0, %v10812_v6 }
  0xec   : > { %10532 = vmatprep.mubr.msk.bf16.mxu0 %vm10764_vm1, %v15500_v1  ;;  %v3676_v7 = vrot.slane %v3660_v61, %v10829_v12  ;;  %v3690_v3 = vrot.slane %v3662_v0, %v10829_v12  ;;  %v3658_v9 = vcombine.low %v3650_v62, %v3657_v63 }
  0xed   : > { %v3683_v4 = vrot.slane %v3661_v5, %v10829_v12  ;;  %v5400_v24 = vunpack.c.0.s8 %v5399_v19 }
  0xee   : > { %v3691_v8 = vcombine.low %v3669_v2, %v3676_v7 }
  0xef   : > { %v3692_v10 = vcombine.low %v3683_v4, %v3690_v3  ;;  %v11555_v30 = vsub.s32 %v5400_v24, %v10812_v6 }
  0xf0   : > { %v3699_v11 = vrot.slane %v3691_v8, %v10829_v12 }
  0xf1   : > { %v3706_v31 = vrot.slane %v3692_v10, %v10829_v12 }
  0xf3   : > { %10533 = vmatmul.mubr.msk.bf16.gmra.mrb[80].mxu0 %vm4724_vm2, %v3658_v9  ;;  %v3707_v13 = vcombine.low %v3699_v11, %v3706_v31 }
  0xf4   : > { %10536 = vmatprep.mubr.msk.bf16.mxu0 %vm10764_vm1, %v15500_v1 }
  0xf6   : > { %v4894_v14 = vpop.f32.mrb[0].mxu0 }
  0xf7   : > { %v10454_v15 = vpop.f32.mrb[1].mxu0  ;;  %v4895_v22 = vadd.f32 %v11548_v17, %v4894_v14 }
  0xf8   : > { %v4897_v16 = vpop.f32.mrb[2].mxu0 }
  0xf9   : > { %v10455_v20 = vpop.f32.mrb[3].mxu0  ;;  %v4898_v25 = vadd.f32 %v11548_v17, %v4897_v16  ;;  %v5233_v29 = vmax.f32 %v4895_v22, 0.0 }
  0xfb   : > { %10537 = vmatmul.mubr.msk.bf16.gmra.mrb[84].mxu0 %vm4724_vm2, %v3707_v13  ;;  %v5234_v32 = vmax.f32 %v4898_v25, 0.0  ;;  %v5397_v42 = vcombine.high %v5233_v29, %v5233_v29  ;;  %v5404_v40 = vrot.slane %v5233_v29, %v11555_v30 }
  0xfc   : > { %v5070_v21 = vpop.f32.mrb[0].mxu1 }
  0xfd   : > { %v10542_v23 = vpop.f32.mrb[1].mxu1  ;;  %v5071_v27 = vadd.f32 %v11548_v17, %v5070_v21  ;;  %v5414_v43 = vcombine.high %v5234_v32, %v5234_v32  ;;  %v5411_v53 = vrot.slane %v5397_v42, %v11555_v30  ;;  %v5412_v59 = vcombine.high %v5404_v40, %v5404_v40 }
  0xfe   : > { %v5073_v26 = vpop.f32.mrb[2].mxu1  ;;  %v5421_v60 = vrot.slane %v5234_v32, %v11555_v30 }
  0xff   : > { %v10543_v28 = vpop.f32.mrb[3].mxu1  ;;  %v5277_v35 = vmax.f32 %v5071_v27, 0.0  ;;  %v5074_v36 = vadd.f32 %v11548_v17, %v5073_v26  ;;  %v11571_v56 = vrot.slane %v5414_v43, %v11555_v30  ;;  %v5413_v16 = vcombine.high %v5411_v53, %v5411_v53 }
 0x100   : > { %v5429_v13 = vcombine.high %v5421_v60, %v5421_v60 }
 0x101   : > { %v4902_v33 = vpop.f32.mrb[4].mxu0  ;;  %v6145_v48 = vcombine.high %v5277_v35, %v5277_v35  ;;  %v5278_v50 = vmax.f32 %v5074_v36, 0.0  ;;  %v11574_v62 = vrot.slane %v5277_v35, %v11555_v30  ;;  %v5430_v22 = vcombine.high %v11571_v56, %v11571_v56 }
 0x102   : > { %v10458_v34 = vpop.f32.mrb[5].mxu0  ;;  %v4903_v38 = vadd.f32 %v11548_v17, %v4902_v33 }
 0x103   : > { %v4905_v41 = vpop.f32.mrb[6].mxu0  ;;  %15642 = vst [vmem:[#allocation4_spill] sm:$0xff] %v11574_v62  ;;  %v11581_v6 = vrot.slane %v6145_v48, %v11555_v30  ;;  %v6162_v5 = vcombine.high %v5278_v50, %v5278_v50  ;;  %v11584_v7 = vrot.slane %v5278_v50, %v11555_v30 }
 0x104   : > { %v4906_v37 = vadd.f32 %v11548_v17, %v4905_v41  ;;  %v10459_v39 = vpop.f32.mrb[7].mxu0  ;;  %v5235_v51 = vmax.f32 %v4903_v38, 0.0 }
 0x105   : > { %15643 = vst [vmem:[#allocation5_spill] sm:$0xff] %v11581_v6  ;;  %15644 = vst [vmem:[#allocation6_spill] sm:$0xff] %v11584_v7  ;;  %v11602_v26 = vrot.slane %v6162_v5, %v11555_v30 }
 0x106   : > { %v5078_v44 = vpop.f32.mrb[4].mxu1  ;;  %v5236_v45 = vmax.f32 %v4906_v37, 0.0  ;;  %v5431_v3 = vcombine.high %v5235_v51, %v5235_v51  ;;  %v5438_v9 = vrot.slane %v5235_v51, %v11555_v30 }
 0x107   : > { %v5079_v46 = vadd.f32 %v11548_v17, %v5078_v44  ;;  %v10546_v47 = vpop.f32.mrb[5].mxu1  ;;  %15645 = vst [vmem:[#allocation7_spill] sm:$0xff] %v11602_v26 }
 0x108   : > { %v5081_v49 = vpop.f32.mrb[6].mxu1  ;;  %v5448_v54 = vcombine.high %v5236_v45, %v5236_v45  ;;  %v11564_v55 = vrot.slane %v5236_v45, %v11555_v30  ;;  %v11607_v29 = vrot.slane %v5431_v3, %v11555_v30  ;;  %v5446_v32 = vcombine.high %v5438_v9, %v5438_v9 }
 0x109   : > { %v10547_v57 = vpop.f32.mrb[7].mxu1  ;;  %v5279_v61 = vmax.f32 %v5079_v46, 0.0  ;;  %v5082_v2 = vadd.f32 %v11548_v17, %v5081_v49 }
 0x10a   : > { %v5462_v63 = vrot.slane %v5448_v54, %v11555_v30  ;;  %v5463_v0 = vcombine.high %v11564_v55, %v11564_v55 }
 0x10b   : > { %v6179_v14 = vcombine.high %v5279_v61, %v5279_v61  ;;  %v5280_v20 = vmax.f32 %v5082_v2, 0.0  ;;  %v11610_v34 = vrot.slane %v5279_v61, %v11555_v30 }
 0x10c   : > { %v4910_v4 = vpop.f32.mrb[8].mxu0  ;;  %v5464_v8 = vcombine.high %v5462_v63, %v5462_v63  ;;  %v11587_v10 = vmax.f32 %v5404_v40, %v5463_v0  ;;  %v11589_v11 = vmax.f32 %v5412_v59, %v5462_v63 }
 0x10d   : > { %v10462_v31 = vpop.f32.mrb[9].mxu0  ;;  %v4911_v15 = vadd.f32 %v11548_v17, %v4910_v4  ;;  %15646 = vst [vmem:[#allocation8_spill] sm:$0xff] %v11610_v34  ;;  %v11613_v35 = vrot.slane %v6179_v14, %v11555_v30  ;;  %v6196_v42 = vcombine.high %v5280_v20, %v5280_v20  ;;  %v11619_v44 = vrot.slane %v5280_v20, %v11555_v30 }
 0x10e   : > { %v4913_v18 = vpop.f32.mrb[10].mxu0  ;;  %v11592_v19 = vmax.f32 %v5411_v53, %v5464_v8 }
 0x10f   : > { %v4914_v21 = vadd.f32 %v11548_v17, %v4913_v18  ;;  %v10463_v23 = vpop.f32.mrb[11].mxu0  ;;  %v5237_v28 = vmax.f32 %v4911_v15, 0.0  ;;  %15647 = vst [vmem:[#allocation9_spill] sm:$0xff] %v11613_v35  ;;  %15648 = vst [vmem:[#allocation10_spill] sm:$0xff] %v11619_v44  ;;  %v11633_v31 = vrot.slane %v6196_v42, %v11555_v30 }
 0x111   : > { %v5238_v33 = vmax.f32 %v4914_v21, 0.0  ;;  %v5465_v36 = vcombine.high %v5237_v28, %v5237_v28  ;;  %v5472_v38 = vrot.slane %v5237_v28, %v11555_v30  ;;  %v5086_v41 = vpop.f32.mrb[8].mxu1  ;;  %15649 = vst [vmem:[#allocation11_spill] sm:$0xff] %v11633_v31 }
 0x112   : > { %v5087_v40 = vadd.f32 %v11548_v17, %v5086_v41  ;;  %v10550_v43 = vpop.f32.mrb[9].mxu1  ;;  %v11668_v41 = vcombine.high %v11619_v44, %v11619_v44 }
 0x113   : > { %v5482_v37 = vcombine.high %v5238_v33, %v5238_v33  ;;  %v5489_v39 = vrot.slane %v5238_v33, %v11555_v30  ;;  %v5479_v45 = vrot.slane %v5465_v36, %v11555_v30  ;;  %v5480_v46 = vcombine.high %v5472_v38, %v5472_v38  ;;  %v5089_v48 = vpop.f32.mrb[10].mxu1 }
 0x114   : > { %v7109_v47 = vmax.f32 %v5413_v16, %v5472_v38  ;;  %v5281_v53 = vmax.f32 %v5087_v40, 0.0  ;;  %v10551_v54 = vpop.f32.mrb[11].mxu1  ;;  %v5090_v63 = vadd.f32 %v11548_v17, %v5089_v48  ;;  %v5447_v33 = vcombine.high %v11607_v29, %v11607_v29  ;;  %15655 = vst [vmem:[#allocation17_spill] sm:$0xff] %v11668_v41 }
 0x115   : > { %v5496_v50 = vrot.slane %v5482_v37, %v11555_v30  ;;  %v5497_v51 = vcombine.high %v5489_v39, %v5489_v39  ;;  %v11623_v49 = vmax.f32 %v5430_v22, %v5489_v39  ;;  %v5481_v57 = vcombine.high %v5479_v45, %v5479_v45 }
 0x116   : > { %v7110_v59 = vmax.f32 %v5421_v60, %v5480_v46  ;;  %v11625_v61 = vmax.f32 %v5429_v13, %v5479_v45  ;;  %v4918_v0 = vpop.f32.mrb[12].mxu0  ;;  %v6213_v4 = vcombine.high %v5281_v53, %v5281_v53  ;;  %v5282_v15 = vmax.f32 %v5090_v63, 0.0 }
 0x117   : > { %v5498_v2 = vcombine.high %v5496_v50, %v5496_v50  ;;  %v11628_v5 = vmax.f32 %v5438_v9, %v5497_v51  ;;  %v11630_v3 = vmax.f32 %v5446_v32, %v5496_v50  ;;  %v10466_v8 = vpop.f32.mrb[13].mxu0  ;;  %v11636_v14 = vmax.f32 %v11571_v56, %v5481_v57 }
 0x118   : > { %v4919_v60 = vadd.f32 %v11548_v17, %v4918_v0  ;;  %v4921_v13 = vpop.f32.mrb[14].mxu0  ;;  %v11643_v9 = vrot.slane %v5281_v53, %v11555_v30  ;;  %v11646_v18 = vrot.slane %v6213_v4, %v11555_v30  ;;  %v11651_v56 = vcombine.high %v11602_v26, %v11602_v26 }
 0x119   : > { %v11640_v16 = vmax.f32 %v11607_v29, %v5498_v2  ;;  %v4922_v20 = vadd.f32 %v11548_v17, %v4921_v13  ;;  %v10467_v21 = vpop.f32.mrb[15].mxu0  ;;  %v6230_v22 = vcombine.high %v5282_v15, %v5282_v15  ;;  %v11654_v23 = vrot.slane %v5282_v15, %v11555_v30 }
 0x11a   : > { %15650 = vst [vmem:[#allocation12_spill] sm:$0xff] %v11643_v9  ;;  %15651 = vst [vmem:[#allocation13_spill] sm:$0xff] %v11646_v18  ;;  %v5239_v28 = vmax.f32 %v4919_v60, 0.0  ;;  %v11658_v32 = vcombine.high %v11610_v34, %v11610_v34  ;;  %v11664_v38 = vcombine.high %v11613_v35, %v11613_v35  ;;  %v6229_v42 = vcombine.high %v11646_v18, %v11646_v18 }
 0x11b   : > { %15652 = vst [vmem:[#allocation14_spill] sm:$0xff] %v11651_v56  ;;  %v5240_v36 = vmax.f32 %v4922_v20, 0.0  ;;  %v11674_v39 = vcombine.high %v11633_v31, %v11633_v31  ;;  %v11678_v29 = vcombine.high %v11643_v9, %v11643_v9  ;;  %v11685_v48 = vrot.slane %v6230_v22, %v11555_v30 }
 0x11c   : > { %15653 = vst [vmem:[#allocation15_spill] sm:$0xff] %v11658_v32  ;;  %15654 = vst [vmem:[#allocation16_spill] sm:$0xff] %v11664_v38  ;;  %v5499_v37 = vcombine.high %v5239_v28, %v5239_v28  ;;  %v5506_v40 = vrot.slane %v5239_v28, %v11555_v30  ;;  %v5094_v46 = vpop.f32.mrb[12].mxu1  ;;  %v6245_v50 = vcombine.high %v11654_v23, %v11654_v23 }
 0x11d   : > { %15656 = vst [vmem:[#allocation18_spill] sm:$0xff] %v11674_v39  ;;  %15657 = vst [vmem:[#allocation19_spill] sm:$0xff] %v11678_v29  ;;  %v5516_v43 = vcombine.high %v5240_v36, %v5240_v36  ;;  %v11682_v45 = vrot.slane %v5240_v36, %v11555_v30  ;;  %v10554_v54 = vpop.f32.mrb[13].mxu1  ;;  %v5095_v13 = vadd.f32 %v11548_v17, %v5094_v46 }
 0x11e   : > { %15658 = vst [vmem:[#allocation20_spill] sm:$0xff] %v11685_v48  ;;  %v11692_v53 = vrot.slane %v5499_v37, %v11555_v30  ;;  %v5514_v57 = vcombine.high %v5506_v40, %v5506_v40  ;;  %v11694_v63 = vmax.f32 %v5447_v33, %v5506_v40  ;;  %v5097_v4 = vpop.f32.mrb[14].mxu1  ;;  %v11711_v22 = vmax.f32 %v11602_v26, %v6229_v42 }
 0x11f   : > { %v11697_v0 = vrot.slane %v5516_v43, %v11555_v30  ;;  %v11701_v2 = vcombine.high %v11682_v45, %v11682_v45  ;;  %v4926_v8 = vpop.f32.mrb[16].mxu0  ;;  %v11707_v60 = vmax.f32 %v11592_v19, %v11682_v45  ;;  %v10555_v20 = vpop.f32.mrb[15].mxu1  ;;  %v6246_v19 = vcombine.high %v11685_v48, %v11685_v48 }
 0x120   : > { %15659 = vst [vmem:[#allocation21_spill] sm:$0xff] %v11692_v53  ;;  %v7119_v15 = vmax.f32 %v11587_v10, %v11692_v53  ;;  %v10470_v21 = vpop.f32.mrb[17].mxu0  ;;  %v11714_v28 = vmax.f32 %v11564_v55, %v5514_v57  ;;  %v5098_v10 = vadd.f32 %v11548_v17, %v5097_v4  ;;  %v11722_v40 = vmax.f32 %v11610_v34, %v6245_v50 }
 0x121   : > { %15660 = vst [vmem:[#allocation22_spill] sm:$0xff] %v11701_v2  ;;  %v7122_v33 = vmax.f32 %v7109_v47, %v11701_v2  ;;  %v7123_v36 = vmax.f32 %v7110_v59, %v11697_v0  ;;  %v4929_v37 = vpop.f32.mrb[18].mxu0  ;;  %v10227_v43 = vrot.slane %v11707_v60, 9  ;;  %v5283_v42 = vmax.f32 %v5095_v13, 0.0 }
 0x122   : > { %v10471_v46 = vpop.f32.mrb[19].mxu0  ;;  %v10203_v54 = vrot.slane %v7119_v15, 9  ;;  %v5284_v57 = vmax.f32 %v5098_v10, 0.0  ;;  %v4927_v13 = vadd.f32 %v11548_v17, %v4926_v8  ;;  %v11779_v12 = vcombine.high %v11692_v53, %v11692_v53 }
 0x123   : > { %v10239_v47 = vrot.slane %v7122_v33, 9  ;;  %v7610_v59 = vmax.f32 %v11707_v60, %v10227_v43  ;;  %v10251_v4 = vrot.slane %v7123_v36, 9  ;;  %v6247_v20 = vcombine.high %v5283_v42, %v5283_v42 }
 0x124   : > { %v11729_v21 = vrot.slane %v5283_v42, %v11555_v30  ;;  %v6264_v50 = vcombine.high %v5284_v57, %v5284_v57  ;;  %v11732_v27 = vrot.slane %v5284_v57, %v11555_v30  ;;  %v4930_v43 = vadd.f32 %v11548_v17, %v4929_v37 }
 0x125   : > { %v7682_v1 = vmax.f32 %v7122_v33, %v10239_v47  ;;  %v7622_v46 = vmax.f32 %v7610_v59, %v7122_v33  ;;  %v11736_v25 = vrot.slane %v6247_v20, %v11555_v30  ;;  %v11742_v42 = vmax.f32 %v11613_v35, %v6246_v19 }
 0x126   : > { %v6262_v10 = vcombine.high %v11729_v21, %v11729_v21  ;;  %v5102_v24 = vpop.f32.mrb[16].mxu1  ;;  %v11745_v55 = vrot.slane %v6264_v50, %v11555_v30  ;;  %v6279_v8 = vcombine.high %v11732_v27, %v11732_v27  ;;  %v11749_v57 = vmax.f32 %v7119_v15, %v10203_v54 }
 0x127   : > { %15661 = vst [vmem:[#allocation23_spill] sm:$0xff] %v11736_v25  ;;  %v7694_v47 = vmax.f32 %v7682_v1, %v7123_v36  ;;  %v10558_v33 = vpop.f32.mrb[17].mxu1  ;;  %v11751_v59 = vmax.f32 %v7123_v36, %v10251_v4  ;;  %v11758_v1 = vrot.slane %v7622_v46, %v11567_v58  ;;  %v6263_v50 = vcombine.high %v11736_v25, %v11736_v25 }
 0x128   : > { %15662 = vst [vmem:[#allocation24_spill] sm:$0xff] %v11745_v55  ;;  %v5105_v19 = vpop.f32.mrb[18].mxu1  ;;  %v11763_v51 = vmax.f32 %v11619_v44, %v6262_v10  ;;  %v5241_v4 = vmax.f32 %v4927_v13, 0.0  ;;  %v5242_v33 = vmax.f32 %v4930_v43, 0.0  ;;  %v5103_v37 = vadd.f32 %v11548_v17, %v5102_v24 }
 0x129   : > { %v10559_v36 = vpop.f32.mrb[19].mxu1  ;;  %v11768_v54 = vrot.slane %v7694_v47, %v11567_v58  ;;  %v6280_v46 = vcombine.high %v11745_v55, %v11745_v55  ;;  %v11774_v20 = vmax.f32 %v11643_v9, %v6279_v8  ;;  %v5106_v10 = vadd.f32 %v11548_v17, %v5105_v19 }
 0x12a   : > { %v5533_v36 = vcombine.high %v5241_v4, %v5241_v4  ;;  %v11782_v47 = vrot.slane %v5241_v4, %v11555_v30  ;;  %v5550_v13 = vcombine.high %v5242_v33, %v5242_v33  ;;  %v11785_v43 = vrot.slane %v5242_v33, %v11555_v30 }
 0x12b   : > { %15663 = vst [vmem:[#allocation25_spill] sm:$0xff] %v11768_v54  ;;  %v4934_v24 = vpop.f32.mrb[20].mxu0  ;;  %v11788_v15 = vmax.f32 %v11633_v31, %v6263_v50  ;;  %v5285_v19 = vmax.f32 %v5103_v37, 0.0  ;;  %v11794_v52 = vmax.f32 %v11589_v11, %v11779_v12  ;;  %v5286_v9 = vmax.f32 %v5106_v10, 0.0 }
 0x12c   : > { %v10474_v44 = vpop.f32.mrb[21].mxu0  ;;  %v11797_v4 = vrot.slane %v5533_v36, %v11555_v30  ;;  %v11801_v33 = vcombine.high %v11782_v47, %v11782_v47  ;;  %v11805_v50 = vmax.f32 %v11636_v14, %v11782_v47  ;;  %v11808_v34 = vrot.slane %v5550_v13, %v11555_v30 }
 0x12d   : > { %v11810_v37 = vpop.f32.mrb[22].mxu0  ;;  %v11814_v11 = vcombine.high %v11785_v43, %v11785_v43  ;;  %v11818_v44 = vmax.f32 %v11640_v16, %v11785_v43  ;;  %v6281_v36 = vcombine.high %v5285_v19, %v5285_v19  ;;  %v11821_v8 = vrot.slane %v5285_v19, %v11555_v30 }
 0x12e   : > { %15664 = vst [vmem:[#allocation26_spill] sm:$0xff] %v11801_v33  ;;  %v10475_v35 = vpop.f32.mrb[23].mxu0  ;;  %v7126_v14 = vmax.f32 %v11623_v49, %v11801_v33  ;;  %v11827_v13 = vmax.f32 %v11628_v5, %v11797_v4  ;;  %v10275_v26 = vrot.slane %v11805_v50, 9  ;;  %v7131_v19 = vmax.f32 %v11714_v28, %v11808_v34 }
 0x12f   : > { %15665 = vst [vmem:[#allocation27_spill] sm:$0xff] %v11814_v11  ;;  %15666 = vst [vmem:[#allocation28_spill] sm:$0xff] %v11818_v44  ;;  %v7130_v16 = vmax.f32 %v11694_v63, %v11814_v11  ;;  %v10323_v35 = vrot.slane %v11818_v44, 9  ;;  %v11838_v7 = vrot.slane %v6281_v36, %v11555_v30  ;;  %v11844_v10 = vcombine.high %v11821_v8, %v11821_v8 }
 0x130   : > { %v11830_v31 = vpop.f32.mrb[20].mxu1  ;;  %v7898_v5 = vmax.f32 %v11805_v50, %v10275_v26  ;;  %v10287_v6 = vrot.slane %v7126_v14, 9  ;;  %v10299_v62 = vrot.slane %v11827_v13, 9  ;;  %v7301_v29 = vmax.f32 %v11711_v22, %v11821_v8 }
 0x131   : > { %v10562_v49 = vpop.f32.mrb[21].mxu1  ;;  %15667 = vst [vmem:[#allocation29_spill] sm:$0xff] %v11844_v10  ;;  %v8186_v63 = vmax.f32 %v11818_v44, %v10323_v35  ;;  %v10335_v28 = vrot.slane %v7130_v16, 9  ;;  %v7303_v36 = vmax.f32 %v11722_v40, %v11838_v7  ;;  %v11854_v26 = vmax.f32 %v11646_v18, %v6280_v46 }
 0x132   : > { %v11846_v55 = vpop.f32.mrb[22].mxu1  ;;  %v7910_v25 = vmax.f32 %v7898_v5, %v7126_v14  ;;  %v7970_v41 = vmax.f32 %v7126_v14, %v10287_v6  ;;  %v15668_v54 = vmax.f32 %v11651_v56, %v11654_v23  ;;  %v10210_v44 = vrot.slane %v7301_v29, 9 }
 0x133   : > { %v10563_v49 = vpop.f32.mrb[23].mxu1  ;;  %v8198_v32 = vmax.f32 %v8186_v63, %v7130_v16  ;;  %v8258_v35 = vmax.f32 %v7130_v16, %v10335_v28  ;;  %v4935_v53 = vadd.f32 %v11548_v17, %v4934_v24  ;;  %v6298_v40 = vcombine.high %v5286_v9, %v5286_v9 }
 0x134   : > { %v7302_v48 = vmax.f32 %v15668_v54, %v11844_v10  ;;  %v7982_v22 = vmax.f32 %v7970_v41, %v11827_v13  ;;  %v11864_v46 = vcombine.high %v11697_v0, %v11697_v0  ;;  %v11869_v6 = vmax.f32 %v11827_v13, %v10299_v62 }
 0x135   : > { %v11866_v5 = vpop.f32.mrb[24].mxu0  ;;  %v11873_v54 = vmax.f32 %v8258_v35, %v7131_v19  ;;  %v7473_v14 = vmax.f32 %v7301_v29, %v10210_v44  ;;  %v10234_v41 = vrot.slane %v7303_v36, 9  ;;  %v11876_v63 = vrot.slane %v5286_v9, %v11555_v30 }
 0x136   : > { %v10222_v11 = vrot.slane %v7302_v48, 9  ;;  %v10478_v24 = vpop.f32.mrb[25].mxu0  ;;  %v11879_v28 = vrot.slane %v6298_v40, %v11555_v30  ;;  %v11884_v62 = vrot.slane %v7910_v25, %v11567_v58  ;;  %v5243_v56 = vmax.f32 %v4935_v53, 0.0 }
 0x137   : > { %v11881_v49 = vpop.f32.mrb[26].mxu0  ;;  %v7485_v13 = vmax.f32 %v7473_v14, %v7302_v48  ;;  %v7478_v19 = vmax.f32 %v11749_v57, %v11794_v52  ;;  %v11890_v9 = vcombine.high %v11876_v63, %v11876_v63  ;;  %v11894_v44 = vmax.f32 %v11742_v42, %v11876_v63 }
 0x138   : > { %v7545_v16 = vmax.f32 %v7302_v48, %v10222_v11  ;;  %v10479_v29 = vpop.f32.mrb[27].mxu0  ;;  %v11898_v25 = vmax.f32 %v11763_v51, %v11879_v28  ;;  %v11901_v48 = vrot.slane %v8198_v32, %v11567_v58  ;;  %v5567_v53 = vcombine.high %v5243_v56, %v5243_v56 }
 0x139   : > { %15669 = vst [vmem:[#allocation30_spill] sm:$0xff] %v11890_v9  ;;  %v11904_v57 = vrot.slane %v5243_v56, %v11555_v30  ;;  %v10215_v35 = vrot.slane %v11794_v52, 9  ;;  %v15671_v42 = vmax.f32 %v11664_v38, %v11729_v21  ;;  %v10258_v51 = vrot.slane %v11894_v44, 9 }
 0x13a   : > { %v7557_v11 = vmax.f32 %v7545_v16, %v7303_v36  ;;  %15670 = vst [vmem:[#allocation31_spill] sm:$0xff] %v11901_v48  ;;  %v4938_v32 = vadd.f32 %v11548_v17, %v11810_v37  ;;  %v11920_v56 = vrot.slane %v5567_v53, %v11555_v30  ;;  %v4946_v33 = vadd.f32 %v11548_v17, %v11881_v49 }
 0x13b   : > { %v11912_v14 = vmax.f32 %v15671_v42, %v11890_v9  ;;  %v11917_v24 = vpop.f32.mrb[24].mxu1  ;;  %v5582_v16 = vcombine.high %v11904_v57, %v11904_v57  ;;  %v7538_v21 = vmax.f32 %v11794_v52, %v10215_v35  ;;  %v11927_v42 = vmax.f32 %v7303_v36, %v10234_v41 }
 0x13c   : > { %v8325_v40 = vrot.slane %v7557_v11, %v11567_v58  ;;  %15672 = vst [vmem:[#allocation32_spill] sm:$0xff] %v11920_v56  ;;  %v10566_v11 = vpop.f32.mrb[25].mxu1  ;;  %v7761_v37 = vmax.f32 %v11894_v44, %v10258_v51  ;;  %v5583_v18 = vcombine.high %v11920_v56, %v11920_v56  ;;  %v11950_v51 = vmax.f32 %v11625_v61, %v11864_v46 }
 0x13d   : > { %v10270_v38 = vrot.slane %v11912_v14, 9  ;;  %v11934_v53 = vpop.f32.mrb[26].mxu1  ;;  %v11939_v48 = vmax.f32 %v11682_v45, %v5582_v16  ;;  %v7550_v36 = vmax.f32 %v7538_v21, %v11707_v60  ;;  %v11955_v45 = vrot.slane %v7982_v22, %v11567_v58 }
 0x13e   : > { %v11930_v23 = vsel %vm4854_vm0, %v7485_v13, %v8325_v40  ;;  %v10567_v41 = vpop.f32.mrb[27].mxu1  ;;  %v7773_v13 = vmax.f32 %v7761_v37, %v11912_v14  ;;  %v5244_v40 = vmax.f32 %v4938_v32, 0.0  ;;  %v11958_v16 = vmax.f32 %v11697_v0, %v5583_v18 }
 0x13f   : > { %v11946_v35 = vmax.f32 %v11912_v14, %v10270_v38  ;;  %v8297_v60 = vrot.slane %v7550_v36, %v11567_v58  ;;  %v5111_v21 = vadd.f32 %v11548_v17, %v11830_v31  ;;  %v5114_v22 = vadd.f32 %v11548_v17, %v11846_v55 }
 0x140   : > { %v11952_v11 = vpop.f32.mrb[28].mxu0  ;;  %v5584_v32 = vcombine.high %v5244_v40, %v5244_v40  ;;  %v11966_v61 = vrot.slane %v5244_v40, %v11555_v30  ;;  %v10263_v31 = vrot.slane %v11950_v51, 9  ;;  %v4943_v56 = vadd.f32 %v11548_v17, %v11866_v5 }
 0x141   : > { %v10482_v38 = vpop.f32.mrb[29].mxu0  ;;  %v7845_v14 = vmax.f32 %v11946_v35, %v11898_v25  ;;  %v9002_v18 = vsel %vm4854_vm0, %v7478_v19, %v8297_v60  ;;  %v5287_v36 = vmax.f32 %v5111_v21, 0.0  ;;  %v10282_v60 = vrot.slane %v11898_v25, 9 }
 0x142   : > { %v11970_v37 = vpop.f32.mrb[30].mxu0  ;;  %v11980_v40 = vsel %vm9014_vm3, %v9002_v18, %v11758_v1  ;;  %v11983_v55 = vrot.slane %v5584_v32, %v11555_v30  ;;  %v5599_v19 = vcombine.high %v11966_v61, %v11966_v61  ;;  %v11991_v21 = vmax.f32 %v11950_v51, %v10263_v31 }
 0x143   : > { %v10483_v41 = vpop.f32.mrb[31].mxu0  ;;  %v12003_v35 = vrot.slane %v5287_v36, %v11555_v30  ;;  %v5288_v0 = vmax.f32 %v5114_v22, 0.0  ;;  %v12030_v5 = vmax.f32 %v11898_v25, %v10282_v60  ;;  %v12130_v49 = vcombine.high %v11838_v7, %v11838_v7 }
 0x144   : > { %15673 = vst [vmem:[#allocation33_spill] sm:$0xff] %v11983_v55  ;;  %v6315_v41 = vcombine.high %v5287_v36, %v5287_v36  ;;  %v11993_v52 = vpop.f32.mrb[28].mxu1  ;;  %v5600_v1 = vcombine.high %v11983_v55, %v11983_v55  ;;  %v11998_v32 = vmax.f32 %v11782_v47, %v5599_v19  ;;  %v7838_v31 = vmax.f32 %v11991_v21, %v11805_v50 }
 0x145   : > { %v10570_v29 = vpop.f32.mrb[29].mxu1  ;;  %v12019_v36 = vcombine.high %v12003_v35, %v12003_v35  ;;  %v12027_v50 = vcombine.high %v11797_v4, %v11797_v4  ;;  %v6332_v21 = vcombine.high %v5288_v0, %v5288_v0 }
 0x146   : > { %v12008_v38 = vrot.slane %v6315_v41, %v11555_v30  ;;  %v12012_v2 = vpop.f32.mrb[30].mxu1  ;;  %v12015_v47 = vmax.f32 %v11797_v4, %v5600_v1  ;;  %v12023_v29 = vmax.f32 %v11788_v15, %v12003_v35  ;;  %v12037_v41 = vrot.slane %v5288_v0, %v11555_v30 }
 0x147   : > { %15674 = vst [vmem:[#allocation34_spill] sm:$0xff] %v12019_v36  ;;  %15675 = vst [vmem:[#allocation35_spill] sm:$0xff] %v12027_v50  ;;  %v10571_v22 = vpop.f32.mrb[31].mxu1  ;;  %v15676_v15 = vmax.f32 %v11674_v39, %v11732_v27  ;;  %v12048_v25 = vmax.f32 %v11630_v3, %v12027_v50  ;;  %v12054_v0 = vrot.slane %v6332_v21, %v11555_v30 }
 0x148   : > { %v12034_v19 = vmax.f32 %v11774_v20, %v12008_v38  ;;  %v10306_v4 = vrot.slane %v12023_v29, 9  ;;  %v5245_v22 = vmax.f32 %v4943_v56, 0.0  ;;  %v12051_v20 = vrot.slane %v7773_v13, %v11567_v58 }
 0x149   : > { %v12043_v1 = vmax.f32 %v15676_v15, %v12019_v36  ;;  %15679 = vst [vmem:[#allocation38_spill] sm:$0xff] %v12054_v0  ;;  %v6347_v60 = vcombine.high %v12037_v41, %v12037_v41  ;;  %v12070_v21 = vrot.slane %v7845_v14, %v11567_v58 }
 0x14a   : > { %15678 = vst [vmem:[#allocation37_spill] sm:$0xff] %v12051_v20  ;;  %v12063_v56 = vmax.f32 %v12023_v29, %v10306_v4  ;;  %v5601_v18 = vcombine.high %v5245_v22, %v5245_v22  ;;  %v12067_v13 = vrot.slane %v5245_v22, %v11555_v30  ;;  %v6348_v20 = vcombine.high %v12054_v0, %v12054_v0 }
 0x14b   : > { %15677 = vst [vmem:[#allocation36_spill] sm:$0xff] %v12043_v1  ;;  %v12060_v15 = vpop.f32.mrb[32].mxu0  ;;  %v10318_v3 = vrot.slane %v12043_v1, 9  ;;  %15682 = vst [vmem:[#allocation41_spill] sm:$0xff] %v12070_v21  ;;  %v12075_v27 = vmax.f32 %v11821_v8, %v6347_v60 }
 0x14c   : > { %15680 = vst [vmem:[#allocation39_spill] sm:$0xff] %v12063_v56  ;;  %15681 = vst [vmem:[#allocation40_spill] sm:$0xff] %v12067_v13  ;;  %v10486_v39 = vpop.f32.mrb[33].mxu0  ;;  %v5616_v14 = vcombine.high %v12067_v13, %v12067_v13  ;;  %v12094_v60 = vmax.f32 %v11838_v7, %v6348_v20  ;;  %v5119_v13 = vadd.f32 %v11548_v17, %v11917_v24  ;;  %v15693_v24 = vld [vmem:[#allocation28_spill] sm:$0xff]  ;;  %v15697_v7 = vld [vmem:[#allocation25_spill] sm:$0xff] }
 0x14d   : > { %v12079_v55 = vpop.f32.mrb[34].mxu0  ;;  %v12084_v22 = vmax.f32 %v12043_v1, %v10318_v3  ;;  %v12087_v39 = vrot.slane %v5601_v18, %v11555_v30  ;;  %v10311_v3 = vrot.slane %v12048_v25, 9  ;;  %v15690_v18 = vld [vmem:[#allocation21_spill] sm:$0xff] }
 0x14e   : > { %15683 = vst [vmem:[#allocation42_spill] sm:$0xff] %v12079_v55  ;;  %v12091_v21 = vpop.f32.mrb[32].mxu1  ;;  %v10487_v8 = vpop.f32.mrb[35].mxu0  ;;  %v5289_v20 = vmax.f32 %v5119_v13, 0.0 }
 0x14f   : > { %15684 = vst [vmem:[#allocation43_spill] sm:$0xff] %v12087_v39  ;;  %15685 = vst [vmem:[#allocation44_spill] sm:$0xff] %v12091_v21  ;;  %v10574_v0 = vpop.f32.mrb[33].mxu1  ;;  %v5617_v10 = vcombine.high %v12087_v39, %v12087_v39  ;;  %v12106_v8 = vmax.f32 %v11785_v43, %v5616_v14  ;;  %v8114_v4 = vmax.f32 %v12048_v25, %v10311_v3 }
 0x150   : > { %v12110_v56 = vpop.f32.mrb[34].mxu1  ;;  %v15689_v0 = vcombine.high %v11808_v34, %v11808_v34  ;;  %v15691_v14 = vmax.f32 %v11751_v59, %v11950_v51  ;;  %v5122_v3 = vadd.f32 %v11548_v17, %v11934_v53  ;;  %v10330_v59 = vrot.slane %v12034_v19, 9  ;;  %v15694_v51 = vld [vmem:[#allocation15_spill] sm:$0xff] }
 0x151   : > { %15686 = vst [vmem:[#allocation45_spill] sm:$0xff] %v12106_v8  ;;  %15688 = vst [vmem:[#allocation46_spill] sm:$0xff] %v12110_v56  ;;  %v10575_v43 = vpop.f32.mrb[35].mxu1  ;;  %v12126_v39 = vmax.f32 %v11808_v34, %v5617_v10  ;;  %v15695_v34 = vld [vmem:[#allocation20_spill] sm:$0xff] }
 0x152   : > { %v7132_v55 = vmax.f32 %v15690_v18, %v15689_v0  ;;  %v8513_v1 = vrot.slane %v15691_v14, %v11567_v58  ;;  %v8585_v18 = vrot.slane %v7838_v31, %v11567_v58  ;;  %v8126_v0 = vmax.f32 %v8114_v4, %v15693_v24 }
 0x153   : > { %15692 = vst [vmem:[#allocation21_spill] sm:$0xff] %v12126_v39  ;;  %v5246_v43 = vmax.f32 %v4946_v33, 0.0  ;;  %v15696_v10 = vmax.f32 %v15694_v51, %v15695_v34  ;;  %v5290_v56 = vmax.f32 %v5122_v3, 0.0  ;;  %v9028_v39 = vsel %vm9027_vm4, %v11980_v40, %v15697_v7 }
 0x154   : > { %v6349_v4 = vcombine.high %v5289_v20, %v5289_v20  ;;  %v12149_v33 = vcombine.high %v11879_v28, %v11879_v28  ;;  %v12154_v24 = vrot.slane %v5289_v20, %v11555_v30 }
 0x155   : > { %v7304_v14 = vmax.f32 %v15696_v10, %v12130_v49  ;;  %v5618_v53 = vcombine.high %v5246_v43, %v5246_v43  ;;  %v12145_v31 = vrot.slane %v5246_v43, %v11555_v30  ;;  %v12151_v13 = vpop.f32.mrb[36].mxu0  ;;  %v6366_v40 = vcombine.high %v5290_v56, %v5290_v56 }
 0x156   : > { %15699 = vst [vmem:[#allocation20_spill] sm:$0xff] %v12151_v13  ;;  %v10490_v10 = vpop.f32.mrb[37].mxu0  ;;  %v12166_v13 = vrot.slane %v6349_v4, %v11555_v30 }
 0x157   : > { %15698 = vst [vmem:[#allocation28_spill] sm:$0xff] %v12145_v31  ;;  %v7629_v3 = vmax.f32 %v11927_v42, %v7304_v14  ;;  %v10246_v34 = vrot.slane %v7304_v14, 9  ;;  %v12158_v43 = vrot.slane %v5618_v53, %v11555_v30  ;;  %v12162_v7 = vcombine.high %v12145_v31, %v12145_v31  ;;  %v12168_v20 = vpop.f32.mrb[38].mxu0 }
 0x158   : > { %v7145_v51 = vmax.f32 %v7132_v55, %v12145_v31  ;;  %15701 = vst [vmem:[#allocation47_spill] sm:$0xff] %v12166_v13  ;;  %15702 = vst [vmem:[#allocation48_spill] sm:$0xff] %v12168_v20  ;;  %v6364_v42 = vcombine.high %v12154_v24, %v12154_v24  ;;  %v10491_v50 = vpop.f32.mrb[39].mxu0  ;;  %v15703_v55 = vmax.f32 %v11779_v12, %v11904_v57 }
 0x159   : > { %15700 = vst [vmem:[#allocation25_spill] sm:$0xff] %v12162_v7  ;;  %v12174_v8 = vmax.f32 %v7304_v14, %v10246_v34  ;;  %v8397_v53 = vrot.slane %v7629_v3, %v11567_v58  ;;  %v12183_v4 = vmax.f32 %v11939_v48, %v12158_v43  ;;  %v6365_v21 = vcombine.high %v12166_v13, %v12166_v13  ;;  %v15706_v14 = vld [vmem:[#allocation23_spill] sm:$0xff] }
 0x15a   : > { %v7146_v31 = vmax.f32 %v15703_v55, %v12162_v7  ;;  %v10204_v20 = vrot.slane %v7145_v51, 9  ;;  %v12188_v10 = vmax.f32 %v11876_v63, %v6364_v42  ;;  %v12199_v48 = vmax.f32 %v12034_v19, %v10330_v59  ;;  %v15705_v55 = vld [vmem:[#allocation17_spill] sm:$0xff] }
 0x15b   : > { %v12196_v12 = vsel %vm9014_vm3, %v11930_v23, %v8397_v53  ;;  %v12202_v34 = vmax.f32 %v11879_v28, %v6365_v21  ;;  %v12205_v63 = vrot.slane %v5290_v56, %v11555_v30  ;;  %v12208_v42 = vrot.slane %v6366_v40, %v11555_v30 }
 0x15c   : > { %v7467_v57 = vmax.f32 %v7145_v51, %v10204_v20  ;;  %v10216_v3 = vrot.slane %v7146_v31, 9  ;;  %v15707_v50 = vmax.f32 %v15705_v55, %v15706_v14  ;;  %v4951_v59 = vadd.f32 %v11548_v17, %v11952_v11  ;;  %v12218_v51 = vpop.f32.mrb[36].mxu1 }
 0x15d   : > { %15704 = vst [vmem:[#allocation49_spill] sm:$0xff] %v12208_v42  ;;  %v8801_v28 = vrot.slane %v8126_v0, %v11567_v58  ;;  %v9041_v56 = vsel %vm9040_vm5, %v9028_v39, %v8513_v1  ;;  %v10578_v53 = vpop.f32.mrb[37].mxu1  ;;  %v6381_v40 = vcombine.high %v12205_v63, %v12205_v63  ;;  %v6382_v14 = vcombine.high %v12208_v42, %v12208_v42 }
 0x15e   : > { %v12214_v23 = vmax.f32 %v15707_v50, %v12149_v33  ;;  %v7479_v21 = vmax.f32 %v7467_v57, %v7146_v31  ;;  %v7539_v20 = vmax.f32 %v7146_v31, %v10216_v3  ;;  %v12230_v55 = vpop.f32.mrb[38].mxu1  ;;  %v9054_v31 = vsel %vm9053_vm6, %v9041_v56, %v8585_v18  ;;  %v15745_v13 = vld [vmem:[#allocation28_spill] sm:$0xff] }
 0x15f   : > { %v12237_v57 = vpop.f32.mrb[40].mxu0  ;;  %v10579_v3 = vpop.f32.mrb[39].mxu1  ;;  %v12240_v53 = vmax.f32 %v12003_v35, %v6381_v40  ;;  %v12243_v50 = vmax.f32 %v12008_v38, %v6382_v14  ;;  %v9067_v11 = vsel %vm9066_vm7, %v9054_v31, %v11884_v62  ;;  %v15709_v1 = vmax.f32 %v12084_v22, %v12034_v19 }
 0x160   : > { %v7551_v0 = vmax.f32 %v7539_v20, %v12183_v4  ;;  %v10294_v39 = vrot.slane %v12214_v23, 9  ;;  %15708 = vst [vmem:[#allocation23_spill] sm:$0xff] %v12237_v57  ;;  %v5247_v20 = vmax.f32 %v4951_v59, 0.0  ;;  %v10494_v42 = vpop.f32.mrb[41].mxu0  ;;  %v12259_v35 = vsel %vm9079_vm8, %v9067_v11, %v11955_v45 }
 0x161   : > { %v12251_v36 = vrot.slane %v15709_v1, %v11567_v58  ;;  %15710 = vst [vmem:[#allocation50_spill] sm:$0xff] %v12259_v35  ;;  %v12261_v40 = vpop.f32.mrb[42].mxu0  ;;  %v12265_v62 = vmul.f32 %v12259_v35, %v12259_v35  ;;  %v5127_v22 = vadd.f32 %v11548_v17, %v11993_v52  ;;  %v12279_v11 = vcombine.high %v12008_v38, %v12008_v38 }
 0x162   : > { %v8301_v18 = vrot.slane %v7551_v0, %v11567_v58  ;;  %v12255_v56 = vmax.f32 %v12214_v23, %v10294_v39  ;;  %15711 = vst [vmem:[#allocation51_spill] sm:$0xff] %v12261_v40  ;;  %v5635_v42 = vcombine.high %v5247_v20, %v5247_v20  ;;  %v12268_v19 = vrot.slane %v5247_v20, %v11555_v30  ;;  %v10495_v59 = vpop.f32.mrb[43].mxu0  ;;  %v15717_v20 = vld [vmem:[#allocation31_spill] sm:$0xff] }
 0x163   : > { %15712 = vst [vmem:[#allocation52_spill] sm:$0xff] %v12265_v62  ;;  %v15713_v0 = vmax.f32 %v11869_v6, %v12048_v25  ;;  %9176 = vrot.lane.b32.xlu0 %v12265_v62, %s10768_s28  ;;  %v5291_v39 = vmax.f32 %v5127_v22, 0.0  ;;  %v10228_v6 = vrot.slane %v12183_v4, 9  ;;  %v15714_v25 = vld [vmem:[#allocation19_spill] sm:$0xff]  ;;  %v15720_v35 = vrot.slane %v11873_v54, %v11567_v58 }
 0x164   : > { %v12273_v14 = vsel %vm4854_vm0, %v7479_v21, %v8301_v18  ;;  %v12288_v52 = vrot.slane %v5635_v42, %v11555_v30  ;;  %v12292_v21 = vcombine.high %v12268_v19, %v12268_v19  ;;  %v12296_v38 = vmax.f32 %v11958_v16, %v12268_v19 }
 0x165   : > { %v9092_v1 = vsel %vm4854_vm0, %v15713_v0, %v8801_v28  ;;  %v15715_v28 = vld [vmem:[#allocation24_spill] sm:$0xff]  ;;  %v4954_v42 = vadd.f32 %v11548_v17, %v11970_v37  ;;  %v12307_v59 = vpop.f32.mrb[40].mxu1  ;;  %v15719_v16 = vmax.f32 %v11864_v46, %v11966_v61 }
 0x166   : > { %v15716_v31 = vmax.f32 %v15714_v25, %v15715_v28  ;;  %v9104_v18 = vsel %vm9014_vm3, %v9092_v1, %v15717_v20  ;;  %15718 = vst [vmem:[#allocation24_spill] sm:$0xff] %v12307_v59  ;;  %v12315_v0 = vmax.f32 %v11998_v32, %v12288_v52  ;;  %v10252_v28 = vrot.slane %v12296_v38, 9  ;;  %v10582_v45 = vpop.f32.mrb[41].mxu1 }
 0x167   : > { %v7150_v22 = vmax.f32 %v15719_v16, %v12292_v21  ;;  %v12319_v1 = vrot.slane %v5291_v39, %v11555_v30  ;;  %v12326_v46 = vsel %vm9027_vm4, %v9104_v18, %v15720_v35  ;;  %v12328_v61 = vpop.f32.mrb[42].mxu1  ;;  %9297 = vrot.lane.b32.xlu0 %v12265_v62, %s10769_s29  ;;  %v15724_v35 = vmax.f32 %v12174_v8, %v11894_v44 }
 0x168   : > { %v7312_v3 = vmax.f32 %v15716_v31, %v12279_v11  ;;  %v6383_v31 = vcombine.high %v5291_v39, %v5291_v39  ;;  %15721 = vst [vmem:[#allocation31_spill] sm:$0xff] %v12326_v46  ;;  %15722 = vst [vmem:[#allocation53_spill] sm:$0xff] %v12328_v61  ;;  %v7755_v32 = vmax.f32 %v12296_v38, %v10252_v28  ;;  %v12338_v45 = vpop.f32.mrb[44].mxu0  ;;  %v10583_v54 = vpop.f32.mrb[43].mxu1  ;;  %v15738_v28 = vld [vmem:[#allocation45_spill] sm:$0xff] }
 0x169   : > { %v10264_v16 = vrot.slane %v7150_v22, 9  ;;  %15723 = vst [vmem:[#allocation54_spill] sm:$0xff] %v12338_v45  ;;  %v12344_v39 = vrot.slane %v15724_v35, %v11567_v58  ;;  %v6398_v18 = vcombine.high %v12319_v1, %v12319_v1  ;;  %v10498_v61 = vpop.f32.mrb[45].mxu0  ;;  %v15726_v54 = vmax.f32 %v11854_v26, %v12037_v41 }
 0x16a   : > { %v8205_v37 = vmax.f32 %v12199_v48, %v7312_v3  ;;  %v10342_v20 = vrot.slane %v7312_v3, 9  ;;  %v12332_v25 = vrot.slane %v6383_v31, %v11555_v30  ;;  %v5130_v48 = vadd.f32 %v11548_v17, %v12012_v2  ;;  %v12357_v44 = vpop.f32.mrb[46].mxu0 }
 0x16b   : > { %v7767_v40 = vmax.f32 %v7755_v32, %v7150_v22  ;;  %v12350_v59 = vmax.f32 %v7150_v22, %v10264_v16  ;;  %v10276_v17 = vrot.slane %v12315_v0, 9  ;;  %15725 = vst [vmem:[#allocation55_spill] sm:$0xff] %v12357_v44  ;;  %v12360_v8 = vmax.f32 %v12037_v41, %v6398_v18  ;;  %9418 = vrot.lane.b32.xlu0 %v12265_v62, %s10770_s30 }
 0x16c   : > { %v8265_v31 = vmax.f32 %v7312_v3, %v10342_v20  ;;  %v12355_v2 = vmax.f32 %v12075_v27, %v12332_v25  ;;  %v12369_v3 = vmul.f32 %v12326_v46, %v12326_v46  ;;  %v5248_v22 = vmax.f32 %v4954_v42, 0.0  ;;  %v10499_v20 = vpop.f32.mrb[47].mxu0 }
 0x16d   : > { %v12372_v61 = vmax.f32 %v12183_v4, %v10228_v6  ;;  %v15728_v27 = vmax.f32 %v12030_v5, %v12214_v23  ;;  %v7839_v26 = vmax.f32 %v12350_v59, %v12315_v0  ;;  %v5292_v41 = vmax.f32 %v5130_v48, 0.0  ;;  %v12395_v5 = vld [vmem:[%s15498_s2] ss:$0 sm:$0xff]  ;;  %v15733_v20 = vld [vmem:[#allocation44_spill] sm:$0xff] }
 0x16e   : > { %v12365_v35 = vmax.f32 %v8265_v31, %v15726_v54  ;;  %15727 = vst [vmem:[#allocation56_spill] sm:$0xff] %v12369_v3  ;;  %v12385_v42 = vrot.slane %v8205_v37, %v11567_v58  ;;  %9299 = vrot.lane.b32.xlu1 %v12369_v3, %s10769_s29  ;;  %v5652_v4 = vcombine.high %v5248_v22, %v5248_v22 }
 0x16f   : > { %v12378_v32 = vrot.slane %v15728_v27, %v11567_v58  ;;  %v12390_v6 = vrot.slane %v5248_v22, %v11555_v30  ;;  %v4959_v23 = vadd.f32 %v12395_v5, %v12060_v15  ;;  %v12400_v59 = vmax.f32 %v12315_v0, %v10276_v17  ;;  %v12419_v17 = vpop.f32.mrb[44].mxu1  ;;  %9539 = vrot.lane.b32.xlu0 %v12265_v62, %s10771_s6 }
 0x170   : > { %v12403_v37 = vrot.slane %v7767_v40, %v11567_v58  ;;  %v6400_v16 = vcombine.high %v5292_v41, %v5292_v41  ;;  %v12406_v48 = vrot.slane %v5292_v41, %v11555_v30  ;;  %v12409_v18 = vrot.slane %v5652_v4, %v11555_v30  ;;  %15731 = vst [vmem:[#allocation59_spill] sm:$0xff] %v12419_v17  ;;  %v15734_v41 = vld [vmem:[#allocation35_spill] sm:$0xff]  ;;  %v15735_v4 = vld [vmem:[#allocation40_spill] sm:$0xff] }
 0x171   : > { %v12413_v31 = vcombine.high %v12390_v6, %v12390_v6  ;;  %v12417_v15 = vmax.f32 %v12015_v47, %v12390_v6  ;;  %v5249_v0 = vmax.f32 %v4959_v23, 0.0  ;;  %v5135_v27 = vadd.f32 %v12395_v5, %v15733_v20  ;;  %v10586_v47 = vpop.f32.mrb[45].mxu1 }
 0x172   : > { %15729 = vst [vmem:[#allocation57_spill] sm:$0xff] %v12403_v37  ;;  %v12422_v40 = vrot.slane %v6400_v16, %v11555_v30  ;;  %v12426_v54 = vcombine.high %v12406_v48, %v12406_v48  ;;  %v12430_v22 = vmax.f32 %v12094_v60, %v12406_v48  ;;  %v15736_v23 = vmax.f32 %v15734_v41, %v15735_v4  ;;  %v12449_v44 = vpop.f32.mrb[46].mxu1 }
 0x173   : > { %15730 = vst [vmem:[#allocation58_spill] sm:$0xff] %v12413_v31  ;;  %v12444_v46 = vmax.f32 %v15738_v28, %v12409_v18  ;;  %v10300_v60 = vrot.slane %v12417_v15, 9  ;;  %9420 = vrot.lane.b32.xlu1 %v12369_v3, %s10770_s30  ;;  %v5669_v20 = vcombine.high %v5249_v0, %v5249_v0  ;;  %15739 = vst [vmem:[#allocation35_spill] sm:$0xff] %v12449_v44  ;;  %v10211_v17 = vrot.slane %v12355_v2, 9 }
 0x174   : > { %15732 = vst [vmem:[#allocation60_spill] sm:$0xff] %v12426_v54  ;;  %v12440_v16 = vmax.f32 %v15736_v23, %v12413_v31  ;;  %v15740_v47 = vmax.f32 %v12130_v49, %v12154_v24  ;;  %v12459_v41 = vmax.f32 %v12188_v10, %v12422_v40  ;;  %v10235_v28 = vrot.slane %v12430_v22, 9  ;;  %v10587_v23 = vpop.f32.mrb[47].mxu1  ;;  %9178 = vrot.lane.b32.xlu0 %v12369_v3, %s10768_s28 }
 0x175   : > { %v12463_v4 = vrot.slane %v5249_v0, %v11555_v30  ;;  %v12467_v44 = vmax.f32 %v12417_v15, %v10300_v60  ;;  %v12471_v49 = vrot.slane %v5669_v20, %v11555_v30  ;;  %v10324_v20 = vrot.slane %v12444_v46, 9 }
 0x176   : > { %15737 = vst [vmem:[#allocation44_spill] sm:$0xff] %v12440_v16  ;;  %v12455_v62 = vmax.f32 %v15740_v47, %v12426_v54  ;;  %v10312_v45 = vrot.slane %v12440_v16, 9  ;;  %v12474_v24 = vmax.f32 %v12430_v22, %v10235_v28  ;;  %v5293_v47 = vmax.f32 %v5135_v27, 0.0 }
 0x177   : > { %15741 = vst [vmem:[#allocation40_spill] sm:$0xff] %v12467_v44  ;;  %15742 = vst [vmem:[#allocation45_spill] sm:$0xff] %v12471_v49  ;;  %v5684_v0 = vcombine.high %v12463_v4, %v12463_v4  ;;  %v5685_v28 = vcombine.high %v12471_v49, %v12471_v49  ;;  %9541 = vrot.lane.b32.xlu1 %v12369_v3, %s10771_s6  ;;  %v10259_v57 = vrot.slane %v12459_v41, 9 }
 0x178   : > { %v10247_v10 = vrot.slane %v12455_v62, 9  ;;  %v12484_v23 = vmax.f32 %v12440_v16, %v10312_v45  ;;  %v7630_v27 = vmax.f32 %v12474_v24, %v12455_v62  ;;  %v12499_v16 = vpop.f32.mrb[48].mxu0  ;;  %v12517_v60 = vrot.slane %v5293_v47, %v11555_v30 }
 0x179   : > { %15744 = vst [vmem:[#allocation61_spill] sm:$0xff] %v12499_v16  ;;  %v12504_v9 = vmax.f32 %v15745_v13, %v5684_v0  ;;  %v12509_v24 = vmax.f32 %v12158_v43, %v5685_v28  ;;  %v6417_v16 = vcombine.high %v5293_v47, %v5293_v47  ;;  %v12522_v13 = vmax.f32 %v12355_v2, %v10211_v17  ;;  %v15750_v0 = vld [vmem:[#allocation42_spill] sm:$0xff] }
 0x17a   : > { %v12494_v37 = vmax.f32 %v12455_v62, %v10247_v10  ;;  %v8127_v44 = vmax.f32 %v12484_v23, %v12444_v46  ;;  %v10502_v62 = vpop.f32.mrb[49].mxu0  ;;  %v12512_v10 = vrot.slane %v7839_v26, %v11567_v58  ;;  %15748 = vst [vmem:[#allocation63_spill] sm:$0xff] %v12517_v60  ;;  %v4962_v28 = vadd.f32 %v12395_v5, %v15750_v0  ;;  %v15751_v26 = vld [vmem:[#allocation46_spill] sm:$0xff] }
 0x17b   : > { %15746 = vst [vmem:[#allocation28_spill] sm:$0xff] %v12509_v24  ;;  %v12519_v23 = vpop.f32.mrb[50].mxu0  ;;  %v12528_v62 = vcombine.high %v12158_v43, %v12158_v43  ;;  %v5138_v3 = vadd.f32 %v12395_v5, %v15751_v26  ;;  %v12533_v49 = vmax.f32 %v12444_v46, %v10324_v20  ;;  %v12536_v47 = vrot.slane %v6417_v16, %v11555_v30  ;;  %v12546_v43 = vpop.f32.mrb[48].mxu1  ;;  %v15756_v46 = vld [vmem:[#allocation22_spill] sm:$0xff]  ;;  %v15757_v20 = vld [vmem:[#allocation32_spill] sm:$0xff] }
 0x17c   : > { %15747 = vst [vmem:[#allocation62_spill] sm:$0xff] %v12512_v10  ;;  %v7702_v45 = vmax.f32 %v12494_v37, %v12459_v41  ;;  %15749 = vst [vmem:[#allocation64_spill] sm:$0xff] %v12519_v23  ;;  %v10503_v37 = vpop.f32.mrb[51].mxu0  ;;  %v12540_v2 = vcombine.high %v12517_v60, %v12517_v60  ;;  %v12544_v17 = vmax.f32 %v12202_v34, %v12517_v60  ;;  %v5250_v26 = vmax.f32 %v4962_v28, 0.0  ;;  %v10590_v7 = vpop.f32.mrb[49].mxu1  ;;  %v15761_v28 = vld [vmem:[#allocation36_spill] sm:$0xff] }
 0x17d   : > { %15752 = vst [vmem:[#allocation42_spill] sm:$0xff] %v12536_v47  ;;  %15755 = vst [vmem:[#allocation66_spill] sm:$0xff] %v12546_v43  ;;  %v12549_v0 = vmax.f32 %v12459_v41, %v10259_v57  ;;  %v15758_v37 = vmax.f32 %v15756_v46, %v15757_v20  ;;  %v5294_v23 = vmax.f32 %v5138_v3, 0.0  ;;  %v15759_v10 = vmax.f32 %v12149_v33, %v12205_v63  ;;  %v15760_v41 = vld [vmem:[#allocation39_spill] sm:$0xff]  ;;  %v12569_v20 = vpop.f32.mrb[50].mxu1 }
 0x17e   : > { %15753 = vst [vmem:[#allocation46_spill] sm:$0xff] %v12540_v2  ;;  %15754 = vst [vmem:[#allocation65_spill] sm:$0xff] %v12544_v17  ;;  %v12561_v34 = vmax.f32 %v12240_v53, %v12536_v47  ;;  %v10283_v57 = vrot.slane %v12544_v17, 9  ;;  %v15762_v43 = vmax.f32 %v15760_v41, %v15761_v28  ;;  %v5686_v7 = vcombine.high %v5250_v26, %v5250_v26  ;;  %v12578_v41 = vpop.f32.mrb[52].mxu0 }
 0x17f   : > { %v7148_v16 = vmax.f32 %v15758_v37, %v12528_v62  ;;  %v7334_v24 = vmax.f32 %v15759_v10, %v12540_v2  ;;  %15763 = vst [vmem:[#allocation22_spill] sm:$0xff] %v12569_v20  ;;  %v12572_v3 = vrot.slane %v5250_v26, %v11555_v30  ;;  %v10591_v10 = vpop.f32.mrb[51].mxu1  ;;  %v6434_v47 = vcombine.high %v5294_v23, %v5294_v23  ;;  %v10506_v28 = vpop.f32.mrb[53].mxu0 }
 0x180   : > { %v9099_v46 = vsel %vm4854_vm0, %v15762_v43, %v12251_v36  ;;  %v7906_v53 = vmax.f32 %v12544_v17, %v10283_v57  ;;  %v8973_v60 = vrot.slane %v12365_v35, %v11567_v58  ;;  %15764 = vst [vmem:[#allocation32_spill] sm:$0xff] %v12578_v41  ;;  %v12581_v36 = vrot.slane %v5686_v7, %v11555_v30  ;;  %v12589_v35 = vpop.f32.mrb[54].mxu0 }
 0x181   : > { %v7623_v33 = vmax.f32 %v12372_v61, %v7148_v16  ;;  %v10240_v63 = vrot.slane %v7148_v16, 9  ;;  %v10295_v37 = vrot.slane %v7334_v24, 9  ;;  %v5701_v43 = vcombine.high %v12572_v3, %v12572_v3  ;;  %15765 = vst [vmem:[#allocation39_spill] sm:$0xff] %v12589_v35  ;;  %v15781_v35 = vld [vmem:[#allocation37_spill] sm:$0xff] }
 0x182   : > { %v7918_v10 = vmax.f32 %v7906_v53, %v7334_v24  ;;  %v10307_v20 = vrot.slane %v12561_v34, 9  ;;  %v5702_v7 = vcombine.high %v12581_v36, %v12581_v36 }
 0x183   : > { %v7683_v26 = vmax.f32 %v7148_v16, %v10240_v63  ;;  %v7978_v57 = vmax.f32 %v7334_v24, %v10295_v37  ;;  %v8373_v17 = vrot.slane %v7623_v33, %v11567_v58  ;;  %v12594_v41 = vmax.f32 %v12268_v19, %v5701_v43  ;;  %v10507_v63 = vpop.f32.mrb[55].mxu0 }
 0x184   : > { %v12600_v24 = vrot.slane %v7630_v27, %v11567_v58  ;;  %v12608_v37 = vrot.slane %v5294_v23, %v11555_v30  ;;  %v12611_v19 = vrot.slane %v8127_v44, %v11567_v58  ;;  %v12614_v43 = vmax.f32 %v12288_v52, %v5702_v7 }
 0x185   : > { %v7695_v16 = vmax.f32 %v7683_v26, %v12296_v38  ;;  %v7990_v53 = vmax.f32 %v7978_v57, %v12561_v34  ;;  %v12605_v33 = vsel %vm9014_vm3, %v12273_v14, %v8373_v17  ;;  %v12617_v38 = vrot.slane %v6434_v47, %v11555_v30  ;;  %v15770_v17 = vld [vmem:[#allocation20_spill] sm:$0xff]  ;;  %v12646_v28 = vpop.f32.mrb[52].mxu1 }
 0x186   : > { %v9111_v27 = vsel %vm9014_vm3, %v9099_v46, %v12385_v42  ;;  %v12622_v26 = vrot.slane %v7702_v45, %v11567_v58  ;;  %v12626_v14 = vcombine.high %v12608_v37, %v12608_v37  ;;  %v12630_v44 = vmax.f32 %v12243_v50, %v12608_v37  ;;  %15771 = vst [vmem:[#allocation20_spill] sm:$0xff] %v12646_v28  ;;  %v10594_v57 = vpop.f32.mrb[53].mxu1 }
 0x187   : > { %v12633_v23 = vsel %vm9027_vm4, %v9111_v27, %v8973_v60  ;;  %v12636_v47 = vmax.f32 %v12561_v34, %v10307_v20  ;;  %v7339_v42 = vmax.f32 %v12360_v8, %v12617_v38  ;;  %v4967_v46 = vadd.f32 %v12395_v5, %v15770_v17  ;;  %v15775_v27 = vld [vmem:[#allocation26_spill] sm:$0xff]  ;;  %v15776_v17 = vld [vmem:[#allocation33_spill] sm:$0xff] }
 0x188   : > { %15766 = vst [vmem:[#allocation36_spill] sm:$0xff] %v12622_v26  ;;  %15767 = vst [vmem:[#allocation67_spill] sm:$0xff] %v12633_v23  ;;  %v12642_v45 = vmul.f32 %v12633_v23, %v12633_v23  ;;  %v15772_v50 = vmax.f32 %v12279_v11, %v12319_v1  ;;  %v10331_v34 = vrot.slane %v12630_v44, 9  ;;  %v12657_v8 = vcombine.high %v12288_v52, %v12288_v52  ;;  %v12673_v1 = vpop.f32.mrb[54].mxu1 }
 0x189   : > { %15768 = vst [vmem:[#allocation68_spill] sm:$0xff] %v12636_v47  ;;  %v5143_v20 = vadd.f32 %v12395_v5, %v12218_v51  ;;  %v12662_v7 = vrot.slane %v7918_v10, %v11567_v58  ;;  %v5251_v63 = vmax.f32 %v4967_v46, 0.0  ;;  %v12668_v11 = vcombine.high %v12332_v25, %v12332_v25  ;;  %15774 = vst [vmem:[#allocation71_spill] sm:$0xff] %v12673_v1  ;;  %v10595_v2 = vpop.f32.mrb[55].mxu1 }
 0x18a   : > { %15769 = vst [vmem:[#allocation69_spill] sm:$0xff] %v12642_v45  ;;  %v12652_v60 = vmax.f32 %v15772_v50, %v12626_v14  ;;  %9206 = vrot.lane.b32.xlu1 %v12642_v45, %s10768_s28  ;;  %v9035_v52 = vsel %vm9027_vm4, %v12196_v12, %v12344_v39  ;;  %v12676_v51 = vmax.f32 %v12630_v44, %v10331_v34  ;;  %v15778_v12 = vld [vmem:[#allocation29_spill] sm:$0xff]  ;;  %v15779_v39 = vld [vmem:[#allocation38_spill] sm:$0xff] }
 0x18b   : > { %15773 = vst [vmem:[#allocation70_spill] sm:$0xff] %v12662_v7  ;;  %v15777_v50 = vmax.f32 %v15775_v27, %v15776_v17  ;;  %v5295_v57 = vmax.f32 %v5143_v20, 0.0  ;;  %v5703_v61 = vcombine.high %v5251_v63, %v5251_v63  ;;  %v12686_v23 = vrot.slane %v5251_v63, %v11555_v30 }
 0x18c   : > { %v10343_v10 = vrot.slane %v12652_v60, 9  ;;  %v15780_v1 = vmax.f32 %v15778_v12, %v15779_v39  ;;  %v9048_v28 = vsel %vm9040_vm5, %v9035_v52, %v15781_v35  ;;  %v12711_v52 = vpop.f32.mrb[56].mxu0  ;;  %v12717_v12 = vrot.slane %v7695_v16, %v11567_v58 }
 0x18d   : > { %v12683_v46 = vmax.f32 %v15777_v50, %v12657_v8  ;;  %v12703_v63 = vrot.slane %v5703_v61, %v11555_v30  ;;  %v6451_v35 = vcombine.high %v5295_v57, %v5295_v57  ;;  %15783 = vst [vmem:[#allocation33_spill] sm:$0xff] %v12711_v52  ;;  %v10510_v2 = vpop.f32.mrb[57].mxu0  ;;  %v12777_v26 = vcombine.high %v12409_v18, %v12409_v18 }
 0x18e   : > { %v12692_v34 = vmax.f32 %v15780_v1, %v12668_v11  ;;  %v8266_v17 = vmax.f32 %v12652_v60, %v10343_v10  ;;  %v5718_v1 = vcombine.high %v12686_v23, %v12686_v23  ;;  %9327 = vrot.lane.b32.xlu1 %v12642_v45, %s10769_s29  ;;  %v12714_v10 = vrot.slane %v7990_v53, %v11567_v58  ;;  %v12734_v16 = vpop.f32.mrb[58].mxu0 }
 0x18f   : > { %v10288_v20 = vrot.slane %v12683_v46, 9  ;;  %15782 = vst [vmem:[#allocation26_spill] sm:$0xff] %v12703_v63  ;;  %v5719_v50 = vcombine.high %v12703_v63, %v12703_v63  ;;  %v12732_v53 = vrot.slane %v5295_v57, %v11555_v30  ;;  %15786 = vst [vmem:[#allocation37_spill] sm:$0xff] %v12734_v16  ;;  %v10511_v57 = vpop.f32.mrb[59].mxu0 }
 0x190   : > { %15784 = vst [vmem:[#allocation29_spill] sm:$0xff] %v12714_v10  ;;  %v12719_v61 = vmax.f32 %v8266_v17, %v7339_v42  ;;  %v12727_v27 = vmax.f32 %v12390_v6, %v5718_v1  ;;  %v12739_v17 = vrot.slane %v6451_v35, %v11555_v30  ;;  %v7486_v2 = vmax.f32 %v12522_v13, %v12692_v34  ;;  %v12747_v1 = vpop.f32.mrb[56].mxu1  ;;  %v15791_v57 = vld [vmem:[#allocation48_spill] sm:$0xff] }
 0x191   : > { %v12722_v39 = vmax.f32 %v12683_v46, %v10288_v20  ;;  %v15788_v6 = vmax.f32 %v12255_v56, %v12023_v29  ;;  %15789 = vst [vmem:[#allocation73_spill] sm:$0xff] %v12747_v1  ;;  %v12750_v52 = vmax.f32 %v12409_v18, %v5719_v50  ;;  %v6466_v42 = vcombine.high %v12732_v53, %v12732_v53  ;;  %v10598_v13 = vpop.f32.mrb[57].mxu1  ;;  %v15790_v50 = vld [vmem:[#allocation41_spill] sm:$0xff]  ;;  %v15795_v18 = vld [vmem:[#allocation27_spill] sm:$0xff] }
 0x192   : > { %15785 = vst [vmem:[#allocation38_spill] sm:$0xff] %v12719_v61  ;;  %15787 = vst [vmem:[#allocation72_spill] sm:$0xff] %v12739_v17  ;;  %v10223_v16 = vrot.slane %v12692_v34, 9  ;;  %9448 = vrot.lane.b32.xlu1 %v12642_v45, %s10770_s30  ;;  %v6467_v29 = vcombine.high %v12739_v17, %v12739_v17  ;;  %v4970_v1 = vadd.f32 %v12395_v5, %v15791_v57  ;;  %v12767_v10 = vpop.f32.mrb[58].mxu1 }
 0x193   : > { %v8757_v20 = vrot.slane %v15788_v6, %v11567_v58  ;;  %v9061_v6 = vsel %vm9053_vm6, %v9048_v28, %v15790_v50  ;;  %15792 = vst [vmem:[#allocation41_spill] sm:$0xff] %v12767_v10  ;;  %v12770_v35 = vmax.f32 %v12406_v48, %v6466_v42  ;;  %v10599_v56 = vpop.f32.mrb[59].mxu1  ;;  %v5146_v48 = vadd.f32 %v12395_v5, %v12230_v55 }
 0x194   : > { %v7546_v7 = vmax.f32 %v12692_v34, %v10223_v16  ;;  %v9074_v13 = vsel %vm9066_vm7, %v9061_v6, %v12378_v32  ;;  %v12780_v28 = vmax.f32 %v12422_v40, %v6467_v29  ;;  %v5252_v57 = vmax.f32 %v4970_v1, 0.0  ;;  %v15796_v16 = vld [vmem:[#allocation43_spill] sm:$0xff] }
 0x195   : > { %v12783_v50 = vsel %vm9079_vm8, %v9074_v13, %v8757_v20  ;;  %v15797_v42 = vmax.f32 %v15795_v18, %v15796_v16  ;;  %v12798_v29 = vcombine.high %v12422_v40, %v12422_v40  ;;  %v6450_v55 = vcombine.high %v12617_v38, %v12617_v38  ;;  %v15798_v13 = vld [vmem:[#allocation30_spill] sm:$0xff]  ;;  %v15799_v18 = vld [vmem:[#allocation47_spill] sm:$0xff] }
 0x196   : > { %15793 = vst [vmem:[#allocation48_spill] sm:$0xff] %v12783_v50  ;;  %v7558_v34 = vmax.f32 %v7546_v7, %v12430_v22  ;;  %v12790_v32 = vmul.f32 %v12783_v50, %v12783_v50  ;;  %9569 = vrot.lane.b32.xlu1 %v12642_v45, %s10771_s6  ;;  %v5720_v22 = vcombine.high %v5252_v57, %v5252_v57  ;;  %v5296_v20 = vmax.f32 %v5146_v48, 0.0  ;;  %v12817_v50 = vpop.f32.mrb[60].mxu0 }
 0x197   : > { %v7156_v56 = vmax.f32 %v15797_v42, %v12777_v26  ;;  %v12805_v7 = vrot.slane %v5252_v57, %v11555_v30  ;;  %v15800_v16 = vmax.f32 %v15798_v13, %v15799_v18  ;;  %15801 = vst [vmem:[#allocation27_spill] sm:$0xff] %v12817_v50  ;;  %v15802_v18 = vld [vmem:[#allocation23_spill] sm:$0xff]  ;;  %v7340_v61 = vmax.f32 %v12332_v25, %v6450_v55 }
 0x198   : > { %15794 = vst [vmem:[#allocation74_spill] sm:$0xff] %v12790_v32  ;;  %v8329_v1 = vrot.slane %v7558_v34, %v11567_v58  ;;  %9204 = vrot.lane.b32.xlu0 %v12790_v32, %s10768_s28  ;;  %v12820_v57 = vrot.slane %v5720_v22, %v11555_v30  ;;  %v6468_v45 = vcombine.high %v5296_v20, %v5296_v20 }
 0x199   : > { %v8199_v6 = vmax.f32 %v12533_v49, %v7156_v56  ;;  %v10336_v40 = vrot.slane %v7156_v56, 9  ;;  %v12815_v42 = vmax.f32 %v15800_v16, %v12798_v29  ;;  %v5735_v48 = vcombine.high %v12805_v7, %v12805_v7  ;;  %v10514_v49 = vpop.f32.mrb[61].mxu0 }
 0x19a   : > { %v9010_v10 = vsel %vm4854_vm0, %v7486_v2, %v8329_v1  ;;  %v12828_v13 = vrot.slane %v5296_v20, %v11555_v30  ;;  %v4975_v16 = vadd.f32 %v12395_v5, %v15802_v18  ;;  %v12832_v50 = vpop.f32.mrb[62].mxu0  ;;  %v12843_v49 = vmax.f32 %v12504_v9, %v12820_v57  ;;  %v15806_v20 = vld [vmem:[#allocation21_spill] sm:$0xff] }
 0x19b   : > { %v8259_v17 = vmax.f32 %v7156_v56, %v10336_v40  ;;  %15803 = vst [vmem:[#allocation43_spill] sm:$0xff] %v12832_v50  ;;  %v12836_v22 = vsel %vm9014_vm3, %v9010_v10, %v12600_v24  ;;  %v12839_v54 = vmax.f32 %v12463_v4, %v5735_v48  ;;  %v12846_v2 = vrot.slane %v6468_v45, %v11555_v30  ;;  %v10515_v56 = vpop.f32.mrb[63].mxu0  ;;  %v15813_v10 = vld [vmem:[#allocation63_spill] sm:$0xff] }
 0x19c   : > { %15804 = vst [vmem:[#allocation30_spill] sm:$0xff] %v12836_v22  ;;  %v15807_v1 = vmax.f32 %v15806_v20, %v12463_v4  ;;  %v6483_v24 = vcombine.high %v12828_v13, %v12828_v13  ;;  %v7774_v48 = vmax.f32 %v12549_v0, %v12815_v42  ;;  %9325 = vrot.lane.b32.xlu0 %v12790_v32, %s10769_s29  ;;  %v10271_v56 = vrot.slane %v12815_v42, 9  ;;  %v12872_v20 = vpop.f32.mrb[60].mxu1 }
 0x19d   : > { %15805 = vst [vmem:[#allocation47_spill] sm:$0xff] %v12846_v2  ;;  %v15808_v9 = vmax.f32 %v12676_v51, %v12652_v60  ;;  %v6484_v4 = vcombine.high %v12846_v2, %v12846_v2  ;;  %15811 = vst [vmem:[#allocation21_spill] sm:$0xff] %v12872_v20  ;;  %v15812_v0 = vmax.f32 %v12400_v59, %v12683_v46  ;;  %v5253_v51 = vmax.f32 %v4975_v16, 0.0  ;;  %v10602_v50 = vpop.f32.mrb[61].mxu1 }
 0x19e   : > { %v12851_v40 = vmax.f32 %v8259_v17, %v15807_v1  ;;  %v12881_v60 = vmax.f32 %v15813_v10, %v6483_v24  ;;  %v7834_v20 = vmax.f32 %v12815_v42, %v10271_v56  ;;  %v12895_v46 = vpop.f32.mrb[62].mxu1  ;;  %v12898_v16 = vrot.slane %v8199_v6, %v11567_v58  ;;  %v15818_v56 = vld [vmem:[#allocation34_spill] sm:$0xff] }
 0x19f   : > { %v12865_v45 = vrot.slane %v15808_v9, %v11567_v58  ;;  %v12878_v1 = vrot.slane %v15812_v0, %v11567_v58  ;;  %v15814_v9 = vld [vmem:[#allocation24_spill] sm:$0xff]  ;;  %15816 = vst [vmem:[#allocation63_spill] sm:$0xff] %v12895_v46  ;;  %v5737_v24 = vcombine.high %v5253_v51, %v5253_v51  ;;  %v12901_v50 = vrot.slane %v5253_v51, %v11555_v30  ;;  %v15817_v0 = vld [vmem:[#allocation65_spill] sm:$0xff]  ;;  %v15822_v46 = vld [vmem:[#allocation51_spill] sm:$0xff]  ;;  %v12915_v51 = vpop.f32.mrb[64].mxu0 }
 0x1a0   : > { %v5151_v34 = vadd.f32 %v12395_v5, %v15814_v9  ;;  %9446 = vrot.lane.b32.xlu0 %v12790_v32, %s10770_s30  ;;  %v7846_v42 = vmax.f32 %v7834_v20, %v15817_v0  ;;  %v4978_v6 = vadd.f32 %v12395_v5, %v15822_v46  ;;  %v15825_v20 = vld [vmem:[#allocation28_spill] sm:$0xff]  ;;  %v15826_v46 = vld [vmem:[#allocation53_spill] sm:$0xff] }
 0x1a1   : > { %15809 = vst [vmem:[#allocation23_spill] sm:$0xff] %v12865_v45  ;;  %v15815_v45 = vld [vmem:[#allocation42_spill] sm:$0xff]  ;;  %v12926_v0 = vmax.f32 %v15825_v20, %v12901_v50  ;;  %v15828_v20 = vmax.f32 %v12528_v62, %v12572_v3 }
 0x1a2   : > { %v12888_v2 = vmax.f32 %v15815_v45, %v6484_v4  ;;  %v12893_v59 = vcombine.high %v15815_v45, %v15815_v45  ;;  %v5297_v10 = vmax.f32 %v5151_v34, 0.0  ;;  %v10603_v4 = vpop.f32.mrb[63].mxu1  ;;  %v15819_v45 = vld [vmem:[#allocation49_spill] sm:$0xff]  ;;  %15823 = vst [vmem:[#allocation42_spill] sm:$0xff] %v12915_v51  ;;  %v12918_v34 = vrot.slane %v5737_v24, %v11555_v30 }
 0x1a3   : > { %v15820_v9 = vmax.f32 %v15818_v56, %v15819_v45  ;;  %v12922_v4 = vcombine.high %v12901_v50, %v12901_v50  ;;  %v10518_v45 = vpop.f32.mrb[65].mxu0  ;;  %v5154_v24 = vadd.f32 %v12395_v5, %v15826_v46 }
 0x1a4   : > { %v6485_v56 = vcombine.high %v5297_v10, %v5297_v10  ;;  %v12936_v51 = vpop.f32.mrb[66].mxu0  ;;  %v10229_v45 = vrot.slane %v12926_v0, 9  ;;  %9567 = vrot.lane.b32.xlu0 %v12790_v32, %s10771_s6 }
 0x1a5   : > { %v12910_v18 = vmax.f32 %v15820_v9, %v12893_v59  ;;  %15824 = vst [vmem:[#allocation65_spill] sm:$0xff] %v12922_v4  ;;  %v12929_v9 = vrot.slane %v5297_v10, %v11555_v30  ;;  %15827 = vst [vmem:[#allocation34_spill] sm:$0xff] %v12936_v51  ;;  %v12942_v17 = vmax.f32 %v15828_v20, %v12922_v4  ;;  %v10519_v46 = vpop.f32.mrb[67].mxu0  ;;  %v5254_v20 = vmax.f32 %v4978_v6, 0.0  ;;  %v12976_v31 = vpop.f32.mrb[64].mxu1 }
 0x1a6   : > { %v12946_v10 = vmax.f32 %v12594_v41, %v12918_v34  ;;  %v12950_v25 = vrot.slane %v6485_v56, %v11555_v30  ;;  %v10205_v41 = vrot.slane %v12843_v49, 9  ;;  %v7612_v47 = vmax.f32 %v12926_v0, %v10229_v45  ;;  %15830 = vst [vmem:[#allocation51_spill] sm:$0xff] %v12976_v31 }
 0x1a7   : > { %15821 = vst [vmem:[#allocation24_spill] sm:$0xff] %v12910_v18  ;;  %v10319_v55 = vrot.slane %v12910_v18, 9  ;;  %v6500_v51 = vcombine.high %v12929_v9, %v12929_v9  ;;  %v10241_v56 = vrot.slane %v12942_v17, 9  ;;  %v5754_v63 = vcombine.high %v5254_v20, %v5254_v20 }
 0x1a8   : > { %15829 = vst [vmem:[#allocation49_spill] sm:$0xff] %v12950_v25  ;;  %v6501_v22 = vcombine.high %v12950_v25, %v12950_v25  ;;  %v7624_v6 = vmax.f32 %v7612_v47, %v12942_v17  ;;  %v10253_v45 = vrot.slane %v12946_v10, 9  ;;  %v10606_v47 = vpop.f32.mrb[65].mxu1  ;;  %v13225_v4 = vcombine.high %v12918_v34, %v12918_v34 }
 0x1a9   : > { %v8122_v3 = vmax.f32 %v12910_v18, %v10319_v55  ;;  %v12965_v46 = vmax.f32 %v12608_v37, %v6500_v51  ;;  %v7684_v55 = vmax.f32 %v12942_v17, %v10241_v56  ;;  %v12979_v37 = vrot.slane %v7774_v48, %v11567_v58  ;;  %v13065_v31 = vpop.f32.mrb[66].mxu1 }
 0x1aa   : > { %v12974_v18 = vmax.f32 %v12617_v38, %v6501_v22  ;;  %v12982_v51 = vrot.slane %v5254_v20, %v11555_v30  ;;  %v12988_v17 = vmax.f32 %v12843_v49, %v10205_v41  ;;  %v12991_v56 = vrot.slane %v7846_v42, %v11567_v58 }
 0x1ab   : > { %v8134_v62 = vmax.f32 %v8122_v3, %v12630_v44  ;;  %v12985_v44 = vrot.slane %v5754_v63, %v11555_v30  ;;  %v5298_v3 = vmax.f32 %v5154_v24, 0.0  ;;  %v7696_v38 = vmax.f32 %v7684_v55, %v12946_v10  ;;  %v13009_v24 = vpop.f32.mrb[68].mxu0  ;;  %v15834_v55 = vld [vmem:[#allocation54_spill] sm:$0xff] }
 0x1ac   : > { %v9029_v22 = vsel %vm9027_vm4, %v12605_v33, %v12717_v12  ;;  %v12999_v48 = vcombine.high %v12982_v51, %v12982_v51  ;;  %v13003_v63 = vmax.f32 %v12614_v43, %v12982_v51  ;;  %15832 = vst [vmem:[#allocation53_spill] sm:$0xff] %v13009_v24  ;;  %v13012_v20 = vmax.f32 %v12946_v10, %v10253_v45  ;;  %v15833_v12 = vld [vmem:[#allocation57_spill] sm:$0xff]  ;;  %v10522_v47 = vpop.f32.mrb[69].mxu0 }
 0x1ad   : > { %v13007_v49 = vmax.f32 %v12727_v27, %v12985_v44  ;;  %v6502_v42 = vcombine.high %v5298_v3, %v5298_v3  ;;  %v13015_v33 = vrot.slane %v5298_v3, %v11555_v30  ;;  %v9042_v41 = vsel %vm9040_vm5, %v9029_v22, %v15833_v12 }
 0x1ae   : > { %15831 = vst [vmem:[#allocation28_spill] sm:$0xff] %v12999_v48  ;;  %v4983_v43 = vadd.f32 %v12395_v5, %v15834_v55  ;;  %v15835_v27 = vmax.f32 %v12657_v8, %v12686_v23  ;;  %v10277_v24 = vrot.slane %v13003_v63, 9  ;;  %v15836_v45 = vmax.f32 %v12722_v39, %v12417_v15  ;;  %v15838_v55 = vld [vmem:[#allocation62_spill] sm:$0xff] }
 0x1af   : > { %v13029_v10 = vrot.slane %v6502_v42, %v11555_v30  ;;  %v13037_v22 = vcombine.high %v13015_v33, %v13015_v33  ;;  %v7353_v12 = vmax.f32 %v7340_v61, %v13015_v33  ;;  %v9055_v23 = vsel %vm9053_vm6, %v9042_v41, %v15838_v55  ;;  %15841 = vst [vmem:[#allocation62_spill] sm:$0xff] %v13065_v31  ;;  %v15852_v31 = vld [vmem:[#allocation55_spill] sm:$0xff] }
 0x1b0   : > { %v13025_v32 = vmax.f32 %v15835_v27, %v12999_v48  ;;  %v8733_v3 = vrot.slane %v15836_v45, %v11567_v58  ;;  %v5255_v8 = vmax.f32 %v4983_v43, 0.0  ;;  %v13043_v47 = vrot.slane %v8134_v62, %v11567_v58 }
 0x1b1   : > { %15837 = vst [vmem:[#allocation57_spill] sm:$0xff] %v13037_v22  ;;  %v7900_v42 = vmax.f32 %v13003_v63, %v10277_v24  ;;  %v13049_v15 = vmax.f32 %v12770_v35, %v13029_v10  ;;  %v15839_v39 = vmax.f32 %v12668_v11, %v12732_v53  ;;  %v10212_v45 = vrot.slane %v7353_v12, 9 }
 0x1b2   : > { %v10289_v27 = vrot.slane %v13025_v32, 9  ;;  %v9068_v41 = vsel %vm9066_vm7, %v9055_v23, %v12878_v1  ;;  %v5771_v43 = vcombine.high %v5255_v8, %v5255_v8  ;;  %v10301_v55 = vrot.slane %v13007_v49, 9  ;;  %v10607_v23 = vpop.f32.mrb[67].mxu1 }
 0x1b3   : > { %v7354_v61 = vmax.f32 %v15839_v39, %v13037_v22  ;;  %v7912_v62 = vmax.f32 %v7900_v42, %v13025_v32  ;;  %v13063_v35 = vsel %vm9079_vm8, %v9068_v41, %v8733_v3  ;;  %v7475_v25 = vmax.f32 %v7353_v12, %v10212_v45 }
 0x1b4   : > { %v13059_v24 = vmax.f32 %v13025_v32, %v10289_v27  ;;  %15840 = vst [vmem:[#allocation54_spill] sm:$0xff] %v13063_v35  ;;  %v13069_v53 = vmul.f32 %v13063_v35, %v13063_v35  ;;  %v13072_v1 = vrot.slane %v5255_v8, %v11555_v30  ;;  %v13075_v32 = vrot.slane %v7624_v6, %v11567_v58  ;;  %v13085_v27 = vpop.f32.mrb[68].mxu1  ;;  %v15850_v35 = vld [vmem:[#allocation44_spill] sm:$0xff] }
 0x1b5   : > { %v10224_v11 = vrot.slane %v7354_v61, 9  ;;  %v13078_v42 = vrot.slane %v7696_v38, %v11567_v58  ;;  %v13083_v12 = vrot.slane %v5771_v43, %v11555_v30  ;;  %15844 = vst [vmem:[#allocation77_spill] sm:$0xff] %v13085_v27  ;;  %v7487_v39 = vmax.f32 %v7475_v25, %v7354_v61  ;;  %v10610_v8 = vpop.f32.mrb[69].mxu1 }
 0x1b6   : > { %15842 = vst [vmem:[#allocation75_spill] sm:$0xff] %v13069_v53  ;;  %v7984_v3 = vmax.f32 %v13059_v24, %v13007_v49  ;;  %9180 = vrot.lane.b32.xlu1 %v13069_v53, %s10768_s28  ;;  %v13091_v6 = vcombine.high %v13072_v1, %v13072_v1  ;;  %v13095_v38 = vmax.f32 %v12750_v52, %v13072_v1  ;;  %v10236_v43 = vrot.slane %v13049_v15, 9 }
 0x1b7   : > { %15843 = vst [vmem:[#allocation76_spill] sm:$0xff] %v13078_v42  ;;  %v7547_v45 = vmax.f32 %v7354_v61, %v10224_v11  ;;  %v13098_v41 = vmax.f32 %v13007_v49, %v10301_v55  ;;  %v7183_v25 = vmax.f32 %v12839_v54, %v13083_v12  ;;  %v15847_v61 = vld [vmem:[#allocation59_spill] sm:$0xff]  ;;  %9301 = vrot.lane.b32.xlu0 %v13069_v53, %s10769_s29  ;;  %v15849_v54 = vld [vmem:[#allocation40_spill] sm:$0xff] }
 0x1b8   : > { %15845 = vst [vmem:[#allocation78_spill] sm:$0xff] %v13091_v6  ;;  %v5159_v24 = vadd.f32 %v12395_v5, %v15847_v61  ;;  %v15848_v52 = vmax.f32 %v12777_v26, %v12805_v7  ;;  %v10325_v49 = vrot.slane %v13095_v38, 9  ;;  %v8949_v55 = vrot.slane %v12851_v40, %v11567_v58 }
 0x1b9   : > { %15846 = vst [vmem:[#allocation79_spill] sm:$0xff] %v13098_v41  ;;  %v7559_v11 = vmax.f32 %v7547_v45, %v13049_v15  ;;  %v15851_v61 = vmax.f32 %v15849_v54, %v15850_v35  ;;  %v4986_v45 = vadd.f32 %v12395_v5, %v15852_v31  ;;  %v13124_v42 = vcombine.high %v12820_v57, %v12820_v57 }
 0x1ba   : > { %v7182_v23 = vmax.f32 %v15848_v52, %v13091_v6  ;;  %v5299_v8 = vmax.f32 %v5159_v24, 0.0  ;;  %v8188_v7 = vmax.f32 %v13095_v38, %v10325_v49  ;;  %v15892_v6 = vld [vmem:[#allocation22_spill] sm:$0xff] }
 0x1bb   : > { %v9093_v27 = vsel %vm4854_vm0, %v15851_v61, %v12611_v19  ;;  %v8333_v26 = vrot.slane %v7559_v11, %v11567_v58  ;;  %v5256_v31 = vmax.f32 %v4986_v45, 0.0  ;;  %9422 = vrot.lane.b32.xlu0 %v13069_v53, %s10770_s30 }
 0x1bc   : > { %v10337_v52 = vrot.slane %v7182_v23, 9  ;;  %v9105_v40 = vsel %vm9014_vm3, %v9093_v27, %v12898_v16  ;;  %v6519_v24 = vcombine.high %v5299_v8, %v5299_v8  ;;  %v13131_v35 = vrot.slane %v5299_v8, %v11555_v30  ;;  %v13145_v16 = vpop.f32.mrb[70].mxu0 }
 0x1bd   : > { %v13134_v19 = vsel %vm9027_vm4, %v9105_v40, %v8949_v55  ;;  %v13139_v54 = vsel %vm4854_vm0, %v7487_v39, %v8333_v26  ;;  %v8200_v11 = vmax.f32 %v8188_v7, %v7182_v23  ;;  %15855 = vst [vmem:[#allocation44_spill] sm:$0xff] %v13145_v16  ;;  %v5788_v39 = vcombine.high %v5256_v31, %v5256_v31  ;;  %v10523_v45 = vpop.f32.mrb[71].mxu0  ;;  %v15859_v40 = vld [vmem:[#allocation45_spill] sm:$0xff] }
 0x1be   : > { %15853 = vst [vmem:[#allocation59_spill] sm:$0xff] %v13134_v19  ;;  %v8260_v49 = vmax.f32 %v7182_v23, %v10337_v52  ;;  %v13143_v61 = vmul.f32 %v13134_v19, %v13134_v19  ;;  %v13148_v27 = vrot.slane %v6519_v24, %v11555_v30  ;;  %v13152_v55 = vcombine.high %v13131_v35, %v13131_v35  ;;  %v15858_v52 = vld [vmem:[#allocation25_spill] sm:$0xff] }
 0x1bf   : > { %v13156_v8 = vmax.f32 %v12780_v28, %v13131_v35  ;;  %v13159_v23 = vrot.slane %v7912_v62, %v11567_v58  ;;  %v13166_v7 = vrot.slane %v5256_v31, %v11555_v30  ;;  %v15860_v24 = vmax.f32 %v15858_v52, %v15859_v40  ;;  %9543 = vrot.lane.b32.xlu0 %v13069_v53, %s10771_s6 }
 0x1c0   : > { %15854 = vst [vmem:[#allocation40_spill] sm:$0xff] %v13143_v61  ;;  %15856 = vst [vmem:[#allocation55_spill] sm:$0xff] %v13152_v55  ;;  %v13161_v26 = vmax.f32 %v8260_v49, %v7183_v25  ;;  %9182 = vrot.lane.b32.xlu1 %v13143_v61, %s10768_s28  ;;  %v15861_v28 = vmax.f32 %v12798_v29, %v12828_v13  ;;  %v13180_v62 = vmax.f32 %v12881_v60, %v13148_v27  ;;  %v15864_v13 = vld [vmem:[#allocation35_spill] sm:$0xff] }
 0x1c1   : > { %v7172_v19 = vmax.f32 %v15860_v24, %v13124_v42  ;;  %v10260_v25 = vrot.slane %v13156_v8, 9  ;;  %v13184_v31 = vrot.slane %v5788_v39, %v11555_v30  ;;  %v13189_v49 = vmax.f32 %v13049_v15, %v10236_v43 }
 0x1c2   : > { %15857 = vst [vmem:[#allocation80_spill] sm:$0xff] %v13161_v26  ;;  %v13176_v45 = vmax.f32 %v15861_v28, %v13152_v55  ;;  %v5803_v29 = vcombine.high %v13166_v7, %v13166_v7  ;;  %v13197_v52 = vrot.slane %v7984_v3, %v11567_v58  ;;  %v13228_v3 = vrot.slane %v8200_v11, %v11567_v58 }
 0x1c3   : > { %15862 = vst [vmem:[#allocation25_spill] sm:$0xff] %v13184_v31  ;;  %v7480_v60 = vmax.f32 %v12988_v17, %v7172_v19  ;;  %v7763_v39 = vmax.f32 %v13156_v8, %v10260_v25  ;;  %v5804_v24 = vcombine.high %v13184_v31, %v13184_v31  ;;  %v10217_v28 = vrot.slane %v7172_v19, 9  ;;  %v15866_v31 = vld [vmem:[#allocation61_spill] sm:$0xff] }
 0x1c4   : > { %15863 = vst [vmem:[#allocation45_spill] sm:$0xff] %v13197_v52  ;;  %v10272_v40 = vrot.slane %v13176_v45, 9  ;;  %v13204_v15 = vmax.f32 %v12901_v50, %v5803_v29  ;;  %v5162_v17 = vadd.f32 %v12395_v5, %v15864_v13  ;;  %9303 = vrot.lane.b32.xlu1 %v13143_v61, %s10769_s29  ;;  %v13219_v29 = vpop.f32.mrb[70].mxu1  ;;  %v4991_v13 = vadd.f32 %v12395_v5, %v15866_v31 }
 0x1c5   : > { %v7775_v25 = vmax.f32 %v7763_v39, %v13176_v45  ;;  %v13217_v50 = vmax.f32 %v12918_v34, %v5804_v24  ;;  %15865 = vst [vmem:[#allocation35_spill] sm:$0xff] %v13219_v29  ;;  %v7540_v43 = vmax.f32 %v7172_v19, %v10217_v28  ;;  %v10611_v52 = vpop.f32.mrb[71].mxu1  ;;  %15867 = vst [vmem:[#allocation61_spill] sm:$0xff] %v13228_v3 }
 0x1c6   : > { %v7835_v53 = vmax.f32 %v13176_v45, %v10272_v40  ;;  %v5300_v16 = vmax.f32 %v5162_v17, 0.0  ;;  %v15868_v40 = vld [vmem:[#allocation66_spill] sm:$0xff]  ;;  %v13235_v24 = vpop.f32.mrb[72].mxu1  ;;  %v5257_v52 = vmax.f32 %v4991_v13, 0.0  ;;  %v10284_v17 = vrot.slane %v13180_v62, 9 }
 0x1c7   : > { %v5167_v19 = vadd.f32 %v12395_v5, %v15868_v40  ;;  %15869 = vst [vmem:[#allocation66_spill] sm:$0xff] %v13235_v24  ;;  %v7552_v31 = vmax.f32 %v7540_v43, %v12926_v0  ;;  %v10614_v11 = vpop.f32.mrb[73].mxu1  ;;  %v15871_v24 = vld [vmem:[#allocation64_spill] sm:$0xff]  ;;  %v13315_v29 = vrot.slane %v7775_v25, %v11567_v58  ;;  %v13332_v25 = vcombine.high %v12985_v44, %v12985_v44 }
 0x1c8   : > { %v7847_v39 = vmax.f32 %v7835_v53, %v13180_v62  ;;  %v6536_v28 = vcombine.high %v5300_v16, %v5300_v16  ;;  %v13239_v34 = vrot.slane %v5300_v16, %v11555_v30  ;;  %9424 = vrot.lane.b32.xlu1 %v13143_v61, %s10770_s30  ;;  %v15870_v53 = vmax.f32 %v12292_v21, %v12581_v36  ;;  %v13470_v26 = vpop.f32.mrb[74].mxu1 }
 0x1c9   : > { %v5301_v45 = vmax.f32 %v5167_v19, 0.0  ;;  %v4994_v0 = vadd.f32 %v12395_v5, %v15871_v24  ;;  %v8305_v16 = vrot.slane %v7552_v31, %v11567_v58  ;;  %v5805_v21 = vcombine.high %v5257_v52, %v5257_v52  ;;  %15879 = vst [vmem:[#allocation86_spill] sm:$0xff] %v13315_v29 }
 0x1ca   : > { %v13248_v40 = vmax.f32 %v15870_v53, %v13225_v4  ;;  %v13254_v43 = vrot.slane %v6536_v28, %v11555_v30  ;;  %v13258_v13 = vcombine.high %v13239_v34, %v13239_v34  ;;  %v13262_v11 = vmax.f32 %v12888_v2, %v13239_v34 }
 0x1cb   : > { %v13265_v36 = vrot.slane %v5257_v52, %v11555_v30  ;;  %v9004_v31 = vsel %vm4854_vm0, %v7480_v60, %v8305_v16  ;;  %v15874_v28 = vmax.f32 %v12893_v59, %v12929_v9  ;;  %v13289_v60 = vrot.slane %v5805_v21, %v11555_v30 }
 0x1cc   : > { %15872 = vst [vmem:[#allocation64_spill] sm:$0xff] %v13258_v13  ;;  %15873 = vst [vmem:[#allocation81_spill] sm:$0xff] %v13262_v11  ;;  %v7768_v19 = vmax.f32 %v13012_v20, %v13248_v40  ;;  %v10265_v24 = vrot.slane %v13248_v40, 9  ;;  %v13279_v2 = vmax.f32 %v12965_v46, %v13254_v43  ;;  %v10308_v52 = vrot.slane %v13262_v11, 9  ;;  %9545 = vrot.lane.b32.xlu1 %v13143_v61, %s10771_s6 }
 0x1cd   : > { %v13275_v53 = vmax.f32 %v15874_v28, %v13258_v13  ;;  %v13286_v20 = vsel %vm9014_vm3, %v9004_v31, %v13075_v32  ;;  %15876 = vst [vmem:[#allocation83_spill] sm:$0xff] %v13289_v60  ;;  %v5820_v59 = vcombine.high %v13265_v36, %v13265_v36  ;;  %v5258_v61 = vmax.f32 %v4994_v0, 0.0 }
 0x1ce   : > { %v13296_v46 = vmax.f32 %v13262_v11, %v10308_v52  ;;  %v13300_v28 = vmax.f32 %v13248_v40, %v10265_v24  ;;  %v13303_v32 = vmax.f32 %v13180_v62, %v10284_v17  ;;  %v5821_v21 = vcombine.high %v13289_v60, %v13289_v60  ;;  %v13312_v52 = vpop.f32.mrb[72].mxu0  ;;  %v15882_v17 = vld [vmem:[#allocation58_spill] sm:$0xff] }
 0x1cf   : > { %15875 = vst [vmem:[#allocation82_spill] sm:$0xff] %v13275_v53  ;;  %v10320_v16 = vrot.slane %v13275_v53, 9  ;;  %v13308_v31 = vmax.f32 %v12982_v51, %v5820_v59  ;;  %15878 = vst [vmem:[#allocation85_spill] sm:$0xff] %v13312_v52  ;;  %v10526_v0 = vpop.f32.mrb[73].mxu0  ;;  %v6553_v24 = vcombine.high %v5301_v45, %v5301_v45  ;;  %v13328_v59 = vrot.slane %v5301_v45, %v11555_v30 }
 0x1d0   : > { %15877 = vst [vmem:[#allocation84_spill] sm:$0xff] %v13296_v46  ;;  %v13325_v51 = vmax.f32 %v12985_v44, %v5821_v21  ;;  %v13335_v40 = vrot.slane %v7847_v39, %v11567_v58  ;;  %v5822_v9 = vcombine.high %v5258_v61, %v5258_v61  ;;  %v13340_v0 = vrot.slane %v5258_v61, %v11555_v30  ;;  %v15883_v39 = vld [vmem:[#allocation26_spill] sm:$0xff]  ;;  %v13380_v60 = vpop.f32.mrb[74].mxu0 }
 0x1d1   : > { %v13320_v62 = vmax.f32 %v13275_v53, %v10320_v16  ;;  %v13343_v21 = vrot.slane %v6553_v24, %v11555_v30  ;;  %v6568_v45 = vcombine.high %v13328_v59, %v13328_v59  ;;  %v15884_v52 = vmax.f32 %v15882_v17, %v15883_v39  ;;  %15887 = vst [vmem:[#allocation89_spill] sm:$0xff] %v13380_v60  ;;  %v10527_v46 = vpop.f32.mrb[75].mxu0 }
 0x1d2   : > { %15880 = vst [vmem:[#allocation87_spill] sm:$0xff] %v13335_v40  ;;  %v10332_v16 = vrot.slane %v13279_v2, 9  ;;  %v13357_v61 = vrot.slane %v5822_v9, %v11555_v30  ;;  %v5837_v24 = vcombine.high %v13340_v0, %v13340_v0  ;;  %v15893_v46 = vld [vmem:[#allocation70_spill] sm:$0xff] }
 0x1d3   : > { %15881 = vst [vmem:[#allocation88_spill] sm:$0xff] %v13343_v21  ;;  %v13353_v53 = vmax.f32 %v15884_v52, %v13332_v25  ;;  %v6569_v44 = vcombine.high %v13343_v21, %v13343_v21  ;;  %v13366_v40 = vmax.f32 %v13015_v33, %v6568_v45  ;;  %v15888_v45 = vld [vmem:[#allocation36_spill] sm:$0xff]  ;;  %v15889_v52 = vld [vmem:[#allocation30_spill] sm:$0xff] }
 0x1d4   : > { %15886 = vst [vmem:[#allocation26_spill] sm:$0xff] %v13357_v61  ;;  %v5838_v9 = vcombine.high %v13357_v61, %v13357_v61  ;;  %v13375_v39 = vmax.f32 %v13072_v1, %v5837_v24  ;;  %v9036_v17 = vsel %vm9027_vm4, %v15889_v52, %v15888_v45  ;;  %v15890_v21 = vld [vmem:[#allocation32_spill] sm:$0xff]  ;;  %v15891_v1 = vcombine.high %v13083_v12, %v13083_v12 }
 0x1d5   : > { %15885 = vst [vmem:[#allocation58_spill] sm:$0xff] %v13353_v53  ;;  %v10313_v29 = vrot.slane %v13353_v53, 9  ;;  %v13383_v33 = vmax.f32 %v13029_v10, %v6569_v44  ;;  %v4999_v22 = vadd.f32 %v12395_v5, %v15890_v21  ;;  %v9049_v44 = vsel %vm9040_vm5, %v9036_v17, %v12979_v37 }
 0x1d6   : > { %v7184_v24 = vmax.f32 %v12820_v57, %v15891_v1  ;;  %v13395_v61 = vmax.f32 %v13083_v12, %v5838_v9  ;;  %v5170_v52 = vadd.f32 %v12395_v5, %v15892_v6  ;;  %v13405_v21 = vrot.slane %v7768_v19, %v11567_v58  ;;  %v15894_v9 = vld [vmem:[#allocation20_spill] sm:$0xff]  ;;  %v15895_v19 = vld [vmem:[#allocation29_spill] sm:$0xff] }
 0x1d7   : > { %v13398_v60 = vmax.f32 %v13353_v53, %v10313_v29  ;;  %v9062_v45 = vsel %vm9053_vm6, %v9049_v44, %v12991_v56  ;;  %v5259_v57 = vmax.f32 %v4999_v22, 0.0  ;;  %v13411_v12 = vcombine.high %v13029_v10, %v13029_v10  ;;  %v15897_v10 = vld [vmem:[#allocation60_spill] sm:$0xff]  ;;  %15905 = vst [vmem:[#allocation20_spill] sm:$0xff] %v13470_v26 }
 0x1d8   : > { %v9075_v37 = vsel %vm9066_vm7, %v9062_v45, %v15893_v46  ;;  %v5302_v17 = vmax.f32 %v5170_v52, 0.0  ;;  %v5175_v6 = vadd.f32 %v12395_v5, %v15894_v9  ;;  %v15898_v44 = vld [vmem:[#allocation72_spill] sm:$0xff]  ;;  %v13439_v46 = vcombine.high %v13148_v27, %v13148_v27 }
 0x1d9   : > { %v13421_v1 = vsel %vm9079_vm8, %v9075_v37, %v15895_v19  ;;  %v5839_v56 = vcombine.high %v5259_v57, %v5259_v57  ;;  %v13424_v22 = vrot.slane %v5259_v57, %v11555_v30  ;;  %v15899_v48 = vmax.f32 %v15897_v10, %v15898_v44  ;;  %v13441_v37 = vpop.f32.mrb[76].mxu0 }
 0x1da   : > { %15896 = vst [vmem:[#allocation36_spill] sm:$0xff] %v13421_v1  ;;  %v13432_v45 = vmul.f32 %v13421_v1, %v13421_v1  ;;  %v6570_v52 = vcombine.high %v5302_v17, %v5302_v17  ;;  %v13435_v5 = vrot.slane %v5302_v17, %v11555_v30  ;;  %15901 = vst [vmem:[#allocation32_spill] sm:$0xff] %v13441_v37  ;;  %v10530_v10 = vpop.f32.mrb[77].mxu0 }
 0x1db   : > { %v7356_v29 = vmax.f32 %v15899_v48, %v13411_v12  ;;  %v13444_v57 = vrot.slane %v5839_v56, %v11555_v30  ;;  %v13448_v48 = vcombine.high %v13424_v22, %v13424_v22  ;;  %v7197_v9 = vmax.f32 %v7184_v24, %v13424_v22  ;;  %v13488_v26 = vpop.f32.mrb[78].mxu0 }
 0x1dc   : > { %15900 = vst [vmem:[#allocation30_spill] sm:$0xff] %v13432_v45  ;;  %9208 = vrot.lane.b32.xlu0 %v13432_v45, %s10768_s28  ;;  %v13455_v17 = vrot.slane %v6570_v52, %v11555_v30  ;;  %v6585_v44 = vcombine.high %v13435_v5, %v13435_v5  ;;  %v15904_v24 = vmax.f32 %v13124_v42, %v13166_v7  ;;  %v10615_v7 = vpop.f32.mrb[75].mxu1  ;;  %15907 = vst [vmem:[#allocation60_spill] sm:$0xff] %v13488_v26 }
 0x1dd   : > { %15902 = vst [vmem:[#allocation22_spill] sm:$0xff] %v13448_v48  ;;  %v7631_v19 = vmax.f32 %v13189_v49, %v7356_v29  ;;  %v10248_v1 = vrot.slane %v7356_v29, 9  ;;  %v13467_v49 = vmax.f32 %v13204_v15, %v13444_v57  ;;  %v10206_v10 = vrot.slane %v7197_v9, 9  ;;  %v15909_v7 = vld [vmem:[#allocation47_spill] sm:$0xff] }
 0x1de   : > { %15903 = vst [vmem:[#allocation70_spill] sm:$0xff] %v13455_v17  ;;  %v7198_v37 = vmax.f32 %v15904_v24, %v13448_v48  ;;  %v6586_v3 = vcombine.high %v13455_v17, %v13455_v17  ;;  %v13475_v56 = vmax.f32 %v13131_v35, %v6585_v44  ;;  %v13482_v15 = vmax.f32 %v13279_v2, %v10332_v16 }
 0x1df   : > { %v8405_v52 = vrot.slane %v7631_v19, %v11567_v58  ;;  %v13479_v42 = vmax.f32 %v7356_v29, %v10248_v1  ;;  %v7469_v24 = vmax.f32 %v7197_v9, %v10206_v10  ;;  %v5303_v29 = vmax.f32 %v5175_v6, 0.0  ;;  %v15908_v1 = vld [vmem:[#allocation46_spill] sm:$0xff]  ;;  %v15912_v6 = vld [vmem:[#allocation68_spill] sm:$0xff] }
 0x1e0   : > { %v10218_v41 = vrot.slane %v7198_v37, 9  ;;  %v13491_v35 = vmax.f32 %v13148_v27, %v6586_v3  ;;  %v15910_v16 = vmax.f32 %v15908_v1, %v15909_v7  ;;  %9329 = vrot.lane.b32.xlu0 %v13432_v45, %s10769_s29  ;;  %v15911_v9 = vmax.f32 %v13300_v28, %v13003_v63 }
 0x1e1   : > { %v13486_v19 = vsel %vm9014_vm3, %v13139_v54, %v8405_v52  ;;  %v10531_v54 = vpop.f32.mrb[79].mxu0  ;;  %v7481_v3 = vmax.f32 %v7469_v24, %v7198_v37  ;;  %v15913_v52 = vld [vmem:[#allocation24_spill] sm:$0xff]  ;;  %v15915_v7 = vmax.f32 %v13320_v62, %v13279_v2  ;;  %v13521_v26 = vrot.slane %v5303_v29, %v11555_v30  ;;  %v13532_v2 = vld [vmem:[%s15498_s2] ss:$0 sm:$0xff]  ;;  %v15918_v62 = vld [vmem:[#allocation39_spill] sm:$0xff] }
 0x1e2   : > { %15906 = vst [vmem:[#allocation29_spill] sm:$0xff] %v13486_v19  ;;  %v13499_v53 = vmax.f32 %v15910_v16, %v13439_v46  ;;  %v13507_v27 = vrot.slane %v15911_v9, %v11567_v58  ;;  %v7541_v10 = vmax.f32 %v7198_v37, %v10218_v41  ;;  %v15914_v44 = vmax.f32 %v15912_v6, %v15913_v52  ;;  %v15917_v37 = vld [vmem:[#allocation23_spill] sm:$0xff] }
 0x1e3   : > { %v13518_v16 = vrot.slane %v15915_v7, %v11567_v58  ;;  %v6587_v54 = vcombine.high %v5303_v29, %v5303_v29  ;;  %v5002_v24 = vadd.f32 %v13532_v2, %v15918_v62  ;;  %v6602_v9 = vcombine.high %v13521_v26, %v13521_v26 }
 0x1e4   : > { %v9100_v1 = vsel %vm4854_vm0, %v15914_v44, %v13043_v47  ;;  %v7553_v41 = vmax.f32 %v7541_v10, %v13467_v49  ;;  %v10296_v28 = vrot.slane %v13499_v53, 9  ;;  %v10230_v44 = vrot.slane %v13467_v49, 9  ;;  %9450 = vrot.lane.b32.xlu0 %v13432_v45, %s10770_s30 }
 0x1e5   : > { %15916 = vst [vmem:[#allocation72_spill] sm:$0xff] %v13518_v16  ;;  %v9112_v47 = vsel %vm9014_vm3, %v9100_v1, %v15917_v37  ;;  %v13538_v29 = vrot.slane %v6587_v54, %v11555_v30  ;;  %v15921_v1 = vld [vmem:[#allocation38_spill] sm:$0xff]  ;;  %v5260_v37 = vmax.f32 %v5002_v24, 0.0  ;;  %v13559_v10 = vmax.f32 %v13239_v34, %v6602_v9  ;;  %v15926_v9 = vld [vmem:[#allocation71_spill] sm:$0xff]  ;;  %v15931_v16 = vld [vmem:[#allocation49_spill] sm:$0xff] }
 0x1e6   : > { %v8309_v6 = vrot.slane %v7553_v41, %v11567_v58  ;;  %v13548_v52 = vmax.f32 %v13499_v53, %v10296_v28  ;;  %v15922_v7 = vrot.slane %v15921_v1, %v11567_v58  ;;  %v13614_v11 = vmax.f32 %v13467_v49, %v10230_v44  ;;  %v13630_v44 = vpop.f32.mrb[80].mxu0 }
 0x1e7   : > { %15919 = vst [vmem:[#allocation46_spill] sm:$0xff] %v13538_v29  ;;  %v6603_v62 = vcombine.high %v13538_v29, %v13538_v29  ;;  %v5856_v24 = vcombine.high %v5260_v37, %v5260_v37  ;;  %v13573_v1 = vrot.slane %v5260_v37, %v11555_v30  ;;  %v15932_v29 = vmax.f32 %v12626_v14, %v15931_v16 }
 0x1e8   : > { %15920 = vst [vmem:[#allocation47_spill] sm:$0xff] %v13548_v52  ;;  %v13554_v54 = vsel %vm9027_vm4, %v9112_v47, %v15922_v7  ;;  %v13568_v28 = vsel %vm4854_vm0, %v7481_v3, %v8309_v6  ;;  %v5178_v7 = vadd.f32 %v13532_v2, %v15926_v9  ;;  %v13584_v3 = vcombine.high %v13254_v43, %v13254_v43  ;;  %v15927_v6 = vld [vmem:[#allocation33_spill] sm:$0xff] }
 0x1e9   : > { %15923 = vst [vmem:[#allocation68_spill] sm:$0xff] %v13554_v54  ;;  %v13565_v41 = vmul.f32 %v13554_v54, %v13554_v54  ;;  %v13576_v34 = vmax.f32 %v13254_v43, %v6603_v62  ;;  %v5007_v63 = vadd.f32 %v13532_v2, %v15927_v6  ;;  %v13589_v47 = vrot.slane %v5856_v24, %v11555_v30  ;;  %v15929_v54 = vld [vmem:[#allocation73_spill] sm:$0xff] }
 0x1ea   : > { %v13593_v37 = vcombine.high %v13573_v1, %v13573_v1  ;;  %v13597_v62 = vmax.f32 %v13217_v50, %v13573_v1  ;;  %v5183_v9 = vadd.f32 %v13532_v2, %v15929_v54  ;;  %9571 = vrot.lane.b32.xlu0 %v13432_v45, %s10771_s6  ;;  %v15930_v43 = vmax.f32 %v13398_v60, %v13095_v38 }
 0x1eb   : > { %15924 = vst [vmem:[#allocation24_spill] sm:$0xff] %v13565_v41  ;;  %15925 = vst [vmem:[#allocation23_spill] sm:$0xff] %v13576_v34  ;;  %9210 = vrot.lane.b32.xlu1 %v13565_v41, %s10768_s28  ;;  %v5304_v6 = vmax.f32 %v5178_v7, 0.0  ;;  %v7364_v13 = vmax.f32 %v15932_v29, %v13584_v3  ;;  %v5261_v50 = vmax.f32 %v5007_v63, 0.0  ;;  %v15933_v54 = vmax.f32 %v13225_v4, %v13265_v36 }
 0x1ec   : > { %15928 = vst [vmem:[#allocation39_spill] sm:$0xff] %v13593_v37  ;;  %v13607_v24 = vrot.slane %v15930_v43, %v11567_v58  ;;  %v7203_v38 = vmax.f32 %v13308_v31, %v13589_v47  ;;  %v10254_v60 = vrot.slane %v13597_v62, 9  ;;  %v5305_v36 = vmax.f32 %v5183_v9, 0.0  ;;  %15934 = vst [vmem:[#allocation38_spill] sm:$0xff] %v13630_v44 }
 0x1ed   : > { %v7202_v45 = vmax.f32 %v15933_v54, %v13593_v37  ;;  %v6604_v7 = vcombine.high %v5304_v6, %v5304_v6  ;;  %v13624_v43 = vrot.slane %v5304_v6, %v11555_v30  ;;  %v8207_v14 = vmax.f32 %v13482_v15, %v7364_v13  ;;  %v10534_v54 = vpop.f32.mrb[81].mxu0 }
 0x1ee   : > { %v10344_v16 = vrot.slane %v7364_v13, 9  ;;  %v7757_v49 = vmax.f32 %v13597_v62, %v10254_v60  ;;  %v5873_v4 = vcombine.high %v5261_v50, %v5261_v50  ;;  %v10278_v17 = vrot.slane %v7203_v38, 9  ;;  %v15935_v60 = vld [vmem:[#allocation37_spill] sm:$0xff]  ;;  %v13641_v9 = vpop.f32.mrb[82].mxu0 }
 0x1ef   : > { %9331 = vrot.lane.b32.xlu1 %v13565_v41, %s10769_s29  ;;  %v10266_v63 = vrot.slane %v7202_v45, 9  ;;  %v13633_v31 = vrot.slane %v6604_v7, %v11555_v30  ;;  %v6619_v29 = vcombine.high %v13624_v43, %v13624_v43  ;;  %v5010_v55 = vadd.f32 %v13532_v2, %v15935_v60  ;;  %15936 = vst [vmem:[#allocation71_spill] sm:$0xff] %v13641_v9 }
 0x1f0   : > { %v8267_v6 = vmax.f32 %v7364_v13, %v10344_v16  ;;  %v7769_v52 = vmax.f32 %v7757_v49, %v7202_v45  ;;  %v15937_v34 = vmax.f32 %v12974_v18, %v13328_v59  ;;  %v13654_v13 = vrot.slane %v5261_v50, %v11555_v30 }
 0x1f1   : > { %v7829_v19 = vmax.f32 %v7202_v45, %v10266_v63  ;;  %v13644_v44 = vmax.f32 %v13328_v59, %v6619_v29  ;;  %v7379_v7 = vmax.f32 %v13366_v40, %v13633_v31  ;;  %v10535_v45 = vpop.f32.mrb[83].mxu0  ;;  %v15939_v16 = vmax.f32 %v13479_v42, %v13156_v8 }
 0x1f2   : > { %v13651_v15 = vmax.f32 %v8267_v6, %v15937_v34  ;;  %v13665_v40 = vrot.slane %v5873_v4, %v11555_v30  ;;  %v6621_v18 = vcombine.high %v5305_v36, %v5305_v36  ;;  %v15940_v59 = vmax.f32 %v13303_v32, %v13499_v53 }
 0x1f3   : > { %9452 = vrot.lane.b32.xlu1 %v13565_v41, %s10770_s30  ;;  %v13662_v49 = vrot.slane %v15939_v16, %v11567_v58  ;;  %v7841_v63 = vmax.f32 %v7829_v19, %v7203_v38  ;;  %v13675_v50 = vcombine.high %v13654_v13, %v13654_v13  ;;  %v13679_v8 = vmax.f32 %v13325_v51, %v13654_v13 }
 0x1f4   : > { %15938 = vst [vmem:[#allocation33_spill] sm:$0xff] %v13651_v15  ;;  %v13671_v34 = vrot.slane %v15940_v59, %v11567_v58  ;;  %v13682_v42 = vrot.slane %v5305_v36, %v11555_v30  ;;  %v13684_v19 = vmax.f32 %v7203_v38, %v10278_v17  ;;  %v13688_v4 = vmax.f32 %v13375_v39, %v13665_v40 }
 0x1f5   : > { %15941 = vst [vmem:[#allocation73_spill] sm:$0xff] %v13675_v50  ;;  %v13691_v53 = vrot.slane %v6621_v18, %v11555_v30  ;;  %v5262_v32 = vmax.f32 %v5010_v55, 0.0  ;;  %v13694_v29 = vrot.slane %v8207_v14, %v11567_v58  ;;  %v15943_v51 = vmax.f32 %v13332_v25, %v13340_v0 }
 0x1f6   : > { %v10302_v17 = vrot.slane %v13679_v8, 9  ;;  %v13705_v38 = vcombine.high %v13682_v42, %v13682_v42  ;;  %v13710_v55 = vrot.slane %v7769_v52, %v11567_v58  ;;  %v13714_v39 = vmax.f32 %v13383_v33, %v13682_v42 }
 0x1f7   : > { %15942 = vst [vmem:[#allocation49_spill] sm:$0xff] %v13694_v29  ;;  %v13700_v6 = vmax.f32 %v15943_v51, %v13675_v50  ;;  %9573 = vrot.lane.b32.xlu1 %v13565_v41, %s10771_s6  ;;  %v13718_v25 = vmax.f32 %v13475_v56, %v13691_v53  ;;  %v5890_v0 = vcombine.high %v5262_v32, %v5262_v32  ;;  %v10213_v56 = vrot.slane %v7379_v7, 9  ;;  %v15985_v29 = vld [vmem:[#allocation26_spill] sm:$0xff] }
 0x1f8   : > { %15945 = vst [vmem:[#allocation90_spill] sm:$0xff] %v13710_v55  ;;  %v13721_v14 = vmax.f32 %v13679_v8, %v10302_v17  ;;  %v15947_v54 = vmax.f32 %v13411_v12, %v13435_v5  ;;  %v13731_v60 = vrot.slane %v5262_v32, %v11555_v30  ;;  %v13734_v33 = vrot.slane %v7841_v63, %v11567_v58  ;;  %v13748_v32 = vpop.f32.mrb[84].mxu0 }
 0x1f9   : > { %15944 = vst [vmem:[#allocation37_spill] sm:$0xff] %v13700_v6  ;;  %v10314_v36 = vrot.slane %v13700_v6, 9  ;;  %v10237_v45 = vrot.slane %v13714_v39, 9  ;;  %v13738_v16 = vrot.slane %v5890_v0, %v11555_v30  ;;  %15950 = vst [vmem:[#allocation94_spill] sm:$0xff] %v13748_v32  ;;  %v10326_v63 = vrot.slane %v13688_v4, 9  ;;  %v15952_v0 = vld [vmem:[#allocation76_spill] sm:$0xff] }
 0x1fa   : > { %15946 = vst [vmem:[#allocation91_spill] sm:$0xff] %v13721_v14  ;;  %v13728_v52 = vmax.f32 %v15947_v54, %v13705_v38  ;;  %15948 = vst [vmem:[#allocation92_spill] sm:$0xff] %v13734_v33  ;;  %v5905_v5 = vcombine.high %v13731_v60, %v13731_v60  ;;  %v15953_v32 = vld [vmem:[#allocation27_spill] sm:$0xff] }
 0x1fb   : > { %15949 = vst [vmem:[#allocation93_spill] sm:$0xff] %v13738_v16  ;;  %v13743_v59 = vmax.f32 %v13700_v6, %v10314_v36  ;;  %v13752_v51 = vmax.f32 %v13714_v39, %v10237_v45  ;;  %v5906_v17 = vcombine.high %v13738_v16, %v13738_v16  ;;  %v10538_v36 = vpop.f32.mrb[85].mxu0  ;;  %v15951_v6 = vld [vmem:[#allocation41_spill] sm:$0xff] }
 0x1fc   : > { %v10249_v12 = vrot.slane %v13728_v52, 9  ;;  %v13762_v41 = vmax.f32 %v13424_v22, %v5905_v5  ;;  %v5186_v36 = vadd.f32 %v13532_v2, %v15951_v6 }
 0x1fd   : > { %v8129_v54 = vmax.f32 %v13743_v59, %v13688_v4  ;;  %v7632_v45 = vmax.f32 %v13752_v51, %v13728_v52  ;;  %v13769_v9 = vmax.f32 %v13444_v57, %v5906_v17  ;;  %v9030_v59 = vsel %vm9027_vm4, %v13286_v20, %v15952_v0 }
 0x1fe   : > { %v7692_v18 = vmax.f32 %v13728_v52, %v10249_v12  ;;  %v13776_v12 = vmax.f32 %v7379_v7, %v10213_v56  ;;  %v9043_v5 = vsel %vm9040_vm5, %v9030_v59, %v13405_v21  ;;  %v5015_v52 = vadd.f32 %v13532_v2, %v15953_v32 }
 0x1ff   : > { %v13784_v51 = vmax.f32 %v13688_v4, %v10326_v63  ;;  %v5306_v17 = vmax.f32 %v5186_v36, 0.0  ;;  %v9056_v6 = vsel %vm9053_vm6, %v9043_v5, %v13507_v27  ;;  %v13790_v20 = vcombine.high %v13444_v57, %v13444_v57  ;;  %v15955_v63 = vld [vmem:[#allocation45_spill] sm:$0xff] }
 0x200   : > { %v7704_v22 = vmax.f32 %v7692_v18, %v13718_v25  ;;  %v10261_v7 = vrot.slane %v13718_v25, 9  ;;  %v9069_v56 = vsel %vm9066_vm7, %v9056_v6, %v13159_v23  ;;  %v5263_v21 = vmax.f32 %v5015_v52, 0.0  ;;  %v15954_v18 = vld [vmem:[#allocation21_spill] sm:$0xff] }
 0x201   : > { %v5191_v32 = vadd.f32 %v13532_v2, %v15954_v18  ;;  %v6638_v0 = vcombine.high %v5306_v17, %v5306_v17  ;;  %v13798_v4 = vrot.slane %v5306_v17, %v11555_v30  ;;  %v13802_v27 = vsel %vm9079_vm8, %v9069_v56, %v15955_v63  ;;  %v15957_v57 = vld [vmem:[#allocation65_spill] sm:$0xff] }
 0x202   : > { %15956 = vst [vmem:[#allocation41_spill] sm:$0xff] %v13802_v27  ;;  %v15958_v36 = vld [vmem:[#allocation25_spill] sm:$0xff]  ;;  %v13810_v23 = vmul.f32 %v13802_v27, %v13802_v27  ;;  %v5907_v52 = vcombine.high %v5263_v21, %v5263_v21  ;;  %v13813_v6 = vrot.slane %v5263_v21, %v11555_v30 }
 0x203   : > { %v15959_v59 = vmax.f32 %v15957_v57, %v15958_v36  ;;  %v5307_v18 = vmax.f32 %v5191_v32, 0.0  ;;  %v13816_v17 = vrot.slane %v6638_v0, %v11555_v30  ;;  %v13820_v56 = vcombine.high %v13798_v4, %v13798_v4 }
 0x204   : > { %15960 = vst [vmem:[#allocation76_spill] sm:$0xff] %v13810_v23  ;;  %v13824_v63 = vmax.f32 %v13491_v35, %v13798_v4  ;;  %9184 = vrot.lane.b32.xlu0 %v13810_v23, %s10768_s28  ;;  %v13830_v21 = vrot.slane %v5907_v52, %v11555_v30  ;;  %v5922_v32 = vcombine.high %v13813_v6, %v13813_v6 }
 0x205   : > { %v7200_v5 = vmax.f32 %v15959_v59, %v13790_v20  ;;  %v15962_v35 = vmax.f32 %v13439_v46, %v13521_v26  ;;  %v13856_v46 = vmax.f32 %v13718_v25, %v10261_v7  ;;  %v13869_v33 = vrot.slane %v5307_v18, %v11555_v30 }
 0x206   : > { %15961 = vst [vmem:[#allocation27_spill] sm:$0xff] %v13830_v21  ;;  %v10285_v52 = vrot.slane %v13824_v63, 9  ;;  %v5923_v14 = vcombine.high %v13830_v21, %v13830_v21  ;;  %v13851_v0 = vmax.f32 %v13573_v1, %v5922_v32  ;;  %v6655_v32 = vcombine.high %v5307_v18, %v5307_v18  ;;  %v15983_v21 = vld [vmem:[#allocation34_spill] sm:$0xff] }
 0x207   : > { %v7625_v57 = vmax.f32 %v13614_v11, %v7200_v5  ;;  %v10242_v36 = vrot.slane %v7200_v5, 9  ;;  %v13840_v59 = vmax.f32 %v15962_v35, %v13820_v56  ;;  %v13844_v11 = vmax.f32 %v13559_v10, %v13816_v17 }
 0x208   : > { %v7908_v10 = vmax.f32 %v13824_v63, %v10285_v52  ;;  %v13865_v55 = vmax.f32 %v13589_v47, %v5923_v14  ;;  %9305 = vrot.lane.b32.xlu0 %v13810_v23, %s10769_s29  ;;  %v13874_v25 = vrot.slane %v8129_v54, %v11567_v58  ;;  %v15966_v14 = vld [vmem:[#allocation58_spill] sm:$0xff]  ;;  %v13887_v18 = vrot.slane %v6655_v32, %v11555_v30  ;;  %v15968_v52 = vld [vmem:[#allocation23_spill] sm:$0xff] }
 0x209   : > { %v8381_v27 = vrot.slane %v7625_v57, %v11567_v58  ;;  %v7685_v26 = vmax.f32 %v7200_v5, %v10242_v36  ;;  %v10297_v35 = vrot.slane %v13840_v59, 9  ;;  %v13884_v36 = vrot.slane %v7632_v45, %v11567_v58 }
 0x20a   : > { %15964 = vst [vmem:[#allocation45_spill] sm:$0xff] %v13874_v25  ;;  %v7920_v7 = vmax.f32 %v7908_v10, %v13840_v59  ;;  %v13891_v54 = vcombine.high %v13869_v33, %v13869_v33  ;;  %v5026_v37 = vadd.f32 %v13532_v2, %v15983_v21 }
 0x20b   : > { %v13862_v57 = vsel %vm9014_vm3, %v13568_v28, %v8381_v27  ;;  %v7697_v1 = vmax.f32 %v7685_v26, %v13597_v62  ;;  %v7980_v28 = vmax.f32 %v13840_v59, %v10297_v35  ;;  %v15965_v27 = vld [vmem:[#allocation79_spill] sm:$0xff]  ;;  %v13895_v26 = vmax.f32 %v15968_v52, %v13869_v33 }
 0x20c   : > { %15963 = vst [vmem:[#allocation21_spill] sm:$0xff] %v13862_v57  ;;  %v15967_v5 = vmax.f32 %v15965_v27, %v15966_v14  ;;  %v13898_v59 = vrot.slane %v7704_v22, %v11567_v58  ;;  %v15972_v35 = vld [vmem:[#allocation43_spill] sm:$0xff]  ;;  %v15973_v27 = vmax.f32 %v13584_v3, %v13624_v43  ;;  %v15974_v22 = vld [vmem:[#allocation80_spill] sm:$0xff]  ;;  %9426 = vrot.lane.b32.xlu0 %v13810_v23, %s10770_s30  ;;  %v15984_v57 = vld [vmem:[#allocation78_spill] sm:$0xff] }
 0x20d   : > { %15969 = vst [vmem:[#allocation65_spill] sm:$0xff] %v13895_v26  ;;  %v7992_v10 = vmax.f32 %v7980_v28, %v13844_v11  ;;  %v5018_v32 = vadd.f32 %v13532_v2, %v15972_v35  ;;  %v10333_v52 = vrot.slane %v13895_v26, 9  ;;  %v15986_v15 = vmax.f32 %v15984_v57, %v15985_v29 }
 0x20e   : > { %v9094_v62 = vsel %vm4854_vm0, %v15967_v5, %v13607_v24  ;;  %15970 = vst [vmem:[#allocation25_spill] sm:$0xff] %v13898_v59  ;;  %v15971_v24 = vld [vmem:[#allocation61_spill] sm:$0xff]  ;;  %v7390_v14 = vmax.f32 %v15973_v27, %v13891_v54  ;;  %v7391_v5 = vmax.f32 %v13644_v44, %v13887_v18  ;;  %v15975_v59 = vrot.slane %v15974_v22, %v11567_v58  ;;  %v15979_v27 = vld [vmem:[#allocation42_spill] sm:$0xff] }
 0x20f   : > { %v9106_v45 = vsel %vm9014_vm3, %v9094_v62, %v15971_v24  ;;  %v13920_v62 = vpop.f32.mrb[86].mxu0  ;;  %v10309_v24 = vrot.slane %v13844_v11, 9  ;;  %v5264_v43 = vmax.f32 %v5018_v32, 0.0  ;;  %v13929_v44 = vcombine.high %v13589_v47, %v13589_v47  ;;  %v15980_v47 = vld [vmem:[#allocation28_spill] sm:$0xff] }
 0x210   : > { %v13916_v28 = vsel %vm9027_vm4, %v9106_v45, %v15975_v59  ;;  %15977 = vst [vmem:[#allocation58_spill] sm:$0xff] %v13920_v62  ;;  %v10539_v35 = vpop.f32.mrb[87].mxu0  ;;  %v8196_v59 = vmax.f32 %v13895_v26, %v10333_v52  ;;  %v10345_v45 = vrot.slane %v7390_v14, 9  ;;  %v5023_v22 = vadd.f32 %v13532_v2, %v15979_v27  ;;  %9547 = vrot.lane.b32.xlu0 %v13810_v23, %s10771_s6 }
 0x211   : > { %15976 = vst [vmem:[#allocation79_spill] sm:$0xff] %v13916_v28  ;;  %v13925_v3 = vmul.f32 %v13916_v28, %v13916_v28  ;;  %v13936_v62 = vcombine.high %v13665_v40, %v13665_v40  ;;  %v5924_v28 = vcombine.high %v5264_v43, %v5264_v43  ;;  %v13941_v32 = vrot.slane %v5264_v43, %v11555_v30  ;;  %v15981_v35 = vld [vmem:[#allocation83_spill] sm:$0xff] }
 0x212   : > { %v15982_v25 = vmax.f32 %v15980_v47, %v15981_v35  ;;  %v8208_v27 = vmax.f32 %v8196_v59, %v7390_v14  ;;  %v8268_v16 = vmax.f32 %v7390_v14, %v10345_v45  ;;  %v5265_v48 = vmax.f32 %v5023_v22, 0.0 }
 0x213   : > { %15978 = vst [vmem:[#allocation23_spill] sm:$0xff] %v13925_v3  ;;  %9186 = vrot.lane.b32.xlu1 %v13925_v3, %s10768_s28  ;;  %v13953_v26 = vmax.f32 %v15986_v15, %v13936_v62  ;;  %v13958_v43 = vrot.slane %v5924_v28, %v11555_v30  ;;  %v13966_v59 = vmax.f32 %v13844_v11, %v10309_v24  ;;  %v5266_v35 = vmax.f32 %v5026_v37, 0.0 }
 0x214   : > { %v7204_v52 = vmax.f32 %v15982_v25, %v13929_v44  ;;  %v5939_v25 = vcombine.high %v13941_v32, %v13941_v32  ;;  %v13968_v29 = vmax.f32 %v8268_v16, %v7391_v5  ;;  %v5941_v57 = vcombine.high %v5265_v48, %v5265_v48 }
 0x215   : > { %15987 = vst [vmem:[#allocation61_spill] sm:$0xff] %v13958_v43  ;;  %15988 = vst [vmem:[#allocation43_spill] sm:$0xff] %v13966_v59  ;;  %v13971_v45 = vrot.slane %v7697_v1, %v11567_v58  ;;  %v5940_v28 = vcombine.high %v13958_v43, %v13958_v43  ;;  %v13983_v16 = vrot.slane %v7920_v7, %v11567_v58  ;;  %v10338_v47 = vrot.slane %v13953_v26, 9  ;;  %v16028_v59 = vld [vmem:[#allocation33_spill] sm:$0xff] }
 0x216   : > { %v7913_v14 = vmax.f32 %v13684_v19, %v7204_v52  ;;  %15989 = vst [vmem:[#allocation80_spill] sm:$0xff] %v13968_v29  ;;  %v10290_v15 = vrot.slane %v7204_v52, 9  ;;  %v13978_v22 = vmax.f32 %v13654_v13, %v5939_v25  ;;  %v13988_v1 = vrot.slane %v5265_v48, %v11555_v30  ;;  %v15993_v19 = vld [vmem:[#allocation63_spill] sm:$0xff]  ;;  %v15997_v48 = vld [vmem:[#allocation57_spill] sm:$0xff] }
 0x217   : > { %9307 = vrot.lane.b32.xlu1 %v13925_v3, %s10769_s29  ;;  %15990 = vst [vmem:[#allocation42_spill] sm:$0xff] %v13983_v16  ;;  %v13991_v5 = vrot.slane %v5941_v57, %v11555_v30  ;;  %v13994_v24 = vmax.f32 %v13665_v40, %v5940_v28  ;;  %v8201_v13 = vmax.f32 %v13784_v51, %v13953_v26 }
 0x218   : > { %v13985_v11 = vmax.f32 %v7204_v52, %v10290_v15  ;;  %v5956_v52 = vcombine.high %v13988_v1, %v13988_v1  ;;  %v14008_v40 = vrot.slane %v7992_v10, %v11567_v58  ;;  %v8261_v51 = vmax.f32 %v13953_v26, %v10338_v47 }
 0x219   : > { %v7223_v25 = vmax.f32 %v13762_v41, %v13991_v5  ;;  %v5958_v37 = vcombine.high %v5266_v35, %v5266_v35  ;;  %v14014_v15 = vrot.slane %v5266_v35, %v11555_v30  ;;  %v14017_v57 = vrot.slane %v8208_v27, %v11567_v58 }
 0x21a   : > { %15991 = vst [vmem:[#allocation28_spill] sm:$0xff] %v14008_v40  ;;  %v14020_v28 = vmax.f32 %v13731_v60, %v5956_v52  ;;  %v5194_v41 = vadd.f32 %v13532_v2, %v15993_v19  ;;  %v14026_v10 = vcombine.high %v13633_v31, %v13633_v31  ;;  %v15994_v26 = vmax.f32 %v13395_v61, %v13731_v60  ;;  %v15998_v61 = vld [vmem:[#allocation88_spill] sm:$0xff] }
 0x21b   : > { %9428 = vrot.lane.b32.xlu1 %v13925_v3, %s10770_s30  ;;  %15992 = vst [vmem:[#allocation83_spill] sm:$0xff] %v14017_v57  ;;  %v14034_v35 = vrot.slane %v5958_v37, %v11555_v30  ;;  %v14038_v27 = vcombine.high %v14014_v15, %v14014_v15  ;;  %v14042_v52 = vmax.f32 %v13769_v9, %v14014_v15  ;;  %v10207_v21 = vrot.slane %v7223_v25, 9 }
 0x21c   : > { %v14031_v47 = vmax.f32 %v8261_v51, %v15994_v26  ;;  %v14045_v19 = vrot.slane %v7913_v14, %v11567_v58  ;;  %v5308_v7 = vmax.f32 %v5194_v41, 0.0  ;;  %v15999_v60 = vmax.f32 %v15997_v48, %v15998_v61  ;;  %v16000_v26 = vld [vmem:[#allocation51_spill] sm:$0xff] }
 0x21d   : > { %15996 = vst [vmem:[#allocation78_spill] sm:$0xff] %v14034_v35  ;;  %v5199_v37 = vadd.f32 %v13532_v2, %v16000_v26  ;;  %v16001_v23 = vmax.f32 %v13790_v20, %v13813_v6  ;;  %v14059_v9 = vmax.f32 %v13851_v0, %v14034_v35  ;;  %v10231_v14 = vrot.slane %v14042_v52, 9 }
 0x21e   : > { %15995 = vst [vmem:[#allocation34_spill] sm:$0xff] %v14031_v47  ;;  %v7380_v51 = vmax.f32 %v15999_v60, %v14026_v10  ;;  %v6672_v48 = vcombine.high %v5308_v7, %v5308_v7  ;;  %v14065_v41 = vrot.slane %v5308_v7, %v11555_v30  ;;  %v14071_v6 = vcombine.high %v13691_v53, %v13691_v53 }
 0x21f   : > { %v7226_v57 = vmax.f32 %v16001_v23, %v14038_v27  ;;  %9549 = vrot.lane.b32.xlu1 %v13925_v3, %s10771_s6  ;;  %v7614_v26 = vmax.f32 %v14042_v52, %v10231_v14  ;;  %v5309_v23 = vmax.f32 %v5199_v37, 0.0  ;;  %v10255_v14 = vrot.slane %v14059_v9, 9 }
 0x220   : > { %v7488_v61 = vmax.f32 %v13776_v12, %v7380_v51  ;;  %v10225_v60 = vrot.slane %v7380_v51, 9  ;;  %v14074_v0 = vrot.slane %v6672_v48, %v11555_v30  ;;  %v6687_v3 = vcombine.high %v14065_v41, %v14065_v41 }
 0x221   : > { %v10243_v20 = vrot.slane %v7226_v57, 9  ;;  %v7626_v12 = vmax.f32 %v7614_v26, %v7226_v57  ;;  %v6689_v47 = vcombine.high %v5309_v23, %v5309_v23  ;;  %v14089_v35 = vmax.f32 %v7223_v25, %v10207_v21  ;;  %v16006_v21 = vld [vmem:[#allocation29_spill] sm:$0xff] }
 0x222   : > { %v7548_v40 = vmax.f32 %v7380_v51, %v10225_v60  ;;  %v14084_v43 = vmax.f32 %v13682_v42, %v6687_v3  ;;  %v14092_v51 = vrot.slane %v8201_v13, %v11567_v58  ;;  %v14096_v60 = vrot.slane %v5309_v23, %v11555_v30  ;;  %v16003_v3 = vld [vmem:[#allocation55_spill] sm:$0xff] }
 0x223   : > { %v7686_v16 = vmax.f32 %v7226_v57, %v10243_v20  ;;  %v14100_v42 = vrot.slane %v6689_v47, %v11555_v30  ;;  %v16004_v20 = vld [vmem:[#allocation70_spill] sm:$0xff]  ;;  %v9037_v13 = vsel %vm9027_vm4, %v16006_v21, %v13662_v49  ;;  %v14110_v25 = vmax.f32 %v14059_v9, %v10255_v14  ;;  %v16008_v47 = vld [vmem:[#allocation81_spill] sm:$0xff] }
 0x224   : > { %v7560_v50 = vmax.f32 %v7548_v40, %v13714_v39  ;;  %16002 = vst [vmem:[#allocation26_spill] sm:$0xff] %v14092_v51  ;;  %v16005_v37 = vmax.f32 %v16003_v3, %v16004_v20  ;;  %v16007_v40 = vld [vmem:[#allocation47_spill] sm:$0xff]  ;;  %v16011_v21 = vld [vmem:[#allocation86_spill] sm:$0xff]  ;;  %v16033_v51 = vld [vmem:[#allocation84_spill] sm:$0xff] }
 0x225   : > { %v7698_v57 = vmax.f32 %v7686_v16, %v14059_v9  ;;  %v6704_v16 = vcombine.high %v14096_v60, %v14096_v60  ;;  %v16009_v23 = vmax.f32 %v16007_v40, %v16008_v47  ;;  %v16012_v40 = vld [vmem:[#allocation53_spill] sm:$0xff]  ;;  %v16014_v3 = vld [vmem:[#allocation62_spill] sm:$0xff] }
 0x226   : > { %v8337_v26 = vrot.slane %v7560_v50, %v11567_v58  ;;  %v7384_v39 = vmax.f32 %v16005_v37, %v14071_v6  ;;  %v9050_v50 = vsel %vm9040_vm5, %v9037_v13, %v16011_v21  ;;  %v5031_v47 = vadd.f32 %v13532_v2, %v16012_v40 }
 0x227   : > { %v8765_v48 = vrot.slane %v16009_v23, %v11567_v58  ;;  %v14129_v20 = vmax.f32 %v13798_v4, %v6704_v16  ;;  %v16013_v23 = vld [vmem:[#allocation87_spill] sm:$0xff]  ;;  %v14145_v13 = vcombine.high %v13816_v17, %v13816_v17  ;;  %v14150_v40 = vrot.slane %v7626_v12, %v11567_v58 }
 0x228   : > { %v9012_v37 = vsel %vm4854_vm0, %v7488_v61, %v8337_v26  ;;  %v7776_v49 = vmax.f32 %v13856_v46, %v7384_v39  ;;  %v10273_v9 = vrot.slane %v7384_v39, 9  ;;  %v9063_v46 = vsel %vm9053_vm6, %v9050_v50, %v16013_v23  ;;  %v16018_v23 = vld [vmem:[#allocation64_spill] sm:$0xff] }
 0x229   : > { %v14126_v14 = vsel %vm9014_vm3, %v9012_v37, %v13884_v36  ;;  %v5202_v36 = vadd.f32 %v13532_v2, %v16014_v3  ;;  %v9076_v4 = vsel %vm9066_vm7, %v9063_v46, %v13671_v34  ;;  %v5267_v16 = vmax.f32 %v5031_v47, 0.0  ;;  %v16015_v37 = vld [vmem:[#allocation77_spill] sm:$0xff]  ;;  %v16019_v46 = vld [vmem:[#allocation46_spill] sm:$0xff] }
 0x22a   : > { %16010 = vst [vmem:[#allocation63_spill] sm:$0xff] %v14126_v14  ;;  %v7836_v26 = vmax.f32 %v7384_v39, %v10273_v9  ;;  %v5207_v21 = vadd.f32 %v13532_v2, %v16015_v37  ;;  %v14154_v50 = vsel %vm9079_vm8, %v9076_v4, %v8765_v48  ;;  %v16020_v37 = vmax.f32 %v16018_v23, %v16019_v46 }
 0x22b   : > { %16016 = vst [vmem:[#allocation57_spill] sm:$0xff] %v14154_v50  ;;  %v5310_v3 = vmax.f32 %v5202_v36, 0.0  ;;  %v14158_v34 = vmul.f32 %v14154_v50, %v14154_v50  ;;  %v5975_v9 = vcombine.high %v5267_v16, %v5267_v16  ;;  %v14161_v47 = vrot.slane %v5267_v16, %v11555_v30 }
 0x22c   : > { %v7848_v39 = vmax.f32 %v7836_v26, %v13824_v63  ;;  %v14167_v12 = vmax.f32 %v16020_v37, %v14145_v13  ;;  %v5311_v48 = vmax.f32 %v5207_v21, 0.0  ;;  %v6671_v26 = vcombine.high %v13887_v18, %v13887_v18 }
 0x22d   : > { %16017 = vst [vmem:[#allocation88_spill] sm:$0xff] %v14158_v34  ;;  %v6706_v61 = vcombine.high %v5310_v3, %v5310_v3  ;;  %v14170_v63 = vrot.slane %v5310_v3, %v11555_v30  ;;  %9212 = vrot.lane.b32.xlu0 %v14158_v34, %s10768_s28  ;;  %v14177_v36 = vrot.slane %v5975_v9, %v11555_v30 }
 0x22e   : > { %16021 = vst [vmem:[#allocation51_spill] sm:$0xff] %v14167_v12  ;;  %v14181_v4 = vcombine.high %v14161_v47, %v14161_v47  ;;  %v14185_v16 = vmax.f32 %v13865_v55, %v14161_v47  ;;  %v10321_v46 = vrot.slane %v14167_v12, 9  ;;  %v16023_v37 = vmax.f32 %v13929_v44, %v13941_v32 }
 0x22f   : > { %v14190_v3 = vrot.slane %v6706_v61, %v11555_v30  ;;  %v6721_v23 = vcombine.high %v14170_v63, %v14170_v63  ;;  %v14205_v21 = vmax.f32 %v13978_v22, %v14177_v36  ;;  %v6723_v7 = vcombine.high %v5311_v48, %v5311_v48 }
 0x230   : > { %16022 = vst [vmem:[#allocation55_spill] sm:$0xff] %v14185_v16  ;;  %v14201_v55 = vmax.f32 %v16023_v37, %v14181_v4  ;;  %v10279_v61 = vrot.slane %v14185_v16, 9  ;;  %v14209_v50 = vrot.slane %v7698_v57, %v11567_v58  ;;  %v14217_v44 = vmax.f32 %v14167_v12, %v10321_v46  ;;  %v16027_v46 = vld [vmem:[#allocation65_spill] sm:$0xff] }
 0x231   : > { %v14212_v9 = vmax.f32 %v13869_v33, %v6721_v23  ;;  %v6730_v57 = vrot.slane %v5311_v48, %v11555_v30  ;;  %9333 = vrot.lane.b32.xlu0 %v14158_v34, %s10769_s29  ;;  %v14228_v33 = vpop.permute.xlu0 %9176  ;;  %v14231_v23 = vrot.slane %v7776_v49, %v11567_v58  ;;  %v6737_v32 = vrot.slane %v6723_v7, %v11555_v30  ;;  %v14248_v7 = vpop.permute.xlu1 %9299 }
 0x232   : > { %16024 = vst [vmem:[#allocation70_spill] sm:$0xff] %v14209_v50  ;;  %v14222_v22 = vmax.f32 %v14185_v16, %v10279_v61  ;;  %v10291_v37 = vrot.slane %v14201_v55, 9  ;;  %16025 = vst [vmem:[#allocation29_spill] sm:$0xff] %v14228_v33  ;;  %v7392_v61 = vmax.f32 %v13633_v31, %v6671_v26  ;;  %v8981_v33 = vrot.slane %v16028_v59, %v11567_v58  ;;  %v16032_v59 = vld [vmem:[#allocation72_spill] sm:$0xff]  ;;  %v16037_v26 = vld [vmem:[#allocation49_spill] sm:$0xff] }
 0x233   : > { %16026 = vst [vmem:[#allocation47_spill] sm:$0xff] %v14231_v23  ;;  %v6738_v12 = vcombine.high %v6730_v57, %v6730_v57  ;;  %v14245_v49 = vrot.slane %v7848_v39, %v11567_v58  ;;  %v6739_v23 = vcombine.high %v6737_v32, %v6737_v32  ;;  %v7407_v29 = vmax.f32 %v14084_v43, %v6737_v32  ;;  %v16034_v39 = vld [vmem:[#allocation82_spill] sm:$0xff] }
 0x234   : > { %v14240_v48 = vmax.f32 %v14201_v55, %v10291_v37  ;;  %v7405_v14 = vmax.f32 %v7392_v61, %v6730_v57  ;;  %16030 = vst [vmem:[#allocation86_spill] sm:$0xff] %v14248_v7  ;;  %v16031_v37 = vmax.f32 %v14026_v10, %v14065_v41  ;;  %v16036_v43 = vmax.f32 %v13705_v38, %v14074_v0 }
 0x235   : > { %16029 = vst [vmem:[#allocation81_spill] sm:$0xff] %v14245_v49  ;;  %v16035_v49 = vmax.f32 %v16033_v51, %v16034_v39  ;;  %9454 = vrot.lane.b32.xlu0 %v14158_v34, %s10770_s30  ;;  %v10238_v31 = vrot.slane %v7407_v29, 9  ;;  %v10303_v10 = vrot.slane %v14205_v21, 9  ;;  %v16039_v51 = vld [vmem:[#allocation44_spill] sm:$0xff] }
 0x236   : > { %v7406_v50 = vmax.f32 %v16031_v37, %v6738_v12  ;;  %v7408_v32 = vmax.f32 %v16036_v43, %v6739_v23  ;;  %v10214_v61 = vrot.slane %v7405_v14, 9  ;;  %v14275_v37 = vpop.permute.xlu0 %9297  ;;  %v16042_v23 = vld [vmem:[#allocation35_spill] sm:$0xff] }
 0x237   : > { %v9101_v57 = vsel %vm4854_vm0, %v16035_v49, %v16032_v59  ;;  %v5034_v49 = vadd.f32 %v13532_v2, %v16039_v51  ;;  %16040 = vst [vmem:[#allocation87_spill] sm:$0xff] %v14275_v37  ;;  %v7621_v39 = vmax.f32 %v7407_v29, %v10238_v31  ;;  %v16044_v51 = vld [vmem:[#allocation66_spill] sm:$0xff] }
 0x238   : > { %v9113_v7 = vsel %vm9014_vm3, %v9101_v57, %v16037_v26  ;;  %v10226_v41 = vrot.slane %v7406_v50, 9  ;;  %v7477_v59 = vmax.f32 %v7405_v14, %v10214_v61  ;;  %v5210_v26 = vadd.f32 %v13532_v2, %v16042_v23 }
 0x239   : > { %v14271_v12 = vsel %vm9027_vm4, %v9113_v7, %v8981_v33  ;;  %v5268_v43 = vmax.f32 %v5034_v49, 0.0  ;;  %v16043_v33 = vcombine.high %v14074_v0, %v14074_v0  ;;  %v10250_v16 = vrot.slane %v7408_v32, 9  ;;  %9575 = vrot.lane.b32.xlu0 %v14158_v34, %s10771_s6 }
 0x23a   : > { %16038 = vst [vmem:[#allocation53_spill] sm:$0xff] %v14271_v12  ;;  %v14279_v38 = vmul.f32 %v14271_v12, %v14271_v12  ;;  %v7549_v57 = vmax.f32 %v7406_v50, %v10226_v41  ;;  %v7489_v14 = vmax.f32 %v7477_v59, %v7406_v50  ;;  %v7633_v31 = vmax.f32 %v7621_v39, %v7408_v32  ;;  %v14293_v41 = vpop.permute.xlu1 %9420 }
 0x23b   : > { %v7396_v7 = vmax.f32 %v13691_v53, %v16043_v33  ;;  %v5312_v61 = vmax.f32 %v5210_v26, 0.0  ;;  %v5215_v23 = vadd.f32 %v13532_v2, %v16044_v51  ;;  %16045 = vst [vmem:[#allocation77_spill] sm:$0xff] %v14293_v41  ;;  %v5992_v12 = vcombine.high %v5268_v43, %v5268_v43 }
 0x23c   : > { %16041 = vst [vmem:[#allocation62_spill] sm:$0xff] %v14279_v38  ;;  %9214 = vrot.lane.b32.xlu1 %v14279_v38, %s10768_s28  ;;  %v7561_v49 = vmax.f32 %v7549_v57, %v7407_v29  ;;  %v14296_v0 = vrot.slane %v5268_v43, %v11555_v30  ;;  %v7693_v53 = vmax.f32 %v7408_v32, %v10250_v16  ;;  %v14312_v16 = vpop.permute.xlu0 %9418 }
 0x23d   : > { %v8413_v33 = vrot.slane %v7633_v31, %v11567_v58  ;;  %v6740_v34 = vcombine.high %v5312_v61, %v5312_v61  ;;  %v6747_v50 = vrot.slane %v5312_v61, %v11555_v30  ;;  %v5313_v59 = vmax.f32 %v5215_v23, 0.0  ;;  %16046 = vst [vmem:[#allocation64_spill] sm:$0xff] %v14312_v16 }
 0x23e   : > { %v8341_v39 = vrot.slane %v7561_v49, %v11567_v58  ;;  %v14302_v26 = vrot.slane %v5992_v12, %v11555_v30  ;;  %v14306_v51 = vcombine.high %v14296_v0, %v14296_v0  ;;  %v14310_v29 = vmax.f32 %v13994_v24, %v14296_v0  ;;  %v14332_v16 = vpop.permute.xlu1 %9541 }
 0x23f   : > { %v14315_v32 = vmax.f32 %v14205_v21, %v10303_v10  ;;  %v6754_v57 = vrot.slane %v6740_v34, %v11555_v30  ;;  %v6755_v43 = vcombine.high %v6747_v50, %v6747_v50  ;;  %v7409_v31 = vmax.f32 %v7396_v7, %v6747_v50 }
 0x240   : > { %9335 = vrot.lane.b32.xlu1 %v14279_v38, %s10769_s29  ;;  %v9013_v12 = vsel %vm4854_vm0, %v7489_v14, %v8341_v39  ;;  %v16047_v61 = vmax.f32 %v13936_v62, %v13988_v1  ;;  %v7235_v23 = vmax.f32 %v14020_v28, %v14302_v26  ;;  %v6757_v49 = vcombine.high %v5313_v59, %v5313_v59 }
 0x241   : > { %v9026_v10 = vsel %vm9014_vm3, %v9013_v12, %v8413_v33  ;;  %v10327_v34 = vrot.slane %v14310_v29, 9  ;;  %v6756_v41 = vcombine.high %v6754_v57, %v6754_v57  ;;  %v16048_v7 = vmax.f32 %v14071_v6, %v14096_v60 }
 0x242   : > { %v7234_v24 = vmax.f32 %v16047_v61, %v14306_v51  ;;  %v14335_v39 = vmax.f32 %v14129_v20, %v6754_v57  ;;  %v7705_v62 = vmax.f32 %v7693_v53, %v7409_v31  ;;  %v10262_v1 = vrot.slane %v7409_v31, 9  ;;  %v14348_v57 = vpop.permute.xlu0 %9539 }
 0x243   : > { %v7410_v50 = vmax.f32 %v16048_v7, %v6755_v43  ;;  %v8190_v28 = vmax.f32 %v14310_v29, %v10327_v34  ;;  %v16049_v33 = vmax.f32 %v13820_v56, %v14100_v42  ;;  %v6764_v37 = vrot.slane %v5313_v59, %v11555_v30 }
 0x244   : > { %v10339_v14 = vrot.slane %v7234_v24, 9  ;;  %9456 = vrot.lane.b32.xlu1 %v14279_v38, %s10770_s30  ;;  %v7765_v60 = vmax.f32 %v7409_v31, %v10262_v1  ;;  %v10286_v20 = vrot.slane %v14335_v39, 9  ;;  %v8485_v53 = vrot.slane %v7705_v62, %v11567_v58 }
 0x245   : > { %v14341_v12 = vmax.f32 %v16049_v33, %v6756_v41  ;;  %v10274_v61 = vrot.slane %v7410_v50, 9  ;;  %v8202_v43 = vmax.f32 %v8190_v28, %v7234_v24  ;;  %v6771_v56 = vrot.slane %v6757_v49, %v11555_v30 }
 0x246   : > { %v8262_v6 = vmax.f32 %v7234_v24, %v10339_v14  ;;  %v6772_v41 = vcombine.high %v6764_v37, %v6764_v37  ;;  %v7777_v59 = vmax.f32 %v7765_v60, %v7410_v50  ;;  %v14356_v33 = vmax.f32 %v14335_v39, %v10286_v20 }
 0x247   : > { %v14350_v34 = vmax.f32 %v7410_v50, %v10274_v61  ;;  %v9039_v31 = vsel %vm9027_vm4, %v9026_v10, %v8485_v53  ;;  %v16050_v14 = vmax.f32 %v14217_v44, %v16027_v46  ;;  %v6773_v1 = vcombine.high %v6771_v56, %v6771_v56  ;;  %v14373_v50 = vpop.permute.xlu1 %9206  ;;  %v16063_v53 = vld [vmem:[#allocation90_spill] sm:$0xff] }
 0x248   : > { %v14353_v7 = vmax.f32 %v8262_v6, %v7235_v23  ;;  %v16051_v23 = vcombine.high %v14100_v42, %v14100_v42  ;;  %9577 = vrot.lane.b32.xlu1 %v14279_v38, %s10771_s6  ;;  %v16052_v44 = vmax.f32 %v14222_v22, %v14201_v55  ;;  %v8557_v28 = vrot.slane %v7777_v59, %v11567_v58 }
 0x249   : > { %v14363_v62 = vrot.slane %v16050_v14, %v11567_v58  ;;  %v16053_v42 = vmax.f32 %v14145_v13, %v14170_v63  ;;  %v16054_v61 = vmax.f32 %v14240_v48, %v14205_v21  ;;  %v7415_v55 = vmax.f32 %v14212_v9, %v6771_v56  ;;  %v14407_v48 = vpop.permute.xlu0 %9178  ;;  %v16057_v9 = vld [vmem:[#allocation85_spill] sm:$0xff] }
 0x24a   : > { %v7400_v49 = vmax.f32 %v13816_v17, %v16051_v23  ;;  %v14379_v46 = vrot.slane %v16052_v44, %v11567_v58  ;;  %v16055_v22 = vmax.f32 %v13891_v54, %v14190_v3  ;;  %v14404_v13 = vsel %vm9040_vm5, %v9039_v31, %v8557_v28 }
 0x24b   : > { %v7414_v17 = vmax.f32 %v16053_v42, %v6772_v41  ;;  %v14391_v6 = vrot.slane %v16054_v61, %v11567_v58  ;;  %16056 = vst [vmem:[#allocation46_spill] sm:$0xff] %v14404_v13  ;;  %v10298_v63 = vrot.slane %v14341_v12, 9  ;;  %v10334_v41 = vrot.slane %v7415_v55, 9  ;;  %v16059_v42 = vld [vmem:[#allocation22_spill] sm:$0xff]  ;;  %v16060_v61 = vld [vmem:[#allocation93_spill] sm:$0xff] }
 0x24c   : > { %v14393_v60 = vmax.f32 %v7400_v49, %v6764_v37  ;;  %v14399_v20 = vmax.f32 %v16055_v22, %v6773_v1  ;;  %v5039_v56 = vadd.f32 %v13532_v2, %v16057_v9  ;;  %v14414_v54 = vcombine.high %v13991_v5, %v13991_v5  ;;  %v16058_v1 = vld [vmem:[#allocation21_spill] sm:$0xff] }
 0x24d   : > { %v10322_v21 = vrot.slane %v7414_v17, 9  ;;  %v14417_v59 = vrot.slane %v8202_v43, %v11567_v58  ;;  %v14420_v31 = vmax.f32 %v14341_v12, %v10298_v63  ;;  %v9031_v23 = vsel %vm9027_vm4, %v16058_v1, %v13971_v45  ;;  %v14432_v43 = vpop.permute.xlu1 %9327  ;;  %v16064_v45 = vld [vmem:[#allocation89_spill] sm:$0xff] }
 0x24e   : > { %v10310_v37 = vrot.slane %v14393_v60, 9  ;;  %v14426_v44 = vmax.f32 %v7415_v55, %v10334_v41  ;;  %v5269_v28 = vmax.f32 %v5039_v56, 0.0  ;;  %v16061_v22 = vmax.f32 %v16059_v42, %v16060_v61  ;;  %16062 = vst [vmem:[#allocation65_spill] sm:$0xff] %v14432_v43  ;;  %v16068_v61 = vld [vmem:[#allocation92_spill] sm:$0xff] }
 0x24f   : > { %v8125_v14 = vmax.f32 %v7414_v17, %v10322_v21  ;;  %v9044_v10 = vsel %vm9040_vm5, %v9031_v23, %v16063_v53  ;;  %v14449_v53 = vpop.permute.xlu0 %9204 }
 0x250   : > { %v8053_v49 = vmax.f32 %v14393_v60, %v10310_v37  ;;  %v7224_v9 = vmax.f32 %v16061_v22, %v14414_v54  ;;  %v5042_v37 = vadd.f32 %v13532_v2, %v16064_v45  ;;  %v6009_v1 = vcombine.high %v5269_v28, %v5269_v28  ;;  %16065 = vst [vmem:[#allocation33_spill] sm:$0xff] %v14449_v53  ;;  %v16121_v53 = vld [vmem:[#allocation17_spill] sm:$0xff] }
 0x251   : > { %v8137_v21 = vmax.f32 %v8125_v14, %v7415_v55  ;;  %v14443_v42 = vrot.slane %v5269_v28, %v11555_v30  ;;  %v16066_v28 = vmax.f32 %v13985_v11, %v13679_v8  ;;  %v9057_v56 = vsel %vm9053_vm6, %v9044_v10, %v16068_v61  ;;  %v14476_v11 = vpop.permute.xlu1 %9448  ;;  %v16071_v10 = vld [vmem:[#allocation78_spill] sm:$0xff] }
 0x252   : > { %v8065_v41 = vmax.f32 %v8053_v49, %v7414_v17  ;;  %v7482_v55 = vmax.f32 %v14089_v35, %v7224_v9  ;;  %v10219_v14 = vrot.slane %v7224_v9, 9  ;;  %v14452_v23 = vrot.slane %v6009_v1, %v11555_v30  ;;  %16069 = vst [vmem:[#allocation84_spill] sm:$0xff] %v14476_v11 }
 0x253   : > { %v8845_v22 = vrot.slane %v8137_v21, %v11567_v58  ;;  %v6024_v17 = vcombine.high %v14443_v42, %v14443_v42  ;;  %v8741_v45 = vrot.slane %v16066_v28, %v11567_v58  ;;  %v5270_v1 = vmax.f32 %v5042_v37, 0.0  ;;  %v16074_v28 = vld [vmem:[#allocation39_spill] sm:$0xff] }
 0x254   : > { %v7542_v35 = vmax.f32 %v7224_v9, %v10219_v14  ;;  %v6025_v63 = vcombine.high %v14452_v23, %v14452_v23  ;;  %v9070_v8 = vsel %vm9066_vm7, %v9057_v56, %v14045_v19  ;;  %v14484_v37 = vcombine.high %v16071_v10, %v16071_v10  ;;  %v16073_v56 = vld [vmem:[#allocation32_spill] sm:$0xff] }
 0x255   : > { %v14463_v21 = vsel %vm4854_vm0, %v8065_v41, %v8845_v22  ;;  %v14470_v24 = vmax.f32 %v14014_v15, %v6024_v17  ;;  %v14480_v41 = vsel %vm9079_vm8, %v9070_v8, %v8741_v45  ;;  %v6026_v61 = vcombine.high %v5270_v1, %v5270_v1  ;;  %v16075_v45 = vld [vmem:[#allocation27_spill] sm:$0xff] }
 0x256   : > { %16067 = vst [vmem:[#allocation72_spill] sm:$0xff] %v14463_v21  ;;  %v7554_v9 = vmax.f32 %v7542_v35, %v14042_v52  ;;  %16070 = vst [vmem:[#allocation82_spill] sm:$0xff] %v14480_v41  ;;  %v14487_v15 = vmax.f32 %v16071_v10, %v6025_v63  ;;  %v14491_v22 = vmul.f32 %v14480_v41, %v14480_v41 }
 0x257   : > { %v14494_v19 = vrot.slane %v5270_v1, %v11555_v30  ;;  %v5047_v52 = vadd.f32 %v13532_v2, %v16073_v56  ;;  %v14500_v17 = vrot.slane %v6026_v61, %v11555_v30  ;;  %v16076_v63 = vmax.f32 %v16074_v28, %v16075_v45  ;;  %v14512_v1 = vpop.permute.xlu0 %9325  ;;  %v16078_v56 = vld [vmem:[#allocation20_spill] sm:$0xff] }
 0x258   : > { %16072 = vst [vmem:[#allocation49_spill] sm:$0xff] %v14491_v22  ;;  %v8313_v14 = vrot.slane %v7554_v9, %v11567_v58  ;;  %v14510_v8 = vcombine.high %v14177_v36, %v14177_v36  ;;  %16077 = vst [vmem:[#allocation44_spill] sm:$0xff] %v14512_v1  ;;  %9188 = vrot.lane.b32.xlu0 %v14491_v22, %s10768_s28  ;;  %v5218_v28 = vadd.f32 %v13532_v2, %v16078_v56 }
 0x259   : > { %v14506_v35 = vmax.f32 %v16076_v63, %v14484_v37  ;;  %v6041_v9 = vcombine.high %v14494_v19, %v14494_v19  ;;  %v5271_v61 = vmax.f32 %v5047_v52, 0.0  ;;  %v6042_v63 = vcombine.high %v14500_v17, %v14500_v17 }
 0x25a   : > { %v9006_v45 = vsel %vm4854_vm0, %v7482_v55, %v8313_v14  ;;  %v14537_v55 = vpop.permute.xlu1 %9569  ;;  %v16080_v14 = vmax.f32 %v14350_v34, %v14335_v39  ;;  %v5314_v39 = vmax.f32 %v5218_v28, 0.0  ;;  %v16085_v34 = vcombine.high %v14190_v3, %v14190_v3 }
 0x25b   : > { %v7770_v41 = vmax.f32 %v14110_v25, %v14506_v35  ;;  %v14531_v38 = vsel %vm9014_vm3, %v9006_v45, %v14150_v40  ;;  %v14534_v52 = vmax.f32 %v14161_v47, %v6041_v9  ;;  %v10267_v2 = vrot.slane %v14506_v35, 9  ;;  %16079 = vst [vmem:[#allocation35_spill] sm:$0xff] %v14537_v55  ;;  %v16082_v47 = vld [vmem:[#allocation73_spill] sm:$0xff]  ;;  %v14574_v28 = vpop.permute.xlu0 %9446  ;;  %v16117_v55 = vld [vmem:[#allocation4_spill] sm:$0xff] }
 0x25c   : > { %v6043_v56 = vcombine.high %v5271_v61, %v5271_v61  ;;  %v14543_v49 = vrot.slane %v16080_v14, %v11567_v58  ;;  %v14546_v25 = vmax.f32 %v14177_v36, %v6042_v63  ;;  %v14549_v40 = vrot.slane %v5271_v61, %v11555_v30  ;;  %v16083_v9 = vld [vmem:[#allocation61_spill] sm:$0xff]  ;;  %9309 = vrot.lane.b32.xlu0 %v14491_v22, %s10769_s29 }
 0x25d   : > { %v16084_v45 = vmax.f32 %v16082_v47, %v16083_v9  ;;  %v7830_v21 = vmax.f32 %v14506_v35, %v10267_v2  ;;  %v7404_v36 = vmax.f32 %v13887_v18, %v16085_v34  ;;  %16086 = vst [vmem:[#allocation85_spill] sm:$0xff] %v14574_v28  ;;  %v6780_v47 = vrot.slane %v5314_v39, %v11555_v30  ;;  %v16088_v35 = vld [vmem:[#allocation34_spill] sm:$0xff] }
 0x25e   : > { %16081 = vst [vmem:[#allocation66_spill] sm:$0xff] %v14543_v49  ;;  %v14559_v13 = vrot.slane %v6043_v56, %v11555_v30  ;;  %v6058_v61 = vcombine.high %v14549_v40, %v14549_v40  ;;  %v16087_v56 = vld [vmem:[#allocation55_spill] sm:$0xff]  ;;  %v10346_v34 = vrot.slane %v14399_v20, 9  ;;  %v8957_v63 = vrot.slane %v16088_v35, %v11567_v58  ;;  %v16093_v49 = vld [vmem:[#allocation37_spill] sm:$0xff]  ;;  %v14607_v35 = vpop.permute.xlu1 %9180 }
 0x25f   : > { %v14555_v10 = vmax.f32 %v16084_v45, %v14510_v8  ;;  %v7842_v3 = vmax.f32 %v7830_v21, %v16087_v56  ;;  %v16089_v21 = vmax.f32 %v14356_v33, %v14341_v12  ;;  %v7417_v39 = vmax.f32 %v7404_v36, %v6780_v47  ;;  %16095 = vst [vmem:[#allocation22_spill] sm:$0xff] %v14607_v35  ;;  %v14617_v36 = vld [vmem:[%s15498_s2] ss:$0 sm:$0xff] }
 0x260   : > { %v6059_v18 = vcombine.high %v14559_v13, %v14559_v13  ;;  %v14583_v9 = vmax.f32 %v14296_v0, %v6058_v61  ;;  %v16091_v0 = vld [vmem:[#allocation45_spill] sm:$0xff]  ;;  %v16092_v61 = vld [vmem:[#allocation91_spill] sm:$0xff]  ;;  %9430 = vrot.lane.b32.xlu0 %v14491_v22, %s10770_s30  ;;  %v8269_v33 = vmax.f32 %v14399_v20, %v10346_v34 }
 0x261   : > { %v10315_v2 = vrot.slane %v14555_v10, 9  ;;  %v14595_v56 = vrot.slane %v16089_v21, %v11567_v58  ;;  %v16096_v21 = vld [vmem:[#allocation26_spill] sm:$0xff] }
 0x262   : > { %v14598_v14 = vmax.f32 %v14302_v26, %v6059_v18 }
 0x263   : > { %v14586_v45 = vmax.f32 %v14555_v10, %v10315_v2  ;;  %16090 = vst [vmem:[#allocation21_spill] sm:$0xff] %v14595_v56  ;;  %v16094_v2 = vmax.f32 %v16092_v61, %v16093_v49  ;;  %v16097_v49 = vld [vmem:[#allocation60_spill] sm:$0xff]  ;;  %v16099_v61 = vcombine.high %v14302_v26, %v14302_v26 }
 0x264   : > { %v5050_v47 = vadd.f32 %v14617_v36, %v16097_v49  ;;  %v14638_v49 = vmax.f32 %v8269_v33, %v7417_v39  ;;  %9551 = vrot.lane.b32.xlu0 %v14491_v22, %s10771_s6  ;;  %v16109_v39 = vld [vmem:[#allocation63_spill] sm:$0xff]  ;;  %v16112_v22 = vld [vmem:[#allocation81_spill] sm:$0xff] }
 0x265   : > { %v9095_v28 = vsel %vm4854_vm0, %v16094_v2, %v16091_v0  ;;  %v8130_v12 = vmax.f32 %v14586_v45, %v14310_v29  ;;  %v7236_v29 = vmax.f32 %v13991_v5, %v16099_v61  ;;  %v16100_v45 = vld [vmem:[#allocation38_spill] sm:$0xff]  ;;  %v14644_v5 = vpop.permute.xlu0 %9567 }
 0x266   : > { %v9107_v18 = vsel %vm9014_vm3, %v9095_v28, %v16096_v21  ;;  %v5055_v34 = vadd.f32 %v14617_v36, %v16100_v45  ;;  %v16101_v28 = vld [vmem:[#allocation71_spill] sm:$0xff]  ;;  %v16102_v21 = vmax.f32 %v14420_v31, %v14393_v60  ;;  %v5272_v26 = vmax.f32 %v5050_v47, 0.0  ;;  %16105 = vst [vmem:[#allocation92_spill] sm:$0xff] %v14644_v5  ;;  %v16108_v31 = vld [vmem:[#allocation25_spill] sm:$0xff] }
 0x267   : > { %v14622_v0 = vsel %vm9027_vm4, %v9107_v18, %v8957_v63  ;;  %v5058_v2 = vadd.f32 %v14617_v36, %v16101_v28  ;;  %v16106_v18 = vmax.f32 %v14426_v44, %v14399_v20  ;;  %v9038_v33 = vsel %vm9027_vm4, %v16109_v39, %v16108_v31  ;;  %v16110_v44 = vld [vmem:[#allocation47_spill] sm:$0xff]  ;;  %v14671_v39 = vpop.permute.xlu1 %9182 }
 0x268   : > { %16098 = vst [vmem:[#allocation93_spill] sm:$0xff] %v14622_v0  ;;  %v14636_v35 = vrot.slane %v16102_v21, %v11567_v58  ;;  %v14642_v63 = vmul.f32 %v14622_v0, %v14622_v0  ;;  %v5273_v45 = vmax.f32 %v5055_v34, 0.0  ;;  %v14658_v28 = vrot.slane %v7770_v41, %v11567_v58  ;;  %16111 = vst [vmem:[#allocation32_spill] sm:$0xff] %v14671_v39 }
 0x269   : > { %v14650_v61 = vrot.slane %v16106_v18, %v11567_v58  ;;  %v5274_v60 = vmax.f32 %v5058_v2, 0.0  ;;  %v6060_v47 = vcombine.high %v5272_v26, %v5272_v26  ;;  %v14663_v20 = vrot.slane %v5272_v26, %v11555_v30 }
 0x26a   : > { %16103 = vst [vmem:[#allocation90_spill] sm:$0xff] %v14636_v35  ;;  %16104 = vst [vmem:[#allocation89_spill] sm:$0xff] %v14642_v63  ;;  %9190 = vrot.lane.b32.xlu1 %v14642_v63, %s10768_s28  ;;  %v9051_v34 = vsel %vm9040_vm5, %v9038_v33, %v16110_v44  ;;  %v6077_v21 = vcombine.high %v5273_v45, %v5273_v45  ;;  %v14668_v2 = vrot.slane %v5273_v45, %v11555_v30 }
 0x26b   : > { %16107 = vst [vmem:[#allocation78_spill] sm:$0xff] %v14650_v61  ;;  %v6094_v18 = vcombine.high %v5274_v60, %v5274_v60  ;;  %v6101_v31 = vrot.slane %v5274_v60, %v11555_v30  ;;  %v14674_v41 = vrot.slane %v6060_v47, %v11555_v30  ;;  %v14678_v0 = vcombine.high %v14663_v20, %v14663_v20  ;;  %v14708_v61 = vpop.permute.xlu0 %9301 }
 0x26c   : > { %v7249_v26 = vmax.f32 %v7236_v29, %v14663_v20  ;;  %v14683_v33 = vsel %vm9053_vm6, %v9051_v34, %v16112_v22  ;;  %v14686_v45 = vrot.slane %v6077_v21, %v11555_v30  ;;  %v14690_v60 = vcombine.high %v14668_v2, %v14668_v2  ;;  %16114 = vst [vmem:[#allocation39_spill] sm:$0xff] %v14708_v61 }
 0x26d   : > { %v14694_v47 = vmax.f32 %v14487_v15, %v14668_v2  ;;  %v6108_v44 = vrot.slane %v6094_v18, %v11555_v30  ;;  %v14698_v39 = vrot.slane %v7842_v3, %v11567_v58  ;;  %v16113_v22 = vmax.f32 %v14414_v54, %v14443_v42 }
 0x26e   : > { %v7251_v34 = vmax.f32 %v14470_v24, %v14674_v41  ;;  %v10208_v21 = vrot.slane %v7249_v26, 9  ;;  %9311 = vrot.lane.b32.xlu1 %v14642_v63, %s10769_s29  ;;  %v6093_v15 = vcombine.high %v14686_v45, %v14686_v45  ;;  %v16115_v3 = vmax.f32 %v14484_v37, %v14494_v19 }
 0x26f   : > { %v7250_v29 = vmax.f32 %v16113_v22, %v14678_v0  ;;  %v14720_v54 = vmax.f32 %v14534_v52, %v14686_v45  ;;  %v10256_v24 = vrot.slane %v14694_v47, 9  ;;  %v6109_v5 = vcombine.high %v6101_v31, %v6101_v31 }
 0x270   : > { %v14716_v18 = vmax.f32 %v16115_v3, %v14690_v60  ;;  %v7471_v42 = vmax.f32 %v7249_v26, %v10208_v21  ;;  %v6110_v35 = vcombine.high %v6108_v44, %v6108_v44  ;;  %v16116_v61 = vmax.f32 %v14181_v4, %v14500_v17  ;;  %v14731_v3 = vpop.permute.xlu1 %9303 }
 0x271   : > { %v10220_v22 = vrot.slane %v7250_v29, 9  ;;  %v7269_v1 = vmax.f32 %v6093_v15, %v16117_v55  ;;  %v7759_v37 = vmax.f32 %v14694_v47, %v10256_v24  ;;  %16118 = vst [vmem:[#allocation27_spill] sm:$0xff] %v14731_v3  ;;  %v14734_v52 = vrot.slane %v8130_v12, %v11567_v58 }
 0x272   : > { %v14726_v56 = vmax.f32 %v16116_v61, %v6093_v15  ;;  %v10268_v19 = vrot.slane %v14716_v18, 9  ;;  %v7483_v26 = vmax.f32 %v7471_v42, %v7250_v29  ;;  %v10280_v11 = vrot.slane %v14720_v54, 9  ;;  %9432 = vrot.lane.b32.xlu1 %v14642_v63, %s10770_s30 }
 0x273   : > { %v7543_v21 = vmax.f32 %v7250_v29, %v10220_v22  ;;  %v10232_v4 = vrot.slane %v7251_v34, 9  ;;  %v7771_v17 = vmax.f32 %v7759_v37, %v14716_v18  ;;  %v7257_v15 = vmax.f32 %v14546_v25, %v6101_v31  ;;  %v14751_v22 = vpop.permute.xlu0 %9422 }
 0x274   : > { %v7831_v61 = vmax.f32 %v14716_v18, %v10268_v19  ;;  %v7903_v3 = vmax.f32 %v14720_v54, %v10280_v11  ;;  %v16119_v12 = vmax.f32 %v14510_v8, %v14549_v40  ;;  %v14749_v29 = vmax.f32 %v14583_v9, %v6108_v44  ;;  %16120 = vst [vmem:[#allocation20_spill] sm:$0xff] %v14751_v22  ;;  %v16124_v19 = vld [vmem:[#allocation5_spill] sm:$0xff] }
 0x275   : > { %v7555_v24 = vmax.f32 %v7543_v21, %v7251_v34  ;;  %v14754_v43 = vmax.f32 %v7269_v1, %v16121_v53  ;;  %v16122_v25 = vmax.f32 %v14306_v51, %v14559_v13  ;;  %v16123_v11 = vcombine.high %v16117_v55, %v16117_v55  ;;  %v16126_v51 = vld [vmem:[#allocation6_spill] sm:$0xff] }
 0x276   : > { %v14746_v42 = vmax.f32 %v16119_v12, %v6109_v5  ;;  %v7843_v18 = vmax.f32 %v7831_v61, %v14720_v54  ;;  %v7915_v9 = vmax.f32 %v7903_v3, %v14726_v56  ;;  %v7271_v21 = vmax.f32 %v6109_v5, %v16124_v19  ;;  %9553 = vrot.lane.b32.xlu1 %v14642_v63, %s10771_s6  ;;  %v16127_v54 = vld [vmem:[#allocation11_spill] sm:$0xff]  ;;  %v16131_v12 = vld [vmem:[#allocation12_spill] sm:$0xff] }
 0x277   : > { %v14760_v37 = vmax.f32 %v16122_v25, %v6110_v35  ;;  %v7270_v8 = vmax.f32 %v6101_v31, %v16123_v11  ;;  %v8317_v40 = vrot.slane %v7555_v24, %v11567_v58  ;;  %v16125_v53 = vcombine.high %v16124_v19, %v16124_v19  ;;  %v14776_v31 = vpop.permute.xlu1 %9424  ;;  %v16129_v24 = vld [vmem:[#allocation18_spill] sm:$0xff]  ;;  %v16133_v63 = vld [vmem:[#allocation19_spill] sm:$0xff] }
 0x278   : > { %v7273_v13 = vmax.f32 %v6110_v35, %v16126_v51  ;;  %v10292_v55 = vrot.slane %v14726_v56, 9  ;;  %16128 = vst [vmem:[#allocation73_spill] sm:$0xff] %v14776_v31  ;;  %v14787_v11 = vmax.f32 %v7251_v34, %v10232_v4  ;;  %v10293_v35 = vrot.slane %v14754_v43, 9 }
 0x279   : > { %v7272_v1 = vmax.f32 %v6108_v44, %v16125_v53  ;;  %v7283_v61 = vmax.f32 %v7270_v8, %v16127_v54  ;;  %v14781_v5 = vsel %vm4854_vm0, %v7483_v26, %v8317_v40  ;;  %v14784_v44 = vmax.f32 %v7271_v21, %v16129_v24  ;;  %v14794_v40 = vpop.permute.xlu0 %9543 }
 0x27a   : > { %v7975_v8 = vmax.f32 %v14726_v56, %v10292_v55  ;;  %v10304_v19 = vrot.slane %v7257_v15, 9  ;;  %v10316_v54 = vrot.slane %v14746_v42, 9  ;;  %v10328_v26 = vrot.slane %v14749_v29, 9 }
 0x27b   : > { %16130 = vst [vmem:[#allocation61_spill] sm:$0xff] %v14784_v44  ;;  %v7285_v25 = vmax.f32 %v7272_v1, %v16131_v12  ;;  %v10305_v53 = vrot.slane %v7283_v61, 9  ;;  %v10317_v3 = vrot.slane %v14784_v44, 9  ;;  %v7976_v21 = vmax.f32 %v14754_v43, %v10293_v35  ;;  %v16147_v35 = vld [vmem:[#allocation58_spill] sm:$0xff] }
 0x27c   : > { %v7987_v24 = vmax.f32 %v7975_v8, %v7257_v15  ;;  %v14797_v1 = vmax.f32 %v7257_v15, %v10304_v19  ;;  %v8119_v56 = vmax.f32 %v14746_v42, %v10316_v54  ;;  %v14804_v12 = vmax.f32 %v14749_v29, %v10328_v26  ;;  %v14813_v15 = vpop.permute.xlu1 %9545  ;;  %v16137_v26 = vld [vmem:[#allocation42_spill] sm:$0xff] }
 0x27d   : > { %v10329_v34 = vrot.slane %v7285_v25, 9  ;;  %v14799_v4 = vmax.f32 %v7283_v61, %v10305_v53  ;;  %v8120_v55 = vmax.f32 %v14784_v44, %v10317_v3  ;;  %v14807_v31 = vmax.f32 %v7273_v13, %v16133_v63  ;;  %16136 = vst [vmem:[#allocation91_spill] sm:$0xff] %v14813_v15 }
 0x27e   : > { %v7988_v22 = vmax.f32 %v7976_v21, %v7283_v61  ;;  %v8131_v53 = vmax.f32 %v8119_v56, %v14749_v29  ;;  %v8203_v54 = vmax.f32 %v14804_v12, %v14760_v37  ;;  %v14821_v63 = vrot.slane %v7771_v17, %v11567_v58  ;;  %v16139_v17 = vld [vmem:[#allocation28_spill] sm:$0xff]  ;;  %v14844_v56 = vpop.permute.xlu0 %9208  ;;  %v16143_v12 = vld [vmem:[#allocation94_spill] sm:$0xff] }
 0x27f   : > { %16132 = vst [vmem:[#allocation55_spill] sm:$0xff] %v14799_v4  ;;  %16134 = vst [vmem:[#allocation34_spill] sm:$0xff] %v14807_v31  ;;  %v14811_v8 = vmax.f32 %v7285_v25, %v10329_v34  ;;  %v8132_v3 = vmax.f32 %v8120_v55, %v7285_v25  ;;  %v14824_v13 = vrot.slane %v7843_v18, %v11567_v58 }
 0x280   : > { %v9077_v21 = vsel %vm9066_vm7, %v14683_v33, %v16137_v26  ;;  %v14832_v34 = vrot.slane %v7915_v9, %v11567_v58  ;;  %v14835_v29 = vrot.slane %v7987_v24, %v11567_v58  ;;  %v14838_v25 = vrot.slane %v7988_v22, %v11567_v58  ;;  %v16142_v33 = vld [vmem:[#allocation29_spill] sm:$0xff] }
 0x281   : > { %16135 = vst [vmem:[#allocation45_spill] sm:$0xff] %v14811_v8  ;;  %v14842_v18 = vsel %vm9079_vm8, %v9077_v21, %v16139_v17  ;;  %v14852_v9 = vsel %vm9248_vm9, %v16142_v33, 0.0  ;;  %v5063_v24 = vadd.f32 %v14617_v36, %v16143_v12  ;;  %v10340_v22 = vrot.slane %v14760_v37, 9  ;;  %v16144_v21 = vld [vmem:[#allocation43_spill] sm:$0xff] }
 0x282   : > { %16138 = vst [vmem:[#allocation37_spill] sm:$0xff] %v14838_v25  ;;  %16140 = vst [vmem:[#allocation26_spill] sm:$0xff] %v14842_v18  ;;  %v14848_v55 = vmul.f32 %v14842_v18, %v14842_v18  ;;  %v10341_v26 = vrot.slane %v14807_v31, 9  ;;  %v16145_v17 = vld [vmem:[#allocation51_spill] sm:$0xff]  ;;  %v5066_v18 = vadd.f32 %v14617_v36, %v16147_v35  ;;  %v6076_v33 = vcombine.high %v14674_v41, %v14674_v41  ;;  %v16151_v35 = vld [vmem:[#allocation80_spill] sm:$0xff] }
 0x283   : > { %v16146_v19 = vmax.f32 %v16144_v21, %v16145_v17  ;;  %v14868_v44 = vrot.slane %v8131_v53, %v11567_v58  ;;  %v14871_v12 = vrot.slane %v8132_v3, %v11567_v58  ;;  %v5275_v4 = vmax.f32 %v5063_v24, 0.0  ;;  %v16149_v25 = vld [vmem:[#allocation83_spill] sm:$0xff] }
 0x284   : > { %16141 = vst [vmem:[#allocation60_spill] sm:$0xff] %v14848_v55  ;;  %9216 = vrot.lane.b32.xlu0 %v14848_v55, %s10768_s28  ;;  %v8263_v36 = vmax.f32 %v14760_v37, %v10340_v22  ;;  %v5276_v17 = vmax.f32 %v5066_v18, 0.0  ;;  %v16154_v3 = vmax.f32 %v14038_v27, %v14452_v23  ;;  %v14897_v18 = vpop.permute.xlu0 %9329 }
 0x285   : > { %v9102_v61 = vsel %vm4854_vm0, %v16146_v19, %v14363_v62  ;;  %16148 = vst [vmem:[#allocation38_spill] sm:$0xff] %v14871_v12  ;;  %v14877_v62 = vpop.permute.xlu1 %9210  ;;  %v16152_v19 = vrot.slane %v16151_v35, %v11567_v58  ;;  %v6111_v8 = vcombine.high %v5275_v4, %v5275_v4  ;;  %v6118_v24 = vrot.slane %v5275_v4, %v11555_v30 }
 0x286   : > { %v9114_v21 = vsel %vm9014_vm3, %v9102_v61, %v16149_v25  ;;  %16150 = vst [vmem:[#allocation71_spill] sm:$0xff] %v14877_v62  ;;  %v7252_v12 = vmax.f32 %v16154_v3, %v6076_v33  ;;  %v8264_v61 = vmax.f32 %v14807_v31, %v10341_v26  ;;  %v6128_v37 = vcombine.high %v5276_v17, %v5276_v17  ;;  %v16158_v62 = vld [vmem:[#allocation13_spill] sm:$0xff] }
 0x287   : > { %v14884_v53 = vsel %vm9027_vm4, %v9114_v21, %v16152_v19  ;;  %v6135_v22 = vrot.slane %v5276_v17, %v11555_v30  ;;  %16156 = vst [vmem:[#allocation47_spill] sm:$0xff] %v14897_v18  ;;  %v6125_v27 = vrot.slane %v6111_v8, %v11555_v30  ;;  %v6126_v23 = vcombine.high %v6118_v24, %v6118_v24 }
 0x288   : > { %16153 = vst [vmem:[#allocation25_spill] sm:$0xff] %v14884_v53  ;;  %v14893_v25 = vmul.f32 %v14884_v53, %v14884_v53  ;;  %v7627_v21 = vmax.f32 %v14787_v11, %v7252_v12  ;;  %v10244_v35 = vrot.slane %v7252_v12, 9  ;;  %v7261_v19 = vmax.f32 %v14598_v14, %v6118_v24  ;;  %9337 = vrot.lane.b32.xlu0 %v14848_v55, %s10769_s29 }
 0x289   : > { %v16157_v4 = vcombine.high %v16126_v51, %v16126_v51  ;;  %v6142_v11 = vrot.slane %v6128_v37, %v11555_v30  ;;  %v6143_v17 = vcombine.high %v6135_v22, %v6135_v22  ;;  %v7265_v3 = vmax.f32 %v6076_v33, %v6135_v22  ;;  %v16160_v22 = vld [vmem:[#allocation14_spill] sm:$0xff] }
 0x28a   : > { %16155 = vst [vmem:[#allocation63_spill] sm:$0xff] %v14893_v25  ;;  %9218 = vrot.lane.b32.xlu1 %v14893_v25, %s10768_s28  ;;  %v14909_v53 = vmax.f32 %v7252_v12, %v10244_v35  ;;  %v6127_v8 = vcombine.high %v6125_v27, %v6125_v27  ;;  %v7262_v31 = vmax.f32 %v14663_v20, %v6126_v23  ;;  %v16159_v12 = vld [vmem:[#allocation7_spill] sm:$0xff] }
 0x28b   : > { %v7274_v26 = vmax.f32 %v6118_v24, %v16157_v4  ;;  %v7263_v14 = vmax.f32 %v14678_v0, %v6125_v27  ;;  %v14914_v24 = vpop.permute.xlu1 %9331  ;;  %v14916_v4 = vmax.f32 %v8263_v36, %v7261_v19  ;;  %v6144_v18 = vcombine.high %v6142_v11, %v6142_v11  ;;  %v16161_v36 = vld [vmem:[#allocation15_spill] sm:$0xff]  ;;  %v16162_v27 = vld [vmem:[#allocation9_spill] sm:$0xff] }
 0x28c   : > { %v7266_v15 = vmax.f32 %v14668_v2, %v6143_v17  ;;  %v7267_v30 = vmax.f32 %v14690_v60, %v6142_v11  ;;  %v7264_v33 = vmax.f32 %v14674_v41, %v6127_v8  ;;  %v7275_v37 = vmax.f32 %v7262_v31, %v16159_v12  ;;  %9458 = vrot.lane.b32.xlu0 %v14848_v55, %s10770_s30  ;;  %v14935_v41 = vpop.permute.xlu0 %9450  ;;  %v16163_v31 = vld [vmem:[#allocation8_spill] sm:$0xff] }
 0x28d   : > { %v7287_v51 = vmax.f32 %v7274_v26, %v16158_v62  ;;  %v7276_v35 = vmax.f32 %v7263_v14, %v16160_v22  ;;  %v14928_v0 = vrot.slane %v8203_v54, %v11567_v58  ;;  %v7268_v62 = vmax.f32 %v14686_v45, %v6144_v18  ;;  %v16164_v26 = vld [vmem:[#allocation16_spill] sm:$0xff]  ;;  %v16165_v54 = vld [vmem:[#allocation10_spill] sm:$0xff] }
 0x28e   : > { %v7278_v2 = vmax.f32 %v7265_v3, %v16161_v36  ;;  %v7279_v60 = vmax.f32 %v7266_v15, %v16162_v27  ;;  %9339 = vrot.lane.b32.xlu1 %v14893_v25, %s10769_s29  ;;  %v10209_v23 = vrot.slane %v7275_v37, 9  ;;  %v7280_v11 = vmax.f32 %v7267_v30, %v16164_v26 }
 0x28f   : > { %v14923_v20 = vmax.f32 %v8264_v61, %v7287_v51  ;;  %v7277_v61 = vmax.f32 %v7264_v33, %v16163_v31  ;;  %v10221_v19 = vrot.slane %v7276_v35, 9  ;;  %v14940_v17 = vmax.f32 %v7268_v62, %v16165_v54  ;;  %v14946_v51 = vpop.permute.xlu1 %9452 }
 0x290   : > { %v10245_v45 = vrot.slane %v7278_v2, 9  ;;  %v7699_v18 = vmax.f32 %v14909_v53, %v14694_v47  ;;  %v7472_v15 = vmax.f32 %v7275_v37, %v10209_v23  ;;  %v10257_v14 = vrot.slane %v7279_v60, 9  ;;  %9579 = vrot.lane.b32.xlu0 %v14848_v55, %s10771_s6  ;;  %v16166_v23 = vld [vmem:[#allocation87_spill] sm:$0xff]  ;;  %v14957_v26 = vpop.permute.xlu0 %9571 }
 0x291   : > { %v7544_v3 = vmax.f32 %v7276_v35, %v10221_v19  ;;  %v10233_v8 = vrot.slane %v7277_v61, 9  ;;  %v10269_v12 = vrot.slane %v7280_v11, 9  ;;  %v10281_v30 = vrot.slane %v14940_v17, 9 }
 0x292   : > { %v7688_v33 = vmax.f32 %v7278_v2, %v10245_v45  ;;  %v8389_v22 = vrot.slane %v7627_v21, %v11567_v58  ;;  %9460 = vrot.lane.b32.xlu1 %v14893_v25, %s10770_s30  ;;  %v7484_v47 = vmax.f32 %v7472_v15, %v7276_v35  ;;  %v7760_v62 = vmax.f32 %v7279_v60, %v10257_v14  ;;  %v16167_v15 = vld [vmem:[#allocation52_spill] sm:$0xff] }
 0x293   : > { %v7556_v53 = vmax.f32 %v7544_v3, %v7277_v61  ;;  %v7616_v37 = vmax.f32 %v7277_v61, %v10233_v8  ;;  %v7832_v27 = vmax.f32 %v7280_v11, %v10269_v12  ;;  %v14953_v31 = vmax.f32 %v14940_v17, %v10281_v30  ;;  %v10113_v61 = vld.sshfl [vmem:[%s10834_s25 + $0x194] sm:$0x33 pattern:$0x75316420]  ;;  %v14982_v12 = vpop.permute.xlu1 %9573 }
 0x294   : > { %v7700_v36 = vmax.f32 %v7688_v33, %v7279_v60  ;;  %v9370_v19 = vsel %vm9369_vm10, 0.0, %v16166_v23  ;;  %v7772_v45 = vmax.f32 %v7760_v62, %v7280_v11  ;;  %v14962_v35 = vsel %vm9014_vm3, %v14781_v5, %v8389_v22  ;;  %v10114_v33 = vld.sshfl [vmem:[%s10834_s25 + $0x198] sm:$0x33 pattern:$0x75316420]  ;;  %v16168_v22 = vld [vmem:[#allocation3_spill] sm:$0xff] }
 0x295   : > { %v8321_v21 = vrot.slane %v7556_v53, %v11567_v58  ;;  %v7628_v54 = vmax.f32 %v7616_v37, %v7278_v2  ;;  %v9273_v60 = vadd.f32 %v14852_v9, %v16167_v15  ;;  %v7844_v8 = vmax.f32 %v7832_v27, %v14940_v17  ;;  %v16169_v27 = vld [vmem:[#allocation2_spill] sm:$0xff] }
 0x296   : > { %9581 = vrot.lane.b32.xlu1 %v14893_v25, %s10771_s6  ;;  %v14980_v9 = vrot.slane %v7699_v18, %v11567_v58  ;;  %v8465_v17 = vrot.slane %v7700_v36, %v11567_v58  ;;  %v2553_v53 = vcombine.high %v16168_v22, %v16168_v22  ;;  %v2561_v37 = vcombine.high %v10113_v61, %v10113_v61  ;;  %v14994_v36 = vpop.permute.xlu0 %9184 }
 0x297   : > { %v9008_v2 = vsel %vm4854_vm0, %v7484_v47, %v8321_v21  ;;  %v8393_v11 = vrot.slane %v7628_v54, %v11567_v58  ;;  %v9394_v30 = vadd.f32 %v9370_v19, %v9273_v60  ;;  %v2568_v23 = vrot.slane %v10113_v61, %v16169_v27  ;;  %16170 = vst [vmem:[#allocation81_spill] sm:$0xff] %v14994_v36  ;;  %v15006_v55 = vpop.permute.xlu1 %9186 }
 0x298   : > { %v2585_v47 = vcombine.high %v10114_v33, %v10114_v33  ;;  %v2592_v21 = vrot.slane %v10114_v33, %v16169_v27  ;;  %v2575_v54 = vrot.slane %v2561_v37, %v16169_v27  ;;  %v14998_v61 = vrot.slane %v7772_v45, %v11567_v58  ;;  %v10115_v37 = vld.sshfl [vmem:[%s10834_s25 + $0x19c] sm:$0x1 pattern:$0x75316420] }
 0x299   : > { %v9021_v62 = vsel %vm9014_vm3, %v9008_v2, %v8393_v11  ;;  %v2576_v19 = vcombine.high %v2568_v23, %v2568_v23  ;;  %v4639_v2 = vcombine.low %v2553_v53, %v2568_v23  ;;  %v16171_v11 = vld [vmem:[#allocation86_spill] sm:$0xff]  ;;  %v15009_v53 = vrot.slane %v7844_v8, %v11567_v58 }
 0x29a   : > { %v14991_v18 = vsel %vm9027_vm4, %v9021_v62, %v8465_v17  ;;  %v2599_v15 = vrot.slane %v2585_v47, %v16169_v27  ;;  %v2600_v60 = vcombine.high %v2592_v21, %v2592_v21  ;;  %v9371_v33 = vsel %vm9369_vm10, 0.0, %v16171_v11  ;;  %v16172_v17 = vld [vmem:[#allocation64_spill] sm:$0xff] }
 0x29b   : > { %v2577_v22 = vcombine.high %v2575_v54, %v2575_v54  ;;  %v9491_v62 = vsel %vm9490_vm11, %v16172_v17, 0.0  ;;  %v4640_v5 = vcombine.low %v2575_v54, %v2576_v19  ;;  %v4649_v14 = vrot.slane %v4639_v2, %v16169_v27  ;;  %v16174_v2 = vld [vmem:[#allocation70_spill] sm:$0xff] }
 0x29c   : > { %v4642_v3 = vcombine.low %v2599_v15, %v2600_v60  ;;  %v9515_v25 = vadd.f32 %v9491_v62, %v9394_v30  ;;  %v9612_v23 = vsel %vm9611_vm12, 0.0, %v14348_v57  ;;  %v2601_v47 = vcombine.high %v2599_v15, %v2599_v15  ;;  %v16173_v30 = vld [vmem:[#allocation77_spill] sm:$0xff] }
 0x29d   : > { %v4641_v45 = vcombine.low %v2577_v22, %v2592_v21  ;;  %v4656_v11 = vrot.slane %v4640_v5, %v16169_v27  ;;  %v2615_v54 = vrot.slane %v10115_v37, %v16169_v27  ;;  %v9492_v60 = vsel %vm9490_vm11, %v16173_v30, 0.0  ;;  %v15024_v21 = vpop.permute.xlu0 %9305 }
 0x29e   : > { %v4670_v17 = vrot.slane %v4642_v3, %v16169_v27  ;;  %v9636_v36 = vadd.f32 %v9612_v23, %v9515_v25  ;;  %v9032_v8 = vsel %vm9027_vm4, %v14531_v38, %v16174_v2  ;;  %v9264_v57 = vsel %vm9248_vm9, %v14373_v50, 0.0 }
 0x29f   : > { %v4663_v19 = vrot.slane %v4641_v45, %v16169_v27  ;;  %v4671_v5 = vcombine.low %v4649_v14, %v4656_v11  ;;  %v4688_v3 = vcombine.low %v2601_v47, %v2615_v54  ;;  %v9045_v25 = vsel %vm9040_vm5, %v9032_v8, %v14658_v28  ;;  %v15038_v47 = vpop.permute.xlu1 %9307 }
 0x2a0   : > { %v9660_v15 = vmul.f32 2e-05, %v9636_v36  ;;  %v9613_v62 = vsel %vm9611_vm12, 0.0, %v14332_v16  ;;  %v9058_v37 = vsel %vm9053_vm6, %v9045_v25, %v14698_v39  ;;  %v9250_v38 = vsel %vm9248_vm9, %v14407_v48, 0.0  ;;  %v16175_v36 = vld [vmem:[#allocation69_spill] sm:$0xff]  ;;  %v16176_v39 = vld [vmem:[#allocation56_spill] sm:$0xff] }
 0x2a1   : > { %v4672_v22 = vcombine.low %v4663_v19, %v4670_v17  ;;  %v4679_v50 = vrot.slane %v4671_v5, %v16169_v27  ;;  %v9071_v14 = vsel %vm9066_vm7, %v9058_v37, %v14379_v46  ;;  %v9288_v23 = vadd.f32 %v9264_v57, %v16175_v36  ;;  %v16182_v25 = vld [vmem:[#allocation74_spill] sm:$0xff]  ;;  %v16183_v37 = vld [vmem:[#allocation44_spill] sm:$0xff] }
 0x2a2   : > { %v9684_v45 = vadd.f32 2.0, %v9660_v15  ;;  %v15043_v16 = vsel %vm9079_vm8, %v9071_v14, %v14391_v6  ;;  %v9274_v11 = vadd.f32 %v9250_v38, %v16176_v39  ;;  %v16177_v48 = vmax.f32 %v14315_v32, %v14555_v10  ;;  %v16179_v32 = vld [vmem:[#allocation65_spill] sm:$0xff]  ;;  %v16187_v39 = vld [vmem:[#allocation66_spill] sm:$0xff] }
 0x2a3   : > { %v4686_v28 = vrot.slane %v4672_v22, %v16169_v27  ;;  %v4695_v46 = vrot.slane %v4688_v3, %v16169_v27  ;;  %v15054_v54 = vmul.f32 %v15043_v16, %v15043_v16  ;;  %v16178_v2 = vrot.slane %v14353_v7, %v11567_v58  ;;  %v16181_v7 = vld [vmem:[#allocation84_spill] sm:$0xff] }
 0x2a4   : > { %v9096_v17 = vsel %vm4854_vm0, %v16177_v48, %v14734_v52  ;;  %10655 = vrsqrt.f32 %v9684_v45  ;;  %v9395_v30 = vadd.f32 %v9371_v33, %v9274_v11  ;;  %v9385_v10 = vsel %vm9369_vm10, 0.0, %v16179_v32  ;;  %v15066_v52 = vpop.permute.xlu0 %9426  ;;  %v16180_v33 = vld [vmem:[#allocation33_spill] sm:$0xff]  ;;  %v16188_v11 = vld [vmem:[#allocation46_spill] sm:$0xff] }
 0x2a5   : > { %v9108_v19 = vsel %vm9014_vm3, %v9096_v17, %v14417_v59  ;;  %v4687_v6 = vcombine.low %v4679_v50, %v4686_v28  ;;  %9192 = vrot.lane.b32.xlu0 %v15054_v54, %s10768_s28  ;;  %v9409_v59 = vadd.f32 %v9385_v10, %v9288_v23  ;;  %v9263_v5 = vsel %vm9248_vm9, %v16180_v33, 0.0  ;;  %v16184_v50 = vld [vmem:[#allocation35_spill] sm:$0xff]  ;;  %v16186_v28 = vld [vmem:[#allocation85_spill] sm:$0xff]  ;;  %v15094_v17 = vpop.permute.xlu1 %9428  ;;  %v16190_v32 = vld [vmem:[#allocation22_spill] sm:$0xff] }
 0x2a6   : > { %v15062_v8 = vsel %vm9027_vm4, %v9108_v19, %v16178_v2  ;;  %v9506_v15 = vsel %vm9490_vm11, %v16181_v7, 0.0  ;;  %v9516_v3 = vadd.f32 %v9492_v60, %v9395_v30  ;;  %v9287_v22 = vadd.f32 %v9263_v5, %v16182_v25  ;;  %v16189_v30 = vld [vmem:[#allocation21_spill] sm:$0xff]  ;;  %v16191_v10 = vld [vmem:[#allocation90_spill] sm:$0xff]  ;;  %v16192_v33 = vld [vmem:[#allocation92_spill] sm:$0xff] }
 0x2a7   : > { %v15072_v57 = vmul.f32 %v15062_v8, %v15062_v8  ;;  %10617 = vmatmul.mubr.msk.bf16.gmra.mrb[76].mxu1 %vm4724_vm2, %v4687_v6  ;;  %v9384_v38 = vsel %vm9369_vm10, 0.0, %v16183_v37  ;;  %v9627_v45 = vsel %vm9611_vm12, 0.0, %v16184_v50  ;;  %v16185_v14 = vmov 0.0   ;;  %v16193_v7 = vld [vmem:[#allocation78_spill] sm:$0xff] }
 0x2a8   : > { %10620 = vmatprep.mubr.msk.bf16.mxu1 %vm10764_vm1, %v16185_v14  ;;  %v4702_v36 = vrot.slane %v4695_v46, %v16169_v27  ;;  %v9530_v23 = vadd.f32 %v9506_v15, %v9409_v59  ;;  %v9505_v60 = vsel %vm9490_vm11, %v16186_v28, 0.0  ;;  %v9065_v48 = vsel %vm9053_vm6, %v16188_v11, %v16187_v39  ;;  %v16199_v11 = vld [vmem:[#allocation32_spill] sm:$0xff] }
 0x2a9   : > { %9194 = vrot.lane.b32.xlu1 %v15072_v57, %s10768_s28  ;;  %v9637_v19 = vadd.f32 %v9613_v62, %v9516_v3  ;;  %v9408_v6 = vadd.f32 %v9384_v38, %v9287_v22  ;;  %v9078_v2 = vsel %vm9066_vm7, %v9065_v48, %v16189_v30  ;;  %v9251_v27 = vsel %vm9248_vm9, %v16190_v32, 0.0  ;;  %9313 = vrot.lane.b32.xlu0 %v15054_v54, %s10769_s29  ;;  %v16194_v62 = vld [vmem:[#allocation72_spill] sm:$0xff]  ;;  %v16195_v22 = vld [vmem:[#allocation75_spill] sm:$0xff] }
 0x2aa   : > { %v9651_v46 = vadd.f32 %v9627_v45, %v9530_v23  ;;  %v15104_v59 = vsel %vm9079_vm8, %v9078_v2, %v16191_v10  ;;  %v9626_v5 = vsel %vm9611_vm12, 0.0, %v16192_v33  ;;  %v9115_v15 = vsel %vm9014_vm3, %v16194_v62, %v16193_v7  ;;  %v15118_v45 = vpop.permute.xlu0 %9547  ;;  %v16200_v30 = vld [vmem:[#allocation40_spill] sm:$0xff]  ;;  %v15142_v7 = vpop.permute.xlu1 %9549 }
 0x2ab   : > { %v9661_v3 = vmul.f32 2e-05, %v9637_v19  ;;  %v9529_v25 = vadd.f32 %v9505_v60, %v9408_v6  ;;  %v9275_v37 = vadd.f32 %v9251_v27, %v16195_v22  ;;  %v16196_v38 = vrot.slane %v14638_v49, %v11567_v58  ;;  %v16198_v60 = vld [vmem:[#allocation39_spill] sm:$0xff]  ;;  %v16203_v22 = vld [vmem:[#allocation73_spill] sm:$0xff] }
 0x2ac   : > { %v16197_v14 = vmax.f32 %v14953_v31, %v14754_v43  ;;  %v9675_v28 = vmul.f32 2e-05, %v9651_v46  ;;  %v9372_v39 = vsel %vm9369_vm10, 0.0, %v16198_v60  ;;  %v9252_v49 = vsel %vm9248_vm9, %v16199_v11, 0.0  ;;  %v16201_v31 = vld [vmem:[#allocation20_spill] sm:$0xff]  ;;  %v16202_v46 = vld [vmem:[#allocation27_spill] sm:$0xff] }
 0x2ad   : > { %v15116_v50 = vsel %vm9027_vm4, %v9115_v15, %v16196_v38  ;;  %9315 = vrot.lane.b32.xlu1 %v15072_v57, %s10769_s29  ;;  %v9685_v48 = vadd.f32 2.0, %v9661_v3  ;;  %v9650_v19 = vadd.f32 %v9626_v5, %v9529_v25  ;;  %v9396_v6 = vadd.f32 %v9372_v39, %v9275_v37  ;;  %9434 = vrot.lane.b32.xlu0 %v15054_v54, %s10770_s30 }
 0x2ae   : > { %v15124_v23 = vrot.slane %v16197_v14, %v11567_v58  ;;  %v9276_v2 = vadd.f32 %v9252_v49, %v16200_v30  ;;  %v10656_v32 = vpop.eup %10655  ;;  %v9699_v43 = vadd.f32 2.0, %v9675_v28  ;;  %v9493_v27 = vsel %vm9490_vm11, %v16201_v31, 0.0  ;;  %v15155_v38 = vpop.permute.xlu0 %9212  ;;  %v16208_v30 = vld [vmem:[#allocation47_spill] sm:$0xff] }
 0x2af   : > { %v9373_v10 = vsel %vm9369_vm10, 0.0, %v16202_v46  ;;  %v9033_v33 = vsel %vm9027_vm4, %v14962_v35, %v14980_v9  ;;  %10657 = vrsqrt.f32 %v10656_v32  ;;  %10621 = vmatmul.mubr.msk.bf16.gmra.mrb[80].mxu1 %vm4724_vm2, %v4702_v36  ;;  %v9674_v5 = vmul.f32 2e-05, %v9650_v19  ;;  %v16209_v32 = vld [vmem:[#allocation71_spill] sm:$0xff] }
 0x2b0   : > { %v9517_v62 = vadd.f32 %v9493_v27, %v9396_v6  ;;  %v9397_v15 = vadd.f32 %v9373_v10, %v9276_v2  ;;  %10659 = vrsqrt.f32 %v9685_v48  ;;  %v9046_v3 = vsel %vm9040_vm5, %v9033_v33, %v14821_v63  ;;  %v15189_v48 = vpop.permute.xlu1 %9214  ;;  %v16210_v10 = vld [vmem:[#allocation24_spill] sm:$0xff] }
 0x2b1   : > { %9436 = vrot.lane.b32.xlu1 %v15072_v57, %s10770_s30  ;;  %v9614_v25 = vsel %vm9611_vm12, 0.0, %v14794_v40  ;;  %v9494_v35 = vsel %vm9490_vm11, %v16203_v22, 0.0  ;;  %10661 = vrsqrt.f32 %v9699_v43  ;;  %v9698_v9 = vadd.f32 2.0, %v9674_v5  ;;  %9555 = vrot.lane.b32.xlu0 %v15054_v54, %s10771_s6 }
 0x2b2   : > { %v9059_v36 = vsel %vm9053_vm6, %v9046_v3, %v14824_v13  ;;  %v9638_v37 = vadd.f32 %v9614_v25, %v9517_v62  ;;  %v9518_v14 = vadd.f32 %v9494_v35, %v9397_v15  ;;  %v16204_v40 = vmax.f32 %v14797_v1, %v14746_v42  ;;  %v16206_v1 = vld [vmem:[#allocation30_spill] sm:$0xff]  ;;  %v15209_v62 = vpop.permute.xlu0 %9333 }
 0x2b3   : > { %v9072_v63 = vsel %vm9066_vm7, %v9059_v36, %v14832_v34  ;;  %v9265_v60 = vsel %vm9248_vm9, %v14844_v56, 0.0  ;;  %10663 = vrsqrt.f32 %v9698_v9  ;;  %v15176_v34 = vmul.f32 %v15104_v59, %v15104_v59  ;;  %v16207_v56 = vld [vmem:[#allocation91_spill] sm:$0xff]  ;;  %v16212_v9 = vld [vmem:[#allocation34_spill] sm:$0xff] }
 0x2b4   : > { %v9097_v28 = vsel %vm4854_vm0, %v16204_v40, %v14868_v44  ;;  %v15170_v13 = vsel %vm9079_vm8, %v9072_v63, %v14835_v29  ;;  %v9662_v39 = vmul.f32 2e-05, %v9638_v37  ;;  %v16205_v42 = vrot.slane %v14916_v4, %v11567_v58  ;;  %v15225_v63 = vpop.permute.xlu1 %9335 }
 0x2b5   : > { %v9109_v11 = vsel %vm9014_vm3, %v9097_v28, %v14928_v0  ;;  %9557 = vrot.lane.b32.xlu1 %v15072_v57, %s10771_s6  ;;  %v9289_v29 = vadd.f32 %v9265_v60, %v16206_v1  ;;  %v9615_v49 = vsel %vm9611_vm12, 0.0, %v16207_v56  ;;  %v15193_v0 = vmul.f32 %v15116_v50, %v15116_v50  ;;  %9220 = vrot.lane.b32.xlu0 %v15176_v34, %s10768_s28  ;;  %v16215_v28 = vld [vmem:[#allocation38_spill] sm:$0xff]  ;;  %v16216_v60 = vld [vmem:[#allocation55_spill] sm:$0xff] }
 0x2b6   : > { %v15184_v44 = vsel %vm9027_vm4, %v9109_v11, %v16205_v42  ;;  %v9686_v19 = vadd.f32 2.0, %v9662_v39  ;;  %v9639_v6 = vadd.f32 %v9615_v49, %v9518_v14  ;;  %v9386_v2 = vsel %vm9369_vm10, 0.0, %v16208_v30 }
 0x2b7   : > { %v9410_v4 = vadd.f32 %v9386_v2, %v9289_v29  ;;  %v9266_v43 = vsel %vm9248_vm9, %v16209_v32, 0.0  ;;  %v9507_v31 = vsel %vm9490_vm11, %v14935_v41, 0.0  ;;  %v9387_v27 = vsel %vm9369_vm10, 0.0, %v14914_v24 }
 0x2b8   : > { %10665 = vrsqrt.f32 %v9686_v19  ;;  %v9663_v46 = vmul.f32 2e-05, %v9639_v6  ;;  %v9290_v33 = vadd.f32 %v9266_v43, %v16210_v10  ;;  %v9047_v5 = vsel %vm9040_vm5, %v14991_v18, %v14998_v61  ;;  %v16211_v61 = vld [vmem:[#allocation45_spill] sm:$0xff] }
 0x2b9   : > { %9222 = vrot.lane.b32.xlu1 %v15193_v0, %s10768_s28  ;;  %v9531_v15 = vadd.f32 %v9507_v31, %v9410_v4  ;;  %v9060_v41 = vsel %vm9053_vm6, %v9047_v5, %v15009_v53  ;;  %v9628_v24 = vsel %vm9611_vm12, 0.0, %v14957_v26  ;;  %v9508_v3 = vsel %vm9490_vm11, %v14946_v51, 0.0  ;;  %v10658_v25 = vpop.eup %10657  ;;  %9341 = vrot.lane.b32.xlu0 %v15176_v34, %s10769_s29  ;;  %v16214_v26 = vld [vmem:[#allocation37_spill] sm:$0xff] }
 0x2ba   : > { %v9687_v22 = vadd.f32 2.0, %v9663_v46  ;;  %v9411_v35 = vadd.f32 %v9387_v27, %v9290_v33  ;;  %v9073_v18 = vsel %vm9066_vm7, %v9060_v41, %v15124_v23  ;;  %v16213_v36 = vmax.f32 %v16211_v61, %v16212_v9  ;;  %v10660_v53 = vpop.eup %10659  ;;  %v16217_v23 = vld [vmem:[#allocation61_spill] sm:$0xff]  ;;  %v9455_v27 = vpop.permute.xlu0 %9454  ;;  %v16221_v46 = vld [vmem:[#allocation50_spill] sm:$0xff]  ;;  %v16222_v33 = vld [vmem:[#allocation76_spill] sm:$0xff] }
 0x2bb   : > { %v9756_v14 = vmul.f32 %v10658_v25, %v10658_v25  ;;  %v15231_v51 = vsel %vm9079_vm8, %v9073_v18, %v16214_v26  ;;  %v9652_v40 = vadd.f32 %v9628_v24, %v9531_v15  ;;  %v16218_v39 = vmax.f32 %v16216_v60, %v16217_v23  ;;  %v10662_v42 = vpop.eup %10661  ;;  %v16220_v43 = vld [vmem:[#allocation81_spill] sm:$0xff]  ;;  %v9457_v24 = vpop.permute.xlu1 %9456 }
 0x2bc   : > { %v8897_v37 = vrot.slane %v16213_v36, %v11567_v58  ;;  %10667 = vrsqrt.f32 %v10660_v53  ;;  %v15241_v1 = vmul.f32 %v15170_v13, %v15170_v13  ;;  %v9532_v29 = vadd.f32 %v9508_v3, %v9411_v35 }
 0x2bd   : > { %v9098_v11 = vsel %vm4854_vm0, %v16218_v39, %v16215_v28  ;;  %v9780_v49 = vmul.f32 %v10658_v25, %v9756_v14  ;;  %10669 = vrsqrt.f32 %v10662_v42  ;;  %9343 = vrot.lane.b32.xlu1 %v15193_v0, %s10769_s29  ;;  %v9676_v19 = vmul.f32 2e-05, %v9652_v40  ;;  %v10664_v2 = vpop.eup %10663  ;;  %9462 = vrot.lane.b32.xlu0 %v15176_v34, %s10770_s30  ;;  %v16224_v14 = vld [vmem:[#allocation88_spill] sm:$0xff] }
 0x2be   : > { %v9110_v56 = vsel %vm9014_vm3, %v9098_v11, %v8897_v37  ;;  %v16219_v6 = vrot.slane %v14923_v20, %v11567_v58  ;;  %v15254_v4 = vmul.f32 %v15184_v44, %v15184_v44  ;;  %10671 = vrsqrt.f32 %v9687_v22  ;;  %v16223_v22 = vld [vmem:[#allocation23_spill] sm:$0xff]  ;;  %v9576_v26 = vpop.permute.xlu0 %9575  ;;  %v16225_v11 = vld [vmem:[#allocation62_spill] sm:$0xff] }
 0x2bf   : > { %v9629_v32 = vsel %vm9611_vm12, 0.0, %v14982_v12  ;;  %v9253_v31 = vsel %vm9248_vm9, %v16220_v43, 0.0  ;;  %v9804_v10 = vmul.f32 %v9780_v49, %v16221_v46  ;;  %10673 = vrsqrt.f32 %v10664_v2 }
 0x2c0   : > { %v15250_v30 = vsel %vm9027_vm4, %v9110_v56, %v16219_v6  ;;  %v9700_v58 = vadd.f32 2.0, %v9676_v19  ;;  %v9653_v20 = vadd.f32 %v9629_v32, %v9532_v29  ;;  %v9277_v12 = vadd.f32 %v9253_v31, %v16222_v33 }
 0x2c1   : > { %v9374_v5 = vsel %vm9369_vm10, 0.0, %v15024_v21  ;;  %v9254_v15 = vsel %vm9248_vm9, %v15006_v55, 0.0  ;;  %v9495_v41 = vsel %vm9490_vm11, %v15066_v52, 0.0  ;;  %v10373_v3 = vpack.c.bf16 %v9804_v10, %v9804_v10  ;;  %9464 = vrot.lane.b32.xlu1 %v15193_v0, %s10770_s30  ;;  %9196 = vrot.lane.b32.xlu0 %v15241_v1, %s10768_s28 }
 0x2c2   : > { %10675 = vrsqrt.f32 %v9700_v58  ;;  %v9677_v25 = vmul.f32 2e-05, %v9653_v20  ;;  %v9278_v35 = vadd.f32 %v9254_v15, %v16223_v22  ;;  %v10666_v18 = vpop.eup %10665  ;;  %v9398_v61 = vadd.f32 %v9374_v5, %v9277_v12  ;;  %v16226_v15 = vld [vmem:[#allocation31_spill] sm:$0xff] }
 0x2c3   : > { %v9375_v21 = vsel %vm9369_vm10, 0.0, %v15038_v47  ;;  %v9616_v55 = vsel %vm9611_vm12, 0.0, %v15118_v45  ;;  %v9496_v52 = vsel %vm9490_vm11, %v15094_v17, 0.0  ;;  %9925 = vst.msk [vmem:[%s15266_s15] sm:$0xf] %vm9924_vm13, %v10373_v3  ;;  %10677 = vrsqrt.f32 %v10666_v18 }
 0x2c4   : > { %v9701_v9 = vadd.f32 2.0, %v9677_v25  ;;  %v9399_v36 = vadd.f32 %v9375_v21, %v9278_v35  ;;  %v9267_v37 = vsel %vm9248_vm9, %v15155_v38, 0.0  ;;  %v9519_v53 = vadd.f32 %v9495_v41, %v9398_v61  ;;  %v16227_v25 = vld [vmem:[#allocation67_spill] sm:$0xff] }
 0x2c5   : > { %v9291_v47 = vadd.f32 %v9267_v37, %v16224_v14  ;;  %v9617_v45 = vsel %vm9611_vm12, 0.0, %v15142_v7  ;;  %v9388_v17 = vsel %vm9369_vm10, 0.0, %v15209_v62  ;;  %9198 = vrot.lane.b32.xlu1 %v15254_v4, %s10768_s28  ;;  %v9268_v28 = vsel %vm9248_vm9, %v15189_v48, 0.0  ;;  %v9578_v62 = vpop.permute.xlu1 %9577  ;;  %9317 = vrot.lane.b32.xlu0 %v15241_v1, %s10769_s29 }
 0x2c6   : > { %10679 = vrsqrt.f32 %v9701_v9  ;;  %v9520_v40 = vadd.f32 %v9496_v52, %v9399_v36  ;;  %v9509_v38 = vsel %vm9490_vm11, %v9455_v27, 0.0  ;;  %v10668_v60 = vpop.eup %10667  ;;  %v9640_v23 = vadd.f32 %v9616_v55, %v9519_v53  ;;  %v16228_v9 = vld [vmem:[#allocation48_spill] sm:$0xff] }
 0x2c7   : > { %v9412_v39 = vadd.f32 %v9388_v17, %v9291_v47  ;;  %v9292_v42 = vadd.f32 %v9268_v28, %v16225_v11  ;;  %v9389_v7 = vsel %vm9369_vm10, 0.0, %v15225_v63  ;;  %v10670_v29 = vpop.eup %10669  ;;  %v9757_v56 = vmul.f32 %v10668_v60, %v10668_v60 }
 0x2c8   : > { %v9641_v49 = vadd.f32 %v9617_v45, %v9520_v40  ;;  %v9630_v19 = vsel %vm9611_vm12, 0.0, %v9576_v26  ;;  %v9510_v48 = vsel %vm9490_vm11, %v9457_v24, 0.0  ;;  %v10672_v6 = vpop.eup %10671  ;;  %v9771_v2 = vmul.f32 %v10670_v29, %v10670_v29 }
 0x2c9   : > { %v9664_v32 = vmul.f32 2e-05, %v9640_v23  ;;  %v9533_v43 = vadd.f32 %v9509_v38, %v9412_v39  ;;  %v9413_v31 = vadd.f32 %v9389_v7, %v9292_v42  ;;  %v10674_v27 = vpop.eup %10673  ;;  %v9781_v46 = vmul.f32 %v10668_v60, %v9757_v56  ;;  %9319 = vrot.lane.b32.xlu1 %v15254_v4, %s10769_s29  ;;  %9438 = vrot.lane.b32.xlu0 %v15241_v1, %s10770_s30  ;;  %v16229_v38 = vld [vmem:[#allocation54_spill] sm:$0xff] }
 0x2ca   : > { %10681 = vrsqrt.f32 %v10672_v6  ;;  %v9665_v63 = vmul.f32 2e-05, %v9641_v49  ;;  %v9631_v10 = vsel %vm9611_vm12, 0.0, %v9578_v62  ;;  %v9795_v58 = vmul.f32 %v10670_v29, %v9771_v2  ;;  %v9189_v28 = vpop.permute.xlu0 %9188  ;;  %v16230_v6 = vld [vmem:[#allocation59_spill] sm:$0xff] }
 0x2cb   : > { %v9770_v20 = vmul.f32 %v10674_v27, %v10674_v27  ;;  %v9688_v33 = vadd.f32 2.0, %v9664_v32  ;;  %v9654_v12 = vadd.f32 %v9630_v19, %v9533_v43  ;;  %v9805_v41 = vmul.f32 %v9781_v46, %v16226_v15 }
 0x2cc   : > { %v10676_v5 = vpop.eup %10675  ;;  %v9689_v24 = vadd.f32 2.0, %v9665_v63  ;;  %v9534_v3 = vadd.f32 %v9510_v48, %v9413_v31  ;;  %v9819_v22 = vmul.f32 %v9795_v58, %v16227_v25  ;;  %v15327_v26 = vmul.f32 %v15231_v51, %v15231_v51  ;;  %v16231_v31 = vld [vmem:[#allocation49_spill] sm:$0xff] }
 0x2cd   : > { %v9794_v35 = vmul.f32 %v10674_v27, %v9770_v20  ;;  %10683 = vrsqrt.f32 %v10676_v5  ;;  %v9678_v18 = vmul.f32 2e-05, %v9654_v12  ;;  %v10678_v61 = vpop.eup %10677  ;;  %v10374_v21 = vpack.c.bf16 %v9805_v41, %v9805_v41  ;;  %9440 = vrot.lane.b32.xlu1 %v15254_v4, %s10770_s30  ;;  %9559 = vrot.lane.b32.xlu0 %v15241_v1, %s10771_s6 }
 0x2ce   : > { %10685 = vrsqrt.f32 %v9688_v33  ;;  %v9655_v55 = vadd.f32 %v9631_v10, %v9534_v3  ;;  %v10388_v52 = vpack.c.bf16 %v9819_v22, %v9819_v22  ;;  %v9758_v37 = vmul.f32 %v10678_v61, %v10678_v61  ;;  %v9310_v7 = vpop.permute.xlu0 %9309  ;;  %v16232_v33 = vld [vmem:[#allocation36_spill] sm:$0xff] }
 0x2cf   : > { %v9818_v36 = vmul.f32 %v9794_v35, %v16228_v9  ;;  %10687 = vrsqrt.f32 %v9689_v24  ;;  %9927 = vst.msk [vmem:[%s15266_s15 + $0x4] sm:$0x3] %vm9926_vm14, %v10374_v21  ;;  %v9702_v14 = vadd.f32 2.0, %v9678_v18  ;;  %v15336_v39 = vmul.f32 %v15250_v30, %v15250_v30 }
 0x2d0   : > { %v10680_v53 = vpop.eup %10679  ;;  %v9679_v47 = vmul.f32 2e-05, %v9655_v55  ;;  %9941 = vst.msk [vmem:[%s15266_s15 + $0x3c] sm:$0x3] %vm9926_vm14, %v10388_v52  ;;  %v9782_v17 = vmul.f32 %v10678_v61, %v9758_v37  ;;  %v9255_v56 = vsel %vm9248_vm9, %v9189_v28, 0.0  ;;  %v9376_v32 = vsel %vm9369_vm10, 0.0, %v9310_v7 }
 0x2d1   : > { %v10387_v45 = vpack.c.bf16 %v9818_v36, %v9818_v36  ;;  %10689 = vrsqrt.f32 %v10680_v53  ;;  %9561 = vrot.lane.b32.xlu1 %v15254_v4, %s10771_s6  ;;  %9200 = vrot.lane.b32.xlu0 %v15327_v26, %s10768_s28  ;;  %v9279_v27 = vadd.f32 %v9255_v56, %v16231_v31  ;;  %v16233_v61 = vld [vmem:[#allocation68_spill] sm:$0xff]  ;;  %v16235_v7 = vld [vmem:[#allocation41_spill] sm:$0xff] }
 0x2d2   : > { %10691 = vrsqrt.f32 %v9702_v14  ;;  %v9703_v40 = vadd.f32 2.0, %v9679_v47  ;;  %v9806_v60 = vmul.f32 %v9782_v17, %v16229_v38  ;;  %v9431_v46 = vpop.permute.xlu0 %9430 }
 0x2d3   : > { %9940 = vst.msk [vmem:[%s15266_s15 + $0x38] sm:$0xf] %vm9924_vm13, %v10387_v45  ;;  %v9497_v58 = vsel %vm9490_vm11, %v9431_v46, 0.0  ;;  %v9400_v15 = vadd.f32 %v9376_v32, %v9279_v27 }
 0x2d4   : > { %v10682_v23 = vpop.eup %10681  ;;  %10693 = vrsqrt.f32 %v9703_v40  ;;  %v10375_v11 = vpack.c.bf16 %v9806_v60, %v9806_v60 }
 0x2d5   : > { %v9759_v42 = vmul.f32 %v10682_v23, %v10682_v23  ;;  %9202 = vrot.lane.b32.xlu1 %v15336_v39, %s10768_s28  ;;  %9321 = vrot.lane.b32.xlu0 %v15327_v26, %s10769_s29  ;;  %v9521_v25 = vadd.f32 %v9497_v58, %v9400_v15 }
 0x2d6   : > { %9928 = vst.msk [vmem:[%s15266_s15 + $0x8] sm:$0xf] %vm9924_vm13, %v10375_v11  ;;  %v9552_v22 = vpop.permute.xlu0 %9551 }
 0x2d7   : > { %v10684_v62 = vpop.eup %10683  ;;  %v9783_v29 = vmul.f32 %v10682_v23, %v9759_v42  ;;  %v9618_v18 = vsel %vm9611_vm12, 0.0, %v9552_v22  ;;  %v16234_v23 = vld [vmem:[#allocation89_spill] sm:$0xff] }
 0x2d8   : > { %v10686_v49 = vpop.eup %10685  ;;  %v9772_v19 = vmul.f32 %v10684_v62, %v10684_v62  ;;  %v9642_v55 = vadd.f32 %v9618_v18, %v9521_v25 }
 0x2d9   : > { %v10688_v48 = vpop.eup %10687  ;;  %v9807_v2 = vmul.f32 %v9783_v29, %v16230_v6  ;;  %10695 = vrsqrt.f32 %v10686_v49  ;;  %9323 = vrot.lane.b32.xlu1 %v15336_v39, %s10769_s29  ;;  %9442 = vrot.lane.b32.xlu0 %v15327_v26, %s10770_s30 }
 0x2da   : > { %v9796_v43 = vmul.f32 %v10684_v62, %v9772_v19  ;;  %10697 = vrsqrt.f32 %v10688_v48  ;;  %v9666_v9 = vmul.f32 2e-05, %v9642_v55  ;;  %v16236_v19 = vld [vmem:[#allocation79_spill] sm:$0xff] }
 0x2db   : > { %v10690_v63 = vpop.eup %10689  ;;  %v10376_v10 = vpack.c.bf16 %v9807_v2, %v9807_v2 }
 0x2dc   : > { %v10692_v20 = vpop.eup %10691  ;;  %v9820_v12 = vmul.f32 %v9796_v43, %v16232_v33  ;;  %v9773_v5 = vmul.f32 %v10690_v63, %v10690_v63  ;;  %v9191_v35 = vpop.permute.xlu1 %9190  ;;  %v9690_v45 = vadd.f32 2.0, %v9666_v9 }
 0x2dd   : > { %9929 = vst.msk [vmem:[%s15266_s15 + $0xc] sm:$0x3] %vm9926_vm14, %v10376_v10  ;;  %10699 = vrsqrt.f32 %v10692_v20  ;;  %9444 = vrot.lane.b32.xlu1 %v15336_v39, %s10770_s30  ;;  %9563 = vrot.lane.b32.xlu0 %v15327_v26, %s10771_s6  ;;  %v9256_v47 = vsel %vm9248_vm9, %v9191_v35, 0.0 }
 0x2de   : > { %v10694_v41 = vpop.eup %10693  ;;  %v10389_v24 = vpack.c.bf16 %v9820_v12, %v9820_v12  ;;  %v9797_v3 = vmul.f32 %v10690_v63, %v9773_v5  ;;  %v9280_v11 = vadd.f32 %v9256_v47, %v16234_v23  ;;  %v16237_v63 = vld [vmem:[#allocation57_spill] sm:$0xff] }
 0x2df   : > { %10701 = vrsqrt.f32 %v10694_v41  ;;  %v16238_v5 = vld [vmem:[#allocation53_spill] sm:$0xff] }
 0x2e0   : > { %9942 = vst.msk [vmem:[%s15266_s15 + $0x40] sm:$0xf] %vm9924_vm13, %v10389_v24  ;;  %v9821_v21 = vmul.f32 %v9797_v3, %v16233_v61  ;;  %v9312_v37 = vpop.permute.xlu1 %9311  ;;  %10703 = vrsqrt.f32 %v9690_v45 }
 0x2e1   : > { %9565 = vrot.lane.b32.xlu1 %v15336_v39, %s10771_s6  ;;  %9583 = vrot.lane.b32.xlu0 %v15176_v34, %s10771_s6  ;;  %v9377_v28 = vsel %vm9369_vm10, 0.0, %v9312_v37  ;;  %v16239_v37 = vld [vmem:[#allocation82_spill] sm:$0xff] }
 0x2e2   : > { %v10390_v52 = vpack.c.bf16 %v9821_v21, %v9821_v21  ;;  %v9401_v6 = vadd.f32 %v9377_v28, %v9280_v11 }
 0x2e3   : > { %v10696_v36 = vpop.eup %10695 }
 0x2e4   : > { %v10698_v53 = vpop.eup %10697  ;;  %9943 = vst.msk [vmem:[%s15266_s15 + $0x44] sm:$0x3] %vm9926_vm14, %v10390_v52  ;;  %v9760_v14 = vmul.f32 %v10696_v36, %v10696_v36  ;;  %v9433_v42 = vpop.permute.xlu1 %9432 }
 0x2e5   : > { %v9761_v17 = vmul.f32 %v10698_v53, %v10698_v53  ;;  %9585 = vrot.lane.b32.xlu1 %v15193_v0, %s10771_s6  ;;  %v9498_v56 = vsel %vm9490_vm11, %v9433_v42, 0.0 }
 0x2e6   : > { %v9784_v40 = vmul.f32 %v10696_v36, %v9760_v14  ;;  %v9522_v27 = vadd.f32 %v9498_v56, %v9401_v6  ;;  %v16240_v14 = vld [vmem:[#allocation60_spill] sm:$0xff] }
 0x2e7   : > { %v10700_v38 = vpop.eup %10699  ;;  %v9785_v60 = vmul.f32 %v10698_v53, %v9761_v17 }
 0x2e8   : > { %v9808_v62 = vmul.f32 %v9784_v40, %v16235_v7  ;;  %v9774_v29 = vmul.f32 %v10700_v38, %v10700_v38  ;;  %v9554_v46 = vpop.permute.xlu1 %9553  ;;  %v16241_v7 = vld [vmem:[#allocation63_spill] sm:$0xff] }
 0x2e9   : > { %v10702_v49 = vpop.eup %10701  ;;  %v9809_v48 = vmul.f32 %v9785_v60, %v16236_v19  ;;  %v9619_v20 = vsel %vm9611_vm12, 0.0, %v9554_v46 }
 0x2ea   : > { %v10377_v2 = vpack.c.bf16 %v9808_v62, %v9808_v62  ;;  %v9798_v32 = vmul.f32 %v10700_v38, %v9774_v29  ;;  %v9775_v43 = vmul.f32 %v10702_v49, %v10702_v49  ;;  %v9643_v33 = vadd.f32 %v9619_v20, %v9522_v27  ;;  %v10704_v24 = vpop.eup %10703 }
 0x2eb   : > { %v10378_v31 = vpack.c.bf16 %v9809_v48, %v9809_v48  ;;  %10705 = vrsqrt.f32 %v10704_v24 }
 0x2ec   : > { %9930 = vst.msk [vmem:[%s15266_s15 + $0x10] sm:$0xf] %vm9924_vm13, %v10377_v2  ;;  %v9822_v10 = vmul.f32 %v9798_v32, %v16237_v63  ;;  %v9799_v58 = vmul.f32 %v10702_v49, %v9775_v43  ;;  %v9667_v41 = vmul.f32 2e-05, %v9643_v33 }
 0x2ed   : > { %9931 = vst.msk [vmem:[%s15266_s15 + $0x14] sm:$0x3] %vm9926_vm14, %v10378_v31 }
 0x2ee   : > { %v10391_v12 = vpack.c.bf16 %v9822_v10, %v9822_v10  ;;  %v9823_v15 = vmul.f32 %v9799_v58, %v16238_v5  ;;  %v9691_v25 = vadd.f32 2.0, %v9667_v41  ;;  %v16242_v58 = vld [vmem:[#allocation93_spill] sm:$0xff] }
 0x2f0   : > { %9944 = vst.msk [vmem:[%s15266_s15 + $0x48] sm:$0xf] %vm9924_vm13, %v10391_v12  ;;  %v10392_v3 = vpack.c.bf16 %v9823_v15, %v9823_v15  ;;  %10707 = vrsqrt.f32 %v9691_v25 }
 0x2f2   : > { %9945 = vst.msk [vmem:[%s15266_s15 + $0x4c] sm:$0x3] %vm9926_vm14, %v10392_v3 }
 0x2f5   : > { %v10706_v35 = vpop.eup %10705 }
 0x2f6   : > { %v9217_v22 = vpop.permute.xlu0 %9216  ;;  %v9762_v18 = vmul.f32 %v10706_v35, %v10706_v35 }
 0x2f7   : > { %v9269_v55 = vsel %vm9248_vm9, %v9217_v22, 0.0 }
 0x2f8   : > { %v9786_v9 = vmul.f32 %v10706_v35, %v9762_v18  ;;  %v9293_v47 = vadd.f32 %v9269_v55, %v16240_v14 }
 0x2fa   : > { %v9338_v61 = vpop.permute.xlu0 %9337  ;;  %v10708_v21 = vpop.eup %10707  ;;  %v9810_v53 = vmul.f32 %v9786_v9, %v16239_v37 }
 0x2fb   : > { %10709 = vrsqrt.f32 %v10708_v21  ;;  %v9390_v36 = vsel %vm9369_vm10, 0.0, %v9338_v61 }
 0x2fc   : > { %v9219_v52 = vpop.permute.xlu1 %9218  ;;  %v10379_v28 = vpack.c.bf16 %v9810_v53, %v9810_v53  ;;  %v9414_v38 = vadd.f32 %v9390_v36, %v9293_v47 }
 0x2fd   : > { %v9270_v60 = vsel %vm9248_vm9, %v9219_v52, 0.0 }
 0x2fe   : > { %v9459_v45 = vpop.permute.xlu0 %9458  ;;  %9932 = vst.msk [vmem:[%s15266_s15 + $0x18] sm:$0xf] %vm9924_vm13, %v10379_v28  ;;  %v9294_v62 = vadd.f32 %v9270_v60, %v16241_v7  ;;  %v16243_v28 = vld [vmem:[#allocation26_spill] sm:$0xff] }
 0x2ff   : > { %v9511_v17 = vsel %vm9490_vm11, %v9459_v45, 0.0 }
 0x300   : > { %v9340_v40 = vpop.permute.xlu1 %9339  ;;  %v9535_v23 = vadd.f32 %v9511_v17, %v9414_v38 }
 0x301   : > { %v9391_v11 = vsel %vm9369_vm10, 0.0, %v9340_v40 }
 0x302   : > { %v9580_v42 = vpop.permute.xlu0 %9579  ;;  %v9415_v48 = vadd.f32 %v9391_v11, %v9294_v62 }
 0x303   : > { %v9632_v29 = vsel %vm9611_vm12, 0.0, %v9580_v42 }
 0x304   : > { %v9461_v56 = vpop.permute.xlu1 %9460  ;;  %v9656_v49 = vadd.f32 %v9632_v29, %v9535_v23 }
 0x305   : > { %v9512_v19 = vsel %vm9490_vm11, %v9461_v56, 0.0  ;;  %v10710_v6 = vpop.eup %10709 }
 0x306   : > { %v9680_v2 = vmul.f32 2e-05, %v9656_v49  ;;  %v9763_v32 = vmul.f32 %v10710_v6, %v10710_v6  ;;  %v9536_v43 = vadd.f32 %v9512_v19, %v9415_v48 }
 0x308   : > { %v9582_v31 = vpop.permute.xlu1 %9581  ;;  %v9704_v27 = vadd.f32 2.0, %v9680_v2  ;;  %v9787_v63 = vmul.f32 %v10710_v6, %v9763_v32  ;;  %v16244_v2 = vld [vmem:[#allocation25_spill] sm:$0xff] }
 0x309   : > { %v9633_v46 = vsel %vm9611_vm12, 0.0, %v9582_v31 }
 0x30a   : > { %v9657_v10 = vadd.f32 %v9633_v46, %v9536_v43  ;;  %10711 = vrsqrt.f32 %v9704_v27  ;;  %v9811_v20 = vmul.f32 %v9787_v63, %v16242_v58 }
 0x30c   : > { %v9681_v33 = vmul.f32 2e-05, %v9657_v10  ;;  %v10380_v12 = vpack.c.bf16 %v9811_v20, %v9811_v20 }
 0x30e   : > { %v9705_v5 = vadd.f32 2.0, %v9681_v33  ;;  %9933 = vst.msk [vmem:[%s15266_s15 + $0x1c] sm:$0x3] %vm9926_vm14, %v10380_v12 }
 0x310   : > { %10713 = vrsqrt.f32 %v9705_v5 }
 0x314   : > { %v10712_v15 = vpop.eup %10711 }
 0x315   : > { %10715 = vrsqrt.f32 %v10712_v15 }
 0x317   : > { %v9193_v41 = vpop.permute.xlu0 %9192 }
 0x318   : > { %v9257_v22 = vsel %vm9248_vm9, %v9193_v41, 0.0 }
 0x319   : > { %v9281_v52 = vadd.f32 %v9257_v22, %v15054_v54 }
 0x31a   : > { %v10714_v24 = vpop.eup %10713 }
 0x31b   : > { %10717 = vrsqrt.f32 %v10714_v24  ;;  %v9195_v3 = vpop.permute.xlu1 %9194  ;;  %v9314_v25 = vpop.permute.xlu0 %9313 }
 0x31c   : > { %v9378_v61 = vsel %vm9369_vm10, 0.0, %v9314_v25  ;;  %v9258_v21 = vsel %vm9248_vm9, %v9195_v3, 0.0 }
 0x31d   : > { %v9402_v14 = vadd.f32 %v9378_v61, %v9281_v52  ;;  %v9282_v47 = vadd.f32 %v9258_v21, %v15072_v57 }
 0x31f   : > { %v9316_v35 = vpop.permute.xlu1 %9315  ;;  %v10716_v18 = vpop.eup %10715 }
 0x320   : > { %v9776_v55 = vmul.f32 %v10716_v18, %v10716_v18  ;;  %v9435_v9 = vpop.permute.xlu0 %9434  ;;  %v9379_v37 = vsel %vm9369_vm10, 0.0, %v9316_v35 }
 0x321   : > { %v9499_v36 = vsel %vm9490_vm11, %v9435_v9, 0.0  ;;  %v9403_v23 = vadd.f32 %v9379_v37, %v9282_v47 }
 0x322   : > { %v9800_v53 = vmul.f32 %v10716_v18, %v9776_v55  ;;  %v9523_v60 = vadd.f32 %v9499_v36, %v9402_v14 }
 0x323   : > { %v9437_v45 = vpop.permute.xlu1 %9436 }
 0x324   : > { %v9500_v17 = vsel %vm9490_vm11, %v9437_v45, 0.0  ;;  %v9824_v38 = vmul.f32 %v9800_v53, %v16243_v28  ;;  %v9556_v11 = vpop.permute.xlu0 %9555 }
 0x325   : > { %v10718_v40 = vpop.eup %10717  ;;  %v9620_v42 = vsel %vm9611_vm12, 0.0, %v9556_v11  ;;  %v9524_v29 = vadd.f32 %v9500_v17, %v9403_v23 }
 0x326   : > { %v9777_v54 = vmul.f32 %v10718_v40, %v10718_v40  ;;  %v10393_v7 = vpack.c.bf16 %v9824_v38, %v9824_v38  ;;  %v9644_v62 = vadd.f32 %v9620_v42, %v9523_v60 }
 0x327   : > { %v9558_v56 = vpop.permute.xlu1 %9557 }
 0x328   : > { %v9801_v49 = vmul.f32 %v10718_v40, %v9777_v54  ;;  %v9621_v57 = vsel %vm9611_vm12, 0.0, %v9558_v56  ;;  %9946 = vst.msk [vmem:[%s15266_s15 + $0x50] sm:$0xf] %vm9924_vm13, %v10393_v7  ;;  %v9668_v19 = vmul.f32 2e-05, %v9644_v62  ;;  %v15418_v48 = vpop.permute.xlu0 %9220 }
 0x329   : > { %v9645_v6 = vadd.f32 %v9621_v57, %v9524_v29 }
 0x32a   : > { %v9825_v32 = vmul.f32 %v9801_v49, %v16244_v2  ;;  %v9692_v43 = vadd.f32 2.0, %v9668_v19 }
 0x32b   : > { %v9669_v31 = vmul.f32 2e-05, %v9645_v6  ;;  %v15421_v27 = vpop.permute.xlu1 %9222 }
 0x32c   : > { %v10394_v46 = vpack.c.bf16 %v9825_v32, %v9825_v32  ;;  %10719 = vrsqrt.f32 %v9692_v43  ;;  %v15423_v10 = vpop.permute.xlu0 %9341 }
 0x32d   : > { %v9693_v63 = vadd.f32 2.0, %v9669_v31 }
 0x32e   : > { %9947 = vst.msk [vmem:[%s15266_s15 + $0x54] sm:$0x3] %vm9926_vm14, %v10394_v46 }
 0x32f   : > { %10721 = vrsqrt.f32 %v9693_v63  ;;  %v15427_v58 = vpop.permute.xlu1 %9343 }
 0x330   : > { %v15429_v20 = vpop.permute.xlu0 %9462 }
 0x333   : > { %v15431_v33 = vpop.permute.xlu1 %9464 }
 0x334   : > { %v9197_v12 = vpop.permute.xlu0 %9196 }
 0x335   : > { %v9259_v3 = vsel %vm9248_vm9, %v9197_v12, 0.0 }
 0x336   : > { %v10720_v5 = vpop.eup %10719  ;;  %v9283_v18 = vadd.f32 %v9259_v3, %v15241_v1 }
 0x337   : > { %v9199_v15 = vpop.permute.xlu1 %9198  ;;  %10723 = vrsqrt.f32 %v10720_v5 }
 0x338   : > { %v9318_v24 = vpop.permute.xlu0 %9317  ;;  %v9260_v35 = vsel %vm9248_vm9, %v9199_v15, 0.0 }
 0x339   : > { %v10722_v41 = vpop.eup %10721  ;;  %v9380_v22 = vsel %vm9369_vm10, 0.0, %v9318_v24  ;;  %v9284_v9 = vadd.f32 %v9260_v35, %v15254_v4  ;;  %v9272_v35 = vsel %vm9248_vm9, %v15421_v27, 0.0 }
 0x33a   : > { %10725 = vrsqrt.f32 %v10722_v41  ;;  %v9404_v52 = vadd.f32 %v9380_v22, %v9283_v18  ;;  %v9392_v22 = vsel %vm9369_vm10, 0.0, %v15423_v10 }
 0x33b   : > { %v9320_v25 = vpop.permute.xlu1 %9319 }
 0x33c   : > { %v9439_v61 = vpop.permute.xlu0 %9438  ;;  %v9381_v55 = vsel %vm9369_vm10, 0.0, %v9320_v25 }
 0x33d   : > { %v9501_v21 = vsel %vm9490_vm11, %v9439_v61, 0.0  ;;  %v9405_v14 = vadd.f32 %v9381_v55, %v9284_v9  ;;  %v9513_v55 = vsel %vm9490_vm11, %v15429_v20, 0.0 }
 0x33e   : > { %v9525_v53 = vadd.f32 %v9501_v21, %v9404_v52 }
 0x33f   : > { %v9441_v36 = vpop.permute.xlu1 %9440 }
 0x340   : > { %v9502_v37 = vsel %vm9490_vm11, %v9441_v36, 0.0  ;;  %v9560_v47 = vpop.permute.xlu0 %9559  ;;  %v9296_v36 = vadd.f32 %v9272_v35, %v15193_v0 }
 0x341   : > { %v10724_v45 = vpop.eup %10723  ;;  %v9622_v17 = vsel %vm9611_vm12, 0.0, %v9560_v47  ;;  %v9526_v1 = vadd.f32 %v9502_v37, %v9405_v14 }
 0x342   : > { %v9764_v40 = vmul.f32 %v10724_v45, %v10724_v45  ;;  %v9646_v28 = vadd.f32 %v9622_v17, %v9525_v53 }
 0x343   : > { %v9562_v38 = vpop.permute.xlu1 %9561 }
 0x344   : > { %v10726_v60 = vpop.eup %10725  ;;  %v9623_v23 = vsel %vm9611_vm12, 0.0, %v9562_v38  ;;  %v9788_v11 = vmul.f32 %v10724_v45, %v9764_v40  ;;  %v9670_v4 = vmul.f32 2e-05, %v9646_v28  ;;  %v9201_v7 = vpop.permute.xlu0 %9200 }
 0x345   : > { %v9765_v54 = vmul.f32 %v10726_v60, %v10726_v60  ;;  %v9647_v42 = vadd.f32 %v9623_v23, %v9526_v1  ;;  %v9261_v43 = vsel %vm9248_vm9, %v9201_v7, 0.0 }
 0x346   : > { %v9812_v62 = vmul.f32 %v9788_v11, %v15043_v16  ;;  %v9694_v56 = vadd.f32 2.0, %v9670_v4  ;;  %v9285_v12 = vadd.f32 %v9261_v43, %v15327_v26 }
 0x347   : > { %v9789_v29 = vmul.f32 %v10726_v60, %v9765_v54  ;;  %v9671_v49 = vmul.f32 2e-05, %v9647_v42  ;;  %v9203_v57 = vpop.permute.xlu1 %9202 }
 0x348   : > { %v10381_v19 = vpack.c.bf16 %v9812_v62, %v9812_v62  ;;  %10727 = vrsqrt.f32 %v9694_v56  ;;  %v9322_v32 = vpop.permute.xlu0 %9321  ;;  %v9262_v16 = vsel %vm9248_vm9, %v9203_v57, 0.0 }
 0x349   : > { %v9813_v6 = vmul.f32 %v9789_v29, %v15062_v8  ;;  %v9695_v2 = vadd.f32 2.0, %v9671_v49  ;;  %v9382_v63 = vsel %vm9369_vm10, 0.0, %v9322_v32  ;;  %v9271_v8 = vsel %vm9248_vm9, %v15418_v48, 0.0 }
 0x34a   : > { %9934 = vst.msk [vmem:[%s15266_s15 + $0x20] sm:$0xf] %vm9924_vm13, %v10381_v19  ;;  %v9286_v24 = vadd.f32 %v9262_v16, %v15336_v39  ;;  %v9406_v3 = vadd.f32 %v9382_v63, %v9285_v12  ;;  %v9295_v18 = vadd.f32 %v9271_v8, %v15176_v34  ;;  %v9393_v39 = vsel %vm9369_vm10, 0.0, %v15427_v58 }
 0x34b   : > { %v10382_v31 = vpack.c.bf16 %v9813_v6, %v9813_v6  ;;  %10729 = vrsqrt.f32 %v9695_v2  ;;  %v9324_v46 = vpop.permute.xlu1 %9323  ;;  %v9514_v34 = vsel %vm9490_vm11, %v15431_v33, 0.0  ;;  %v9417_v45 = vadd.f32 %v9393_v39, %v9296_v36 }
 0x34c   : > { %v9443_v5 = vpop.permute.xlu0 %9442  ;;  %v9383_v15 = vsel %vm9369_vm10, 0.0, %v9324_v46  ;;  %v9416_v10 = vadd.f32 %v9392_v22, %v9295_v18 }
 0x34d   : > { %9935 = vst.msk [vmem:[%s15266_s15 + $0x24] sm:$0x3] %vm9926_vm14, %v10382_v31  ;;  %v9503_v41 = vsel %vm9490_vm11, %v9443_v5, 0.0  ;;  %v9407_v61 = vadd.f32 %v9383_v15, %v9286_v24  ;;  %v9538_v1 = vadd.f32 %v9514_v34, %v9417_v45 }
 0x34e   : > { %v9527_v48 = vadd.f32 %v9503_v41, %v9406_v3  ;;  %v9537_v20 = vadd.f32 %v9513_v55, %v9416_v10 }
 0x34f   : > { %v9445_v25 = vpop.permute.xlu1 %9444 }
 0x350   : > { %v9504_v26 = vsel %vm9490_vm11, %v9445_v25, 0.0  ;;  %v9564_v21 = vpop.permute.xlu0 %9563 }
 0x351   : > { %v9624_v52 = vsel %vm9611_vm12, 0.0, %v9564_v21  ;;  %v9528_v27 = vadd.f32 %v9504_v26, %v9407_v61 }
 0x352   : > { %v10728_v9 = vpop.eup %10727  ;;  %v9648_v37 = vadd.f32 %v9624_v52, %v9527_v48 }
 0x353   : > { %v9566_v53 = vpop.permute.xlu1 %9565  ;;  %10731 = vrsqrt.f32 %v10728_v9 }
 0x354   : > { %v9625_v14 = vsel %vm9611_vm12, 0.0, %v9566_v53  ;;  %v9672_v17 = vmul.f32 2e-05, %v9648_v37  ;;  %v9584_v40 = vpop.permute.xlu0 %9583 }
 0x355   : > { %v10730_v47 = vpop.eup %10729  ;;  %v9649_v58 = vadd.f32 %v9625_v14, %v9528_v27  ;;  %v9634_v28 = vsel %vm9611_vm12, 0.0, %v9584_v40 }
 0x356   : > { %10733 = vrsqrt.f32 %v10730_v47  ;;  %v9696_v0 = vadd.f32 2.0, %v9672_v17  ;;  %v9658_v60 = vadd.f32 %v9634_v28, %v9537_v20 }
 0x357   : > { %v9673_v38 = vmul.f32 2e-05, %v9649_v58  ;;  %v9586_v23 = vpop.permute.xlu1 %9585 }
 0x358   : > { %v9635_v11 = vsel %vm9611_vm12, 0.0, %v9586_v23  ;;  %10735 = vrsqrt.f32 %v9696_v0  ;;  %v9682_v54 = vmul.f32 2e-05, %v9658_v60 }
 0x359   : > { %v9697_v33 = vadd.f32 2.0, %v9673_v38  ;;  %v9659_v4 = vadd.f32 %v9635_v11, %v9538_v1 }
 0x35a   : > { %v9706_v42 = vadd.f32 2.0, %v9682_v54 }
 0x35b   : > { %10737 = vrsqrt.f32 %v9697_v33  ;;  %v9683_v7 = vmul.f32 2e-05, %v9659_v4 }
 0x35c   : > { %10739 = vrsqrt.f32 %v9706_v42 }
 0x35d   : > { %v9707_v62 = vadd.f32 2.0, %v9683_v7  ;;  %v10732_v29 = vpop.eup %10731 }
 0x35e   : > { %v9766_v56 = vmul.f32 %v10732_v29, %v10732_v29 }
 0x35f   : > { %10741 = vrsqrt.f32 %v9707_v62 }
 0x360   : > { %v10734_v49 = vpop.eup %10733  ;;  %v9790_v57 = vmul.f32 %v10732_v29, %v9766_v56 }
 0x361   : > { %v9767_v19 = vmul.f32 %v10734_v49, %v10734_v49 }
 0x362   : > { %v10736_v6 = vpop.eup %10735  ;;  %v9814_v2 = vmul.f32 %v9790_v57, %v15170_v13 }
 0x363   : > { %v9791_v32 = vmul.f32 %v10734_v49, %v9767_v19  ;;  %10743 = vrsqrt.f32 %v10736_v6 }
 0x364   : > { %v10383_v31 = vpack.c.bf16 %v9814_v2, %v9814_v2 }
 0x365   : > { %v10738_v43 = vpop.eup %10737  ;;  %v9815_v46 = vmul.f32 %v9791_v32, %v15184_v44 }
 0x366   : > { %10745 = vrsqrt.f32 %v10738_v43  ;;  %v10740_v16 = vpop.eup %10739  ;;  %9936 = vst.msk [vmem:[%s15266_s15 + $0x28] sm:$0xf] %vm9924_vm13, %v10383_v31 }
 0x367   : > { %v10384_v63 = vpack.c.bf16 %v9815_v46, %v9815_v46  ;;  %10747 = vrsqrt.f32 %v10740_v16 }
 0x369   : > { %v10742_v12 = vpop.eup %10741  ;;  %9937 = vst.msk [vmem:[%s15266_s15 + $0x2c] sm:$0x3] %vm9926_vm14, %v10384_v63 }
 0x36a   : > { %10749 = vrsqrt.f32 %v10742_v12 }
 0x36d   : > { %v10744_v5 = vpop.eup %10743 }
 0x36e   : > { %v9768_v8 = vmul.f32 %v10744_v5, %v10744_v5 }
 0x370   : > { %v10746_v13 = vpop.eup %10745  ;;  %v9792_v15 = vmul.f32 %v10744_v5, %v9768_v8 }
 0x371   : > { %v9769_v41 = vmul.f32 %v10746_v13, %v10746_v13  ;;  %v10748_v24 = vpop.eup %10747 }
 0x372   : > { %v9816_v44 = vmul.f32 %v9792_v15, %v15231_v51  ;;  %v9778_v25 = vmul.f32 %v10748_v24, %v10748_v24 }
 0x373   : > { %v9793_v3 = vmul.f32 %v10746_v13, %v9769_v41 }
 0x374   : > { %v10750_v22 = vpop.eup %10749  ;;  %v10385_v35 = vpack.c.bf16 %v9816_v44, %v9816_v44  ;;  %v9802_v18 = vmul.f32 %v10748_v24, %v9778_v25 }
 0x375   : > { %v9817_v26 = vmul.f32 %v9793_v3, %v15250_v30  ;;  %v9779_v61 = vmul.f32 %v10750_v22, %v10750_v22 }
 0x376   : > { %9938 = vst.msk [vmem:[%s15266_s15 + $0x30] sm:$0xf] %vm9924_vm13, %v10385_v35  ;;  %v9826_v21 = vmul.f32 %v9802_v18, %v15104_v59 }
 0x377   : > { %v10386_v48 = vpack.c.bf16 %v9817_v26, %v9817_v26  ;;  %v9803_v55 = vmul.f32 %v10750_v22, %v9779_v61 }
 0x378   : > { %v10395_v39 = vpack.c.bf16 %v9826_v21, %v9826_v21 }
 0x379   : > { %9939 = vst.msk [vmem:[%s15266_s15 + $0x34] sm:$0x3] %vm9926_vm14, %v10386_v48  ;;  %v9827_v51 = vmul.f32 %v9803_v55, %v15116_v50 }
 0x37a   : > { %9948 = vst.msk [vmem:[%s15266_s15 + $0x58] sm:$0xf] %vm9924_vm13, %v10395_v39  ;;  %v5222_v9 = vpop.f32.mrb[76].mxu1 }
 0x37b   : > { %v10396_v52 = vpack.c.bf16 %v9827_v51, %v9827_v51  ;;  %v10618_v10 = vpop.f32.mrb[77].mxu1 }
 0x37c   : > { %v5224_v30 = vpop.f32.mrb[78].mxu1 }
 0x37d   : > { %9949 = vst.msk [vmem:[%s15266_s15 + $0x5c] sm:$0x3] %vm9926_vm14, %v10396_v52  ;;  %v10619_v36 = vpop.f32.mrb[79].mxu1 }
 0x382   : > { %v5228_v27 = vpop.f32.mrb[80].mxu1 }
 0x383   : > { %v10622_v37 = vpop.f32.mrb[81].mxu1 }
 0x384   : > { %v5230_v53 = vpop.f32.mrb[82].mxu1 }
 0x385   : > { %v10623_v34 = vpop.f32.mrb[83].mxu1 }
 0x386 PF: > { %s13_s12 = sadd.s32 1, %s10761_s12  }
 0x387   : > { %p10_p4 = scmp.ge.s32.totalorder %s13_s12, 4  }
 0x389   :  { %12 = sbr.rel (!%p10_p4) target bundleno = 1 (0x1), region = 62 }

// kernel: cnn_simple_forward.5
= control target key start
LH: loop header
LB: loop body
LE: loop exit
PB: predicated region body
PF: predicated region fallthrough
CT: control target
= control target key end

     0   :  { %v602_v32 = vlaneseq  ;;  %v5994_v33 = vmov 1966171168   ;;  %s8106_s0 = inlined_call_operand.vmem [shape: bf16[2,1152], index: 0, kind: input, shape index: {}]   ;;  %s8107_s1 = inlined_call_operand.vmem [shape: bf16[1152,1000], index: 1, kind: input, shape index: {}]   ;;  %s8108_s2 = inlined_call_operand.vmem [shape: f32[1,1000], index: 2, kind: input, shape index: {}]   ;;  %s8109_s3 = inlined_call_operand.vmem [shape: bf16[1000,50], index: 3, kind: input, shape index: {}]   ;;  %s8110_s4 = inlined_call_operand.vmem [shape: f32[1,50], index: 4, kind: input, shape index: {}]   ;;  %s8111_s5 = inlined_call_operand.hbm [shape: f32[2,50], index: 5, kind: output, shape index: {}]  }
   0x1   :  { %v24_v0 = vld [vmem:[%s8107_s1] sm:$0xff]  ;;  %v25_v2 = vld [vmem:[%s8107_s1 + $0x8] sm:$0xff]  ;;  %v646_v34 = vunpack.c.l.s4 %v5994_v33 }
   0x2   :  { %v28_v1 = vld [vmem:[%s8107_s1 + $0x20] sm:$0xff]  ;;  %v29_v4 = vld [vmem:[%s8107_s1 + $0x28] sm:$0xff]  ;;  %v6093_v43 = vshrl.u32 %v602_v32, 7 }
   0x3   :  { %v5125_v3 = vcombine.high %v24_v0, %v28_v1  ;;  %v5124_v5 = vcombine.low %v24_v0, %v28_v1  ;;  %v32_v6 = vld [vmem:[%s8107_s1 + $0x40] sm:$0xff]  ;;  %v5127_v8 = vcombine.high %v25_v2, %v29_v4  ;;  %v5126_v9 = vcombine.low %v25_v2, %v29_v4  ;;  %v33_v11 = vld [vmem:[%s8107_s1 + $0x48] sm:$0xff] }
   0x4   :  { %v36_v7 = vld [vmem:[%s8107_s1 + $0x60] sm:$0xff]  ;;  %v37_v12 = vld [vmem:[%s8107_s1 + $0x68] sm:$0xff]  ;;  %v647_v44 = vunpack.c.0.s8 %v646_v34 }
   0x5   :  { %v5133_v10 = vcombine.high %v32_v6, %v36_v7  ;;  %v40_v13 = vld [vmem:[%s8107_s1 + $0x80] sm:$0xff]  ;;  %3596 = vmatprep.subr.bf16.mxu0 %v5125_v3  ;;  %v5135_v14 = vcombine.high %v33_v11, %v37_v12  ;;  %v41_v16 = vld [vmem:[%s8107_s1 + $0x88] sm:$0xff]  ;;  %3801 = vmatprep.subr.bf16.mxu1 %v5127_v8  ;;  %v5132_v18 = vcombine.low %v32_v6, %v36_v7 }
   0x6   :  { %v44_v15 = vld [vmem:[%s8107_s1 + $0xa0] sm:$0xff]  ;;  %v45_v17 = vld [vmem:[%s8107_s1 + $0xa8] sm:$0xff]  ;;  %3597 = vmatpush1.bf16.msra.mxu0 %v5124_v5  ;;  %3802 = vmatpush1.bf16.msra.mxu1 %v5126_v9  ;;  %v5134_v19 = vcombine.low %v33_v11, %v37_v12  ;;  %v6108_v53 = vsub.s32 %v647_v44, %v6093_v43 }
   0x7   :  { %3598 = vmatprep.subr.bf16.mxu0 %v5133_v10  ;;  %v5141_v20 = vcombine.high %v40_v13, %v44_v15  ;;  %3803 = vmatprep.subr.bf16.mxu1 %v5135_v14  ;;  %v5143_v21 = vcombine.high %v41_v16, %v45_v17  ;;  %v48_v22 = vld [vmem:[%s8107_s1 + $0xc0] sm:$0xff]  ;;  %v49_v24 = vld [vmem:[%s8107_s1 + $0xc8] sm:$0xff]  ;;  %v5140_v26 = vcombine.low %v40_v13, %v44_v15 }
   0x8   :  { %v52_v23 = vld [vmem:[%s8107_s1 + $0xe0] sm:$0xff]  ;;  %v53_v25 = vld [vmem:[%s8107_s1 + $0xe8] sm:$0xff]  ;;  %v5142_v27 = vcombine.low %v41_v16, %v45_v17 }
   0x9   :  { %v5149_v28 = vcombine.high %v48_v22, %v52_v23  ;;  %v5151_v29 = vcombine.high %v49_v24, %v53_v25  ;;  %v56_v30 = vld [vmem:[%s8107_s1 + $0x100] sm:$0xff]  ;;  %v57_v35 = vld [vmem:[%s8107_s1 + $0x108] sm:$0xff]  ;;  %v5148_v37 = vcombine.low %v48_v22, %v52_v23  ;;  %v5150_v38 = vcombine.low %v49_v24, %v53_v25 }
   0xa   :  { %3599 = vmatpush1.bf16.msra.mxu0 %v5132_v18  ;;  %3804 = vmatpush1.bf16.msra.mxu1 %v5134_v19  ;;  %v60_v31 = vld [vmem:[%s8107_s1 + $0x120] sm:$0xff]  ;;  %v61_v36 = vld [vmem:[%s8107_s1 + $0x128] sm:$0xff] }
   0xb   :  { %3600 = vmatprep.subr.bf16.mxu0 %v5141_v20  ;;  %3805 = vmatprep.subr.bf16.mxu1 %v5143_v21  ;;  %v5157_v39 = vcombine.high %v56_v30, %v60_v31  ;;  %v5159_v40 = vcombine.high %v57_v35, %v61_v36  ;;  %v64_v41 = vld [vmem:[%s8107_s1 + $0x140] sm:$0xff]  ;;  %v65_v45 = vld [vmem:[%s8107_s1 + $0x148] sm:$0xff]  ;;  %v5156_v47 = vcombine.low %v56_v30, %v60_v31 }
   0xc   :  { %v68_v42 = vld [vmem:[%s8107_s1 + $0x160] sm:$0xff]  ;;  %v69_v46 = vld [vmem:[%s8107_s1 + $0x168] sm:$0xff]  ;;  %v5158_v48 = vcombine.low %v57_v35, %v61_v36 }
   0xd   :  { %v5165_v49 = vcombine.high %v64_v41, %v68_v42  ;;  %v5167_v50 = vcombine.high %v65_v45, %v69_v46  ;;  %v72_v51 = vld [vmem:[%s8107_s1 + $0x180] sm:$0xff]  ;;  %v73_v54 = vld [vmem:[%s8107_s1 + $0x188] sm:$0xff]  ;;  %v5164_v56 = vcombine.low %v64_v41, %v68_v42  ;;  %v5166_v57 = vcombine.low %v65_v45, %v69_v46 }
   0xe   :  { %3601 = vmatpush1.bf16.msra.mxu0 %v5140_v26  ;;  %3806 = vmatpush1.bf16.msra.mxu1 %v5142_v27  ;;  %v76_v52 = vld [vmem:[%s8107_s1 + $0x1a0] sm:$0xff]  ;;  %v77_v55 = vld [vmem:[%s8107_s1 + $0x1a8] sm:$0xff] }
   0xf   :  { %3602 = vmatprep.subr.bf16.mxu0 %v5149_v28  ;;  %3807 = vmatprep.subr.bf16.mxu1 %v5151_v29  ;;  %v5173_v58 = vcombine.high %v72_v51, %v76_v52  ;;  %v6119_v59 = vld [vmem:[%s8106_s0] sm:$0xff]  ;;  %v5175_v60 = vcombine.high %v73_v54, %v77_v55  ;;  %v81_v0 = vld [vmem:[%s8107_s1 + $0x1c8] sm:$0xff]  ;;  %v5172_v2 = vcombine.low %v72_v51, %v76_v52 }
  0x10   :  { %v80_v61 = vld [vmem:[%s8107_s1 + $0x1c0] sm:$0xff]  ;;  %v6129_v63 = vrot.slane %v6119_v59, %v6108_v53  ;;  %v85_v1 = vld [vmem:[%s8107_s1 + $0x1e8] sm:$0xff]  ;;  %v5174_v4 = vcombine.low %v73_v54, %v77_v55 }
  0x11   :  { %v84_v62 = vld [vmem:[%s8107_s1 + $0x1e0] sm:$0xff]  ;;  %v5183_v6 = vcombine.high %v81_v0, %v85_v1  ;;  %v89_v10 = vld [vmem:[%s8107_s1 + $0x208] sm:$0xff]  ;;  %v5182_v13 = vcombine.low %v81_v0, %v85_v1 }
  0x12   :  { %3603 = vmatpush1.bf16.msra.mxu0 %v5148_v37  ;;  %3808 = vmatpush1.bf16.msra.mxu1 %v5150_v38  ;;  %v659_v3 = vcombine.high %v6129_v63, %v6129_v63  ;;  %v5181_v5 = vcombine.high %v80_v61, %v84_v62  ;;  %v88_v7 = vld [vmem:[%s8107_s1 + $0x200] sm:$0xff]  ;;  %v93_v11 = vld [vmem:[%s8107_s1 + $0x228] sm:$0xff]  ;;  %v5180_v12 = vcombine.low %v80_v61, %v84_v62 }
  0x13   :  { %3604 = vmatprep.subr.bf16.mxu0 %v5157_v39  ;;  %3809 = vmatprep.subr.bf16.mxu1 %v5159_v40  ;;  %v92_v8 = vld [vmem:[%s8107_s1 + $0x220] sm:$0xff]  ;;  %v5191_v15 = vcombine.high %v89_v10, %v93_v11  ;;  %v97_v18 = vld [vmem:[%s8107_s1 + $0x248] sm:$0xff]  ;;  %v5190_v21 = vcombine.low %v89_v10, %v93_v11 }
  0x14   :  { %v6146_v9 = vrot.slane %v659_v3, %v6108_v53  ;;  %v5189_v14 = vcombine.high %v88_v7, %v92_v8  ;;  %v96_v16 = vld [vmem:[%s8107_s1 + $0x240] sm:$0xff]  ;;  %v101_v19 = vld [vmem:[%s8107_s1 + $0x268] sm:$0xff]  ;;  %v5188_v20 = vcombine.low %v88_v7, %v92_v8 }
  0x15   :  { %v100_v17 = vld [vmem:[%s8107_s1 + $0x260] sm:$0xff]  ;;  %v5199_v23 = vcombine.high %v97_v18, %v101_v19  ;;  %v105_v26 = vld [vmem:[%s8107_s1 + $0x288] sm:$0xff]  ;;  %v5198_v29 = vcombine.low %v97_v18, %v101_v19 }
  0x16   :  { %3605 = vmatpush1.bf16.msra.mxu0 %v5156_v47  ;;  %3810 = vmatpush1.bf16.msra.mxu1 %v5158_v48  ;;  %v5197_v22 = vcombine.high %v96_v16, %v100_v17  ;;  %v104_v24 = vld [vmem:[%s8107_s1 + $0x280] sm:$0xff]  ;;  %v109_v27 = vld [vmem:[%s8107_s1 + $0x2a8] sm:$0xff]  ;;  %v5196_v28 = vcombine.low %v96_v16, %v100_v17 }
  0x17   :  { %3606 = vmatprep.subr.bf16.mxu0 %v5165_v49  ;;  %3811 = vmatprep.subr.bf16.mxu1 %v5167_v50  ;;  %v108_v25 = vld [vmem:[%s8107_s1 + $0x2a0] sm:$0xff]  ;;  %v5207_v31 = vcombine.high %v105_v26, %v109_v27  ;;  %v113_v34 = vld [vmem:[%s8107_s1 + $0x2c8] sm:$0xff]  ;;  %v5206_v37 = vcombine.low %v105_v26, %v109_v27 }
  0x18   :  { %3628 = vmatprep.mubr.bf16.mxu0 %v6146_v9  ;;  %3833 = vmatprep.mubr.bf16.mxu1 %v6146_v9  ;;  %v5205_v30 = vcombine.high %v104_v24, %v108_v25  ;;  %v112_v32 = vld [vmem:[%s8107_s1 + $0x2c0] sm:$0xff]  ;;  %v117_v35 = vld [vmem:[%s8107_s1 + $0x2e8] sm:$0xff]  ;;  %v5204_v36 = vcombine.low %v104_v24, %v108_v25 }
  0x19   :  { %v116_v33 = vld [vmem:[%s8107_s1 + $0x2e0] sm:$0xff]  ;;  %v5215_v39 = vcombine.high %v113_v34, %v117_v35  ;;  %v121_v42 = vld [vmem:[%s8107_s1 + $0x308] sm:$0xff]  ;;  %v5214_v46 = vcombine.low %v113_v34, %v117_v35 }
  0x1a   :  { %3607 = vmatpush1.bf16.msra.mxu0 %v5164_v56  ;;  %3812 = vmatpush1.bf16.msra.mxu1 %v5166_v57  ;;  %v5213_v38 = vcombine.high %v112_v32, %v116_v33  ;;  %v120_v40 = vld [vmem:[%s8107_s1 + $0x300] sm:$0xff]  ;;  %v125_v44 = vld [vmem:[%s8107_s1 + $0x328] sm:$0xff]  ;;  %v5212_v45 = vcombine.low %v112_v32, %v116_v33  ;;  %v6282_v33 = vcombine.high %v6146_v9, %v6146_v9 }
  0x1b   :  { %3608 = vmatprep.subr.bf16.mxu0 %v5173_v58  ;;  %3813 = vmatprep.subr.bf16.mxu1 %v5175_v60  ;;  %v124_v41 = vld [vmem:[%s8107_s1 + $0x320] sm:$0xff]  ;;  %v5223_v48 = vcombine.high %v121_v42, %v125_v44  ;;  %v129_v51 = vld [vmem:[%s8107_s1 + $0x348] sm:$0xff]  ;;  %v5222_v55 = vcombine.low %v121_v42, %v125_v44 }
  0x1c   :  { %v5221_v47 = vcombine.high %v120_v40, %v124_v41  ;;  %v128_v49 = vld [vmem:[%s8107_s1 + $0x340] sm:$0xff]  ;;  %v133_v52 = vld [vmem:[%s8107_s1 + $0x368] sm:$0xff]  ;;  %v5220_v54 = vcombine.low %v120_v40, %v124_v41 }
  0x1d   :  { %v132_v50 = vld [vmem:[%s8107_s1 + $0x360] sm:$0xff]  ;;  %v5231_v57 = vcombine.high %v129_v51, %v133_v52  ;;  %v137_v61 = vld [vmem:[%s8107_s1 + $0x388] sm:$0xff]  ;;  %v5230_v1 = vcombine.low %v129_v51, %v133_v52 }
  0x1e   :  { %3609 = vmatpush1.bf16.msra.mxu0 %v5172_v2  ;;  %3814 = vmatpush1.bf16.msra.mxu1 %v5174_v4  ;;  %v5229_v56 = vcombine.high %v128_v49, %v132_v50  ;;  %v136_v58 = vld [vmem:[%s8107_s1 + $0x380] sm:$0xff]  ;;  %v141_v62 = vld [vmem:[%s8107_s1 + $0x3a8] sm:$0xff]  ;;  %v5228_v0 = vcombine.low %v128_v49, %v132_v50 }
  0x1f   :  { %3610 = vmatprep.subr.bf16.mxu0 %v5181_v5  ;;  %3815 = vmatprep.subr.bf16.mxu1 %v5183_v6  ;;  %v140_v60 = vld [vmem:[%s8107_s1 + $0x3a0] sm:$0xff]  ;;  %v5239_v3 = vcombine.high %v137_v61, %v141_v62  ;;  %v145_v6 = vld [vmem:[%s8107_s1 + $0x3c8] sm:$0xff]  ;;  %v5238_v10 = vcombine.low %v137_v61, %v141_v62 }
  0x20   :  { %v5237_v2 = vcombine.high %v136_v58, %v140_v60  ;;  %v144_v4 = vld [vmem:[%s8107_s1 + $0x3c0] sm:$0xff]  ;;  %v149_v7 = vld [vmem:[%s8107_s1 + $0x3e8] sm:$0xff]  ;;  %v5236_v8 = vcombine.low %v136_v58, %v140_v60 }
  0x21   :  { %v148_v5 = vld [vmem:[%s8107_s1 + $0x3e0] sm:$0xff]  ;;  %v157_v16 = vld [vmem:[%s8107_s1 + $0x428] sm:$0xff]  ;;  %v5246_v18 = vcombine.low %v145_v6, %v149_v7 }
  0x22   :  { %3611 = vmatpush1.bf16.msra.mxu0 %v5180_v12  ;;  %3816 = vmatpush1.bf16.msra.mxu1 %v5182_v13  ;;  %v5245_v11 = vcombine.high %v144_v4, %v148_v5  ;;  %v5247_v12 = vcombine.high %v145_v6, %v149_v7  ;;  %v152_v13 = vld [vmem:[%s8107_s1 + $0x400] sm:$0xff]  ;;  %v5244_v17 = vcombine.low %v144_v4, %v148_v5  ;;  %v161_v24 = vld [vmem:[%s8107_s1 + $0x448] sm:$0xff] }
  0x23   :  { %3612 = vmatprep.subr.bf16.mxu0 %v5189_v14  ;;  %3817 = vmatprep.subr.bf16.mxu1 %v5191_v15  ;;  %v156_v14 = vld [vmem:[%s8107_s1 + $0x420] sm:$0xff]  ;;  %v153_v15 = vld [vmem:[%s8107_s1 + $0x408] sm:$0xff] }
  0x24   :  { %v5253_v19 = vcombine.high %v152_v13, %v156_v14  ;;  %v165_v25 = vld [vmem:[%s8107_s1 + $0x468] sm:$0xff]  ;;  %v5252_v26 = vcombine.low %v152_v13, %v156_v14  ;;  %v5254_v27 = vcombine.low %v153_v15, %v157_v16 }
  0x25   :  { %v173_v32 = vld [vmem:[%s8107_s1 + $0x4a8] sm:$0xff]  ;;  %v5262_v35 = vcombine.low %v161_v24, %v165_v25 }
  0x26   :  { %3613 = vmatpush1.bf16.msra.mxu0 %v5188_v20  ;;  %3818 = vmatpush1.bf16.msra.mxu1 %v5190_v21  ;;  %v5255_v20 = vcombine.high %v153_v15, %v157_v16  ;;  %v160_v21 = vld [vmem:[%s8107_s1 + $0x440] sm:$0xff]  ;;  %v181_v41 = vld [vmem:[%s8107_s1 + $0x4e8] sm:$0xff] }
  0x27   :  { %3614 = vmatprep.subr.bf16.mxu0 %v5197_v22  ;;  %3819 = vmatprep.subr.bf16.mxu1 %v5199_v23  ;;  %v164_v22 = vld [vmem:[%s8107_s1 + $0x460] sm:$0xff]  ;;  %v6260_v23 = vrot.slane %v6129_v63, %v6108_v53  ;;  %v189_v50 = vld [vmem:[%s8107_s1 + $0x528] sm:$0xff] }
  0x28   :  { %v172_v63 = vld [vmem:[%s8107_s1 + $0x4a0] sm:$0xff]  ;;  %v5260_v34 = vcombine.low %v160_v21, %v164_v22  ;;  %v197_v60 = vld [vmem:[%s8107_s1 + $0x568] sm:$0xff] }
  0x29   :  { %v205_v5 = vld [vmem:[%s8107_s1 + $0x5a8] sm:$0xff] }
  0x2a   :  { %3615 = vmatpush1.bf16.msra.mxu0 %v5196_v28  ;;  %3820 = vmatpush1.bf16.msra.mxu1 %v5198_v29  ;;  %v5261_v28 = vcombine.high %v160_v21, %v164_v22  ;;  %v168_v29 = vld [vmem:[%s8107_s1 + $0x480] sm:$0xff]  ;;  %v213_v14 = vld [vmem:[%s8107_s1 + $0x5e8] sm:$0xff] }
  0x2b   :  { %3616 = vmatprep.subr.bf16.mxu0 %v5205_v30  ;;  %3821 = vmatprep.subr.bf16.mxu1 %v5207_v31  ;;  %v169_v30 = vld [vmem:[%s8107_s1 + $0x488] sm:$0xff]  ;;  %v5263_v31 = vcombine.high %v161_v24, %v165_v25  ;;  %v5268_v42 = vcombine.low %v168_v29, %v172_v63 }
  0x2c   :  { %v5271_v40 = vcombine.high %v169_v30, %v173_v32  ;;  %v5270_v44 = vcombine.low %v169_v30, %v173_v32  ;;  %v221_v22 = vld [vmem:[%s8107_s1 + $0x628] sm:$0xff] }
  0x2d   :  { %v229_v30 = vld [vmem:[%s8107_s1 + $0x668] sm:$0xff] }
  0x2e   :  { %3617 = vmatpush1.bf16.msra.mxu0 %v5204_v36  ;;  %3822 = vmatpush1.bf16.msra.mxu1 %v5206_v37  ;;  %v5269_v36 = vcombine.high %v168_v29, %v172_v63  ;;  %v176_v37 = vld [vmem:[%s8107_s1 + $0x4c0] sm:$0xff]  ;;  %v225_v29 = vld [vmem:[%s8107_s1 + $0x648] sm:$0xff] }
  0x2f   :  { %3618 = vmatprep.subr.bf16.mxu0 %v5213_v38  ;;  %3823 = vmatprep.subr.bf16.mxu1 %v5215_v39  ;;  %v180_v38 = vld [vmem:[%s8107_s1 + $0x4e0] sm:$0xff]  ;;  %v177_v39 = vld [vmem:[%s8107_s1 + $0x4c8] sm:$0xff] }
  0x30   :  { %v5279_v49 = vcombine.high %v177_v39, %v181_v41  ;;  %v5276_v51 = vcombine.low %v176_v37, %v180_v38  ;;  %v5278_v52 = vcombine.low %v177_v39, %v181_v41  ;;  %v237_v39 = vld [vmem:[%s8107_s1 + $0x6a8] sm:$0xff]  ;;  %v5326_v41 = vcombine.low %v225_v29, %v229_v30 }
  0x32   :  { %3619 = vmatpush1.bf16.msra.mxu0 %v5212_v45  ;;  %3824 = vmatpush1.bf16.msra.mxu1 %v5214_v46  ;;  %v5277_v45 = vcombine.high %v176_v37, %v180_v38  ;;  %v184_v46 = vld [vmem:[%s8107_s1 + $0x500] sm:$0xff]  ;;  %v233_v37 = vld [vmem:[%s8107_s1 + $0x688] sm:$0xff]  ;;  %v5327_v38 = vcombine.high %v225_v29, %v229_v30 }
  0x33   :  { %3620 = vmatprep.subr.bf16.mxu0 %v5221_v47  ;;  %3825 = vmatprep.subr.bf16.mxu1 %v5223_v48  ;;  %v188_v47 = vld [vmem:[%s8107_s1 + $0x520] sm:$0xff]  ;;  %v185_v48 = vld [vmem:[%s8107_s1 + $0x508] sm:$0xff] }
  0x34   :  { %v5287_v58 = vcombine.high %v185_v48, %v189_v50  ;;  %v5284_v61 = vcombine.low %v184_v46, %v188_v47  ;;  %v5286_v62 = vcombine.low %v185_v48, %v189_v50  ;;  %v245_v48 = vld [vmem:[%s8107_s1 + $0x6e8] sm:$0xff]  ;;  %v5334_v50 = vcombine.low %v233_v37, %v237_v39 }
  0x35   :  { %v285_v29 = vld [vmem:[%s8107_s1 + $0x828] sm:$0xff] }
  0x36   :  { %3621 = vmatpush1.bf16.msra.mxu0 %v5220_v54  ;;  %3826 = vmatpush1.bf16.msra.mxu1 %v5222_v55  ;;  %v5285_v54 = vcombine.high %v184_v46, %v188_v47  ;;  %v192_v55 = vld [vmem:[%s8107_s1 + $0x540] sm:$0xff]  ;;  %v241_v46 = vld [vmem:[%s8107_s1 + $0x6c8] sm:$0xff]  ;;  %v5335_v47 = vcombine.high %v233_v37, %v237_v39  ;;  %v6474_v39 = vcombine.high %v6260_v23, %v6260_v23 }
  0x37   :  { %3622 = vmatprep.subr.bf16.mxu0 %v5229_v56  ;;  %3827 = vmatprep.subr.bf16.mxu1 %v5231_v57  ;;  %v196_v56 = vld [vmem:[%s8107_s1 + $0x560] sm:$0xff]  ;;  %v193_v57 = vld [vmem:[%s8107_s1 + $0x548] sm:$0xff] }
  0x38   :  { %v5295_v4 = vcombine.high %v193_v57, %v197_v60  ;;  %v5292_v6 = vcombine.low %v192_v55, %v196_v56  ;;  %v5294_v7 = vcombine.low %v193_v57, %v197_v60  ;;  %v253_v57 = vld [vmem:[%s8107_s1 + $0x728] sm:$0xff]  ;;  %v5342_v60 = vcombine.low %v241_v46, %v245_v48 }
  0x39   :  { %v289_v37 = vld [vmem:[%s8107_s1 + $0x848] sm:$0xff] }
  0x3a   :  { %3623 = vmatpush1.bf16.msra.mxu0 %v5228_v0  ;;  %3828 = vmatpush1.bf16.msra.mxu1 %v5230_v1  ;;  %v5293_v0 = vcombine.high %v192_v55, %v196_v56  ;;  %v200_v1 = vld [vmem:[%s8107_s1 + $0x580] sm:$0xff]  ;;  %v249_v55 = vld [vmem:[%s8107_s1 + $0x708] sm:$0xff]  ;;  %v5343_v56 = vcombine.high %v241_v46, %v245_v48 }
  0x3b   :  { %3624 = vmatprep.subr.bf16.mxu0 %v5237_v2  ;;  %3829 = vmatprep.subr.bf16.mxu1 %v5239_v3  ;;  %v204_v2 = vld [vmem:[%s8107_s1 + $0x5a0] sm:$0xff]  ;;  %v201_v3 = vld [vmem:[%s8107_s1 + $0x588] sm:$0xff] }
  0x3c   :  { %v5303_v13 = vcombine.high %v201_v3, %v205_v5  ;;  %v5300_v15 = vcombine.low %v200_v1, %v204_v2  ;;  %v5302_v16 = vcombine.low %v201_v3, %v205_v5  ;;  %v261_v3 = vld [vmem:[%s8107_s1 + $0x768] sm:$0xff]  ;;  %v5350_v5 = vcombine.low %v249_v55, %v253_v57 }
  0x3e   :  { %3625 = vmatpush1.bf16.msra.mxu0 %v5236_v8  ;;  %3830 = vmatpush1.bf16.msra.mxu1 %v5238_v10  ;;  %v5301_v8 = vcombine.high %v200_v1, %v204_v2  ;;  %v208_v10 = vld [vmem:[%s8107_s1 + $0x5c0] sm:$0xff]  ;;  %v257_v1 = vld [vmem:[%s8107_s1 + $0x748] sm:$0xff]  ;;  %v5351_v2 = vcombine.high %v249_v55, %v253_v57 }
  0x3f   :  { %3626 = vmatprep.subr.bf16.mxu0 %v5245_v11  ;;  %3831 = vmatprep.subr.bf16.mxu1 %v5247_v12  ;;  %v212_v11 = vld [vmem:[%s8107_s1 + $0x5e0] sm:$0xff]  ;;  %v209_v12 = vld [vmem:[%s8107_s1 + $0x5c8] sm:$0xff] }
  0x40   :  { %v5311_v21 = vcombine.high %v209_v12, %v213_v14  ;;  %v5308_v24 = vcombine.low %v208_v10, %v212_v11  ;;  %v5310_v25 = vcombine.low %v209_v12, %v213_v14  ;;  %v269_v12 = vld [vmem:[%s8107_s1 + $0x7a8] sm:$0xff]  ;;  %v5358_v14 = vcombine.low %v257_v1, %v261_v3 }
  0x42   :  { %3627 = vmatpush1.bf16.msra.mxu0 %v5244_v17  ;;  %3832 = vmatpush1.bf16.msra.mxu1 %v5246_v18  ;;  %v5309_v17 = vcombine.high %v208_v10, %v212_v11  ;;  %v216_v18 = vld [vmem:[%s8107_s1 + $0x600] sm:$0xff]  ;;  %v265_v10 = vld [vmem:[%s8107_s1 + $0x788] sm:$0xff]  ;;  %v5359_v11 = vcombine.high %v257_v1, %v261_v3 }
  0x43   :  { %3637 = vmatprep.subr.bf16.mxu0 %v5253_v19  ;;  %3842 = vmatprep.subr.bf16.mxu1 %v5255_v20  ;;  %v220_v19 = vld [vmem:[%s8107_s1 + $0x620] sm:$0xff]  ;;  %v217_v20 = vld [vmem:[%s8107_s1 + $0x608] sm:$0xff] }
  0x44   :  { %v5319_v63 = vcombine.high %v217_v20, %v221_v22  ;;  %v5318_v32 = vcombine.low %v217_v20, %v221_v22  ;;  %v277_v20 = vld [vmem:[%s8107_s1 + $0x7e8] sm:$0xff] }
  0x45   :  { %3629 = vmatmul.mubr.bf16.vlgmr.msra.gmra.mrb[0].mxu0 %v6260_v23  ;;  %3834 = vmatmul.mubr.bf16.vlgmr.msra.gmra.mrb[0].mxu1 %v6260_v23 }
  0x46   :  { %3638 = vmatpush1.bf16.msra.mxu0 %v5252_v26  ;;  %3843 = vmatpush1.bf16.msra.mxu1 %v5254_v27  ;;  %v5317_v26 = vcombine.high %v216_v18, %v220_v19  ;;  %v224_v27 = vld [vmem:[%s8107_s1 + $0x640] sm:$0xff] }
  0x47   :  { %3639 = vmatprep.subr.bf16.mxu0 %v5261_v28  ;;  %3844 = vmatprep.subr.bf16.mxu1 %v5263_v31  ;;  %v228_v28 = vld [vmem:[%s8107_s1 + $0x660] sm:$0xff]  ;;  %v5316_v31 = vcombine.low %v216_v18, %v220_v19  ;;  %v273_v18 = vld [vmem:[%s8107_s1 + $0x7c8] sm:$0xff]  ;;  %v5367_v19 = vcombine.high %v265_v10, %v269_v12 }
  0x48   :  { %3669 = vmatprep.mubr.bf16.mxu0 %v6282_v33  ;;  %3874 = vmatprep.mubr.bf16.mxu1 %v6282_v33 }
  0x4a   :  { %3640 = vmatpush1.bf16.msra.mxu0 %v5260_v34  ;;  %3845 = vmatpush1.bf16.msra.mxu1 %v5262_v35  ;;  %v5325_v34 = vcombine.high %v224_v27, %v228_v28  ;;  %v232_v35 = vld [vmem:[%s8107_s1 + $0x680] sm:$0xff] }
  0x4b   :  { %3641 = vmatprep.subr.bf16.mxu0 %v5269_v36  ;;  %3846 = vmatprep.subr.bf16.mxu1 %v5271_v40  ;;  %v236_v36 = vld [vmem:[%s8107_s1 + $0x6a0] sm:$0xff]  ;;  %v5324_v40 = vcombine.low %v224_v27, %v228_v28  ;;  %v281_v28 = vld [vmem:[%s8107_s1 + $0x808] sm:$0xff] }
  0x4c   :  { %v284_v27 = vld [vmem:[%s8107_s1 + $0x820] sm:$0xff] }
  0x4e   :  { %3642 = vmatpush1.bf16.msra.mxu0 %v5268_v42  ;;  %3847 = vmatpush1.bf16.msra.mxu1 %v5270_v44  ;;  %v5333_v42 = vcombine.high %v232_v35, %v236_v36  ;;  %v240_v44 = vld [vmem:[%s8107_s1 + $0x6c0] sm:$0xff] }
  0x4f   :  { %3643 = vmatprep.subr.bf16.mxu0 %v5277_v45  ;;  %3848 = vmatprep.subr.bf16.mxu1 %v5279_v49  ;;  %v244_v45 = vld [vmem:[%s8107_s1 + $0x6e0] sm:$0xff]  ;;  %v5332_v49 = vcombine.low %v232_v35, %v236_v36  ;;  %v5383_v36 = vcombine.high %v281_v28, %v285_v29 }
  0x50   :  { %v292_v35 = vld [vmem:[%s8107_s1 + $0x860] sm:$0xff] }
  0x52   :  { %3644 = vmatpush1.bf16.msra.mxu0 %v5276_v51  ;;  %3849 = vmatpush1.bf16.msra.mxu1 %v5278_v52  ;;  %v5341_v51 = vcombine.high %v240_v44, %v244_v45  ;;  %v248_v52 = vld [vmem:[%s8107_s1 + $0x700] sm:$0xff] }
  0x53   :  { %3645 = vmatprep.subr.bf16.mxu0 %v5285_v54  ;;  %3850 = vmatprep.subr.bf16.mxu1 %v5287_v58  ;;  %v252_v54 = vld [vmem:[%s8107_s1 + $0x720] sm:$0xff]  ;;  %v5340_v58 = vcombine.low %v240_v44, %v244_v45 }
  0x56   :  { %3646 = vmatpush1.bf16.msra.mxu0 %v5284_v61  ;;  %3851 = vmatpush1.bf16.msra.mxu1 %v5286_v62  ;;  %v5349_v61 = vcombine.high %v248_v52, %v252_v54  ;;  %v256_v62 = vld [vmem:[%s8107_s1 + $0x740] sm:$0xff] }
  0x57   :  { %3647 = vmatprep.subr.bf16.mxu0 %v5293_v0  ;;  %3852 = vmatprep.subr.bf16.mxu1 %v5295_v4  ;;  %v260_v0 = vld [vmem:[%s8107_s1 + $0x760] sm:$0xff]  ;;  %v5348_v4 = vcombine.low %v248_v52, %v252_v54 }
  0x5a   :  { %3648 = vmatpush1.bf16.msra.mxu0 %v5292_v6  ;;  %3853 = vmatpush1.bf16.msra.mxu1 %v5294_v7  ;;  %v5357_v6 = vcombine.high %v256_v62, %v260_v0  ;;  %v264_v7 = vld [vmem:[%s8107_s1 + $0x780] sm:$0xff] }
  0x5b   :  { %3649 = vmatprep.subr.bf16.mxu0 %v5301_v8  ;;  %3854 = vmatprep.subr.bf16.mxu1 %v5303_v13  ;;  %v268_v8 = vld [vmem:[%s8107_s1 + $0x7a0] sm:$0xff]  ;;  %v5356_v13 = vcombine.low %v256_v62, %v260_v0 }
  0x5c   :  { %v5364_v22 = vcombine.low %v264_v7, %v268_v8 }
  0x5e   :  { %3650 = vmatpush1.bf16.msra.mxu0 %v5300_v15  ;;  %3855 = vmatpush1.bf16.msra.mxu1 %v5302_v16  ;;  %v5365_v15 = vcombine.high %v264_v7, %v268_v8  ;;  %v272_v16 = vld [vmem:[%s8107_s1 + $0x7c0] sm:$0xff] }
  0x5f   :  { %3651 = vmatprep.subr.bf16.mxu0 %v5309_v17  ;;  %3856 = vmatprep.subr.bf16.mxu1 %v5311_v21  ;;  %v276_v17 = vld [vmem:[%s8107_s1 + $0x7e0] sm:$0xff]  ;;  %v644_v21 = vcombine.high %v6119_v59, %v6119_v59  ;;  %v5375_v59 = vcombine.high %v273_v18, %v277_v20 }
  0x60   :  { %v5372_v30 = vcombine.low %v272_v16, %v276_v17 }
  0x62   :  { %3652 = vmatpush1.bf16.msra.mxu0 %v5308_v24  ;;  %3857 = vmatpush1.bf16.msra.mxu1 %v5310_v25  ;;  %v5366_v24 = vcombine.low %v265_v10, %v269_v12  ;;  %v5373_v25 = vcombine.high %v272_v16, %v276_v17 }
  0x63   :  { %3653 = vmatprep.subr.bf16.mxu0 %v5317_v26  ;;  %3858 = vmatprep.subr.bf16.mxu1 %v5319_v63  ;;  %v280_v26 = vld [vmem:[%s8107_s1 + $0x800] sm:$0xff]  ;;  %v6459_v63 = vrot.slane %v644_v21, %v6108_v53 }
  0x66   :  { %3654 = vmatpush1.bf16.msra.mxu0 %v5316_v31  ;;  %3859 = vmatpush1.bf16.msra.mxu1 %v5318_v32  ;;  %v5374_v31 = vcombine.low %v273_v18, %v277_v20  ;;  %v5381_v32 = vcombine.high %v280_v26, %v284_v27 }
  0x67   :  { %3655 = vmatprep.subr.bf16.mxu0 %v5325_v34  ;;  %3860 = vmatprep.subr.bf16.mxu1 %v5327_v38  ;;  %v288_v34 = vld [vmem:[%s8107_s1 + $0x840] sm:$0xff]  ;;  %v660_v38 = vcombine.high %v6459_v63, %v6459_v63 }
  0x6a   :  { %3656 = vmatpush1.bf16.msra.mxu0 %v5324_v40  ;;  %3861 = vmatpush1.bf16.msra.mxu1 %v5326_v41  ;;  %v293_v40 = vld [vmem:[%s8107_s1 + $0x868] sm:$0xff] }
  0x6b   :  { %3657 = vmatprep.subr.bf16.mxu0 %v5333_v42  ;;  %3862 = vmatprep.subr.bf16.mxu1 %v5335_v47 }
  0x6e   :  { %3658 = vmatpush1.bf16.msra.mxu0 %v5332_v49  ;;  %3863 = vmatpush1.bf16.msra.mxu1 %v5334_v50 }
  0x6f   :  { %3659 = vmatprep.subr.bf16.mxu0 %v5341_v51  ;;  %3864 = vmatprep.subr.bf16.mxu1 %v5343_v56 }
  0x72   :  { %3660 = vmatpush1.bf16.msra.mxu0 %v5340_v58  ;;  %3865 = vmatpush1.bf16.msra.mxu1 %v5342_v60 }
  0x73   :  { %3661 = vmatprep.subr.bf16.mxu0 %v5349_v61  ;;  %3866 = vmatprep.subr.bf16.mxu1 %v5351_v2 }
  0x76   :  { %3662 = vmatpush1.bf16.msra.mxu0 %v5348_v4  ;;  %3867 = vmatpush1.bf16.msra.mxu1 %v5350_v5 }
  0x77   :  { %3663 = vmatprep.subr.bf16.mxu0 %v5357_v6  ;;  %3868 = vmatprep.subr.bf16.mxu1 %v5359_v11 }
  0x7a   :  { %3664 = vmatpush1.bf16.msra.mxu0 %v5356_v13  ;;  %3869 = vmatpush1.bf16.msra.mxu1 %v5358_v14 }
  0x7b   :  { %3665 = vmatprep.subr.bf16.mxu0 %v5365_v15  ;;  %3870 = vmatprep.subr.bf16.mxu1 %v5367_v19 }
  0x7e   :  { %3666 = vmatpush1.bf16.msra.mxu0 %v5364_v22  ;;  %3871 = vmatpush1.bf16.msra.mxu1 %v5366_v24 }
  0x7f   :  { %3667 = vmatprep.subr.bf16.mxu0 %v5373_v25  ;;  %3872 = vmatprep.subr.bf16.mxu1 %v5375_v59 }
  0x80   :  { %10 = vsyncpa [#allocation3], 0  ;;  %v5380_v41 = vcombine.low %v280_v26, %v284_v27  ;;  %v5382_v42 = vcombine.low %v281_v28, %v285_v29  ;;  %v5389_v44 = vcombine.high %v288_v34, %v292_v35  ;;  %v5391_v45 = vcombine.high %v289_v37, %v293_v40  ;;  %v296_v46 = vld [vmem:[%s8107_s1 + $0x880] sm:$0xff]  ;;  %v297_v49 = vld [vmem:[%s8107_s1 + $0x888] sm:$0xff]  ;;  %s5996_s16 = smov [#allocation2]  }
  0x81   :  { %v300_v47 = vld [vmem:[%s8107_s1 + $0x8a0] sm:$0xff]  ;;  %v6486_v48 = vrot.slane %v660_v38, %v6108_v53  ;;  %v301_v50 = vld [vmem:[%s8107_s1 + $0x8a8] sm:$0xff]  ;;  %v5388_v51 = vcombine.low %v288_v34, %v292_v35  ;;  %v5390_v52 = vcombine.low %v289_v37, %v293_v40  ;;  %vm4943_vm0 = vcmask 1043456  }
  0x82   :  { %3668 = vmatpush1.bf16.msra.mxu0 %v5372_v30  ;;  %3873 = vmatpush1.bf16.msra.mxu1 %v5374_v31  ;;  %v5397_v54 = vcombine.high %v296_v46, %v300_v47  ;;  %v5399_v55 = vcombine.high %v297_v49, %v301_v50  ;;  %v304_v56 = vld [vmem:[%s8107_s1 + $0x8c0] sm:$0xff]  ;;  %v305_v58 = vld [vmem:[%s8107_s1 + $0x8c8] sm:$0xff]  ;;  %v5396_v61 = vcombine.low %v296_v46, %v300_v47  ;;  %vm4939_vm1 = vcmask 850944  }
  0x83   :  { %3678 = vmatprep.subr.bf16.mxu0 %v5381_v32  ;;  %3883 = vmatprep.subr.bf16.mxu1 %v5383_v36  ;;  %v308_v57 = vld [vmem:[%s8107_s1 + $0x8e0] sm:$0xff]  ;;  %v309_v60 = vld [vmem:[%s8107_s1 + $0x8e8] sm:$0xff]  ;;  %v5398_v62 = vcombine.low %v297_v49, %v301_v50  ;;  %vm5107_vm2 = vcmask 402432  }
  0x84   :  { %v5405_v0 = vcombine.high %v304_v56, %v308_v57  ;;  %v5407_v1 = vcombine.high %v305_v58, %v309_v60  ;;  %v312_v2 = vld [vmem:[%s8107_s1 + $0x900] sm:$0xff]  ;;  %v313_v4 = vld [vmem:[%s8107_s1 + $0x908] sm:$0xff]  ;;  %v5404_v6 = vcombine.low %v304_v56, %v308_v57  ;;  %v5406_v7 = vcombine.low %v305_v58, %v309_v60 }
  0x85   :  { %3670 = vmatmul.mubr.bf16.vlgmr.msra.gmra.mrb[0].mxu0 %v6474_v39  ;;  %3875 = vmatmul.mubr.bf16.vlgmr.msra.gmra.mrb[0].mxu1 %v6474_v39  ;;  %v316_v3 = vld [vmem:[%s8107_s1 + $0x920] sm:$0xff]  ;;  %v317_v5 = vld [vmem:[%s8107_s1 + $0x928] sm:$0xff] }
  0x86   :  { %3679 = vmatpush1.bf16.msra.mxu0 %v5380_v41  ;;  %3884 = vmatpush1.bf16.msra.mxu1 %v5382_v42  ;;  %v5413_v8 = vcombine.high %v312_v2, %v316_v3  ;;  %v5415_v10 = vcombine.high %v313_v4, %v317_v5  ;;  %v320_v11 = vld [vmem:[%s8107_s1 + $0x940] sm:$0xff]  ;;  %v321_v13 = vld [vmem:[%s8107_s1 + $0x948] sm:$0xff]  ;;  %v5412_v15 = vcombine.low %v312_v2, %v316_v3 }
  0x87   :  { %3680 = vmatprep.subr.bf16.mxu0 %v5389_v44  ;;  %3885 = vmatprep.subr.bf16.mxu1 %v5391_v45  ;;  %v324_v12 = vld [vmem:[%s8107_s1 + $0x960] sm:$0xff]  ;;  %v325_v14 = vld [vmem:[%s8107_s1 + $0x968] sm:$0xff]  ;;  %v5414_v16 = vcombine.low %v313_v4, %v317_v5 }
  0x88   :  { %3710 = vmatprep.mubr.bf16.mxu0 %v6486_v48  ;;  %3915 = vmatprep.mubr.bf16.mxu1 %v6486_v48  ;;  %v5421_v17 = vcombine.high %v320_v11, %v324_v12  ;;  %v5423_v18 = vcombine.high %v321_v13, %v325_v14  ;;  %v328_v19 = vld [vmem:[%s8107_s1 + $0x980] sm:$0xff]  ;;  %v329_v21 = vld [vmem:[%s8107_s1 + $0x988] sm:$0xff]  ;;  %v5420_v24 = vcombine.low %v320_v11, %v324_v12 }
  0x89   :  { %v332_v20 = vld [vmem:[%s8107_s1 + $0x9a0] sm:$0xff]  ;;  %v333_v22 = vld [vmem:[%s8107_s1 + $0x9a8] sm:$0xff]  ;;  %v5422_v25 = vcombine.low %v321_v13, %v325_v14 }
  0x8a   :  { %3681 = vmatpush1.bf16.msra.mxu0 %v5388_v51  ;;  %3886 = vmatpush1.bf16.msra.mxu1 %v5390_v52  ;;  %v5429_v26 = vcombine.high %v328_v19, %v332_v20  ;;  %v5431_v27 = vcombine.high %v329_v21, %v333_v22  ;;  %v336_v28 = vld [vmem:[%s8107_s1 + $0x9c0] sm:$0xff]  ;;  %v337_v29 = vld [vmem:[%s8107_s1 + $0x9c8] sm:$0xff]  ;;  %v5428_v31 = vcombine.low %v328_v19, %v332_v20 }
  0x8b   :  { %3682 = vmatprep.subr.bf16.mxu0 %v5397_v54  ;;  %3887 = vmatprep.subr.bf16.mxu1 %v5399_v55  ;;  %v340_v59 = vld [vmem:[%s8107_s1 + $0x9e0] sm:$0xff]  ;;  %v341_v30 = vld [vmem:[%s8107_s1 + $0x9e8] sm:$0xff]  ;;  %v5430_v32 = vcombine.low %v329_v21, %v333_v22 }
  0x8c   :  { %v5437_v34 = vcombine.high %v336_v28, %v340_v59  ;;  %v5439_v35 = vcombine.high %v337_v29, %v341_v30  ;;  %v344_v36 = vld [vmem:[%s8107_s1 + $0xa00] sm:$0xff]  ;;  %v345_v38 = vld [vmem:[%s8107_s1 + $0xa08] sm:$0xff]  ;;  %v5436_v41 = vcombine.low %v336_v28, %v340_v59  ;;  %v5438_v42 = vcombine.low %v337_v29, %v341_v30 }
  0x8d   :  { %v348_v37 = vld [vmem:[%s8107_s1 + $0xa20] sm:$0xff]  ;;  %v349_v40 = vld [vmem:[%s8107_s1 + $0xa28] sm:$0xff] }
  0x8e   :  { %3683 = vmatpush1.bf16.msra.mxu0 %v5396_v61  ;;  %3888 = vmatpush1.bf16.msra.mxu1 %v5398_v62  ;;  %v5445_v44 = vcombine.high %v344_v36, %v348_v37  ;;  %v5447_v45 = vcombine.high %v345_v38, %v349_v40  ;;  %v352_v46 = vld [vmem:[%s8107_s1 + $0xa40] sm:$0xff]  ;;  %v353_v49 = vld [vmem:[%s8107_s1 + $0xa48] sm:$0xff]  ;;  %v5444_v51 = vcombine.low %v344_v36, %v348_v37 }
  0x8f   :  { %3684 = vmatprep.subr.bf16.mxu0 %v5405_v0  ;;  %3889 = vmatprep.subr.bf16.mxu1 %v5407_v1  ;;  %v356_v47 = vld [vmem:[%s8107_s1 + $0xa60] sm:$0xff]  ;;  %v357_v50 = vld [vmem:[%s8107_s1 + $0xa68] sm:$0xff]  ;;  %v5446_v52 = vcombine.low %v345_v38, %v349_v40 }
  0x90   :  { %v5453_v54 = vcombine.high %v352_v46, %v356_v47  ;;  %v5455_v55 = vcombine.high %v353_v49, %v357_v50  ;;  %v360_v56 = vld [vmem:[%s8107_s1 + $0xa80] sm:$0xff]  ;;  %v361_v58 = vld [vmem:[%s8107_s1 + $0xa88] sm:$0xff]  ;;  %v5452_v61 = vcombine.low %v352_v46, %v356_v47  ;;  %v5454_v62 = vcombine.low %v353_v49, %v357_v50 }
  0x91   :  { %v364_v57 = vld [vmem:[%s8107_s1 + $0xaa0] sm:$0xff]  ;;  %v365_v60 = vld [vmem:[%s8107_s1 + $0xaa8] sm:$0xff] }
  0x92   :  { %3685 = vmatpush1.bf16.msra.mxu0 %v5404_v6  ;;  %3890 = vmatpush1.bf16.msra.mxu1 %v5406_v7  ;;  %v5461_v0 = vcombine.high %v360_v56, %v364_v57  ;;  %v5463_v1 = vcombine.high %v361_v58, %v365_v60  ;;  %v368_v2 = vld [vmem:[%s8107_s1 + $0xac0] sm:$0xff]  ;;  %v369_v4 = vld [vmem:[%s8107_s1 + $0xac8] sm:$0xff]  ;;  %v5460_v6 = vcombine.low %v360_v56, %v364_v57 }
  0x93   :  { %3686 = vmatprep.subr.bf16.mxu0 %v5413_v8  ;;  %3891 = vmatprep.subr.bf16.mxu1 %v5415_v10  ;;  %v372_v3 = vld [vmem:[%s8107_s1 + $0xae0] sm:$0xff]  ;;  %v373_v5 = vld [vmem:[%s8107_s1 + $0xae8] sm:$0xff]  ;;  %v5462_v7 = vcombine.low %v361_v58, %v365_v60  ;;  %v6674_v58 = vrot.slane %v6459_v63, %v6108_v53 }
  0x94   :  { %v5469_v8 = vcombine.high %v368_v2, %v372_v3  ;;  %v5471_v10 = vcombine.high %v369_v4, %v373_v5  ;;  %v376_v11 = vld [vmem:[%s8107_s1 + $0xb00] sm:$0xff]  ;;  %v377_v13 = vld [vmem:[%s8107_s1 + $0xb08] sm:$0xff] }
  0x95   :  { %v380_v12 = vld [vmem:[%s8107_s1 + $0xb20] sm:$0xff]  ;;  %v381_v14 = vld [vmem:[%s8107_s1 + $0xb28] sm:$0xff] }
  0x96   :  { %3687 = vmatpush1.bf16.msra.mxu0 %v5412_v15  ;;  %3892 = vmatpush1.bf16.msra.mxu1 %v5414_v16  ;;  %v5468_v15 = vcombine.low %v368_v2, %v372_v3  ;;  %v5470_v16 = vcombine.low %v369_v4, %v373_v5  ;;  %v384_v19 = vld [vmem:[%s8107_s1 + $0xb40] sm:$0xff]  ;;  %v385_v21 = vld [vmem:[%s8107_s1 + $0xb48] sm:$0xff]  ;;  %v6690_v4 = vcombine.high %v6486_v48, %v6486_v48 }
  0x97   :  { %3688 = vmatprep.subr.bf16.mxu0 %v5421_v17  ;;  %3893 = vmatprep.subr.bf16.mxu1 %v5423_v18  ;;  %v5477_v17 = vcombine.high %v376_v11, %v380_v12  ;;  %v5479_v18 = vcombine.high %v377_v13, %v381_v14  ;;  %v388_v20 = vld [vmem:[%s8107_s1 + $0xb60] sm:$0xff]  ;;  %v389_v22 = vld [vmem:[%s8107_s1 + $0xb68] sm:$0xff] }
  0x98   :  { %v392_v28 = vld [vmem:[%s8107_s1 + $0xb80] sm:$0xff]  ;;  %v393_v29 = vld [vmem:[%s8107_s1 + $0xb88] sm:$0xff] }
  0x99   :  { %v396_v59 = vld [vmem:[%s8107_s1 + $0xba0] sm:$0xff]  ;;  %v397_v30 = vld [vmem:[%s8107_s1 + $0xba8] sm:$0xff] }
  0x9a   :  { %3689 = vmatpush1.bf16.msra.mxu0 %v5420_v24  ;;  %3894 = vmatpush1.bf16.msra.mxu1 %v5422_v25  ;;  %v5476_v24 = vcombine.low %v376_v11, %v380_v12  ;;  %v5478_v25 = vcombine.low %v377_v13, %v381_v14  ;;  %v400_v36 = vld [vmem:[%s8107_s1 + $0xbc0] sm:$0xff]  ;;  %v401_v38 = vld [vmem:[%s8107_s1 + $0xbc8] sm:$0xff] }
  0x9b   :  { %3690 = vmatprep.subr.bf16.mxu0 %v5429_v26  ;;  %3895 = vmatprep.subr.bf16.mxu1 %v5431_v27  ;;  %v5485_v26 = vcombine.high %v384_v19, %v388_v20  ;;  %v5487_v27 = vcombine.high %v385_v21, %v389_v22  ;;  %v404_v37 = vld [vmem:[%s8107_s1 + $0xbe0] sm:$0xff]  ;;  %v405_v40 = vld [vmem:[%s8107_s1 + $0xbe8] sm:$0xff] }
  0x9c   :  { %v408_v46 = vld [vmem:[%s8107_s1 + $0xc00] sm:$0xff]  ;;  %v409_v49 = vld [vmem:[%s8107_s1 + $0xc08] sm:$0xff] }
  0x9d   :  { %v412_v47 = vld [vmem:[%s8107_s1 + $0xc20] sm:$0xff]  ;;  %v413_v50 = vld [vmem:[%s8107_s1 + $0xc28] sm:$0xff] }
  0x9e   :  { %3691 = vmatpush1.bf16.msra.mxu0 %v5428_v31  ;;  %3896 = vmatpush1.bf16.msra.mxu1 %v5430_v32  ;;  %v5484_v31 = vcombine.low %v384_v19, %v388_v20  ;;  %v5486_v32 = vcombine.low %v385_v21, %v389_v22  ;;  %v416_v56 = vld [vmem:[%s8107_s1 + $0xc40] sm:$0xff]  ;;  %v417_v60 = vld [vmem:[%s8107_s1 + $0xc48] sm:$0xff] }
  0x9f   :  { %3692 = vmatprep.subr.bf16.mxu0 %v5437_v34  ;;  %3897 = vmatprep.subr.bf16.mxu1 %v5439_v35  ;;  %v5493_v34 = vcombine.high %v392_v28, %v396_v59  ;;  %v5495_v35 = vcombine.high %v393_v29, %v397_v30  ;;  %v420_v57 = vld [vmem:[%s8107_s1 + $0xc60] sm:$0xff]  ;;  %v425_v5 = vld [vmem:[%s8107_s1 + $0xc88] sm:$0xff] }
  0xa0   :  { %v424_v63 = vld [vmem:[%s8107_s1 + $0xc80] sm:$0xff]  ;;  %v433_v14 = vld [vmem:[%s8107_s1 + $0xcc8] sm:$0xff] }
  0xa1   :  { %v428_v3 = vld [vmem:[%s8107_s1 + $0xca0] sm:$0xff]  ;;  %v441_v22 = vld [vmem:[%s8107_s1 + $0xd08] sm:$0xff] }
  0xa2   :  { %3693 = vmatpush1.bf16.msra.mxu0 %v5436_v41  ;;  %3898 = vmatpush1.bf16.msra.mxu1 %v5438_v42  ;;  %v5492_v41 = vcombine.low %v392_v28, %v396_v59  ;;  %v5494_v42 = vcombine.low %v393_v29, %v397_v30  ;;  %v432_v12 = vld [vmem:[%s8107_s1 + $0xcc0] sm:$0xff]  ;;  %v449_v30 = vld [vmem:[%s8107_s1 + $0xd48] sm:$0xff] }
  0xa3   :  { %3694 = vmatprep.subr.bf16.mxu0 %v5445_v44  ;;  %3899 = vmatprep.subr.bf16.mxu1 %v5447_v45  ;;  %v5501_v44 = vcombine.high %v400_v36, %v404_v37  ;;  %v5503_v45 = vcombine.high %v401_v38, %v405_v40  ;;  %v436_v13 = vld [vmem:[%s8107_s1 + $0xce0] sm:$0xff] }
  0xa4   :  { %v440_v20 = vld [vmem:[%s8107_s1 + $0xd00] sm:$0xff] }
  0xa5   :  { %v444_v21 = vld [vmem:[%s8107_s1 + $0xd20] sm:$0xff] }
  0xa6   :  { %3695 = vmatpush1.bf16.msra.mxu0 %v5444_v51  ;;  %3900 = vmatpush1.bf16.msra.mxu1 %v5446_v52  ;;  %v5500_v51 = vcombine.low %v400_v36, %v404_v37  ;;  %v5502_v52 = vcombine.low %v401_v38, %v405_v40  ;;  %v448_v59 = vld [vmem:[%s8107_s1 + $0xd40] sm:$0xff]  ;;  %v457_v40 = vld [vmem:[%s8107_s1 + $0xd88] sm:$0xff] }
  0xa7   :  { %3696 = vmatprep.subr.bf16.mxu0 %v5453_v54  ;;  %3901 = vmatprep.subr.bf16.mxu1 %v5455_v55  ;;  %v5509_v54 = vcombine.high %v408_v46, %v412_v47  ;;  %v5511_v55 = vcombine.high %v409_v49, %v413_v50  ;;  %v452_v29 = vld [vmem:[%s8107_s1 + $0xd60] sm:$0xff] }
  0xa8   :  { %v456_v37 = vld [vmem:[%s8107_s1 + $0xd80] sm:$0xff] }
  0xa9   :  { %v460_v38 = vld [vmem:[%s8107_s1 + $0xda0] sm:$0xff] }
  0xaa   :  { %3697 = vmatpush1.bf16.msra.mxu0 %v5452_v61  ;;  %3902 = vmatpush1.bf16.msra.mxu1 %v5454_v62  ;;  %v421_v61 = vld [vmem:[%s8107_s1 + $0xc68] sm:$0xff]  ;;  %v5508_v62 = vcombine.low %v408_v46, %v412_v47  ;;  %v464_v47 = vld [vmem:[%s8107_s1 + $0xdc0] sm:$0xff] }
  0xab   :  { %3698 = vmatprep.subr.bf16.mxu0 %v5461_v0  ;;  %3903 = vmatprep.subr.bf16.mxu1 %v5463_v1  ;;  %v5510_v0 = vcombine.low %v409_v49, %v413_v50  ;;  %v5517_v1 = vcombine.high %v416_v56, %v420_v57  ;;  %v5519_v2 = vcombine.high %v417_v60, %v421_v61  ;;  %v468_v49 = vld [vmem:[%s8107_s1 + $0xde0] sm:$0xff]  ;;  %v465_v50 = vld [vmem:[%s8107_s1 + $0xdc8] sm:$0xff] }
  0xae   :  { %3699 = vmatpush1.bf16.msra.mxu0 %v5460_v6  ;;  %3904 = vmatpush1.bf16.msra.mxu1 %v5462_v7  ;;  %v429_v6 = vld [vmem:[%s8107_s1 + $0xca8] sm:$0xff]  ;;  %v5516_v7 = vcombine.low %v416_v56, %v420_v57  ;;  %v472_v57 = vld [vmem:[%s8107_s1 + $0xe00] sm:$0xff] }
  0xaf   :  { %3700 = vmatprep.subr.bf16.mxu0 %v5469_v8  ;;  %3905 = vmatprep.subr.bf16.mxu1 %v5471_v10  ;;  %v5518_v8 = vcombine.low %v417_v60, %v421_v61  ;;  %v5525_v10 = vcombine.high %v424_v63, %v428_v3  ;;  %v5527_v11 = vcombine.high %v425_v5, %v429_v6  ;;  %v476_v60 = vld [vmem:[%s8107_s1 + $0xe20] sm:$0xff]  ;;  %v473_v61 = vld [vmem:[%s8107_s1 + $0xe08] sm:$0xff] }
  0xb2   :  { %3701 = vmatpush1.bf16.msra.mxu0 %v5468_v15  ;;  %3906 = vmatpush1.bf16.msra.mxu1 %v5470_v16  ;;  %v437_v15 = vld [vmem:[%s8107_s1 + $0xce8] sm:$0xff]  ;;  %v5524_v16 = vcombine.low %v424_v63, %v428_v3  ;;  %v480_v3 = vld [vmem:[%s8107_s1 + $0xe40] sm:$0xff] }
  0xb3   :  { %3702 = vmatprep.subr.bf16.mxu0 %v5477_v17  ;;  %3907 = vmatprep.subr.bf16.mxu1 %v5479_v18  ;;  %v5526_v17 = vcombine.low %v425_v5, %v429_v6  ;;  %v5533_v18 = vcombine.high %v432_v12, %v436_v13  ;;  %v5535_v19 = vcombine.high %v433_v14, %v437_v15  ;;  %v484_v5 = vld [vmem:[%s8107_s1 + $0xe60] sm:$0xff]  ;;  %v481_v6 = vld [vmem:[%s8107_s1 + $0xe48] sm:$0xff] }
  0xb6   :  { %3703 = vmatpush1.bf16.msra.mxu0 %v5476_v24  ;;  %3908 = vmatpush1.bf16.msra.mxu1 %v5478_v25  ;;  %v445_v24 = vld [vmem:[%s8107_s1 + $0xd28] sm:$0xff]  ;;  %v5532_v25 = vcombine.low %v432_v12, %v436_v13  ;;  %v488_v13 = vld [vmem:[%s8107_s1 + $0xe80] sm:$0xff] }
  0xb7   :  { %3704 = vmatprep.subr.bf16.mxu0 %v5485_v26  ;;  %3909 = vmatprep.subr.bf16.mxu1 %v5487_v27  ;;  %v5534_v26 = vcombine.low %v433_v14, %v437_v15  ;;  %v5541_v27 = vcombine.high %v440_v20, %v444_v21  ;;  %v5543_v28 = vcombine.high %v441_v22, %v445_v24  ;;  %v492_v14 = vld [vmem:[%s8107_s1 + $0xea0] sm:$0xff]  ;;  %v489_v15 = vld [vmem:[%s8107_s1 + $0xe88] sm:$0xff] }
  0xba   :  { %3705 = vmatpush1.bf16.msra.mxu0 %v5484_v31  ;;  %3910 = vmatpush1.bf16.msra.mxu1 %v5486_v32  ;;  %v453_v31 = vld [vmem:[%s8107_s1 + $0xd68] sm:$0xff]  ;;  %v5540_v32 = vcombine.low %v440_v20, %v444_v21  ;;  %v496_v21 = vld [vmem:[%s8107_s1 + $0xec0] sm:$0xff] }
  0xbb   :  { %3706 = vmatprep.subr.bf16.mxu0 %v5493_v34  ;;  %3911 = vmatprep.subr.bf16.mxu1 %v5495_v35  ;;  %v5542_v34 = vcombine.low %v441_v22, %v445_v24  ;;  %v5549_v35 = vcombine.high %v448_v59, %v452_v29  ;;  %v5551_v36 = vcombine.high %v449_v30, %v453_v31  ;;  %v500_v22 = vld [vmem:[%s8107_s1 + $0xee0] sm:$0xff]  ;;  %v497_v24 = vld [vmem:[%s8107_s1 + $0xec8] sm:$0xff] }
  0xbe   :  { %3707 = vmatpush1.bf16.msra.mxu0 %v5492_v41  ;;  %3912 = vmatpush1.bf16.msra.mxu1 %v5494_v42  ;;  %v461_v41 = vld [vmem:[%s8107_s1 + $0xda8] sm:$0xff]  ;;  %v5548_v42 = vcombine.low %v448_v59, %v452_v29  ;;  %v504_v29 = vld [vmem:[%s8107_s1 + $0xf00] sm:$0xff] }
  0xbf   :  { %3708 = vmatprep.subr.bf16.mxu0 %v5501_v44  ;;  %3913 = vmatprep.subr.bf16.mxu1 %v5503_v45  ;;  %v5550_v44 = vcombine.low %v449_v30, %v453_v31  ;;  %v5557_v45 = vcombine.high %v456_v37, %v460_v38  ;;  %v5559_v46 = vcombine.high %v457_v40, %v461_v41  ;;  %v508_v30 = vld [vmem:[%s8107_s1 + $0xf20] sm:$0xff]  ;;  %v505_v31 = vld [vmem:[%s8107_s1 + $0xf08] sm:$0xff] }
  0xc2   :  { %3709 = vmatpush1.bf16.msra.mxu0 %v5500_v51  ;;  %3914 = vmatpush1.bf16.msra.mxu1 %v5502_v52  ;;  %v469_v51 = vld [vmem:[%s8107_s1 + $0xde8] sm:$0xff]  ;;  %v5556_v52 = vcombine.low %v456_v37, %v460_v38  ;;  %v512_v38 = vld [vmem:[%s8107_s1 + $0xf40] sm:$0xff] }
  0xc3   :  { %3719 = vmatprep.subr.bf16.mxu0 %v5509_v54  ;;  %3924 = vmatprep.subr.bf16.mxu1 %v5511_v55  ;;  %v5558_v54 = vcombine.low %v457_v40, %v461_v41  ;;  %v5565_v55 = vcombine.high %v464_v47, %v468_v49  ;;  %v5567_v56 = vcombine.high %v465_v50, %v469_v51  ;;  %v516_v40 = vld [vmem:[%s8107_s1 + $0xf60] sm:$0xff]  ;;  %v513_v41 = vld [vmem:[%s8107_s1 + $0xf48] sm:$0xff] }
  0xc5   :  { %3711 = vmatmul.mubr.bf16.vlgmr.msra.gmra.mrb[0].mxu0 %v6674_v58  ;;  %3916 = vmatmul.mubr.bf16.vlgmr.msra.gmra.mrb[0].mxu1 %v6674_v58 }
  0xc6   :  { %3720 = vmatpush1.bf16.msra.mxu0 %v5508_v62  ;;  %3925 = vmatpush1.bf16.msra.mxu1 %v5510_v0  ;;  %v477_v62 = vld [vmem:[%s8107_s1 + $0xe28] sm:$0xff]  ;;  %v5564_v0 = vcombine.low %v464_v47, %v468_v49  ;;  %v520_v49 = vld [vmem:[%s8107_s1 + $0xf80] sm:$0xff] }
  0xc7   :  { %3721 = vmatprep.subr.bf16.mxu0 %v5517_v1  ;;  %3926 = vmatprep.subr.bf16.mxu1 %v5519_v2  ;;  %v5566_v1 = vcombine.low %v465_v50, %v469_v51  ;;  %v5573_v2 = vcombine.high %v472_v57, %v476_v60  ;;  %v5575_v63 = vcombine.high %v473_v61, %v477_v62  ;;  %v524_v50 = vld [vmem:[%s8107_s1 + $0xfa0] sm:$0xff]  ;;  %v521_v51 = vld [vmem:[%s8107_s1 + $0xf88] sm:$0xff] }
  0xc8   :  { %3751 = vmatprep.mubr.bf16.mxu0 %v6690_v4  ;;  %3956 = vmatprep.mubr.bf16.mxu1 %v6690_v4 }
  0xca   :  { %3722 = vmatpush1.bf16.msra.mxu0 %v5516_v7  ;;  %3927 = vmatpush1.bf16.msra.mxu1 %v5518_v8  ;;  %v485_v7 = vld [vmem:[%s8107_s1 + $0xe68] sm:$0xff]  ;;  %v5572_v8 = vcombine.low %v472_v57, %v476_v60  ;;  %v528_v60 = vld [vmem:[%s8107_s1 + $0xfc0] sm:$0xff] }
  0xcb   :  { %3723 = vmatprep.subr.bf16.mxu0 %v5525_v10  ;;  %3928 = vmatprep.subr.bf16.mxu1 %v5527_v11  ;;  %v5574_v10 = vcombine.low %v473_v61, %v477_v62  ;;  %v5581_v11 = vcombine.high %v480_v3, %v484_v5  ;;  %v5583_v12 = vcombine.high %v481_v6, %v485_v7  ;;  %v532_v61 = vld [vmem:[%s8107_s1 + $0xfe0] sm:$0xff]  ;;  %v529_v62 = vld [vmem:[%s8107_s1 + $0xfc8] sm:$0xff] }
  0xce   :  { %3724 = vmatpush1.bf16.msra.mxu0 %v5524_v16  ;;  %3929 = vmatpush1.bf16.msra.mxu1 %v5526_v17  ;;  %v493_v16 = vld [vmem:[%s8107_s1 + $0xea8] sm:$0xff]  ;;  %v5580_v17 = vcombine.low %v480_v3, %v484_v5  ;;  %v536_v5 = vld [vmem:[%s8107_s1 + $0x1000] sm:$0xff] }
  0xcf   :  { %3725 = vmatprep.subr.bf16.mxu0 %v5533_v18  ;;  %3930 = vmatprep.subr.bf16.mxu1 %v5535_v19  ;;  %v5582_v18 = vcombine.low %v481_v6, %v485_v7  ;;  %v5589_v19 = vcombine.high %v488_v13, %v492_v14  ;;  %v5591_v20 = vcombine.high %v489_v15, %v493_v16  ;;  %v540_v6 = vld [vmem:[%s8107_s1 + $0x1020] sm:$0xff]  ;;  %v537_v7 = vld [vmem:[%s8107_s1 + $0x1008] sm:$0xff] }
  0xd2   :  { %3726 = vmatpush1.bf16.msra.mxu0 %v5532_v25  ;;  %3931 = vmatpush1.bf16.msra.mxu1 %v5534_v26  ;;  %v501_v25 = vld [vmem:[%s8107_s1 + $0xee8] sm:$0xff]  ;;  %v5588_v26 = vcombine.low %v488_v13, %v492_v14  ;;  %v544_v14 = vld [vmem:[%s8107_s1 + $0x1040] sm:$0xff] }
  0xd3   :  { %3727 = vmatprep.subr.bf16.mxu0 %v5541_v27  ;;  %3932 = vmatprep.subr.bf16.mxu1 %v5543_v28  ;;  %v5590_v27 = vcombine.low %v489_v15, %v493_v16  ;;  %v5597_v28 = vcombine.high %v496_v21, %v500_v22  ;;  %v5599_v59 = vcombine.high %v497_v24, %v501_v25  ;;  %v548_v15 = vld [vmem:[%s8107_s1 + $0x1060] sm:$0xff] }
  0xd4   :  { %v6878_v16 = vcombine.high %v6674_v58, %v6674_v58 }
  0xd6   :  { %3728 = vmatpush1.bf16.msra.mxu0 %v5540_v32  ;;  %3933 = vmatpush1.bf16.msra.mxu1 %v5542_v34  ;;  %v509_v32 = vld [vmem:[%s8107_s1 + $0xf28] sm:$0xff]  ;;  %v5596_v34 = vcombine.low %v496_v21, %v500_v22  ;;  %v5645_v21 = vcombine.high %v544_v14, %v548_v15 }
  0xd7   :  { %3729 = vmatprep.subr.bf16.mxu0 %v5549_v35  ;;  %3934 = vmatprep.subr.bf16.mxu1 %v5551_v36  ;;  %v5598_v35 = vcombine.low %v497_v24, %v501_v25  ;;  %v5605_v36 = vcombine.high %v504_v29, %v508_v30  ;;  %v5607_v37 = vcombine.high %v505_v31, %v509_v32  ;;  %v552_v24 = vld [vmem:[%s8107_s1 + $0x1080] sm:$0xff] }
  0xd8   :  { %v556_v25 = vld [vmem:[%s8107_s1 + $0x10a0] sm:$0xff] }
  0xda   :  { %3730 = vmatpush1.bf16.msra.mxu0 %v5548_v42  ;;  %3935 = vmatpush1.bf16.msra.mxu1 %v5550_v44  ;;  %v517_v42 = vld [vmem:[%s8107_s1 + $0xf68] sm:$0xff]  ;;  %v5604_v44 = vcombine.low %v504_v29, %v508_v30  ;;  %v5653_v29 = vcombine.high %v552_v24, %v556_v25 }
  0xdb   :  { %3731 = vmatprep.subr.bf16.mxu0 %v5557_v45  ;;  %3936 = vmatprep.subr.bf16.mxu1 %v5559_v46  ;;  %v5606_v45 = vcombine.low %v505_v31, %v509_v32  ;;  %v5613_v46 = vcombine.high %v512_v38, %v516_v40  ;;  %v5615_v47 = vcombine.high %v513_v41, %v517_v42  ;;  %v560_v31 = vld [vmem:[%s8107_s1 + $0x10c0] sm:$0xff] }
  0xdc   :  { %v564_v32 = vld [vmem:[%s8107_s1 + $0x10e0] sm:$0xff] }
  0xde   :  { %3732 = vmatpush1.bf16.msra.mxu0 %v5556_v52  ;;  %3937 = vmatpush1.bf16.msra.mxu1 %v5558_v54  ;;  %v525_v52 = vld [vmem:[%s8107_s1 + $0xfa8] sm:$0xff]  ;;  %v5612_v54 = vcombine.low %v512_v38, %v516_v40  ;;  %v5661_v40 = vcombine.high %v560_v31, %v564_v32 }
  0xdf   :  { %3733 = vmatprep.subr.bf16.mxu0 %v5565_v55  ;;  %3938 = vmatprep.subr.bf16.mxu1 %v5567_v56  ;;  %v5614_v55 = vcombine.low %v513_v41, %v517_v42  ;;  %v5621_v56 = vcombine.high %v520_v49, %v524_v50  ;;  %v5623_v57 = vcombine.high %v521_v51, %v525_v52  ;;  %v568_v42 = vld [vmem:[%s8107_s1 + $0x1100] sm:$0xff] }
  0xe2   :  { %3734 = vmatpush1.bf16.msra.mxu0 %v5564_v0  ;;  %3939 = vmatpush1.bf16.msra.mxu1 %v5566_v1  ;;  %v533_v0 = vld [vmem:[%s8107_s1 + $0xfe8] sm:$0xff]  ;;  %v5620_v1 = vcombine.low %v520_v49, %v524_v50 }
  0xe3   :  { %3735 = vmatprep.subr.bf16.mxu0 %v5573_v2  ;;  %3940 = vmatprep.subr.bf16.mxu1 %v5575_v63  ;;  %v5622_v2 = vcombine.low %v521_v51, %v525_v52  ;;  %v5629_v63 = vcombine.high %v528_v60, %v532_v61  ;;  %v5631_v3 = vcombine.high %v529_v62, %v533_v0  ;;  %v576_v52 = vld [vmem:[%s8107_s1 + $0x1140] sm:$0xff] }
  0xe6   :  { %3736 = vmatpush1.bf16.msra.mxu0 %v5572_v8  ;;  %3941 = vmatpush1.bf16.msra.mxu1 %v5574_v10  ;;  %v541_v8 = vld [vmem:[%s8107_s1 + $0x1028] sm:$0xff]  ;;  %v5628_v10 = vcombine.low %v528_v60, %v532_v61 }
  0xe7   :  { %3737 = vmatprep.subr.bf16.mxu0 %v5581_v11  ;;  %3942 = vmatprep.subr.bf16.mxu1 %v5583_v12  ;;  %v5630_v11 = vcombine.low %v529_v62, %v533_v0  ;;  %v5637_v12 = vcombine.high %v536_v5, %v540_v6  ;;  %v5639_v13 = vcombine.high %v537_v7, %v541_v8  ;;  %v584_v0 = vld [vmem:[%s8107_s1 + $0x1180] sm:$0xff] }
  0xea   :  { %3738 = vmatpush1.bf16.msra.mxu0 %v5580_v17  ;;  %3943 = vmatpush1.bf16.msra.mxu1 %v5582_v18  ;;  %v545_v17 = vld [vmem:[%s8107_s1 + $0x1048] sm:$0xff] }
  0xeb   :  { %3739 = vmatprep.subr.bf16.mxu0 %v5589_v19  ;;  %3944 = vmatprep.subr.bf16.mxu1 %v5591_v20  ;;  %v549_v18 = vld [vmem:[%s8107_s1 + $0x1068] sm:$0xff]  ;;  %v5636_v19 = vcombine.low %v536_v5, %v540_v6  ;;  %v5638_v20 = vcombine.low %v537_v7, %v541_v8  ;;  %v592_v8 = vld [vmem:[%s8107_s1 + $0x11c0] sm:$0xff] }
  0xec   :  { %v5647_v22 = vcombine.high %v545_v17, %v549_v18 }
  0xee   :  { %3740 = vmatpush1.bf16.msra.mxu0 %v5588_v26  ;;  %3945 = vmatpush1.bf16.msra.mxu1 %v5590_v27  ;;  %v553_v26 = vld [vmem:[%s8107_s1 + $0x1088] sm:$0xff] }
  0xef   :  { %3741 = vmatprep.subr.bf16.mxu0 %v5597_v28  ;;  %3946 = vmatprep.subr.bf16.mxu1 %v5599_v59  ;;  %v557_v27 = vld [vmem:[%s8107_s1 + $0x10a8] sm:$0xff]  ;;  %v5644_v28 = vcombine.low %v544_v14, %v548_v15  ;;  %v5646_v59 = vcombine.low %v545_v17, %v549_v18  ;;  %v26_v18 = vld [vmem:[%s8107_s1 + $0x10] sm:$0xff] }
  0xf0   :  { %v5655_v30 = vcombine.high %v553_v26, %v557_v27  ;;  %v5654_v38 = vcombine.low %v553_v26, %v557_v27 }
  0xf2   :  { %3742 = vmatpush1.bf16.msra.mxu0 %v5596_v34  ;;  %3947 = vmatpush1.bf16.msra.mxu1 %v5598_v35  ;;  %v5995_v34 = vmov 0   ;;  %v561_v35 = vld [vmem:[%s8107_s1 + $0x10c8] sm:$0xff] }
  0xf3   :  { %3743 = vmatprep.subr.bf16.mxu0 %v5605_v36  ;;  %3948 = vmatprep.subr.bf16.mxu1 %v5607_v37  ;;  %v565_v36 = vld [vmem:[%s8107_s1 + $0x10e8] sm:$0xff]  ;;  %v5652_v37 = vcombine.low %v552_v24, %v556_v25 }
  0xf4   :  { %v5663_v41 = vcombine.high %v561_v35, %v565_v36  ;;  %v5662_v49 = vcombine.low %v561_v35, %v565_v36  ;;  %v5123_v24 = vld.sshfl [vmem:[%s8106_s0 + $0x8] sm:$0x1 pattern:$0x75316420] }
  0xf6   :  { %3744 = vmatpush1.bf16.msra.mxu0 %v5604_v44  ;;  %3949 = vmatpush1.bf16.msra.mxu1 %v5606_v45  ;;  %v572_v44 = vld [vmem:[%s8107_s1 + $0x1120] sm:$0xff]  ;;  %v569_v45 = vld [vmem:[%s8107_s1 + $0x1108] sm:$0xff] }
  0xf7   :  { %3745 = vmatprep.subr.bf16.mxu0 %v5613_v46  ;;  %3950 = vmatprep.subr.bf16.mxu1 %v5615_v47  ;;  %v573_v46 = vld [vmem:[%s8107_s1 + $0x1128] sm:$0xff]  ;;  %v5660_v47 = vcombine.low %v560_v31, %v564_v32  ;;  %v5669_v50 = vcombine.high %v568_v42, %v572_v44  ;;  %v39_v31 = vld [vmem:[%s8107_s1 + $0x78] sm:$0xff] }
  0xf8   :  { %v5671_v51 = vcombine.high %v569_v45, %v573_v46  ;;  %v5670_v60 = vcombine.low %v569_v45, %v573_v46 }
  0xfa   :  { %3746 = vmatpush1.bf16.msra.mxu0 %v5612_v54  ;;  %3951 = vmatpush1.bf16.msra.mxu1 %v5614_v55  ;;  %v580_v54 = vld [vmem:[%s8107_s1 + $0x1160] sm:$0xff]  ;;  %v577_v55 = vld [vmem:[%s8107_s1 + $0x1148] sm:$0xff] }
  0xfb   :  { %3747 = vmatprep.subr.bf16.mxu0 %v5621_v56  ;;  %3952 = vmatprep.subr.bf16.mxu1 %v5623_v57  ;;  %v581_v56 = vld [vmem:[%s8107_s1 + $0x1168] sm:$0xff]  ;;  %v5668_v57 = vcombine.low %v568_v42, %v572_v44  ;;  %v5677_v61 = vcombine.high %v576_v52, %v580_v54 }
  0xfc   :  { %v5679_v62 = vcombine.high %v577_v55, %v581_v56  ;;  %v5678_v5 = vcombine.low %v577_v55, %v581_v56 }
  0xfe   :  { %3748 = vmatpush1.bf16.msra.mxu0 %v5620_v1  ;;  %3953 = vmatpush1.bf16.msra.mxu1 %v5622_v2  ;;  %v588_v1 = vld [vmem:[%s8107_s1 + $0x11a0] sm:$0xff]  ;;  %v585_v2 = vld [vmem:[%s8107_s1 + $0x1188] sm:$0xff] }
  0xff   :  { %3749 = vmatprep.subr.bf16.mxu0 %v5629_v63  ;;  %3954 = vmatprep.subr.bf16.mxu1 %v5631_v3  ;;  %v589_v63 = vld [vmem:[%s8107_s1 + $0x11a8] sm:$0xff]  ;;  %v5676_v3 = vcombine.low %v576_v52, %v580_v54  ;;  %v5685_v6 = vcombine.high %v584_v0, %v588_v1 }
 0x100   :  { %v5687_v7 = vcombine.high %v585_v2, %v589_v63  ;;  %v5686_v14 = vcombine.low %v585_v2, %v589_v63  ;;  %v66_v63 = vld [vmem:[%s8107_s1 + $0x150] sm:$0xff] }
 0x102   :  { %3750 = vmatpush1.bf16.msra.mxu0 %v5628_v10  ;;  %3955 = vmatpush1.bf16.msra.mxu1 %v5630_v11  ;;  %v596_v10 = vld [vmem:[%s8107_s1 + $0x11e0] sm:$0xff]  ;;  %v593_v11 = vld [vmem:[%s8107_s1 + $0x11c8] sm:$0xff] }
 0x103   :  { %3760 = vmatprep.subr.bf16.mxu0 %v5637_v12  ;;  %3965 = vmatprep.subr.bf16.mxu1 %v5639_v13  ;;  %v597_v12 = vld [vmem:[%s8107_s1 + $0x11e8] sm:$0xff]  ;;  %v5684_v13 = vcombine.low %v584_v0, %v588_v1  ;;  %v5693_v15 = vcombine.high %v592_v8, %v596_v10 }
 0x104   :  { %v5695_v17 = vcombine.high %v593_v11, %v597_v12  ;;  %v5694_v25 = vcombine.low %v593_v11, %v597_v12  ;;  %v74_v12 = vld [vmem:[%s8107_s1 + $0x190] sm:$0xff] }
 0x105   :  { %3752 = vmatmul.mubr.bf16.vlgmr.msra.gmra.mrb[0].mxu0 %v6878_v16  ;;  %3957 = vmatmul.mubr.bf16.vlgmr.msra.gmra.mrb[0].mxu1 %v6878_v16 }
 0x106   :  { %3761 = vmatpush1.bf16.msra.mxu0 %v5636_v19  ;;  %3966 = vmatpush1.bf16.msra.mxu1 %v5638_v20  ;;  %v30_v19 = vld [vmem:[%s8107_s1 + $0x30] sm:$0xff]  ;;  %v27_v20 = vld [vmem:[%s8107_s1 + $0x18] sm:$0xff] }
 0x107   :  { %3762 = vmatprep.subr.bf16.mxu0 %v5645_v21  ;;  %3967 = vmatprep.subr.bf16.mxu1 %v5647_v22  ;;  %v31_v21 = vld [vmem:[%s8107_s1 + $0x38] sm:$0xff]  ;;  %v5692_v22 = vcombine.low %v592_v8, %v596_v10  ;;  %v5129_v26 = vcombine.high %v26_v18, %v30_v19  ;;  %v5128_v32 = vcombine.low %v26_v18, %v30_v19 }
 0x108   :  { %3792 = vmatprep.mubr.bf16.mxu0 %v5995_v34  ;;  %3997 = vmatprep.mubr.bf16.mxu1 %v5995_v34  ;;  %v5131_v27 = vcombine.high %v27_v20, %v31_v21  ;;  %v5130_v35 = vcombine.low %v27_v20, %v31_v21  ;;  %v82_v21 = vld [vmem:[%s8107_s1 + $0x1d0] sm:$0xff] }
 0x10a   :  { %3763 = vmatpush1.bf16.msra.mxu0 %v5644_v28  ;;  %3968 = vmatpush1.bf16.msra.mxu1 %v5646_v59  ;;  %v34_v28 = vld [vmem:[%s8107_s1 + $0x50] sm:$0xff] }
 0x10b   :  { %3764 = vmatprep.subr.bf16.mxu0 %v5653_v29  ;;  %3969 = vmatprep.subr.bf16.mxu1 %v5655_v30  ;;  %v38_v59 = vld [vmem:[%s8107_s1 + $0x70] sm:$0xff]  ;;  %v6984_v29 = vrot.slane %v5123_v24, %v6108_v53  ;;  %v35_v30 = vld [vmem:[%s8107_s1 + $0x58] sm:$0xff] }
 0x10c   :  { %v5137_v36 = vcombine.high %v34_v28, %v38_v59  ;;  %v42_v53 = vld [vmem:[%s8107_s1 + $0x90] sm:$0xff]  ;;  %v5136_v42 = vcombine.low %v34_v28, %v38_v59  ;;  %v5138_v44 = vcombine.low %v35_v30, %v39_v31  ;;  %v83_v24 = vld [vmem:[%s8107_s1 + $0x1d8] sm:$0xff] }
 0x10e   :  { %3765 = vmatpush1.bf16.msra.mxu0 %v5652_v37  ;;  %3970 = vmatpush1.bf16.msra.mxu1 %v5654_v38  ;;  %v5139_v37 = vcombine.high %v35_v30, %v39_v31  ;;  %v46_v38 = vld [vmem:[%s8107_s1 + $0xb0] sm:$0xff] }
 0x10f   :  { %3766 = vmatprep.subr.bf16.mxu0 %v5661_v40  ;;  %3971 = vmatprep.subr.bf16.mxu1 %v5663_v41  ;;  %v43_v40 = vld [vmem:[%s8107_s1 + $0x98] sm:$0xff]  ;;  %v5145_v45 = vcombine.high %v42_v53, %v46_v38  ;;  %v5144_v52 = vcombine.low %v42_v53, %v46_v38  ;;  %v90_v30 = vld [vmem:[%s8107_s1 + $0x210] sm:$0xff] }
 0x110   :  { %v47_v41 = vld [vmem:[%s8107_s1 + $0xb8] sm:$0xff]  ;;  %v94_v31 = vld [vmem:[%s8107_s1 + $0x230] sm:$0xff] }
 0x111   :  { %v5147_v46 = vcombine.high %v43_v40, %v47_v41  ;;  %v5146_v54 = vcombine.low %v43_v40, %v47_v41  ;;  %v5193_v53 = vcombine.high %v90_v30, %v94_v31  ;;  %v98_v40 = vld [vmem:[%s8107_s1 + $0x250] sm:$0xff] }
 0x112   :  { %3767 = vmatpush1.bf16.msra.mxu0 %v5660_v47  ;;  %3972 = vmatpush1.bf16.msra.mxu1 %v5662_v49  ;;  %v50_v47 = vld [vmem:[%s8107_s1 + $0xd0] sm:$0xff] }
 0x113   :  { %3768 = vmatprep.subr.bf16.mxu0 %v5669_v50  ;;  %3973 = vmatprep.subr.bf16.mxu1 %v5671_v51  ;;  %v54_v49 = vld [vmem:[%s8107_s1 + $0xf0] sm:$0xff]  ;;  %v51_v50 = vld [vmem:[%s8107_s1 + $0xd8] sm:$0xff] }
 0x114   :  { %v55_v51 = vld [vmem:[%s8107_s1 + $0xf8] sm:$0xff]  ;;  %v5153_v55 = vcombine.high %v50_v47, %v54_v49  ;;  %v102_v41 = vld [vmem:[%s8107_s1 + $0x270] sm:$0xff] }
 0x115   :  { %v5155_v56 = vcombine.high %v51_v50, %v55_v51  ;;  %v5154_v0 = vcombine.low %v51_v50, %v55_v51  ;;  %v106_v50 = vld [vmem:[%s8107_s1 + $0x290] sm:$0xff] }
 0x116   :  { %3769 = vmatpush1.bf16.msra.mxu0 %v5668_v57  ;;  %3974 = vmatpush1.bf16.msra.mxu1 %v5670_v60  ;;  %v58_v57 = vld [vmem:[%s8107_s1 + $0x110] sm:$0xff] }
 0x117   :  { %3770 = vmatprep.subr.bf16.mxu0 %v5677_v61  ;;  %3975 = vmatprep.subr.bf16.mxu1 %v5679_v62  ;;  %v62_v60 = vld [vmem:[%s8107_s1 + $0x130] sm:$0xff]  ;;  %v63_v61 = vld [vmem:[%s8107_s1 + $0x138] sm:$0xff]  ;;  %v5152_v62 = vcombine.low %v50_v47, %v54_v49  ;;  %v5201_v47 = vcombine.high %v98_v40, %v102_v41 }
 0x118   :  { %v5161_v1 = vcombine.high %v58_v57, %v62_v60  ;;  %v110_v51 = vld [vmem:[%s8107_s1 + $0x2b0] sm:$0xff] }
 0x11a   :  { %3771 = vmatpush1.bf16.msra.mxu0 %v5676_v3  ;;  %3976 = vmatpush1.bf16.msra.mxu1 %v5678_v5  ;;  %v70_v3 = vld [vmem:[%s8107_s1 + $0x170] sm:$0xff]  ;;  %v67_v5 = vld [vmem:[%s8107_s1 + $0x158] sm:$0xff] }
 0x11b   :  { %3772 = vmatprep.subr.bf16.mxu0 %v5685_v6  ;;  %3977 = vmatprep.subr.bf16.mxu1 %v5687_v7  ;;  %v71_v6 = vld [vmem:[%s8107_s1 + $0x178] sm:$0xff]  ;;  %v5160_v7 = vcombine.low %v58_v57, %v62_v60  ;;  %v5169_v10 = vcombine.high %v66_v63, %v70_v3  ;;  %v5209_v57 = vcombine.high %v106_v50, %v110_v51 }
 0x11c   :  { %v5171_v11 = vcombine.high %v67_v5, %v71_v6  ;;  %v5170_v18 = vcombine.low %v67_v5, %v71_v6  ;;  %v122_v5 = vld [vmem:[%s8107_s1 + $0x310] sm:$0xff] }
 0x11d   :  { %v126_v6 = vld [vmem:[%s8107_s1 + $0x330] sm:$0xff] }
 0x11e   :  { %3773 = vmatpush1.bf16.msra.mxu0 %v5684_v13  ;;  %3978 = vmatpush1.bf16.msra.mxu1 %v5686_v14  ;;  %v78_v13 = vld [vmem:[%s8107_s1 + $0x1b0] sm:$0xff]  ;;  %v75_v14 = vld [vmem:[%s8107_s1 + $0x198] sm:$0xff] }
 0x11f   :  { %3774 = vmatprep.subr.bf16.mxu0 %v5693_v15  ;;  %3979 = vmatprep.subr.bf16.mxu1 %v5695_v17  ;;  %v79_v15 = vld [vmem:[%s8107_s1 + $0x1b8] sm:$0xff]  ;;  %v5168_v17 = vcombine.low %v66_v63, %v70_v3  ;;  %v5177_v19 = vcombine.high %v74_v12, %v78_v13 }
 0x120   :  { %v5179_v20 = vcombine.high %v75_v14, %v79_v15 }
 0x122   :  { %3775 = vmatpush1.bf16.msra.mxu0 %v5692_v22  ;;  %3980 = vmatpush1.bf16.msra.mxu1 %v5694_v25  ;;  %v86_v22 = vld [vmem:[%s8107_s1 + $0x1f0] sm:$0xff]  ;;  %v87_v25 = vld [vmem:[%s8107_s1 + $0x1f8] sm:$0xff] }
 0x123   :  { %4006 = vmatprep.subr.bf16.mxu0 %v5129_v26  ;;  %4211 = vmatprep.subr.bf16.mxu1 %v5131_v27  ;;  %v5176_v26 = vcombine.low %v74_v12, %v78_v13  ;;  %v5178_v27 = vcombine.low %v75_v14, %v79_v15  ;;  %v5185_v28 = vcombine.high %v82_v21, %v86_v22  ;;  %v130_v14 = vld [vmem:[%s8107_s1 + $0x350] sm:$0xff] }
 0x124   :  { %v5187_v59 = vcombine.high %v83_v24, %v87_v25  ;;  %v5225_v12 = vcombine.high %v122_v5, %v126_v6  ;;  %v134_v15 = vld [vmem:[%s8107_s1 + $0x370] sm:$0xff] }
 0x125   :  { %3793 = vmatmul.mubr.bf16.vlgmr.msra.gmra.mrb[0].mxu0 %v6984_v29  ;;  %3998 = vmatmul.mubr.bf16.vlgmr.msra.gmra.mrb[0].mxu1 %v6984_v29 }
 0x126   :  { %4007 = vmatpush1.bf16.msra.mxu0 %v5128_v32  ;;  %4212 = vmatpush1.bf16.msra.mxu1 %v5130_v35  ;;  %v91_v32 = vld [vmem:[%s8107_s1 + $0x218] sm:$0xff] }
 0x127   :  { %4008 = vmatprep.subr.bf16.mxu0 %v5137_v36  ;;  %4213 = vmatprep.subr.bf16.mxu1 %v5139_v37  ;;  %v95_v35 = vld [vmem:[%s8107_s1 + $0x238] sm:$0xff]  ;;  %v5184_v36 = vcombine.low %v82_v21, %v86_v22  ;;  %v5186_v37 = vcombine.low %v83_v24, %v87_v25  ;;  %v5233_v21 = vcombine.high %v130_v14, %v134_v15  ;;  %v138_v24 = vld [vmem:[%s8107_s1 + $0x390] sm:$0xff] }
 0x128   :  { %4038 = vmatprep.mubr.bf16.mxu0 %v6146_v9  ;;  %4243 = vmatprep.mubr.bf16.mxu1 %v6146_v9  ;;  %v59_v9 = vld [vmem:[%s8107_s1 + $0x118] sm:$0xff]  ;;  %v5195_v38 = vcombine.high %v91_v32, %v95_v35  ;;  %v142_v25 = vld [vmem:[%s8107_s1 + $0x3b0] sm:$0xff] }
 0x129   :  { %v5163_v2 = vcombine.high %v59_v9, %v63_v61  ;;  %v5162_v8 = vcombine.low %v59_v9, %v63_v61  ;;  %v114_v9 = vld [vmem:[%s8107_s1 + $0x2d0] sm:$0xff] }
 0x12a   :  { %4009 = vmatpush1.bf16.msra.mxu0 %v5136_v42  ;;  %4214 = vmatpush1.bf16.msra.mxu1 %v5138_v44  ;;  %v99_v42 = vld [vmem:[%s8107_s1 + $0x258] sm:$0xff]  ;;  %v118_v61 = vld [vmem:[%s8107_s1 + $0x2f0] sm:$0xff] }
 0x12b   :  { %4010 = vmatprep.subr.bf16.mxu0 %v5145_v45  ;;  %4215 = vmatprep.subr.bf16.mxu1 %v5147_v46  ;;  %v103_v44 = vld [vmem:[%s8107_s1 + $0x278] sm:$0xff]  ;;  %v5192_v45 = vcombine.low %v90_v30, %v94_v31  ;;  %v5194_v46 = vcombine.low %v91_v32, %v95_v35  ;;  %v5217_v63 = vcombine.high %v114_v9, %v118_v61  ;;  %v146_v32 = vld [vmem:[%s8107_s1 + $0x3d0] sm:$0xff] }
 0x12c   :  { %v5203_v49 = vcombine.high %v99_v42, %v103_v44  ;;  %v5241_v30 = vcombine.high %v138_v24, %v142_v25  ;;  %v150_v35 = vld [vmem:[%s8107_s1 + $0x3f0] sm:$0xff] }
 0x12e   :  { %4011 = vmatpush1.bf16.msra.mxu0 %v5144_v52  ;;  %4216 = vmatpush1.bf16.msra.mxu1 %v5146_v54  ;;  %v107_v52 = vld [vmem:[%s8107_s1 + $0x298] sm:$0xff] }
 0x12f   :  { %4012 = vmatprep.subr.bf16.mxu0 %v5153_v55  ;;  %4217 = vmatprep.subr.bf16.mxu1 %v5155_v56  ;;  %v111_v54 = vld [vmem:[%s8107_s1 + $0x2b8] sm:$0xff]  ;;  %v5200_v55 = vcombine.low %v98_v40, %v102_v41  ;;  %v5202_v56 = vcombine.low %v99_v42, %v103_v44  ;;  %v5249_v40 = vcombine.high %v146_v32, %v150_v35  ;;  %v154_v42 = vld [vmem:[%s8107_s1 + $0x410] sm:$0xff] }
 0x130   :  { %v5211_v60 = vcombine.high %v107_v52, %v111_v54  ;;  %v158_v44 = vld [vmem:[%s8107_s1 + $0x430] sm:$0xff] }
 0x132   :  { %4013 = vmatpush1.bf16.msra.mxu0 %v5152_v62  ;;  %4218 = vmatpush1.bf16.msra.mxu1 %v5154_v0  ;;  %v115_v62 = vld [vmem:[%s8107_s1 + $0x2d8] sm:$0xff] }
 0x133   :  { %4014 = vmatprep.subr.bf16.mxu0 %v5161_v1  ;;  %4219 = vmatprep.subr.bf16.mxu1 %v5163_v2  ;;  %v119_v0 = vld [vmem:[%s8107_s1 + $0x2f8] sm:$0xff]  ;;  %v5208_v1 = vcombine.low %v106_v50, %v110_v51  ;;  %v5210_v2 = vcombine.low %v107_v52, %v111_v54  ;;  %v5257_v50 = vcombine.high %v154_v42, %v158_v44  ;;  %v162_v52 = vld [vmem:[%s8107_s1 + $0x450] sm:$0xff] }
 0x134   :  { %v5219_v3 = vcombine.high %v115_v62, %v119_v0  ;;  %v166_v54 = vld [vmem:[%s8107_s1 + $0x470] sm:$0xff] }
 0x136   :  { %4015 = vmatpush1.bf16.msra.mxu0 %v5160_v7  ;;  %4220 = vmatpush1.bf16.msra.mxu1 %v5162_v8  ;;  %v123_v7 = vld [vmem:[%s8107_s1 + $0x318] sm:$0xff] }
 0x137   :  { %4016 = vmatprep.subr.bf16.mxu0 %v5169_v10  ;;  %4221 = vmatprep.subr.bf16.mxu1 %v5171_v11  ;;  %v127_v8 = vld [vmem:[%s8107_s1 + $0x338] sm:$0xff]  ;;  %v5216_v10 = vcombine.low %v114_v9, %v118_v61  ;;  %v5218_v11 = vcombine.low %v115_v62, %v119_v0  ;;  %v5265_v9 = vcombine.high %v162_v52, %v166_v54  ;;  %v170_v62 = vld [vmem:[%s8107_s1 + $0x490] sm:$0xff] }
 0x138   :  { %v5227_v13 = vcombine.high %v123_v7, %v127_v8  ;;  %v174_v0 = vld [vmem:[%s8107_s1 + $0x4b0] sm:$0xff] }
 0x13a   :  { %4017 = vmatpush1.bf16.msra.mxu0 %v5168_v17  ;;  %4222 = vmatpush1.bf16.msra.mxu1 %v5170_v18  ;;  %v131_v17 = vld [vmem:[%s8107_s1 + $0x358] sm:$0xff] }
 0x13b   :  { %4018 = vmatprep.subr.bf16.mxu0 %v5177_v19  ;;  %4223 = vmatprep.subr.bf16.mxu1 %v5179_v20  ;;  %v135_v18 = vld [vmem:[%s8107_s1 + $0x378] sm:$0xff]  ;;  %v5224_v19 = vcombine.low %v122_v5, %v126_v6  ;;  %v5226_v20 = vcombine.low %v123_v7, %v127_v8  ;;  %v5273_v5 = vcombine.high %v170_v62, %v174_v0  ;;  %v178_v7 = vld [vmem:[%s8107_s1 + $0x4d0] sm:$0xff] }
 0x13c   :  { %v5235_v22 = vcombine.high %v131_v17, %v135_v18  ;;  %v182_v8 = vld [vmem:[%s8107_s1 + $0x4f0] sm:$0xff] }
 0x13e   :  { %4019 = vmatpush1.bf16.msra.mxu0 %v5176_v26  ;;  %4224 = vmatpush1.bf16.msra.mxu1 %v5178_v27  ;;  %v139_v26 = vld [vmem:[%s8107_s1 + $0x398] sm:$0xff] }
 0x13f   :  { %4020 = vmatprep.subr.bf16.mxu0 %v5185_v28  ;;  %4225 = vmatprep.subr.bf16.mxu1 %v5187_v59  ;;  %v143_v27 = vld [vmem:[%s8107_s1 + $0x3b8] sm:$0xff]  ;;  %v5232_v28 = vcombine.low %v130_v14, %v134_v15  ;;  %v5234_v59 = vcombine.low %v131_v17, %v135_v18  ;;  %v186_v15 = vld [vmem:[%s8107_s1 + $0x510] sm:$0xff] }
 0x140   :  { %v5243_v31 = vcombine.high %v139_v26, %v143_v27  ;;  %v190_v17 = vld [vmem:[%s8107_s1 + $0x530] sm:$0xff]  ;;  %v191_v18 = vld [vmem:[%s8107_s1 + $0x538] sm:$0xff] }
 0x142   :  { %4021 = vmatpush1.bf16.msra.mxu0 %v5184_v36  ;;  %4226 = vmatpush1.bf16.msra.mxu1 %v5186_v37  ;;  %v147_v36 = vld [vmem:[%s8107_s1 + $0x3d8] sm:$0xff] }
 0x143   :  { %4022 = vmatprep.subr.bf16.mxu0 %v5193_v53  ;;  %4227 = vmatprep.subr.bf16.mxu1 %v5195_v38  ;;  %v151_v37 = vld [vmem:[%s8107_s1 + $0x3f8] sm:$0xff]  ;;  %v5240_v53 = vcombine.low %v138_v24, %v142_v25  ;;  %v5242_v38 = vcombine.low %v139_v26, %v143_v27  ;;  %v194_v24 = vld [vmem:[%s8107_s1 + $0x550] sm:$0xff] }
 0x144   :  { %v5251_v41 = vcombine.high %v147_v36, %v151_v37  ;;  %v198_v25 = vld [vmem:[%s8107_s1 + $0x570] sm:$0xff]  ;;  %v195_v26 = vld [vmem:[%s8107_s1 + $0x558] sm:$0xff] }
 0x145   :  { %v199_v27 = vld [vmem:[%s8107_s1 + $0x578] sm:$0xff] }
 0x146   :  { %4023 = vmatpush1.bf16.msra.mxu0 %v5192_v45  ;;  %4228 = vmatpush1.bf16.msra.mxu1 %v5194_v46  ;;  %v155_v45 = vld [vmem:[%s8107_s1 + $0x418] sm:$0xff] }
 0x147   :  { %4024 = vmatprep.subr.bf16.mxu0 %v5201_v47  ;;  %4229 = vmatprep.subr.bf16.mxu1 %v5203_v49  ;;  %v159_v46 = vld [vmem:[%s8107_s1 + $0x438] sm:$0xff]  ;;  %v5248_v47 = vcombine.low %v146_v32, %v150_v35  ;;  %v5250_v49 = vcombine.low %v147_v36, %v151_v37  ;;  %v202_v32 = vld [vmem:[%s8107_s1 + $0x590] sm:$0xff] }
 0x148   :  { %v5259_v51 = vcombine.high %v155_v45, %v159_v46  ;;  %v206_v35 = vld [vmem:[%s8107_s1 + $0x5b0] sm:$0xff]  ;;  %v203_v36 = vld [vmem:[%s8107_s1 + $0x598] sm:$0xff] }
 0x149   :  { %v207_v37 = vld [vmem:[%s8107_s1 + $0x5b8] sm:$0xff] }
 0x14a   :  { %4025 = vmatpush1.bf16.msra.mxu0 %v5200_v55  ;;  %4230 = vmatpush1.bf16.msra.mxu1 %v5202_v56  ;;  %v163_v55 = vld [vmem:[%s8107_s1 + $0x458] sm:$0xff] }
 0x14b   :  { %4026 = vmatprep.subr.bf16.mxu0 %v5209_v57  ;;  %4231 = vmatprep.subr.bf16.mxu1 %v5211_v60  ;;  %v167_v56 = vld [vmem:[%s8107_s1 + $0x478] sm:$0xff]  ;;  %v5256_v57 = vcombine.low %v154_v42, %v158_v44  ;;  %v5258_v60 = vcombine.low %v155_v45, %v159_v46  ;;  %v210_v42 = vld [vmem:[%s8107_s1 + $0x5d0] sm:$0xff] }
 0x14c   :  { %v5267_v61 = vcombine.high %v163_v55, %v167_v56  ;;  %v214_v44 = vld [vmem:[%s8107_s1 + $0x5f0] sm:$0xff]  ;;  %v211_v45 = vld [vmem:[%s8107_s1 + $0x5d8] sm:$0xff] }
 0x14d   :  { %v215_v46 = vld [vmem:[%s8107_s1 + $0x5f8] sm:$0xff] }
 0x14e   :  { %4027 = vmatpush1.bf16.msra.mxu0 %v5208_v1  ;;  %4232 = vmatpush1.bf16.msra.mxu1 %v5210_v2  ;;  %v171_v1 = vld [vmem:[%s8107_s1 + $0x498] sm:$0xff] }
 0x14f   :  { %4028 = vmatprep.subr.bf16.mxu0 %v5217_v63  ;;  %4233 = vmatprep.subr.bf16.mxu1 %v5219_v3  ;;  %v175_v2 = vld [vmem:[%s8107_s1 + $0x4b8] sm:$0xff]  ;;  %v5264_v63 = vcombine.low %v162_v52, %v166_v54  ;;  %v5266_v3 = vcombine.low %v163_v55, %v167_v56  ;;  %v218_v52 = vld [vmem:[%s8107_s1 + $0x610] sm:$0xff] }
 0x150   :  { %v5275_v6 = vcombine.high %v171_v1, %v175_v2  ;;  %v222_v54 = vld [vmem:[%s8107_s1 + $0x630] sm:$0xff]  ;;  %v219_v55 = vld [vmem:[%s8107_s1 + $0x618] sm:$0xff] }
 0x151   :  { %v223_v56 = vld [vmem:[%s8107_s1 + $0x638] sm:$0xff] }
 0x152   :  { %4029 = vmatpush1.bf16.msra.mxu0 %v5216_v10  ;;  %4234 = vmatpush1.bf16.msra.mxu1 %v5218_v11  ;;  %v183_v10 = vld [vmem:[%s8107_s1 + $0x4f8] sm:$0xff]  ;;  %v5272_v11 = vcombine.low %v170_v62, %v174_v0  ;;  %v226_v62 = vld [vmem:[%s8107_s1 + $0x650] sm:$0xff] }
 0x153   :  { %4030 = vmatprep.subr.bf16.mxu0 %v5225_v12  ;;  %4235 = vmatprep.subr.bf16.mxu1 %v5227_v13  ;;  %v5274_v12 = vcombine.low %v171_v1, %v175_v2  ;;  %v5281_v13 = vcombine.high %v178_v7, %v182_v8  ;;  %v230_v0 = vld [vmem:[%s8107_s1 + $0x670] sm:$0xff]  ;;  %v227_v1 = vld [vmem:[%s8107_s1 + $0x658] sm:$0xff] }
 0x154   :  { %v231_v2 = vld [vmem:[%s8107_s1 + $0x678] sm:$0xff] }
 0x156   :  { %4031 = vmatpush1.bf16.msra.mxu0 %v5224_v19  ;;  %4236 = vmatpush1.bf16.msra.mxu1 %v5226_v20  ;;  %v5280_v19 = vcombine.low %v178_v7, %v182_v8  ;;  %v234_v7 = vld [vmem:[%s8107_s1 + $0x690] sm:$0xff] }
 0x157   :  { %4032 = vmatprep.subr.bf16.mxu0 %v5233_v21  ;;  %4237 = vmatprep.subr.bf16.mxu1 %v5235_v22  ;;  %v5289_v21 = vcombine.high %v186_v15, %v190_v17  ;;  %v238_v8 = vld [vmem:[%s8107_s1 + $0x6b0] sm:$0xff] }
 0x15a   :  { %4033 = vmatpush1.bf16.msra.mxu0 %v5232_v28  ;;  %4238 = vmatpush1.bf16.msra.mxu1 %v5234_v59  ;;  %v5288_v28 = vcombine.low %v186_v15, %v190_v17  ;;  %v242_v15 = vld [vmem:[%s8107_s1 + $0x6d0] sm:$0xff] }
 0x15b   :  { %4034 = vmatprep.subr.bf16.mxu0 %v5241_v30  ;;  %4239 = vmatprep.subr.bf16.mxu1 %v5243_v31  ;;  %v5297_v30 = vcombine.high %v194_v24, %v198_v25  ;;  %v5299_v31 = vcombine.high %v195_v26, %v199_v27  ;;  %v246_v17 = vld [vmem:[%s8107_s1 + $0x6f0] sm:$0xff] }
 0x15e   :  { %4035 = vmatpush1.bf16.msra.mxu0 %v5240_v53  ;;  %4240 = vmatpush1.bf16.msra.mxu1 %v5242_v38  ;;  %v5296_v53 = vcombine.low %v194_v24, %v198_v25  ;;  %v5298_v38 = vcombine.low %v195_v26, %v199_v27  ;;  %v250_v24 = vld [vmem:[%s8107_s1 + $0x710] sm:$0xff]  ;;  %v251_v26 = vld [vmem:[%s8107_s1 + $0x718] sm:$0xff] }
 0x15f   :  { %4036 = vmatprep.subr.bf16.mxu0 %v5249_v40  ;;  %4241 = vmatprep.subr.bf16.mxu1 %v5251_v41  ;;  %v5305_v40 = vcombine.high %v202_v32, %v206_v35  ;;  %v5307_v41 = vcombine.high %v203_v36, %v207_v37  ;;  %v254_v25 = vld [vmem:[%s8107_s1 + $0x730] sm:$0xff]  ;;  %v255_v27 = vld [vmem:[%s8107_s1 + $0x738] sm:$0xff] }
 0x162   :  { %4037 = vmatpush1.bf16.msra.mxu0 %v5248_v47  ;;  %4242 = vmatpush1.bf16.msra.mxu1 %v5250_v49  ;;  %v5304_v47 = vcombine.low %v202_v32, %v206_v35  ;;  %v5306_v49 = vcombine.low %v203_v36, %v207_v37  ;;  %v258_v32 = vld [vmem:[%s8107_s1 + $0x750] sm:$0xff]  ;;  %v259_v36 = vld [vmem:[%s8107_s1 + $0x758] sm:$0xff] }
 0x163   :  { %4047 = vmatprep.subr.bf16.mxu0 %v5257_v50  ;;  %4252 = vmatprep.subr.bf16.mxu1 %v5259_v51  ;;  %v5313_v50 = vcombine.high %v210_v42, %v214_v44  ;;  %v5315_v51 = vcombine.high %v211_v45, %v215_v46  ;;  %v262_v35 = vld [vmem:[%s8107_s1 + $0x770] sm:$0xff]  ;;  %v263_v37 = vld [vmem:[%s8107_s1 + $0x778] sm:$0xff] }
 0x165   :  { %4039 = vmatmul.mubr.bf16.vlgmr.msra.gmra.mrb[4].mxu0 %v6260_v23  ;;  %4244 = vmatmul.mubr.bf16.vlgmr.msra.gmra.mrb[4].mxu1 %v6260_v23  ;;  %v179_v23 = vld [vmem:[%s8107_s1 + $0x4d8] sm:$0xff] }
 0x166   :  { %4048 = vmatpush1.bf16.msra.mxu0 %v5256_v57  ;;  %4253 = vmatpush1.bf16.msra.mxu1 %v5258_v60  ;;  %v5283_v14 = vcombine.high %v179_v23, %v183_v10  ;;  %v5282_v20 = vcombine.low %v179_v23, %v183_v10  ;;  %v5312_v57 = vcombine.low %v210_v42, %v214_v44  ;;  %v235_v23 = vld [vmem:[%s8107_s1 + $0x698] sm:$0xff]  ;;  %v266_v42 = vld [vmem:[%s8107_s1 + $0x790] sm:$0xff] }
 0x167   :  { %4049 = vmatprep.subr.bf16.mxu0 %v5265_v9  ;;  %4254 = vmatprep.subr.bf16.mxu1 %v5267_v61  ;;  %v5314_v60 = vcombine.low %v211_v45, %v215_v46  ;;  %v5321_v9 = vcombine.high %v218_v52, %v222_v54  ;;  %v5323_v61 = vcombine.high %v219_v55, %v223_v56  ;;  %v239_v10 = vld [vmem:[%s8107_s1 + $0x6b8] sm:$0xff]  ;;  %v270_v44 = vld [vmem:[%s8107_s1 + $0x7b0] sm:$0xff] }
 0x168   :  { %4079 = vmatprep.mubr.bf16.mxu0 %v6282_v33  ;;  %4284 = vmatprep.mubr.bf16.mxu1 %v6282_v33  ;;  %v187_v33 = vld [vmem:[%s8107_s1 + $0x518] sm:$0xff] }
 0x169   :  { %v5291_v22 = vcombine.high %v187_v33, %v191_v18  ;;  %v5290_v59 = vcombine.low %v187_v33, %v191_v18  ;;  %v243_v33 = vld [vmem:[%s8107_s1 + $0x6d8] sm:$0xff] }
 0x16a   :  { %4050 = vmatpush1.bf16.msra.mxu0 %v5264_v63  ;;  %4255 = vmatpush1.bf16.msra.mxu1 %v5266_v3  ;;  %v5320_v63 = vcombine.low %v218_v52, %v222_v54  ;;  %v5322_v3 = vcombine.low %v219_v55, %v223_v56  ;;  %v247_v18 = vld [vmem:[%s8107_s1 + $0x6f8] sm:$0xff]  ;;  %v274_v52 = vld [vmem:[%s8107_s1 + $0x7d0] sm:$0xff] }
 0x16b   :  { %4051 = vmatprep.subr.bf16.mxu0 %v5273_v5  ;;  %4256 = vmatprep.subr.bf16.mxu1 %v5275_v6  ;;  %v5329_v5 = vcombine.high %v226_v62, %v230_v0  ;;  %v5331_v6 = vcombine.high %v227_v1, %v231_v2  ;;  %v267_v45 = vld [vmem:[%s8107_s1 + $0x798] sm:$0xff]  ;;  %v278_v54 = vld [vmem:[%s8107_s1 + $0x7f0] sm:$0xff] }
 0x16c   :  { %v271_v46 = vld [vmem:[%s8107_s1 + $0x7b8] sm:$0xff] }
 0x16d   :  { %v275_v55 = vld [vmem:[%s8107_s1 + $0x7d8] sm:$0xff] }
 0x16e   :  { %4052 = vmatpush1.bf16.msra.mxu0 %v5272_v11  ;;  %4257 = vmatpush1.bf16.msra.mxu1 %v5274_v12  ;;  %v5328_v11 = vcombine.low %v226_v62, %v230_v0  ;;  %v5330_v12 = vcombine.low %v227_v1, %v231_v2  ;;  %v279_v56 = vld [vmem:[%s8107_s1 + $0x7f8] sm:$0xff]  ;;  %v282_v62 = vld [vmem:[%s8107_s1 + $0x810] sm:$0xff] }
 0x16f   :  { %4053 = vmatprep.subr.bf16.mxu0 %v5281_v13  ;;  %4258 = vmatprep.subr.bf16.mxu1 %v5283_v14  ;;  %v5337_v13 = vcombine.high %v234_v7, %v238_v8  ;;  %v5339_v14 = vcombine.high %v235_v23, %v239_v10  ;;  %v286_v0 = vld [vmem:[%s8107_s1 + $0x830] sm:$0xff]  ;;  %v283_v1 = vld [vmem:[%s8107_s1 + $0x818] sm:$0xff] }
 0x170   :  { %v287_v2 = vld [vmem:[%s8107_s1 + $0x838] sm:$0xff] }
 0x172   :  { %4054 = vmatpush1.bf16.msra.mxu0 %v5280_v19  ;;  %4259 = vmatpush1.bf16.msra.mxu1 %v5282_v20  ;;  %v5336_v19 = vcombine.low %v234_v7, %v238_v8  ;;  %v5338_v20 = vcombine.low %v235_v23, %v239_v10  ;;  %v290_v7 = vld [vmem:[%s8107_s1 + $0x850] sm:$0xff]  ;;  %v291_v23 = vld [vmem:[%s8107_s1 + $0x858] sm:$0xff] }
 0x173   :  { %4055 = vmatprep.subr.bf16.mxu0 %v5289_v21  ;;  %4260 = vmatprep.subr.bf16.mxu1 %v5291_v22  ;;  %v5345_v21 = vcombine.high %v242_v15, %v246_v17  ;;  %v5347_v22 = vcombine.high %v243_v33, %v247_v18  ;;  %v294_v8 = vld [vmem:[%s8107_s1 + $0x870] sm:$0xff]  ;;  %v295_v10 = vld [vmem:[%s8107_s1 + $0x878] sm:$0xff] }
 0x176   :  { %4056 = vmatpush1.bf16.msra.mxu0 %v5288_v28  ;;  %4261 = vmatpush1.bf16.msra.mxu1 %v5290_v59  ;;  %v5344_v28 = vcombine.low %v242_v15, %v246_v17  ;;  %v5346_v59 = vcombine.low %v243_v33, %v247_v18  ;;  %v298_v15 = vld [vmem:[%s8107_s1 + $0x890] sm:$0xff]  ;;  %v299_v33 = vld [vmem:[%s8107_s1 + $0x898] sm:$0xff] }
 0x177   :  { %4057 = vmatprep.subr.bf16.mxu0 %v5297_v30  ;;  %4262 = vmatprep.subr.bf16.mxu1 %v5299_v31  ;;  %v5353_v30 = vcombine.high %v250_v24, %v254_v25  ;;  %v5355_v31 = vcombine.high %v251_v26, %v255_v27  ;;  %v302_v17 = vld [vmem:[%s8107_s1 + $0x8b0] sm:$0xff]  ;;  %v303_v18 = vld [vmem:[%s8107_s1 + $0x8b8] sm:$0xff] }
 0x17a   :  { %4058 = vmatpush1.bf16.msra.mxu0 %v5296_v53  ;;  %4263 = vmatpush1.bf16.msra.mxu1 %v5298_v38  ;;  %v5352_v53 = vcombine.low %v250_v24, %v254_v25  ;;  %v5354_v38 = vcombine.low %v251_v26, %v255_v27  ;;  %v306_v24 = vld [vmem:[%s8107_s1 + $0x8d0] sm:$0xff]  ;;  %v311_v26 = vld [vmem:[%s8107_s1 + $0x8f8] sm:$0xff]  ;;  %v5400_v27 = vcombine.low %v298_v15, %v302_v17 }
 0x17b   :  { %4059 = vmatprep.subr.bf16.mxu0 %v5305_v40  ;;  %4264 = vmatprep.subr.bf16.mxu1 %v5307_v41  ;;  %v5361_v40 = vcombine.high %v258_v32, %v262_v35  ;;  %v5363_v41 = vcombine.high %v259_v36, %v263_v37  ;;  %v310_v25 = vld [vmem:[%s8107_s1 + $0x8f0] sm:$0xff] }
 0x17e   :  { %4060 = vmatpush1.bf16.msra.mxu0 %v5304_v47  ;;  %4265 = vmatpush1.bf16.msra.mxu1 %v5306_v49  ;;  %v5360_v47 = vcombine.low %v258_v32, %v262_v35  ;;  %v5362_v49 = vcombine.low %v259_v36, %v263_v37  ;;  %v318_v32 = vld [vmem:[%s8107_s1 + $0x930] sm:$0xff]  ;;  %v319_v35 = vld [vmem:[%s8107_s1 + $0x938] sm:$0xff]  ;;  %v5408_v36 = vcombine.low %v306_v24, %v310_v25 }
 0x17f   :  { %4061 = vmatprep.subr.bf16.mxu0 %v5313_v50  ;;  %4266 = vmatprep.subr.bf16.mxu1 %v5315_v51  ;;  %v5369_v50 = vcombine.high %v266_v42, %v270_v44  ;;  %v5371_v51 = vcombine.high %v267_v45, %v271_v46 }
 0x182   :  { %4062 = vmatpush1.bf16.msra.mxu0 %v5312_v57  ;;  %4267 = vmatpush1.bf16.msra.mxu1 %v5314_v60  ;;  %v5368_v57 = vcombine.low %v266_v42, %v270_v44  ;;  %v5370_v60 = vcombine.low %v267_v45, %v271_v46  ;;  %v323_v42 = vld [vmem:[%s8107_s1 + $0x958] sm:$0xff] }
 0x183   :  { %4063 = vmatprep.subr.bf16.mxu0 %v5321_v9  ;;  %4268 = vmatprep.subr.bf16.mxu1 %v5323_v61  ;;  %v5377_v9 = vcombine.high %v274_v52, %v278_v54  ;;  %v5379_v61 = vcombine.high %v275_v55, %v279_v56  ;;  %v327_v44 = vld [vmem:[%s8107_s1 + $0x978] sm:$0xff] }
 0x186   :  { %4064 = vmatpush1.bf16.msra.mxu0 %v5320_v63  ;;  %4269 = vmatpush1.bf16.msra.mxu1 %v5322_v3  ;;  %v5376_v63 = vcombine.low %v274_v52, %v278_v54  ;;  %v5378_v3 = vcombine.low %v275_v55, %v279_v56  ;;  %v331_v52 = vld [vmem:[%s8107_s1 + $0x998] sm:$0xff]  ;;  %v5426_v56 = vcombine.low %v323_v42, %v327_v44 }
 0x187   :  { %4065 = vmatprep.subr.bf16.mxu0 %v5329_v5  ;;  %4270 = vmatprep.subr.bf16.mxu1 %v5331_v6  ;;  %v5385_v5 = vcombine.high %v282_v62, %v286_v0  ;;  %v5387_v6 = vcombine.high %v283_v1, %v287_v2  ;;  %v335_v54 = vld [vmem:[%s8107_s1 + $0x9b8] sm:$0xff] }
 0x18a   :  { %4066 = vmatpush1.bf16.msra.mxu0 %v5328_v11  ;;  %4271 = vmatpush1.bf16.msra.mxu1 %v5330_v12  ;;  %v5384_v11 = vcombine.low %v282_v62, %v286_v0  ;;  %v5386_v12 = vcombine.low %v283_v1, %v287_v2  ;;  %v339_v62 = vld [vmem:[%s8107_s1 + $0x9d8] sm:$0xff]  ;;  %v5434_v2 = vcombine.low %v331_v52, %v335_v54 }
 0x18b   :  { %4067 = vmatprep.subr.bf16.mxu0 %v5337_v13  ;;  %4272 = vmatprep.subr.bf16.mxu1 %v5339_v14  ;;  %v5393_v13 = vcombine.high %v290_v7, %v294_v8  ;;  %v5395_v14 = vcombine.high %v291_v23, %v295_v10  ;;  %v343_v0 = vld [vmem:[%s8107_s1 + $0x9f8] sm:$0xff] }
 0x18e   :  { %4068 = vmatpush1.bf16.msra.mxu0 %v5336_v19  ;;  %4273 = vmatpush1.bf16.msra.mxu1 %v5338_v20  ;;  %v5392_v19 = vcombine.low %v290_v7, %v294_v8  ;;  %v5394_v20 = vcombine.low %v291_v23, %v295_v10  ;;  %v347_v7 = vld [vmem:[%s8107_s1 + $0xa18] sm:$0xff]  ;;  %v5442_v10 = vcombine.low %v339_v62, %v343_v0 }
 0x18f   :  { %4069 = vmatprep.subr.bf16.mxu0 %v5345_v21  ;;  %4274 = vmatprep.subr.bf16.mxu1 %v5347_v22  ;;  %v5401_v21 = vcombine.high %v298_v15, %v302_v17  ;;  %v5403_v22 = vcombine.high %v299_v33, %v303_v18  ;;  %v351_v8 = vld [vmem:[%s8107_s1 + $0xa38] sm:$0xff] }
 0x190   :  { %v355_v15 = vld [vmem:[%s8107_s1 + $0xa58] sm:$0xff] }
 0x191   :  { %v359_v17 = vld [vmem:[%s8107_s1 + $0xa78] sm:$0xff] }
 0x192   :  { %4070 = vmatpush1.bf16.msra.mxu0 %v5344_v28  ;;  %4275 = vmatpush1.bf16.msra.mxu1 %v5346_v59  ;;  %v5402_v28 = vcombine.low %v299_v33, %v303_v18  ;;  %v5409_v59 = vcombine.high %v306_v24, %v310_v25  ;;  %v5450_v18 = vcombine.low %v347_v7, %v351_v8  ;;  %v363_v24 = vld [vmem:[%s8107_s1 + $0xa98] sm:$0xff] }
 0x193   :  { %4071 = vmatprep.subr.bf16.mxu0 %v5353_v30  ;;  %4276 = vmatprep.subr.bf16.mxu1 %v5355_v31  ;;  %v314_v31 = vld [vmem:[%s8107_s1 + $0x910] sm:$0xff]  ;;  %v367_v25 = vld [vmem:[%s8107_s1 + $0xab8] sm:$0xff] }
 0x194   :  { %v5416_v45 = vcombine.low %v314_v31, %v318_v32 }
 0x196   :  { %4072 = vmatpush1.bf16.msra.mxu0 %v5352_v53  ;;  %4277 = vmatpush1.bf16.msra.mxu1 %v5354_v38  ;;  %v5417_v53 = vcombine.high %v314_v31, %v318_v32  ;;  %v371_v31 = vld [vmem:[%s8107_s1 + $0xad8] sm:$0xff] }
 0x197   :  { %4073 = vmatprep.subr.bf16.mxu0 %v5361_v40  ;;  %4278 = vmatprep.subr.bf16.mxu1 %v5363_v41  ;;  %v322_v40 = vld [vmem:[%s8107_s1 + $0x950] sm:$0xff]  ;;  %v375_v32 = vld [vmem:[%s8107_s1 + $0xaf8] sm:$0xff] }
 0x198   :  { %v326_v41 = vld [vmem:[%s8107_s1 + $0x970] sm:$0xff] }
 0x199   :  { %v5424_v55 = vcombine.low %v322_v40, %v326_v41 }
 0x19a   :  { %4074 = vmatpush1.bf16.msra.mxu0 %v5360_v47  ;;  %4279 = vmatpush1.bf16.msra.mxu1 %v5362_v49  ;;  %v5425_v47 = vcombine.high %v322_v40, %v326_v41  ;;  %v5427_v49 = vcombine.high %v323_v42, %v327_v44  ;;  %v379_v40 = vld [vmem:[%s8107_s1 + $0xb18] sm:$0xff]  ;;  %v5474_v44 = vcombine.low %v371_v31, %v375_v32 }
 0x19b   :  { %4075 = vmatprep.subr.bf16.mxu0 %v5369_v50  ;;  %4280 = vmatprep.subr.bf16.mxu1 %v5371_v51  ;;  %v330_v50 = vld [vmem:[%s8107_s1 + $0x990] sm:$0xff]  ;;  %v383_v41 = vld [vmem:[%s8107_s1 + $0xb38] sm:$0xff] }
 0x19c   :  { %v334_v51 = vld [vmem:[%s8107_s1 + $0x9b0] sm:$0xff] }
 0x19d   :  { %v5432_v1 = vcombine.low %v330_v50, %v334_v51 }
 0x19e   :  { %4076 = vmatpush1.bf16.msra.mxu0 %v5368_v57  ;;  %4281 = vmatpush1.bf16.msra.mxu1 %v5370_v60  ;;  %v5433_v57 = vcombine.high %v330_v50, %v334_v51  ;;  %v5435_v60 = vcombine.high %v331_v52, %v335_v54  ;;  %v387_v50 = vld [vmem:[%s8107_s1 + $0xb58] sm:$0xff]  ;;  %v5482_v54 = vcombine.low %v379_v40, %v383_v41 }
 0x19f   :  { %4077 = vmatprep.subr.bf16.mxu0 %v5377_v9  ;;  %4282 = vmatprep.subr.bf16.mxu1 %v5379_v61  ;;  %v338_v9 = vld [vmem:[%s8107_s1 + $0x9d0] sm:$0xff]  ;;  %v391_v51 = vld [vmem:[%s8107_s1 + $0xb78] sm:$0xff] }
 0x1a0   :  { %v342_v61 = vld [vmem:[%s8107_s1 + $0x9f0] sm:$0xff] }
 0x1a1   :  { %v5440_v23 = vcombine.low %v338_v9, %v342_v61 }
 0x1a2   :  { %4078 = vmatpush1.bf16.msra.mxu0 %v5376_v63  ;;  %4283 = vmatpush1.bf16.msra.mxu1 %v5378_v3  ;;  %v5441_v63 = vcombine.high %v338_v9, %v342_v61  ;;  %v5443_v3 = vcombine.high %v339_v62, %v343_v0  ;;  %v395_v9 = vld [vmem:[%s8107_s1 + $0xb98] sm:$0xff]  ;;  %v5490_v0 = vcombine.low %v387_v50, %v391_v51 }
 0x1a3   :  { %4088 = vmatprep.subr.bf16.mxu0 %v5385_v5  ;;  %4293 = vmatprep.subr.bf16.mxu1 %v5387_v6  ;;  %v346_v5 = vld [vmem:[%s8107_s1 + $0xa10] sm:$0xff]  ;;  %v399_v61 = vld [vmem:[%s8107_s1 + $0xbb8] sm:$0xff] }
 0x1a4   :  { %v350_v6 = vld [vmem:[%s8107_s1 + $0xa30] sm:$0xff] }
 0x1a5   :  { %4080 = vmatmul.mubr.bf16.vlgmr.msra.gmra.mrb[4].mxu0 %v6474_v39  ;;  %4285 = vmatmul.mubr.bf16.vlgmr.msra.gmra.mrb[4].mxu1 %v6474_v39  ;;  %v307_v39 = vld [vmem:[%s8107_s1 + $0x8d8] sm:$0xff]  ;;  %v5448_v33 = vcombine.low %v346_v5, %v350_v6 }
 0x1a6   :  { %4089 = vmatpush1.bf16.msra.mxu0 %v5384_v11  ;;  %4294 = vmatpush1.bf16.msra.mxu1 %v5386_v12  ;;  %v5411_v30 = vcombine.high %v307_v39, %v311_v26  ;;  %v5410_v37 = vcombine.low %v307_v39, %v311_v26  ;;  %v5449_v11 = vcombine.high %v346_v5, %v350_v6  ;;  %v403_v5 = vld [vmem:[%s8107_s1 + $0xbd8] sm:$0xff] }
 0x1a7   :  { %4090 = vmatprep.subr.bf16.mxu0 %v5393_v13  ;;  %4295 = vmatprep.subr.bf16.mxu1 %v5395_v14  ;;  %v5451_v12 = vcombine.high %v347_v7, %v351_v8  ;;  %v354_v13 = vld [vmem:[%s8107_s1 + $0xa50] sm:$0xff]  ;;  %v5458_v26 = vcombine.low %v355_v15, %v359_v17  ;;  %v407_v6 = vld [vmem:[%s8107_s1 + $0xbf8] sm:$0xff]  ;;  %v5498_v8 = vcombine.low %v395_v9, %v399_v61 }
 0x1a8   :  { %4120 = vmatprep.mubr.bf16.mxu0 %v6486_v48  ;;  %4325 = vmatprep.mubr.bf16.mxu1 %v6486_v48  ;;  %v315_v48 = vld [vmem:[%s8107_s1 + $0x918] sm:$0xff]  ;;  %v358_v14 = vld [vmem:[%s8107_s1 + $0xa70] sm:$0xff] }
 0x1a9   :  { %v5419_v38 = vcombine.high %v315_v48, %v319_v35  ;;  %v5418_v46 = vcombine.low %v315_v48, %v319_v35  ;;  %v5456_v39 = vcombine.low %v354_v13, %v358_v14  ;;  %v5466_v35 = vcombine.low %v363_v24, %v367_v25 }
 0x1aa   :  { %4091 = vmatpush1.bf16.msra.mxu0 %v5392_v19  ;;  %4296 = vmatpush1.bf16.msra.mxu1 %v5394_v20  ;;  %v5457_v19 = vcombine.high %v354_v13, %v358_v14  ;;  %v5459_v20 = vcombine.high %v355_v15, %v359_v17  ;;  %v411_v13 = vld [vmem:[%s8107_s1 + $0xc18] sm:$0xff]  ;;  %v5506_v17 = vcombine.low %v403_v5, %v407_v6 }
 0x1ab   :  { %4092 = vmatprep.subr.bf16.mxu0 %v5401_v21  ;;  %4297 = vmatprep.subr.bf16.mxu1 %v5403_v22  ;;  %v362_v21 = vld [vmem:[%s8107_s1 + $0xa90] sm:$0xff]  ;;  %v415_v14 = vld [vmem:[%s8107_s1 + $0xc38] sm:$0xff] }
 0x1ac   :  { %v366_v22 = vld [vmem:[%s8107_s1 + $0xab0] sm:$0xff] }
 0x1ad   :  { %v5464_v48 = vcombine.low %v362_v21, %v366_v22 }
 0x1ae   :  { %4093 = vmatpush1.bf16.msra.mxu0 %v5400_v27  ;;  %4298 = vmatpush1.bf16.msra.mxu1 %v5402_v28  ;;  %v5465_v27 = vcombine.high %v362_v21, %v366_v22  ;;  %v5467_v28 = vcombine.high %v363_v24, %v367_v25  ;;  %v419_v21 = vld [vmem:[%s8107_s1 + $0xc58] sm:$0xff]  ;;  %v5514_v25 = vcombine.low %v411_v13, %v415_v14 }
 0x1af   :  { %4094 = vmatprep.subr.bf16.mxu0 %v5409_v59  ;;  %4299 = vmatprep.subr.bf16.mxu1 %v5411_v30  ;;  %v370_v59 = vld [vmem:[%s8107_s1 + $0xad0] sm:$0xff]  ;;  %v423_v22 = vld [vmem:[%s8107_s1 + $0xc78] sm:$0xff] }
 0x1b0   :  { %v374_v30 = vld [vmem:[%s8107_s1 + $0xaf0] sm:$0xff] }
 0x1b1   :  { %v5472_v42 = vcombine.low %v370_v59, %v374_v30 }
 0x1b2   :  { %4095 = vmatpush1.bf16.msra.mxu0 %v5408_v36  ;;  %4300 = vmatpush1.bf16.msra.mxu1 %v5410_v37  ;;  %v5473_v36 = vcombine.high %v370_v59, %v374_v30  ;;  %v5475_v37 = vcombine.high %v371_v31, %v375_v32  ;;  %v427_v59 = vld [vmem:[%s8107_s1 + $0xc98] sm:$0xff]  ;;  %v5522_v32 = vcombine.low %v419_v21, %v423_v22 }
 0x1b3   :  { %4096 = vmatprep.subr.bf16.mxu0 %v5417_v53  ;;  %4301 = vmatprep.subr.bf16.mxu1 %v5419_v38  ;;  %v378_v53 = vld [vmem:[%s8107_s1 + $0xb10] sm:$0xff]  ;;  %v431_v30 = vld [vmem:[%s8107_s1 + $0xcb8] sm:$0xff] }
 0x1b4   :  { %v382_v38 = vld [vmem:[%s8107_s1 + $0xb30] sm:$0xff] }
 0x1b5   :  { %v5480_v52 = vcombine.low %v378_v53, %v382_v38 }
 0x1b6   :  { %4097 = vmatpush1.bf16.msra.mxu0 %v5416_v45  ;;  %4302 = vmatpush1.bf16.msra.mxu1 %v5418_v46  ;;  %v5481_v45 = vcombine.high %v378_v53, %v382_v38  ;;  %v5483_v46 = vcombine.high %v379_v40, %v383_v41  ;;  %v439_v53 = vld [vmem:[%s8107_s1 + $0xcf8] sm:$0xff]  ;;  %v5530_v40 = vcombine.low %v427_v59, %v431_v30 }
 0x1b7   :  { %4098 = vmatprep.subr.bf16.mxu0 %v5425_v47  ;;  %4303 = vmatprep.subr.bf16.mxu1 %v5427_v49  ;;  %v386_v47 = vld [vmem:[%s8107_s1 + $0xb50] sm:$0xff] }
 0x1b8   :  { %v390_v49 = vld [vmem:[%s8107_s1 + $0xb70] sm:$0xff] }
 0x1b9   :  { %v5488_v62 = vcombine.low %v386_v47, %v390_v49 }
 0x1ba   :  { %4099 = vmatpush1.bf16.msra.mxu0 %v5424_v55  ;;  %4304 = vmatpush1.bf16.msra.mxu1 %v5426_v56  ;;  %v5489_v55 = vcombine.high %v386_v47, %v390_v49  ;;  %v5491_v56 = vcombine.high %v387_v50, %v391_v51 }
 0x1bb   :  { %4100 = vmatprep.subr.bf16.mxu0 %v5433_v57  ;;  %4305 = vmatprep.subr.bf16.mxu1 %v5435_v60  ;;  %v394_v57 = vld [vmem:[%s8107_s1 + $0xb90] sm:$0xff] }
 0x1bc   :  { %v398_v60 = vld [vmem:[%s8107_s1 + $0xbb0] sm:$0xff] }
 0x1bd   :  { %v5496_v7 = vcombine.low %v394_v57, %v398_v60 }
 0x1be   :  { %4101 = vmatpush1.bf16.msra.mxu0 %v5432_v1  ;;  %4306 = vmatpush1.bf16.msra.mxu1 %v5434_v2  ;;  %v5497_v1 = vcombine.high %v394_v57, %v398_v60  ;;  %v5499_v2 = vcombine.high %v395_v9, %v399_v61 }
 0x1bf   :  { %4102 = vmatprep.subr.bf16.mxu0 %v5441_v63  ;;  %4307 = vmatprep.subr.bf16.mxu1 %v5443_v3  ;;  %v402_v63 = vld [vmem:[%s8107_s1 + $0xbd0] sm:$0xff] }
 0x1c0   :  { %v406_v3 = vld [vmem:[%s8107_s1 + $0xbf0] sm:$0xff] }
 0x1c1   :  { %v5504_v15 = vcombine.low %v402_v63, %v406_v3 }
 0x1c2   :  { %4103 = vmatpush1.bf16.msra.mxu0 %v5440_v23  ;;  %4308 = vmatpush1.bf16.msra.mxu1 %v5442_v10  ;;  %v5505_v23 = vcombine.high %v402_v63, %v406_v3  ;;  %v5507_v10 = vcombine.high %v403_v5, %v407_v6 }
 0x1c3   :  { %4104 = vmatprep.subr.bf16.mxu0 %v5449_v11  ;;  %4309 = vmatprep.subr.bf16.mxu1 %v5451_v12  ;;  %v410_v11 = vld [vmem:[%s8107_s1 + $0xc10] sm:$0xff] }
 0x1c4   :  { %v414_v12 = vld [vmem:[%s8107_s1 + $0xc30] sm:$0xff] }
 0x1c5   :  { %v5512_v24 = vcombine.low %v410_v11, %v414_v12 }
 0x1c6   :  { %4105 = vmatpush1.bf16.msra.mxu0 %v5448_v33  ;;  %4310 = vmatpush1.bf16.msra.mxu1 %v5450_v18  ;;  %v5513_v33 = vcombine.high %v410_v11, %v414_v12  ;;  %v5515_v18 = vcombine.high %v411_v13, %v415_v14  ;;  %v467_v12 = vld [vmem:[%s8107_s1 + $0xdd8] sm:$0xff] }
 0x1c7   :  { %4106 = vmatprep.subr.bf16.mxu0 %v5457_v19  ;;  %4311 = vmatprep.subr.bf16.mxu1 %v5459_v20  ;;  %v418_v19 = vld [vmem:[%s8107_s1 + $0xc50] sm:$0xff]  ;;  %v471_v13 = vld [vmem:[%s8107_s1 + $0xdf8] sm:$0xff] }
 0x1c8   :  { %v422_v20 = vld [vmem:[%s8107_s1 + $0xc70] sm:$0xff] }
 0x1c9   :  { %v5520_v31 = vcombine.low %v418_v19, %v422_v20 }
 0x1ca   :  { %4107 = vmatpush1.bf16.msra.mxu0 %v5456_v39  ;;  %4312 = vmatpush1.bf16.msra.mxu1 %v5458_v26  ;;  %v5521_v39 = vcombine.high %v418_v19, %v422_v20  ;;  %v5523_v26 = vcombine.high %v419_v21, %v423_v22  ;;  %v5571_v22 = vcombine.high %v467_v12, %v471_v13 }
 0x1cb   :  { %4108 = vmatprep.subr.bf16.mxu0 %v5465_v27  ;;  %4313 = vmatprep.subr.bf16.mxu1 %v5467_v28  ;;  %v426_v27 = vld [vmem:[%s8107_s1 + $0xc90] sm:$0xff] }
 0x1cc   :  { %v430_v28 = vld [vmem:[%s8107_s1 + $0xcb0] sm:$0xff] }
 0x1cd   :  { %v5528_v38 = vcombine.low %v426_v27, %v430_v28 }
 0x1ce   :  { %4109 = vmatpush1.bf16.msra.mxu0 %v5464_v48  ;;  %4314 = vmatpush1.bf16.msra.mxu1 %v5466_v35  ;;  %v5529_v48 = vcombine.high %v426_v27, %v430_v28  ;;  %v5531_v35 = vcombine.high %v427_v59, %v431_v30  ;;  %v5570_v28 = vcombine.low %v467_v12, %v471_v13 }
 0x1cf   :  { %4110 = vmatprep.subr.bf16.mxu0 %v5473_v36  ;;  %4315 = vmatprep.subr.bf16.mxu1 %v5475_v37  ;;  %v434_v36 = vld [vmem:[%s8107_s1 + $0xcd0] sm:$0xff] }
 0x1d0   :  { %v438_v37 = vld [vmem:[%s8107_s1 + $0xcf0] sm:$0xff] }
 0x1d1   :  { %v5537_v41 = vcombine.high %v434_v36, %v438_v37  ;;  %v5536_v47 = vcombine.low %v434_v36, %v438_v37 }
 0x1d2   :  { %4111 = vmatpush1.bf16.msra.mxu0 %v5472_v42  ;;  %4316 = vmatpush1.bf16.msra.mxu1 %v5474_v44  ;;  %v442_v44 = vld [vmem:[%s8107_s1 + $0xd10] sm:$0xff] }
 0x1d3   :  { %4112 = vmatprep.subr.bf16.mxu0 %v5481_v45  ;;  %4317 = vmatprep.subr.bf16.mxu1 %v5483_v46  ;;  %v446_v45 = vld [vmem:[%s8107_s1 + $0xd30] sm:$0xff]  ;;  %v447_v46 = vld [vmem:[%s8107_s1 + $0xd38] sm:$0xff] }
 0x1d4   :  { %v5545_v50 = vcombine.high %v442_v44, %v446_v45  ;;  %v5544_v57 = vcombine.low %v442_v44, %v446_v45 }
 0x1d6   :  { %4113 = vmatpush1.bf16.msra.mxu0 %v5480_v52  ;;  %4318 = vmatpush1.bf16.msra.mxu1 %v5482_v54  ;;  %v450_v52 = vld [vmem:[%s8107_s1 + $0xd50] sm:$0xff] }
 0x1d7   :  { %4114 = vmatprep.subr.bf16.mxu0 %v5489_v55  ;;  %4319 = vmatprep.subr.bf16.mxu1 %v5491_v56  ;;  %v454_v54 = vld [vmem:[%s8107_s1 + $0xd70] sm:$0xff]  ;;  %v451_v55 = vld [vmem:[%s8107_s1 + $0xd58] sm:$0xff] }
 0x1d8   :  { %v455_v56 = vld [vmem:[%s8107_s1 + $0xd78] sm:$0xff]  ;;  %v5553_v9 = vcombine.high %v450_v52, %v454_v54  ;;  %v5552_v63 = vcombine.low %v450_v52, %v454_v54 }
 0x1d9   :  { %v5555_v61 = vcombine.high %v451_v55, %v455_v56  ;;  %v5554_v3 = vcombine.low %v451_v55, %v455_v56 }
 0x1da   :  { %4115 = vmatpush1.bf16.msra.mxu0 %v5488_v62  ;;  %4320 = vmatpush1.bf16.msra.mxu1 %v5490_v0  ;;  %v458_v62 = vld [vmem:[%s8107_s1 + $0xd90] sm:$0xff] }
 0x1db   :  { %4116 = vmatprep.subr.bf16.mxu0 %v5497_v1  ;;  %4321 = vmatprep.subr.bf16.mxu1 %v5499_v2  ;;  %v462_v0 = vld [vmem:[%s8107_s1 + $0xdb0] sm:$0xff]  ;;  %v459_v1 = vld [vmem:[%s8107_s1 + $0xd98] sm:$0xff] }
 0x1dc   :  { %v463_v2 = vld [vmem:[%s8107_s1 + $0xdb8] sm:$0xff]  ;;  %v5561_v5 = vcombine.high %v458_v62, %v462_v0 }
 0x1dd   :  { %v5562_v19 = vcombine.low %v459_v1, %v463_v2 }
 0x1de   :  { %4117 = vmatpush1.bf16.msra.mxu0 %v5496_v7  ;;  %4322 = vmatpush1.bf16.msra.mxu1 %v5498_v8  ;;  %v5563_v7 = vcombine.high %v459_v1, %v463_v2  ;;  %v466_v8 = vld [vmem:[%s8107_s1 + $0xdd0] sm:$0xff] }
 0x1df   :  { %4118 = vmatprep.subr.bf16.mxu0 %v5505_v23  ;;  %4323 = vmatprep.subr.bf16.mxu1 %v5507_v10  ;;  %v470_v23 = vld [vmem:[%s8107_s1 + $0xdf0] sm:$0xff] }
 0x1e0   :  { %v5569_v20 = vcombine.high %v466_v8, %v470_v23  ;;  %v5568_v27 = vcombine.low %v466_v8, %v470_v23 }
 0x1e2   :  { %4119 = vmatpush1.bf16.msra.mxu0 %v5504_v15  ;;  %4324 = vmatpush1.bf16.msra.mxu1 %v5506_v17  ;;  %v5560_v17 = vcombine.low %v458_v62, %v462_v0 }
 0x1e3   :  { %4129 = vmatprep.subr.bf16.mxu0 %v5513_v33  ;;  %4334 = vmatprep.subr.bf16.mxu1 %v5515_v18 }
 0x1e5   :  { %4121 = vmatmul.mubr.bf16.vlgmr.msra.gmra.mrb[4].mxu0 %v6674_v58  ;;  %4326 = vmatmul.mubr.bf16.vlgmr.msra.gmra.mrb[4].mxu1 %v6674_v58  ;;  %v435_v58 = vld [vmem:[%s8107_s1 + $0xcd8] sm:$0xff] }
 0x1e6   :  { %4130 = vmatpush1.bf16.msra.mxu0 %v5512_v24  ;;  %4335 = vmatpush1.bf16.msra.mxu1 %v5514_v25  ;;  %v5539_v42 = vcombine.high %v435_v58, %v439_v53  ;;  %v5538_v49 = vcombine.low %v435_v58, %v439_v53  ;;  %v474_v24 = vld [vmem:[%s8107_s1 + $0xe10] sm:$0xff] }
 0x1e7   :  { %4131 = vmatprep.subr.bf16.mxu0 %v5521_v39  ;;  %4336 = vmatprep.subr.bf16.mxu1 %v5523_v26  ;;  %v478_v25 = vld [vmem:[%s8107_s1 + $0xe30] sm:$0xff]  ;;  %v475_v39 = vld [vmem:[%s8107_s1 + $0xe18] sm:$0xff] }
 0x1e8   :  { %4161 = vmatprep.mubr.bf16.mxu0 %v6690_v4  ;;  %4366 = vmatprep.mubr.bf16.mxu1 %v6690_v4  ;;  %v443_v4 = vld [vmem:[%s8107_s1 + $0xd18] sm:$0xff]  ;;  %v5577_v59 = vcombine.high %v474_v24, %v478_v25  ;;  %v5576_v36 = vcombine.low %v474_v24, %v478_v25  ;;  %v530_v24 = vld [vmem:[%s8107_s1 + $0xfd0] sm:$0xff] }
 0x1e9   :  { %v5547_v51 = vcombine.high %v443_v4, %v447_v46  ;;  %v5546_v60 = vcombine.low %v443_v4, %v447_v46  ;;  %v479_v26 = vld [vmem:[%s8107_s1 + $0xe38] sm:$0xff]  ;;  %v534_v25 = vld [vmem:[%s8107_s1 + $0xff0] sm:$0xff] }
 0x1ea   :  { %4132 = vmatpush1.bf16.msra.mxu0 %v5520_v31  ;;  %4337 = vmatpush1.bf16.msra.mxu1 %v5522_v32  ;;  %v5579_v30 = vcombine.high %v475_v39, %v479_v26  ;;  %v482_v31 = vld [vmem:[%s8107_s1 + $0xe50] sm:$0xff]  ;;  %v5578_v37 = vcombine.low %v475_v39, %v479_v26  ;;  %v531_v39 = vld [vmem:[%s8107_s1 + $0xfd8] sm:$0xff] }
 0x1eb   :  { %4133 = vmatprep.subr.bf16.mxu0 %v5529_v48  ;;  %4338 = vmatprep.subr.bf16.mxu1 %v5531_v35  ;;  %v486_v32 = vld [vmem:[%s8107_s1 + $0xe70] sm:$0xff]  ;;  %v483_v48 = vld [vmem:[%s8107_s1 + $0xe58] sm:$0xff] }
 0x1ec   :  { %v487_v35 = vld [vmem:[%s8107_s1 + $0xe78] sm:$0xff]  ;;  %v5585_v58 = vcombine.high %v482_v31, %v486_v32  ;;  %v5584_v44 = vcombine.low %v482_v31, %v486_v32  ;;  %v538_v31 = vld [vmem:[%s8107_s1 + $0x1010] sm:$0xff] }
 0x1ed   :  { %v5587_v53 = vcombine.high %v483_v48, %v487_v35  ;;  %v5586_v45 = vcombine.low %v483_v48, %v487_v35  ;;  %v535_v26 = vld [vmem:[%s8107_s1 + $0xff8] sm:$0xff]  ;;  %v542_v32 = vld [vmem:[%s8107_s1 + $0x1030] sm:$0xff] }
 0x1ee   :  { %4134 = vmatpush1.bf16.msra.mxu0 %v5528_v38  ;;  %4339 = vmatpush1.bf16.msra.mxu1 %v5530_v40  ;;  %v490_v38 = vld [vmem:[%s8107_s1 + $0xe90] sm:$0xff]  ;;  %v539_v48 = vld [vmem:[%s8107_s1 + $0x1018] sm:$0xff] }
 0x1ef   :  { %4135 = vmatprep.subr.bf16.mxu0 %v5537_v41  ;;  %4340 = vmatprep.subr.bf16.mxu1 %v5539_v42  ;;  %v494_v40 = vld [vmem:[%s8107_s1 + $0xeb0] sm:$0xff]  ;;  %v491_v41 = vld [vmem:[%s8107_s1 + $0xe98] sm:$0xff] }
 0x1f0   :  { %v495_v42 = vld [vmem:[%s8107_s1 + $0xeb8] sm:$0xff]  ;;  %v5593_v4 = vcombine.high %v490_v38, %v494_v40  ;;  %v5592_v52 = vcombine.low %v490_v38, %v494_v40  ;;  %v546_v38 = vld [vmem:[%s8107_s1 + $0x1050] sm:$0xff] }
 0x1f1   :  { %v5595_v46 = vcombine.high %v491_v41, %v495_v42  ;;  %v5594_v54 = vcombine.low %v491_v41, %v495_v42  ;;  %v543_v35 = vld [vmem:[%s8107_s1 + $0x1038] sm:$0xff]  ;;  %v550_v40 = vld [vmem:[%s8107_s1 + $0x1070] sm:$0xff] }
 0x1f2   :  { %4136 = vmatpush1.bf16.msra.mxu0 %v5536_v47  ;;  %4341 = vmatpush1.bf16.msra.mxu1 %v5538_v49  ;;  %v498_v47 = vld [vmem:[%s8107_s1 + $0xed0] sm:$0xff]  ;;  %v547_v41 = vld [vmem:[%s8107_s1 + $0x1058] sm:$0xff] }
 0x1f3   :  { %4137 = vmatprep.subr.bf16.mxu0 %v5545_v50  ;;  %4342 = vmatprep.subr.bf16.mxu1 %v5547_v51  ;;  %v502_v49 = vld [vmem:[%s8107_s1 + $0xef0] sm:$0xff]  ;;  %v499_v50 = vld [vmem:[%s8107_s1 + $0xed8] sm:$0xff] }
 0x1f4   :  { %v503_v51 = vld [vmem:[%s8107_s1 + $0xef8] sm:$0xff]  ;;  %v5601_v55 = vcombine.high %v498_v47, %v502_v49  ;;  %v5600_v62 = vcombine.low %v498_v47, %v502_v49  ;;  %v554_v47 = vld [vmem:[%s8107_s1 + $0x1090] sm:$0xff] }
 0x1f5   :  { %v5603_v56 = vcombine.high %v499_v50, %v503_v51  ;;  %v5602_v0 = vcombine.low %v499_v50, %v503_v51  ;;  %v551_v42 = vld [vmem:[%s8107_s1 + $0x1078] sm:$0xff]  ;;  %v558_v49 = vld [vmem:[%s8107_s1 + $0x10b0] sm:$0xff] }
 0x1f6   :  { %4138 = vmatpush1.bf16.msra.mxu0 %v5544_v57  ;;  %4343 = vmatpush1.bf16.msra.mxu1 %v5546_v60  ;;  %v506_v57 = vld [vmem:[%s8107_s1 + $0xf10] sm:$0xff]  ;;  %v555_v50 = vld [vmem:[%s8107_s1 + $0x1098] sm:$0xff] }
 0x1f7   :  { %4139 = vmatprep.subr.bf16.mxu0 %v5553_v9  ;;  %4344 = vmatprep.subr.bf16.mxu1 %v5555_v61  ;;  %v510_v60 = vld [vmem:[%s8107_s1 + $0xf30] sm:$0xff]  ;;  %v507_v9 = vld [vmem:[%s8107_s1 + $0xf18] sm:$0xff] }
 0x1f8   :  { %v7644_v6 = vpop.f32.mrb[0].mxu0  ;;  %v7652_v10 = vpop.f32.mrb[0].mxu1  ;;  %v511_v61 = vld [vmem:[%s8107_s1 + $0xf38] sm:$0xff]  ;;  %v5609_v1 = vcombine.high %v506_v57, %v510_v60  ;;  %v5608_v8 = vcombine.low %v506_v57, %v510_v60  ;;  %v562_v57 = vld [vmem:[%s8107_s1 + $0x10d0] sm:$0xff] }
 0x1f9   :  { %v7654_v11 = vpop.f32.mrb[1].mxu0  ;;  %v7662_v14 = vpop.f32.mrb[1].mxu1  ;;  %v5611_v2 = vcombine.high %v507_v9, %v511_v61  ;;  %v5610_v23 = vcombine.low %v507_v9, %v511_v61  ;;  %v559_v51 = vld [vmem:[%s8107_s1 + $0x10b8] sm:$0xff]  ;;  %v566_v60 = vld [vmem:[%s8107_s1 + $0x10f0] sm:$0xff]  ;;  %v5656_v61 = vcombine.low %v554_v47, %v558_v49 }
 0x1fa   :  { %v3798_v15 = vpop.f32.mrb[2].mxu0  ;;  %4140 = vmatpush1.bf16.msra.mxu0 %v5552_v63  ;;  %v4003_v33 = vpop.f32.mrb[2].mxu1  ;;  %4345 = vmatpush1.bf16.msra.mxu1 %v5554_v3  ;;  %v514_v63 = vld [vmem:[%s8107_s1 + $0xf50] sm:$0xff]  ;;  %v567_v9 = vld [vmem:[%s8107_s1 + $0x10f8] sm:$0xff] }
 0x1fb   :  { %v3799_v18 = vpop.f32.mrb[3].mxu0  ;;  %4141 = vmatprep.subr.bf16.mxu0 %v5561_v5  ;;  %v4004_v21 = vpop.f32.mrb[3].mxu1  ;;  %4346 = vmatprep.subr.bf16.mxu1 %v5563_v7  ;;  %v518_v3 = vld [vmem:[%s8107_s1 + $0xf70] sm:$0xff]  ;;  %v515_v5 = vld [vmem:[%s8107_s1 + $0xf58] sm:$0xff] }
 0x1fc   :  { %v519_v7 = vld [vmem:[%s8107_s1 + $0xf78] sm:$0xff]  ;;  %v5617_v12 = vcombine.high %v514_v63, %v518_v3  ;;  %v522_v15 = vld [vmem:[%s8107_s1 + $0xf90] sm:$0xff] }
 0x1fd   :  { %v5619_v13 = vcombine.high %v515_v5, %v519_v7  ;;  %v523_v33 = vld [vmem:[%s8107_s1 + $0xf98] sm:$0xff] }
 0x1fe   :  { %4142 = vmatpush1.bf16.msra.mxu0 %v5560_v17  ;;  %4347 = vmatpush1.bf16.msra.mxu1 %v5562_v19  ;;  %v526_v17 = vld [vmem:[%s8107_s1 + $0xfb0] sm:$0xff]  ;;  %v527_v18 = vld [vmem:[%s8107_s1 + $0xfb8] sm:$0xff]  ;;  %v5616_v19 = vcombine.low %v514_v63, %v518_v3 }
 0x1ff   :  { %4143 = vmatprep.subr.bf16.mxu0 %v5569_v20  ;;  %4348 = vmatprep.subr.bf16.mxu1 %v5571_v22  ;;  %v5618_v20 = vcombine.low %v515_v5, %v519_v7  ;;  %v5625_v21 = vcombine.high %v522_v15, %v526_v17  ;;  %v5627_v22 = vcombine.high %v523_v33, %v527_v18  ;;  %v574_v63 = vld [vmem:[%s8107_s1 + $0x1130] sm:$0xff]  ;;  %v571_v3 = vld [vmem:[%s8107_s1 + $0x1118] sm:$0xff] }
 0x200   :  { %v575_v5 = vld [vmem:[%s8107_s1 + $0x1138] sm:$0xff]  ;;  %v5664_v7 = vcombine.low %v562_v57, %v566_v60 }
 0x202   :  { %4144 = vmatpush1.bf16.msra.mxu0 %v5568_v27  ;;  %4349 = vmatpush1.bf16.msra.mxu1 %v5570_v28  ;;  %v5624_v27 = vcombine.low %v522_v15, %v526_v17  ;;  %v5626_v28 = vcombine.low %v523_v33, %v527_v18  ;;  %v582_v15 = vld [vmem:[%s8107_s1 + $0x1170] sm:$0xff]  ;;  %v579_v17 = vld [vmem:[%s8107_s1 + $0x1158] sm:$0xff] }
 0x203   :  { %4145 = vmatprep.subr.bf16.mxu0 %v5577_v59  ;;  %4350 = vmatprep.subr.bf16.mxu1 %v5579_v30  ;;  %v5633_v59 = vcombine.high %v530_v24, %v534_v25  ;;  %v5635_v30 = vcombine.high %v531_v39, %v535_v26  ;;  %v583_v33 = vld [vmem:[%s8107_s1 + $0x1178] sm:$0xff] }
 0x206   :  { %4146 = vmatpush1.bf16.msra.mxu0 %v5576_v36  ;;  %4351 = vmatpush1.bf16.msra.mxu1 %v5578_v37  ;;  %v5632_v36 = vcombine.low %v530_v24, %v534_v25  ;;  %v5634_v37 = vcombine.low %v531_v39, %v535_v26  ;;  %v590_v24 = vld [vmem:[%s8107_s1 + $0x11b0] sm:$0xff]  ;;  %v608_v25 = vsub.s32 1, %v6093_v43  ;;  %v587_v39 = vld [vmem:[%s8107_s1 + $0x1198] sm:$0xff] }
 0x207   :  { %4147 = vmatprep.subr.bf16.mxu0 %v5585_v58  ;;  %4352 = vmatprep.subr.bf16.mxu1 %v5587_v53  ;;  %v5641_v58 = vcombine.high %v538_v31, %v542_v32  ;;  %v5643_v53 = vcombine.high %v539_v48, %v543_v35  ;;  %v591_v26 = vld [vmem:[%s8107_s1 + $0x11b8] sm:$0xff] }
 0x20a   :  { %4148 = vmatpush1.bf16.msra.mxu0 %v5584_v44  ;;  %4353 = vmatpush1.bf16.msra.mxu1 %v5586_v45  ;;  %v5640_v44 = vcombine.low %v538_v31, %v542_v32  ;;  %v5642_v45 = vcombine.low %v539_v48, %v543_v35  ;;  %v5691_v32 = vcombine.high %v587_v39, %v591_v26  ;;  %v594_v48 = vld [vmem:[%s8107_s1 + $0x11d0] sm:$0xff] }
 0x20b   :  { %4149 = vmatprep.subr.bf16.mxu0 %v5593_v4  ;;  %4354 = vmatprep.subr.bf16.mxu1 %v5595_v46  ;;  %v5649_v4 = vcombine.high %v546_v38, %v550_v40  ;;  %v5651_v46 = vcombine.high %v547_v41, %v551_v42  ;;  %v598_v35 = vld [vmem:[%s8107_s1 + $0x11f0] sm:$0xff] }
 0x20e   :  { %4150 = vmatpush1.bf16.msra.mxu0 %v5592_v52  ;;  %4355 = vmatpush1.bf16.msra.mxu1 %v5594_v54  ;;  %v5648_v52 = vcombine.low %v546_v38, %v550_v40  ;;  %v5650_v54 = vcombine.low %v547_v41, %v551_v42  ;;  %v5690_v40 = vcombine.low %v587_v39, %v591_v26  ;;  %v5936_v26 = vld [vmem:[%s8109_s3 + $0xf8] sm:$0xff]  }
 0x20f   :  { %4151 = vmatprep.subr.bf16.mxu0 %v5601_v55  ;;  %4356 = vmatprep.subr.bf16.mxu1 %v5603_v56  ;;  %v5657_v55 = vcombine.high %v554_v47, %v558_v49  ;;  %v5659_v56 = vcombine.high %v555_v50, %v559_v51  ;;  %v5697_v41 = vcombine.high %v594_v48, %v598_v35  ;;  %v5907_v47 = vld [vmem:[%s8109_s3 + $0x40] sm:$0xff]  }
 0x210   :  { %v5908_v49 = vld [vmem:[%s8109_s3 + $0xc0] sm:$0xff]  }
 0x212   :  { %4152 = vmatpush1.bf16.msra.mxu0 %v5600_v62  ;;  %4357 = vmatpush1.bf16.msra.mxu1 %v5602_v0  ;;  %v5658_v62 = vcombine.low %v555_v50, %v559_v51  ;;  %v5665_v0 = vcombine.high %v562_v57, %v566_v60  ;;  %v5913_v57 = vld [vmem:[%s8109_s3 + $0x8] sm:$0xff]  }
 0x213   :  { %4153 = vmatprep.subr.bf16.mxu0 %v5609_v1  ;;  %4358 = vmatprep.subr.bf16.mxu1 %v5611_v2  ;;  %v570_v2 = vld [vmem:[%s8107_s1 + $0x1110] sm:$0xff]  ;;  %v5914_v60 = vld [vmem:[%s8109_s3 + $0x88] sm:$0xff]  }
 0x214   :  { %v5672_v18 = vcombine.low %v570_v2, %v574_v63 }
 0x216   :  { %4154 = vmatpush1.bf16.msra.mxu0 %v5608_v8  ;;  %4359 = vmatpush1.bf16.msra.mxu1 %v5610_v23  ;;  %v5673_v23 = vcombine.high %v570_v2, %v574_v63  ;;  %v5922_v2 = vld [vmem:[%s8109_s3 + $0x98] sm:$0xff]   ;;  %v5923_v63 = vld [vmem:[%s8109_s3 + $0x60] sm:$0xff]  }
 0x217   :  { %4155 = vmatprep.subr.bf16.mxu0 %v5617_v12  ;;  %4360 = vmatprep.subr.bf16.mxu1 %v5619_v13  ;;  %v5675_v12 = vcombine.high %v571_v3, %v575_v5  ;;  %v578_v13 = vld [vmem:[%s8107_s1 + $0x1150] sm:$0xff] }
 0x21a   :  { %4156 = vmatpush1.bf16.msra.mxu0 %v5616_v19  ;;  %4361 = vmatpush1.bf16.msra.mxu1 %v5618_v20  ;;  %v5674_v19 = vcombine.low %v571_v3, %v575_v5  ;;  %v5681_v20 = vcombine.high %v578_v13, %v582_v15  ;;  %v5924_v3 = vld [vmem:[%s8109_s3 + $0xe0] sm:$0xff]  }
 0x21b   :  { %4157 = vmatprep.subr.bf16.mxu0 %v5625_v21  ;;  %4362 = vmatprep.subr.bf16.mxu1 %v5627_v22  ;;  %v5683_v21 = vcombine.high %v579_v17, %v583_v33  ;;  %v586_v22 = vld [vmem:[%s8107_s1 + $0x1190] sm:$0xff]  ;;  %v5925_v5 = vld [vmem:[%s8109_s3 + $0x20] sm:$0xff]  }
 0x21c   :  { %v5689_v31 = vcombine.high %v586_v22, %v590_v24  ;;  %v5688_v38 = vcombine.low %v586_v22, %v590_v24  ;;  %v5934_v24 = vld [vmem:[%s8109_s3 + $0xb0] sm:$0xff]  }
 0x21e   :  { %4158 = vmatpush1.bf16.msra.mxu0 %v5624_v27  ;;  %4363 = vmatpush1.bf16.msra.mxu1 %v5626_v28  ;;  %v7852_v27 = vld [vmem:[%s8108_s2] sm:$0xff]  ;;  %v616_v28 = vsub.s32 3, %v6093_v43 }
 0x21f   :  { %4159 = vmatprep.subr.bf16.mxu0 %v5633_v59  ;;  %4364 = vmatprep.subr.bf16.mxu1 %v5635_v30  ;;  %v5680_v59 = vcombine.low %v578_v13, %v582_v15  ;;  %v5682_v30 = vcombine.low %v579_v17, %v583_v33  ;;  %v5928_v13 = vld [vmem:[%s8109_s3 + $0xe8] sm:$0xff]  }
 0x220   :  { %v5929_v15 = vld [vmem:[%s8109_s3 + $0x28] sm:$0xff]  }
 0x221   :  { %v5930_v33 = vld [vmem:[%s8109_s3 + $0xa8] sm:$0xff]  }
 0x222   :  { %4160 = vmatpush1.bf16.msra.mxu0 %v5632_v36  ;;  %4365 = vmatpush1.bf16.msra.mxu1 %v5634_v37  ;;  %v609_v36 = vrot.slane %v7852_v27, %v608_v25  ;;  %v595_v37 = vld [vmem:[%s8107_s1 + $0x11d8] sm:$0xff] }
 0x223   :  { %4170 = vmatprep.subr.bf16.mxu0 %v5641_v58  ;;  %4375 = vmatprep.subr.bf16.mxu1 %v5643_v53  ;;  %v599_v58 = vld [vmem:[%s8107_s1 + $0x11f8] sm:$0xff]  ;;  %v617_v53 = vrot.slane %v7852_v27, %v616_v28 }
 0x224   :  { %v5699_v42 = vcombine.high %v595_v37, %v599_v58  ;;  %v5935_v25 = vld [vmem:[%s8109_s3 + $0x78] sm:$0xff]  }
 0x225   :  { %4162 = vmatmul.mubr.bf16.vlgmr.msra.gmra.mrb[4].mxu0 %v6878_v16  ;;  %4367 = vmatmul.mubr.bf16.vlgmr.msra.gmra.mrb[4].mxu1 %v6878_v16  ;;  %v563_v16 = vld [vmem:[%s8107_s1 + $0x10d8] sm:$0xff] }
 0x226   :  { %4171 = vmatpush1.bf16.msra.mxu0 %v5640_v44  ;;  %4376 = vmatpush1.bf16.msra.mxu1 %v5642_v45  ;;  %v5667_v1 = vcombine.high %v563_v16, %v567_v9  ;;  %v5666_v8 = vcombine.low %v563_v16, %v567_v9  ;;  %v5832_v44 = vadd.f32 %v7654_v11, %v609_v36  ;;  %v5909_v11 = vld [vmem:[%s8109_s3] sm:$0xff]   ;;  %v5915_v16 = vld [vmem:[%s8109_s3 + $0x50] sm:$0xff]  }
 0x227   :  { %4172 = vmatprep.subr.bf16.mxu0 %v5649_v4  ;;  %4377 = vmatprep.subr.bf16.mxu1 %v5651_v46  ;;  %v5834_v45 = vadd.f32 %v7662_v14, %v617_v53  ;;  %v5696_v4 = vcombine.low %v594_v48, %v598_v35  ;;  %v5698_v46 = vcombine.low %v595_v37, %v599_v58  ;;  %v5910_v14 = vld [vmem:[%s8109_s3 + $0x80] sm:$0xff]   ;;  %v5917_v9 = vld [vmem:[%s8109_s3 + $0x10] sm:$0xff]   ;;  %v5949_v35 = vld [vmem:[%s8109_s3 + $0x148] sm:$0xff]  }
 0x228   :  { %4202 = vmatprep.mubr.bf16.mxu0 %v5995_v34  ;;  %4407 = vmatprep.mubr.bf16.mxu1 %v5995_v34  ;;  %v4417_v50 = vmax.f32 %v5832_v44, 0.0  ;;  %v5939_v48 = vld [vmem:[%s8109_s3 + $0x180] sm:$0xff]   ;;  %v5950_v37 = vld [vmem:[%s8109_s3 + $0x108] sm:$0xff]   ;;  %v5952_v53 = vld [vmem:[%s8109_s3 + $0x150] sm:$0xff]  }
 0x229   :  { %v4419_v51 = vmax.f32 %v5834_v45, 0.0  ;;  %v5940_v58 = vld [vmem:[%s8109_s3 + $0x188] sm:$0xff]   ;;  %v5942_v44 = vld [vmem:[%s8109_s3 + $0x198] sm:$0xff]   ;;  %v5958_v45 = vld [vmem:[%s8109_s3 + $0x160] sm:$0xff]  }
 0x22a   :  { %4173 = vmatpush1.bf16.msra.mxu0 %v5648_v52  ;;  %4378 = vmatpush1.bf16.msra.mxu1 %v5650_v54  ;;  %v5911_v52 = vld [vmem:[%s8109_s3 + $0x48] sm:$0xff]   ;;  %v4425_v54 = vpack.c.bf16 %v4417_v50, %v4417_v50 }
 0x22b   :  { %4174 = vmatprep.subr.bf16.mxu0 %v5657_v55  ;;  %4379 = vmatprep.subr.bf16.mxu1 %v5659_v56  ;;  %v5912_v55 = vld [vmem:[%s8109_s3 + $0xc8] sm:$0xff]   ;;  %v4427_v56 = vpack.c.bf16 %v4419_v51, %v4419_v51  ;;  %v5945_v51 = vld [vmem:[%s8109_s3 + $0x1b0] sm:$0xff]  }
 0x22c   :  { %v5944_v50 = vld [vmem:[%s8109_s3 + $0x1a8] sm:$0xff]  }
 0x22e   :  { %4175 = vmatpush1.bf16.msra.mxu0 %v5656_v61  ;;  %4380 = vmatpush1.bf16.msra.mxu1 %v5658_v62  ;;  %v5918_v61 = vld [vmem:[%s8109_s3 + $0x90] sm:$0xff]   ;;  %v5919_v62 = vld [vmem:[%s8109_s3 + $0x58] sm:$0xff]  }
 0x22f   :  { %4176 = vmatprep.subr.bf16.mxu0 %v5665_v0  ;;  %4381 = vmatprep.subr.bf16.mxu1 %v5667_v1  ;;  %v5920_v0 = vld [vmem:[%s8109_s3 + $0xd8] sm:$0xff]  }
 0x230   :  { %v5921_v1 = vld [vmem:[%s8109_s3 + $0x18] sm:$0xff]  }
 0x232   :  { %4177 = vmatpush1.bf16.msra.mxu0 %v5664_v7  ;;  %4382 = vmatpush1.bf16.msra.mxu1 %v5666_v8  ;;  %v604_v7 = vsub.s32 0, %v6093_v43  ;;  %v5926_v8 = vld [vmem:[%s8109_s3 + $0xa0] sm:$0xff]  }
 0x233   :  { %4178 = vmatprep.subr.bf16.mxu0 %v5673_v23  ;;  %4383 = vmatprep.subr.bf16.mxu1 %v5675_v12  ;;  %v5927_v23 = vld [vmem:[%s8109_s3 + $0x68] sm:$0xff]   ;;  %v612_v12 = vsub.s32 2, %v6093_v43 }
 0x234   :  { %v605_v17 = vrot.slane %v7852_v27, %v604_v7 }
 0x236   :  { %4179 = vmatpush1.bf16.msra.mxu0 %v5672_v18  ;;  %4384 = vmatpush1.bf16.msra.mxu1 %v5674_v19  ;;  %v5931_v18 = vld [vmem:[%s8109_s3 + $0x70] sm:$0xff]   ;;  %v613_v19 = vrot.slane %v7852_v27, %v612_v12  ;;  %v5831_v22 = vadd.f32 %v7644_v6, %v605_v17  ;;  %v5937_v6 = vld [vmem:[%s8109_s3 + $0x38] sm:$0xff]  }
 0x237   :  { %4180 = vmatprep.subr.bf16.mxu0 %v5681_v20  ;;  %4385 = vmatprep.subr.bf16.mxu1 %v5683_v21  ;;  %v5932_v20 = vld [vmem:[%s8109_s3 + $0xf0] sm:$0xff]  }
 0x238   :  { %v5933_v21 = vld [vmem:[%s8109_s3 + $0x30] sm:$0xff]   ;;  %v5833_v39 = vadd.f32 %v7652_v10, %v613_v19  ;;  %v4416_v28 = vmax.f32 %v5831_v22, 0.0  ;;  %v5946_v10 = vld [vmem:[%s8109_s3 + $0x140] sm:$0xff]  }
 0x23a   :  { %4181 = vmatpush1.bf16.msra.mxu0 %v5680_v59  ;;  %4386 = vmatpush1.bf16.msra.mxu1 %v5682_v30  ;;  %v5938_v59 = vld [vmem:[%s8109_s3 + $0xb8] sm:$0xff]   ;;  %v4418_v30 = vmax.f32 %v5833_v39, 0.0 }
 0x23b   :  { %4182 = vmatprep.subr.bf16.mxu0 %v5689_v31  ;;  %4387 = vmatprep.subr.bf16.mxu1 %v5691_v32  ;;  %v5947_v31 = vld [vmem:[%s8109_s3 + $0x100] sm:$0xff]   ;;  %v4424_v32 = vpack.c.bf16 %v4416_v28, %v4416_v28 }
 0x23c   :  { %v4426_v36 = vpack.c.bf16 %v4418_v30, %v4418_v30  ;;  %v5700_v30 = vld [vmem:[%s8110_s4] ss:$0 sm:$0xff]  ;;  %s5115_s4 = sshll.u32 %s5996_s16, 4  ;;  %s5116_s4 = int_to_ptr.vmem [resolvable:$true] %s5115_s4 }
 0x23d   :  { %s5970_s17 = scalar_lea.vmem %s5116_s4, 32  ;;  %p5975_p1 = scmp.lt.s32.totalorder %s5116_s4, %s5116_s4 }
 0x23e   :  { %4183 = vmatpush1.bf16.msra.mxu0 %v5688_v38  ;;  %4388 = vmatpush1.bf16.msra.mxu1 %v5690_v40  ;;  %v5953_v38 = vld [vmem:[%s8109_s3 + $0x110] sm:$0xff]   ;;  %p5971_p0 = scmp.ne.s32.totalorder %s5116_s4, %s5970_s17  ;;  %p5976_p2 = scmp.lt.s32.totalorder %s5970_s17, %s5970_s17 }
 0x23f   :  { %4184 = vmatprep.subr.bf16.mxu0 %v5697_v41  ;;  %4389 = vmatprep.subr.bf16.mxu1 %v5699_v42  ;;  %v5941_v40 = vld [vmem:[%s8109_s3 + $0x190] sm:$0xff]   ;;  %v5955_v41 = vld [vmem:[%s8109_s3 + $0x158] sm:$0xff]  }
 0x240   :  { %v5956_v42 = vld [vmem:[%s8109_s3 + $0x118] sm:$0xff]   ;;  %p5977_p3 = por %p5976_p2, %p5975_p1 }
 0x242   :  { %4185 = vmatpush1.bf16.msra.mxu0 %v5696_v4  ;;  %4390 = vmatpush1.bf16.msra.mxu1 %v5698_v46  ;;  %v5959_v4 = vld [vmem:[%s8109_s3 + $0x120] sm:$0xff]   ;;  %p5978_p4 = pnand %p5977_p3, %p5971_p0 }
 0x243   :  { %5765 = vmatprep.subr.bf16.mxu0 %v5907_v47  ;;  %5787 = vmatprep.subr.bf16.mxu1 %v5908_v49  ;;  %v5943_v46 = vld [vmem:[%s8109_s3 + $0x1a0] sm:$0xff]   ;;  %v5961_v47 = vld [vmem:[%s8109_s3 + $0x168] sm:$0xff]  }
 0x244   :  { %v5962_v49 = vld [vmem:[%s8109_s3 + $0x128] sm:$0xff]  }
 0x245   :  { %4203 = vmatmul.mubr.bf16.vlgmr.msra.gmra.mrb[4].mxu0 %v6984_v29  ;;  %4408 = vmatmul.mubr.bf16.vlgmr.msra.gmra.mrb[4].mxu1 %v6984_v29  ;;  %v5916_v29 = vld [vmem:[%s8109_s3 + $0xd0] sm:$0xff]  }
 0x246   :  { %5766 = vmatpush3.bf16.msra.mxu0 %v5909_v11  ;;  %4979 = vmatprep.mubr.bf16.mxu0 %v4425_v54  ;;  %v5948_v11 = vld [vmem:[%s8109_s3 + $0x1b8] sm:$0xff]   ;;  %v5957_v54 = vld [vmem:[%s8109_s3 + $0x1d0] sm:$0xff]  }
 0x247   :  { %5788 = vmatpush3.bf16.msra.mxu1 %v5910_v14  ;;  %5019 = vmatprep.mubr.bf16.mxu1 %v4427_v56  ;;  %v5951_v14 = vld [vmem:[%s8109_s3 + $0x1c0] sm:$0xff]  }
 0x248   :  { %5767 = vmatprep.subr.bf16.mxu0 %v5911_v52  ;;  %5789 = vmatprep.subr.bf16.mxu1 %v5912_v55  ;;  %v5954_v52 = vld [vmem:[%s8109_s3 + $0x1c8] sm:$0xff]   ;;  %v5960_v55 = vld [vmem:[%s8109_s3 + $0x1d8] sm:$0xff]   ;;  %v5963_v56 = vld [vmem:[%s8109_s3 + $0x1e0] sm:$0xff]  }
 0x24a   :  { %5768 = vmatpush3.bf16.msra.mxu0 %v5913_v57  ;;  %v5964_v57 = vld [vmem:[%s8109_s3 + $0x170] sm:$0xff]  }
 0x24b   :  { %5790 = vmatpush3.bf16.msra.mxu1 %v5914_v60  ;;  %5769 = vmatprep.subr.bf16.mxu0 %v5915_v16  ;;  %v5965_v60 = vld [vmem:[%s8109_s3 + $0x130] sm:$0xff]   ;;  %v5966_v16 = vld [vmem:[%s8109_s3 + $0x1e8] sm:$0xff]  }
 0x24c   :  { %5791 = vmatprep.subr.bf16.mxu1 %v5916_v29  ;;  %v5967_v29 = vld [vmem:[%s8109_s3 + $0x178] sm:$0xff]  }
 0x24e   :  { %5770 = vmatpush3.bf16.msra.mxu0 %v5917_v9  ;;  %v5969_v9 = vld [vmem:[%s8109_s3 + $0x1f0] ss:$0 sps:$4 sm:$0xff]  }
 0x24f   :  { %5792 = vmatpush3.bf16.msra.mxu1 %v5918_v61  ;;  %5771 = vmatprep.subr.bf16.mxu0 %v5919_v62  ;;  %v5968_v61 = vld [vmem:[%s8109_s3 + $0x138] sm:$0xff]   ;;  %v4945_v62 = vsel %vm4943_vm0, %v5969_v9, 0 }
 0x250   :  { %5793 = vmatprep.subr.bf16.mxu1 %v5920_v0  ;;  %v620_v0 = vsub.s32 4, %v6093_v43 }
 0x252   :  { %5772 = vmatpush3.bf16.msra.mxu0 %v5921_v1  ;;  %v628_v1 = vsub.s32 6, %v6093_v43 }
 0x253   :  { %5794 = vmatpush3.bf16.msra.mxu1 %v5922_v2  ;;  %5773 = vmatprep.subr.bf16.mxu0 %v5923_v63  ;;  %v624_v2 = vsub.s32 5, %v6093_v43  ;;  %v621_v63 = vrot.slane %v7852_v27, %v620_v0 }
 0x254   :  { %5795 = vmatprep.subr.bf16.mxu1 %v5924_v3  ;;  %v629_v3 = vrot.slane %v7852_v27, %v628_v1 }
 0x256   :  { %5774 = vmatpush3.bf16.msra.mxu0 %v5925_v5  ;;  %v625_v5 = vrot.slane %v7852_v27, %v624_v2 }
 0x257   :  { %5796 = vmatpush3.bf16.msra.mxu1 %v5926_v8  ;;  %5775 = vmatprep.subr.bf16.mxu0 %v5927_v23 }
 0x258   :  { %5797 = vmatprep.subr.bf16.mxu1 %v5928_v13 }
 0x25a   :  { %5776 = vmatpush3.bf16.msra.mxu0 %v5929_v15 }
 0x25b   :  { %5798 = vmatpush3.bf16.msra.mxu1 %v5930_v33  ;;  %5777 = vmatprep.subr.bf16.mxu0 %v5931_v18 }
 0x25c   :  { %5799 = vmatprep.subr.bf16.mxu1 %v5932_v20 }
 0x25e   :  { %5778 = vmatpush3.bf16.msra.mxu0 %v5933_v21 }
 0x25f   :  { %5800 = vmatpush3.bf16.msra.mxu1 %v5934_v24  ;;  %5779 = vmatprep.subr.bf16.mxu0 %v5935_v25 }
 0x260   :  { %5801 = vmatprep.subr.bf16.mxu1 %v5936_v26 }
 0x262   :  { %5780 = vmatpush3.bf16.msra.mxu0 %v5937_v6 }
 0x263   :  { %5802 = vmatpush3.bf16.msra.mxu1 %v5938_v59  ;;  %5809 = vmatprep.subr.bf16.mxu0 %v5946_v10 }
 0x264   :  { %5067 = vmatprep.subr.bf16.mxu1 %v5995_v34 }
 0x265   :  { %4980 = vmatmul.mubr.bf16.vlgmr.msra.gmra.mrb[8].mxu0 %v4424_v32 }
 0x266   :  { %5020 = vmatmul.mubr.bf16.vlgmr.msra.gmra.mrb[8].mxu1 %v4426_v36  ;;  %5810 = vmatpush3.bf16.msra.mxu0 %v5947_v31 }
 0x267   :  { %5068 = vmatpush1.bf16.msra.mxu1 %v5939_v48  ;;  %5811 = vmatprep.subr.bf16.mxu0 %v5949_v35 }
 0x268   :  { %5069 = vmatprep.subr.bf16.mxu1 %v5995_v34 }
 0x26a   :  { %5812 = vmatpush3.bf16.msra.mxu0 %v5950_v37 }
 0x26b   :  { %5070 = vmatpush1.bf16.msra.mxu1 %v5940_v58  ;;  %5813 = vmatprep.subr.bf16.mxu0 %v5952_v53 }
 0x26c   :  { %5071 = vmatprep.subr.bf16.mxu1 %v5995_v34 }
 0x26e   :  { %5814 = vmatpush3.bf16.msra.mxu0 %v5953_v38 }
 0x26f   :  { %5072 = vmatpush1.bf16.msra.mxu1 %v5941_v40  ;;  %5815 = vmatprep.subr.bf16.mxu0 %v5955_v41 }
 0x270   :  { %5073 = vmatprep.subr.bf16.mxu1 %v5995_v34 }
 0x272   :  { %5816 = vmatpush3.bf16.msra.mxu0 %v5956_v42 }
 0x273   :  { %5074 = vmatpush1.bf16.msra.mxu1 %v5942_v44  ;;  %5817 = vmatprep.subr.bf16.mxu0 %v5958_v45 }
 0x274   :  { %5075 = vmatprep.subr.bf16.mxu1 %v5995_v34 }
 0x276   :  { %5818 = vmatpush3.bf16.msra.mxu0 %v5959_v4 }
 0x277   :  { %5076 = vmatpush1.bf16.msra.mxu1 %v5943_v46  ;;  %5819 = vmatprep.subr.bf16.mxu0 %v5961_v47 }
 0x278   :  { %5077 = vmatprep.subr.bf16.mxu1 %v5995_v34 }
 0x27a   :  { %5820 = vmatpush3.bf16.msra.mxu0 %v5962_v49 }
 0x27b   :  { %5078 = vmatpush1.bf16.msra.mxu1 %v5944_v50  ;;  %5821 = vmatprep.subr.bf16.mxu0 %v5964_v57 }
 0x27c   :  { %5079 = vmatprep.subr.bf16.mxu1 %v5995_v34 }
 0x27e   :  { %5822 = vmatpush3.bf16.msra.mxu0 %v5965_v60 }
 0x27f   :  { %5080 = vmatpush1.bf16.msra.mxu1 %v5945_v51  ;;  %5823 = vmatprep.subr.bf16.mxu0 %v5967_v29 }
 0x280   :  { %5081 = vmatprep.subr.bf16.mxu1 %v5995_v34 }
 0x282   :  { %5824 = vmatpush3.bf16.msra.mxu0 %v5968_v61 }
 0x283   :  { %5082 = vmatpush1.bf16.msra.mxu1 %v5948_v11 }
 0x284   :  { %5083 = vmatprep.subr.bf16.mxu1 %v5995_v34 }
 0x287   :  { %5084 = vmatpush1.bf16.msra.mxu1 %v5951_v14 }
 0x288   :  { %5085 = vmatprep.subr.bf16.mxu1 %v5995_v34 }
 0x28b   :  { %5086 = vmatpush1.bf16.msra.mxu1 %v5954_v52 }
 0x28c   :  { %5087 = vmatprep.subr.bf16.mxu1 %v5995_v34 }
 0x28f   :  { %5088 = vmatpush1.bf16.msra.mxu1 %v5957_v54 }
 0x290   :  { %5089 = vmatprep.subr.bf16.mxu1 %v5995_v34 }
 0x293   :  { %5090 = vmatpush1.bf16.msra.mxu1 %v5960_v55 }
 0x294   :  { %5091 = vmatprep.subr.bf16.mxu1 %v5995_v34 }
 0x297   :  { %5092 = vmatpush1.bf16.msra.mxu1 %v5963_v56 }
 0x298   :  { %5093 = vmatprep.subr.bf16.mxu1 %v5995_v34 }
 0x29b   :  { %5094 = vmatpush1.bf16.msra.mxu1 %v5966_v16 }
 0x29c   :  { %5095 = vmatprep.subr.bf16.mxu1 %v5995_v34  ;;  %v632_v34 = vsub.s32 7, %v6093_v43 }
 0x29e   :  { %v633_v7 = vrot.slane %v7852_v27, %v632_v34 }
 0x29f   :  { %5096 = vmatpush1.bf16.msra.mxu1 %v4945_v62 }
 0x318   :  { %v4204_v8 = vpop.f32.mrb[4].mxu0  ;;  %v4409_v12 = vpop.f32.mrb[4].mxu1 }
 0x319   :  { %v5835_v23 = vadd.f32 %v4204_v8, %v621_v63  ;;  %v4206_v13 = vpop.f32.mrb[5].mxu0  ;;  %v5837_v15 = vadd.f32 %v4409_v12, %v629_v3  ;;  %v4411_v33 = vpop.f32.mrb[5].mxu1 }
 0x31a   :  { %v5836_v17 = vadd.f32 %v4206_v13, %v625_v5  ;;  %v4208_v18 = vpop.f32.mrb[6].mxu0  ;;  %v5838_v20 = vadd.f32 %v4411_v33, %v633_v7  ;;  %v4413_v21 = vpop.f32.mrb[6].mxu1 }
 0x31b   :  { %v4420_v19 = vmax.f32 %v5835_v23, 0.0  ;;  %v4209_v43 = vpop.f32.mrb[7].mxu0  ;;  %v4422_v22 = vmax.f32 %v5837_v15, 0.0  ;;  %v4414_v25 = vpop.f32.mrb[7].mxu1 }
 0x31c   :  { %v4421_v24 = vmax.f32 %v5836_v17, 0.0  ;;  %v4423_v39 = vmax.f32 %v5838_v20, 0.0 }
 0x31d   :  { %v4428_v6 = vpack.c.bf16 %v4420_v19, %v4420_v19  ;;  %v4430_v28 = vpack.c.bf16 %v4422_v22, %v4422_v22 }
 0x31e   :  { %v4429_v26 = vpack.c.bf16 %v4421_v24, %v4421_v24  ;;  %v4431_v27 = vpack.c.bf16 %v4423_v39, %v4423_v39 }
 0x320   :  { %5059 = vmatprep.mubr.bf16.mxu0 %v4429_v26  ;;  %5764 = vmatprep.mubr.msk.bf16.mxu1 %vm4939_vm1, %v4431_v27 }
 0x321   :  { %5060 = vmatmul.mubr.bf16.vlgmr.msra.gmra.mrb[12].mxu0 %v4428_v6  ;;  %5100 = vmatmul.mubr.bf16.vlgmr.msra.gmra.mrb[12].mxu1 %v4430_v28 }
 0x338   :  { %v5781_v59 = vpop.f32.mrb[8].mxu0 }
 0x339   :  { %v5803_v10 = vpop.f32.mrb[8].mxu1  ;;  %v5782_v31 = vpop.f32.mrb[9].mxu0 }
 0x33a   :  { %v5783_v32 = vadd.f32 %v5782_v31, %v5781_v59  ;;  %v5804_v48 = vpop.f32.mrb[9].mxu1  ;;  %v5784_v35 = vpop.f32.mrb[10].mxu0 }
 0x33b   :  { %v5805_v36 = vadd.f32 %v5804_v48, %v5803_v10  ;;  %v5806_v37 = vpop.f32.mrb[10].mxu1  ;;  %v5785_v58 = vpop.f32.mrb[11].mxu0 }
 0x33c   :  { %v4982_v53 = vadd.f32 %v5783_v32, %v5700_v30  ;;  %v5807_v38 = vpop.f32.mrb[11].mxu1 }
 0x33e   :  { %v5022_v40 = vadd.f32 %v5805_v36, %v4982_v53 }
 0x3f4   :  { %v5825_v41 = vpop.f32.mrb[12].mxu0  ;;  %v5101_v42 = vpop.f32.mrb[12].mxu1 }
 0x3f5   :  { %v5826_v44 = vpop.f32.mrb[13].mxu0  ;;  %v5103_v4 = vpop.f32.mrb[13].mxu1 }
 0x3f6   :  { %v5827_v45 = vadd.f32 %v5826_v44, %v5825_v41  ;;  %v5828_v46 = vpop.f32.mrb[14].mxu0  ;;  %v5104_v47 = vpop.f32.mrb[14].mxu1 }
 0x3f7   :  { %v5829_v49 = vpop.f32.mrb[15].mxu0  ;;  %v5105_v51 = vpop.f32.mrb[15].mxu1 }
 0x3f8   :  { %v5062_v50 = vadd.f32 %v5827_v45, %v5022_v40 }
 0x3fa   :  { %v5102_v11 = vadd.f32 %v5101_v42, %v5062_v50 }
 0x3fc   :  { %5108 = vst.msk [vmem:[#allocation2] sm:$0x3] %vm5107_vm2, %v5102_v11 }
 0x3fd   :  { %5981 = shalt.err (!%p5978_p4)
}
 0x3fe   :  { %s5982_s20 = scalar_lea.hbm %s8111_s5, 32 }
 0x3ff   :  { %p5983_p5 = scmp.ne.s32.totalorder %s8111_s5, %s5982_s20  ;;  %p5986_p6 = scmp.lt.u32.totalorder %s5982_s20, %s8111_s5 }
 0x401   :  { %p5988_p7 = pnand %p5986_p6, %p5983_p5 }
 0x403   :  { %5991 = shalt.err (!%p5988_p7)
}
 0x404   :  { %5118 = dma.vmem_to_hbm [thread:$0]  %s5116_s4, 32, %s8111_s5, [#allocation3]  }
 0x405   :  { %5992 = dma.done.wait [#allocation3], 32  }
 0x406   :  { %5993 = vsyncadd [#allocation3], 4294967264 }
 0x407   :  { %5122 = vsyncpa [#allocation3], 1 }

</bundles_post_ra>
